<compile_context>
chip_gen: v7x
topology: tpu7x:2x2x1
jax: 0.10.0
libtpu: 0.0.40
codegen_flags: <defaults>
</compile_context>

<pallas_src>
import math
import functools

import jax
import jax.numpy as jnp
from jax import lax
from jax.experimental import pallas as pl
from jax.experimental.pallas import tpu as pltpu


# ----------------------------------------------------------------------------
# Pallas kernel: one grid step == TB windows
# ----------------------------------------------------------------------------
def _window_attention_kernel(x_ref, wqkv_ref, seg_ref, qscale_ref, vmask_ref,
                             dmat_ref, pbm_ref, wproj_ref, bproj_ref, o_ref, *,
                             num_heads, head_dim, tb, n_tok, n_wtypes):
    f32, bf16 = jnp.float32, jnp.bfloat16
    H, N, TB = num_heads, n_tok, tb
    C = H * head_dim
    HN = H * N
    TBN = TB * N

    x = x_ref[...]                                                   # (TB*N, C) bf16

    # ---- QKV projection (nn.Linear(dim, 3*dim, bias=False)), bf16 x bf16 -> f32 acc
    qkv = jnp.dot(x, wqkv_ref[...], preferred_element_type=f32)      # (TB*N, 3C)
    v = qkv[:, 2 * C:]

    # ---- fused per-head L2 normalization of q and k (F.normalize, eps=1e-12).
    # q and k are stacked along rows so ONE block-diagonal ones matmul returns each
    # head's sum-of-squares broadcast across that head's lanes (no cross-lane reduces).
    qk = jnp.concatenate([qkv[:, :C], qkv[:, C:2 * C]], axis=0)      # (2*TB*N, C) f32
    ss = jnp.dot((qk * qk).astype(bf16), seg_ref[...],
                 preferred_element_type=f32)                         # (2*TB*N, C)
    qk = qk * lax.rsqrt(jnp.maximum(ss, 1e-24))

    # logit scale exp(clamp(logit_scale)) folded into q per lane (f32, exact).
    qn = (qk[:TBN] * qscale_ref[...]).astype(bf16).reshape(TB, N, C)
    kn = qk[TBN:].astype(bf16).reshape(TB, N, C)
    vv = v.astype(bf16).reshape(TB, N, C)

    # ---- lane-packed key / value stacks: head h occupies rows [h*N, (h+1)*N) with all
    # other heads' lanes zeroed, so ONE batched einsum yields all heads' scores and ONE
    # batched einsum yields all heads' outputs (every intermediate stays 128-lane dense).
    kstack = jnp.concatenate(
        [kn * vmask_ref[pl.ds(h, 1), :] for h in range(H)], axis=1)  # (TB, HN, C) bf16
    vstack = jnp.concatenate(
        [vv * vmask_ref[pl.ds(h, 1), :] for h in range(H)], axis=1)  # (TB, HN, C) bf16

    s = jnp.einsum('bnc,bkc->bnk', qn, kstack,
                   preferred_element_type=f32)                       # (TB, N, HN) f32

    # 16*sigmoid(rel-pos bias) + window mask - (scale[h]+16), TB-independent resident
    # (nW, N, HN), replicated over the TB//nW window groups inside the block.
    pbm = pbm_ref[...]                                               # (nW, N, HN)
    if TB > n_wtypes:
        pbm = jnp.concatenate([pbm] * (TB // n_wtypes), axis=0)      # (TB, N, HN)
    s = s + pbm

    # ---- per-head-segment softmax: the folded shift guarantees s <= 0 (no overflow,
    # softmax is shift-invariant); segment sums via a block-ones MXU matmul, then the
    # attention output is normalized per output lane (lane c <-> head(c) segment).
    e = jnp.exp(s)
    eb = e.astype(bf16)
    denom = jnp.dot(eb.reshape(TBN, HN), dmat_ref[...],
                    preferred_element_type=f32)                      # (TB*N, C)
    num = jnp.einsum('bnk,bkc->bnc', eb, vstack,
                     preferred_element_type=f32).reshape(TBN, C)     # (TB*N, C)
    attn = num * pl.reciprocal(jnp.maximum(denom, 1e-30), approx=True)

    # ---- output projection (nn.Linear(dim, dim)), bf16 x bf16 -> f32 acc, + bias
    out = jnp.dot(attn.astype(bf16), wproj_ref[...],
                  preferred_element_type=f32) + bproj_ref[...]
    o_ref[...] = out.astype(o_ref.dtype)
    # TODO(synk): attn_drop / proj_drop are identity at p=0.0 (eval); dropout not implemented.


def window_attention3d(x, mask, params, *, num_heads, windows_per_block=16):
    """x: (B_, N, C) float32; mask: (nW, N, N) float32; params: dict of weights."""
    B_, N, C = x.shape
    assert C % num_heads == 0
    head_dim = C // num_heads
    H = num_heads
    HN = H * N
    nW = mask.shape[0]
    tb = windows_per_block
    assert tb % nW == 0 and B_ % tb == 0, \
        "windows_per_block must be a multiple of nW and divide B_"

    f32, bf16 = jnp.float32, jnp.bfloat16

    wqkv_t = params["wqkv"].T.astype(bf16)                           # (C, 3C)
    wproj_t = params["wproj"].T.astype(bf16)                         # (C, C)
    bproj2 = params["bproj"].reshape(1, C).astype(f32)               # (1, C)

    # clamp(logit_scale, max=log(1/0.01)).exp()
    scale = jnp.exp(jnp.minimum(params["logit_scale"].reshape(-1),
                                math.log(1.0 / 0.01))).astype(f32)   # (H,)

    # Head-structure helpers (tiny, resident in VMEM):
    head_of_lane = jnp.arange(C) // head_dim                         # (C,)
    onehot = (jnp.arange(H)[:, None] == head_of_lane[None, :])       # (H, C)
    vmask = onehot.astype(bf16)                                      # per-head lane mask
    qscale = scale[head_of_lane].reshape(1, C).astype(f32)           # logit scale per lane
    seg = (head_of_lane[:, None] == head_of_lane[None, :]).astype(bf16)   # (C, C) block-diag
    head_of_key = jnp.arange(HN) // N
    dmat = (head_of_key[:, None] == head_of_lane[None, :]).astype(bf16)   # (HN, C) seg-sum

    # De-tiled bias+mask, packed along the HN key axis, with the conservative per-head
    # shift -(scale[h] + 16) folded in:  pbm[w, n, h*N+m] = 16*sigmoid(bias)[h,n,m]
    #                                                       + mask[w,n,m] - scale[h] - 16
    bias16 = 16.0 * jax.nn.sigmoid(params["rel_pos_bias_logits"]).astype(f32)   # (H, N, N)
    shift = scale + 16.0                                              # (H,)
    term1 = jnp.transpose(bias16 - shift[:, None, None], (1, 0, 2)).reshape(N, HN)
    mask_rep = jnp.tile(mask.astype(f32)[:, :, None, :], (1, 1, H, 1)).reshape(nW, N, HN)
    pbm = term1[None, :, :] + mask_rep                                # (nW, N, HN)

    x2d = x.reshape(B_ * N, C).astype(bf16)                           # lane-dense bf16 tokens

    kernel = functools.partial(_window_attention_kernel, num_heads=H,
                               head_dim=head_dim, tb=tb, n_tok=N, n_wtypes=nW)

    grid_spec = pltpu.PrefetchScalarGridSpec(
        num_scalar_prefetch=0,
        grid=(B_ // tb,),
        in_specs=[
            pl.BlockSpec((tb * N, C), lambda b: (b, 0)),              # x tokens (bf16)
            pl.BlockSpec((C, 3 * C), lambda b: (0, 0)),               # qkv weight^T (bf16)
            pl.BlockSpec((C, C), lambda b: (0, 0)),                   # head seg-sum matrix
            pl.BlockSpec((1, C), lambda b: (0, 0)),                   # per-lane logit scale
            pl.BlockSpec((H, C), lambda b: (0, 0)),                   # per-head lane mask
            pl.BlockSpec((HN, C), lambda b: (0, 0)),                  # softmax-denominator matrix
            pl.BlockSpec((nW, N, HN), lambda b: (0, 0, 0)),           # bias+mask+shift (resident)
            pl.BlockSpec((C, C), lambda b: (0, 0)),                   # proj weight^T (bf16)
            pl.BlockSpec((1, C), lambda b: (0, 0)),                   # proj bias
        ],
        out_specs=pl.BlockSpec((tb * N, C), lambda b: (b, 0)),
    )

    flops = (2 * B_ * N * C * 3 * C                       # qkv projection
             + 2 * (2 * B_ * N) * C * C                   # fused q/k norm segment sums
             + 2 * B_ * N * HN * C                        # scores (all heads, one einsum)
             + 2 * B_ * N * HN * C                        # softmax denominators
             + 2 * B_ * N * HN * C                        # attn @ v (all heads, one einsum)
             + 2 * B_ * N * C * C)                        # output projection
    transcendentals = B_ * N * HN + 2 * B_ * N * C + B_ * N * C
    bytes_accessed = (B_ * N * C * (2 + 4)                # x bf16 in, out f32
                      + wqkv_t.size * 2 + wproj_t.size * 2 + seg.size * 2
                      + dmat.size * 2 + vmask.size * 2 + pbm.size * 4
                      + qscale.size * 4 + bproj2.size * 4)

    out2d = pl.pallas_call(
        kernel,
        out_shape=jax.ShapeDtypeStruct((B_ * N, C), x.dtype),
        grid_spec=grid_spec,
        compiler_params=pltpu.CompilerParams(
            dimension_semantics=("parallel",),
            vmem_limit_bytes=32 * 1024 * 1024),
        cost_estimate=pl.CostEstimate(flops=int(flops),
                                      transcendentals=int(transcendentals),
                                      bytes_accessed=int(bytes_accessed)),
    )(x2d, wqkv_t, seg, qscale, vmask, dmat, pbm, wproj_t, bproj2)

    return out2d.reshape(B_, N, C)


# ----------------------------------------------------------------------------
# Parameter-only glue (plain JAX): relative coords table, cpb MLP, index gather
# ----------------------------------------------------------------------------
def make_relative_position_bias_logits(window_size, num_heads, w1, b1, w2):
    Wd, Wh, Ww = window_size
    rd = jnp.arange(-(Wd - 1), Wd, dtype=jnp.float32)
    rh = jnp.arange(-(Wh - 1), Wh, dtype=jnp.float32)
    rw = jnp.arange(-(Ww - 1), Ww, dtype=jnp.float32)
    table = jnp.stack(jnp.meshgrid(rd, rh, rw, indexing="ij"), axis=-1)
    table = table / jnp.array([Wd - 1, Wh - 1, Ww - 1], dtype=jnp.float32)
    table = table * 8.0
    table = jnp.sign(table) * jnp.log2(jnp.abs(table) + 1.0) / math.log2(8.0)

    flat = table.reshape(-1, 3)
    hidden = jax.nn.relu(flat @ w1.T + b1)                            # Linear(3, 512) + ReLU
    logits = hidden @ w2.T                                            # Linear(512, H, bias=False)

    coords = jnp.stack(jnp.meshgrid(jnp.arange(Wd), jnp.arange(Wh),
                                    jnp.arange(Ww), indexing="ij"))    # (3, Wd, Wh, Ww)
    coords_flat = coords.reshape(3, -1)
    rel = coords_flat[:, :, None] - coords_flat[:, None, :]           # (3, N, N)
    rel = rel.transpose(1, 2, 0)
    rel = rel + jnp.array([Wd - 1, Wh - 1, Ww - 1])
    rel = rel.at[:, :, 0].multiply((2 * Wh - 1) * (2 * Ww - 1))
    rel = rel.at[:, :, 1].multiply(2 * Ww - 1)
    rel_pos_index = rel.sum(-1)                                       # (N, N)

    N = Wd * Wh * Ww
    bias = logits[rel_pos_index.reshape(-1)].reshape(N, N, num_heads)
    return bias.transpose(2, 0, 1)                                    # (H, N, N)


# ----------------------------------------------------------------------------
# Pure-JAX reference of the PyTorch forward (for correctness check)
# ----------------------------------------------------------------------------
def reference_forward(x, mask, params, num_heads):
    B_, N, C = x.shape
    d = C // num_heads
    qkv = x @ params["wqkv"].T
    qkv = qkv.reshape(B_, N, 3, num_heads, d).transpose(2, 0, 3, 1, 4)
    q, k, v = qkv[0], qkv[1], qkv[2]
    qn = q / jnp.maximum(jnp.linalg.norm(q, axis=-1, keepdims=True), 1e-12)
    kn = k / jnp.maximum(jnp.linalg.norm(k, axis=-1, keepdims=True), 1e-12)
    attn = qn @ jnp.swapaxes(kn, -2, -1)
    logit_scale = jnp.exp(jnp.minimum(params["logit_scale"], math.log(1.0 / 0.01)))
    attn = attn * logit_scale[None]
    bias = 16.0 * jax.nn.sigmoid(params["rel_pos_bias_logits"])
    attn = attn + bias[None]
    nW = mask.shape[0]
    attn = attn.reshape(B_ // nW, nW, num_heads, N, N) + mask[None, :, None]
    attn = attn.reshape(-1, num_heads, N, N)
    attn = jax.nn.softmax(attn, axis=-1)
    out = (attn @ v).transpose(0, 2, 1, 3).reshape(B_, N, C)
    return out @ params["wproj"].T + params["bproj"]


# ----------------------------------------------------------------------------
if __name__ == "__main__":
    dim = 128
    num_heads = 4                     # head_dim = 32 (Swin V2 convention)
    window_size = (2, 4, 4)
    N = window_size[0] * window_size[1] * window_size[2]   # 32 tokens per window
    batch = 16
    nW = 2
    B_ = batch * nW                                         # 32 windows total
    TB = 16                           # windows per grid step -> GEMM M = TB*N = 512, grid = 2

    key = jax.random.PRNGKey(0)
    ks = jax.random.split(key, 8)

    # Deterministic synthetic parameters (module __init__ shapes).
    w_qkv = jax.random.normal(ks[0], (3 * dim, dim), jnp.float32) * 0.05
    w_proj = jax.random.normal(ks[1], (dim, dim), jnp.float32) * 0.05
    b_proj = jax.random.normal(ks[2], (dim,), jnp.float32) * 0.05
    cpb_w1 = jax.random.normal(ks[3], (512, 3), jnp.float32) * 0.05
    cpb_b1 = jax.random.normal(ks[4], (512,), jnp.float32) * 0.05
    cpb_w2 = jax.random.normal(ks[5], (num_heads, 512), jnp.float32) * 0.05
    logit_scale = jnp.log(10.0 * jnp.ones((num_heads, 1, 1), jnp.float32))

    params = {
        "wqkv": w_qkv,
        "wproj": w_proj,
        "bproj": b_proj,
        "logit_scale": logit_scale,
        "rel_pos_bias_logits": make_relative_position_bias_logits(
            window_size, num_heads, cpb_w1, cpb_b1, cpb_w2),
    }

    # Inputs: x (num_windows*B, N, C), mask (nW, N, N) with 0 / -100 entries.
    # Like real shifted-window masks, the diagonal is always unmasked.
    x = jax.random.normal(ks[6], (B_, N, dim), jnp.float32)
    mask = jnp.where(jax.random.uniform(ks[7], (nW, N, N)) < 0.8, 0.0, -100.0).astype(jnp.float32)
    mask = jnp.where(jnp.eye(N, dtype=bool)[None, :, :], 0.0, mask)

    out = window_attention3d(x, mask, params, num_heads=num_heads, windows_per_block=TB)
    out = jax.block_until_ready(out)

    with jax.default_matmul_precision("highest"):
        ref = reference_forward(x, mask, params, num_heads)

    assert out.shape == (B_, N, dim), out.shape
    assert bool(jnp.all(jnp.isfinite(out)))
    max_err = float(jnp.max(jnp.abs(out - ref)))
    assert jnp.allclose(out, ref, rtol=2e-2, atol=2e-2), max_err

    print("KERNEL_OK")
</pallas_src>

<mosaic_0001>
module attributes {stable_mosaic.version = 11 : i64} {
  func.func @_window_attention_kernel(%arg0: i32, %arg1: memref<512x128xbf16, #tpu.memory_space<vmem>>, %arg2: memref<128x384xbf16, #tpu.memory_space<vmem>>, %arg3: memref<128x128xbf16, #tpu.memory_space<vmem>>, %arg4: memref<1x128xf32, #tpu.memory_space<vmem>>, %arg5: memref<4x128xbf16, #tpu.memory_space<vmem>>, %arg6: memref<128x128xbf16, #tpu.memory_space<vmem>>, %arg7: memref<2x32x128xf32, #tpu.memory_space<vmem>>, %arg8: memref<128x128xbf16, #tpu.memory_space<vmem>>, %arg9: memref<1x128xf32, #tpu.memory_space<vmem>>, %arg10: memref<512x128xf32, #tpu.memory_space<vmem>>) attributes {dimension_semantics = [#tpu.dimension_semantics<parallel>], iteration_bounds = array<i64: 2>, scalar_prefetch = 0 : i64, scratch_operands = 0 : i64, tpu.core_type = #tpu.core_type<tc>, window_params = [{transform_indices = @transform_0, window_bounds = array<i64: 512, 128>}, {pipeline_mode = #tpu.pipeline_mode<synchronous>, transform_indices = @transform_1, window_bounds = array<i64: 128, 384>}, {pipeline_mode = #tpu.pipeline_mode<synchronous>, transform_indices = @transform_2, window_bounds = array<i64: 128, 128>}, {pipeline_mode = #tpu.pipeline_mode<synchronous>, transform_indices = @transform_3, window_bounds = array<i64: 1, 128>}, {pipeline_mode = #tpu.pipeline_mode<synchronous>, transform_indices = @transform_4, window_bounds = array<i64: 4, 128>}, {pipeline_mode = #tpu.pipeline_mode<synchronous>, transform_indices = @transform_5, window_bounds = array<i64: 128, 128>}, {pipeline_mode = #tpu.pipeline_mode<synchronous>, transform_indices = @transform_6, window_bounds = array<i64: 2, 32, 128>}, {pipeline_mode = #tpu.pipeline_mode<synchronous>, transform_indices = @transform_7, window_bounds = array<i64: 128, 128>}, {pipeline_mode = #tpu.pipeline_mode<synchronous>, transform_indices = @transform_8, window_bounds = array<i64: 1, 128>}, {transform_indices = @transform_9, window_bounds = array<i64: 512, 128>}]} {
    %c0 = arith.constant 0 : index
    %c0_0 = arith.constant 0 : index
    %0 = vector.load %arg1[%c0, %c0_0] : memref<512x128xbf16, #tpu.memory_space<vmem>>, vector<512x128xbf16>
    %c0_1 = arith.constant 0 : index
    %c0_2 = arith.constant 0 : index
    %1 = vector.load %arg2[%c0_1, %c0_2] : memref<128x384xbf16, #tpu.memory_space<vmem>>, vector<128x384xbf16>
    %cst = arith.constant dense<0.000000e+00> : vector<512x384xf32>
    %2 = tpu.matmul %0, %1, %cst {dimension_numbers = #tpu.dot_dimension_numbers<[1], [0], [0], [1], [0, 0, 1, 1], [], []>} : vector<512x128xbf16>, vector<128x384xbf16>, vector<512x384xf32> -> vector<512x384xf32>
    %3 = vector.extract_strided_slice %2 {offsets = [0, 256], sizes = [512, 128], strides = [1, 1]} : vector<512x384xf32> to vector<512x128xf32>
    %4 = vector.extract_strided_slice %2 {offsets = [0, 0], sizes = [512, 128], strides = [1, 1]} : vector<512x384xf32> to vector<512x128xf32>
    %5 = vector.extract_strided_slice %2 {offsets = [0, 128], sizes = [512, 128], strides = [1, 1]} : vector<512x384xf32> to vector<512x128xf32>
    %6 = tpu.concatenate %4, %5 in 0 : vector<512x128xf32>, vector<512x128xf32> -> vector<1024x128xf32>
    %7 = arith.mulf %6, %6 : vector<1024x128xf32>
    %8 = arith.truncf %7 : vector<1024x128xf32> to vector<1024x128xbf16>
    %c0_3 = arith.constant 0 : index
    %c0_4 = arith.constant 0 : index
    %9 = vector.load %arg3[%c0_3, %c0_4] : memref<128x128xbf16, #tpu.memory_space<vmem>>, vector<128x128xbf16>
    %cst_5 = arith.constant dense<0.000000e+00> : vector<1024x128xf32>
    %10 = tpu.matmul %8, %9, %cst_5 {dimension_numbers = #tpu.dot_dimension_numbers<[1], [0], [0], [1], [0, 0, 1, 1], [], []>} : vector<1024x128xbf16>, vector<128x128xbf16>, vector<1024x128xf32> -> vector<1024x128xf32>
    %cst_6 = arith.constant 1.000000e-24 : f32
    %11 = vector.broadcast %cst_6 : f32 to vector<1024x128xf32>
    %12 = arith.maximumf %10, %11 : vector<1024x128xf32>
    %13 = math.rsqrt %12 : vector<1024x128xf32>
    %14 = arith.mulf %6, %13 : vector<1024x128xf32>
    %15 = vector.extract_strided_slice %14 {offsets = [0, 0], sizes = [512, 128], strides = [1, 1]} : vector<1024x128xf32> to vector<512x128xf32>
    %c0_7 = arith.constant 0 : index
    %c0_8 = arith.constant 0 : index
    %16 = vector.load %arg4[%c0_7, %c0_8] : memref<1x128xf32, #tpu.memory_space<vmem>>, vector<1x128xf32>
    %17 = vector.broadcast %16 : vector<1x128xf32> to vector<512x128xf32>
    %18 = arith.mulf %15, %17 : vector<512x128xf32>
    %19 = arith.truncf %18 : vector<512x128xf32> to vector<512x128xbf16>
    %20 = vector.shape_cast %19 : vector<512x128xbf16> to vector<16x32x128xbf16>
    %21 = vector.extract_strided_slice %14 {offsets = [512, 0], sizes = [512, 128], strides = [1, 1]} : vector<1024x128xf32> to vector<512x128xf32>
    %22 = arith.truncf %21 : vector<512x128xf32> to vector<512x128xbf16>
    %23 = vector.shape_cast %22 : vector<512x128xbf16> to vector<16x32x128xbf16>
    %24 = arith.truncf %3 : vector<512x128xf32> to vector<512x128xbf16>
    %25 = vector.shape_cast %24 : vector<512x128xbf16> to vector<16x32x128xbf16>
    %c0_9 = arith.constant 0 : index
    %c0_10 = arith.constant 0 : index
    %26 = vector.load %arg5[%c0_9, %c0_10] : memref<4x128xbf16, #tpu.memory_space<vmem>>, vector<1x128xbf16>
    %27 = vector.shape_cast %26 : vector<1x128xbf16> to vector<1x1x128xbf16>
    %28 = vector.broadcast %27 : vector<1x1x128xbf16> to vector<16x32x128xbf16>
    %29 = arith.mulf %23, %28 : vector<16x32x128xbf16>
    %c1 = arith.constant 1 : index
    %c0_11 = arith.constant 0 : index
    %30 = vector.load %arg5[%c1, %c0_11] : memref<4x128xbf16, #tpu.memory_space<vmem>>, vector<1x128xbf16>
    %31 = vector.shape_cast %30 : vector<1x128xbf16> to vector<1x1x128xbf16>
    %32 = vector.broadcast %31 : vector<1x1x128xbf16> to vector<16x32x128xbf16>
    %33 = arith.mulf %23, %32 : vector<16x32x128xbf16>
    %c2 = arith.constant 2 : index
    %c0_12 = arith.constant 0 : index
    %34 = vector.load %arg5[%c2, %c0_12] : memref<4x128xbf16, #tpu.memory_space<vmem>>, vector<1x128xbf16>
    %35 = vector.shape_cast %34 : vector<1x128xbf16> to vector<1x1x128xbf16>
    %36 = vector.broadcast %35 : vector<1x1x128xbf16> to vector<16x32x128xbf16>
    %37 = arith.mulf %23, %36 : vector<16x32x128xbf16>
    %c3 = arith.constant 3 : index
    %c0_13 = arith.constant 0 : index
    %38 = vector.load %arg5[%c3, %c0_13] : memref<4x128xbf16, #tpu.memory_space<vmem>>, vector<1x128xbf16>
    %39 = vector.shape_cast %38 : vector<1x128xbf16> to vector<1x1x128xbf16>
    %40 = vector.broadcast %39 : vector<1x1x128xbf16> to vector<16x32x128xbf16>
    %41 = arith.mulf %23, %40 : vector<16x32x128xbf16>
    %42 = tpu.concatenate %29, %33, %37, %41 in 1 : vector<16x32x128xbf16>, vector<16x32x128xbf16>, vector<16x32x128xbf16>, vector<16x32x128xbf16> -> vector<16x128x128xbf16>
    %c0_14 = arith.constant 0 : index
    %c0_15 = arith.constant 0 : index
    %43 = vector.load %arg5[%c0_14, %c0_15] : memref<4x128xbf16, #tpu.memory_space<vmem>>, vector<1x128xbf16>
    %44 = vector.shape_cast %43 : vector<1x128xbf16> to vector<1x1x128xbf16>
    %45 = vector.broadcast %44 : vector<1x1x128xbf16> to vector<16x32x128xbf16>
    %46 = arith.mulf %25, %45 : vector<16x32x128xbf16>
    %c1_16 = arith.constant 1 : index
    %c0_17 = arith.constant 0 : index
    %47 = vector.load %arg5[%c1_16, %c0_17] : memref<4x128xbf16, #tpu.memory_space<vmem>>, vector<1x128xbf16>
    %48 = vector.shape_cast %47 : vector<1x128xbf16> to vector<1x1x128xbf16>
    %49 = vector.broadcast %48 : vector<1x1x128xbf16> to vector<16x32x128xbf16>
    %50 = arith.mulf %25, %49 : vector<16x32x128xbf16>
    %c2_18 = arith.constant 2 : index
    %c0_19 = arith.constant 0 : index
    %51 = vector.load %arg5[%c2_18, %c0_19] : memref<4x128xbf16, #tpu.memory_space<vmem>>, vector<1x128xbf16>
    %52 = vector.shape_cast %51 : vector<1x128xbf16> to vector<1x1x128xbf16>
    %53 = vector.broadcast %52 : vector<1x1x128xbf16> to vector<16x32x128xbf16>
    %54 = arith.mulf %25, %53 : vector<16x32x128xbf16>
    %c3_20 = arith.constant 3 : index
    %c0_21 = arith.constant 0 : index
    %55 = vector.load %arg5[%c3_20, %c0_21] : memref<4x128xbf16, #tpu.memory_space<vmem>>, vector<1x128xbf16>
    %56 = vector.shape_cast %55 : vector<1x128xbf16> to vector<1x1x128xbf16>
    %57 = vector.broadcast %56 : vector<1x1x128xbf16> to vector<16x32x128xbf16>
    %58 = arith.mulf %25, %57 : vector<16x32x128xbf16>
    %59 = tpu.concatenate %46, %50, %54, %58 in 1 : vector<16x32x128xbf16>, vector<16x32x128xbf16>, vector<16x32x128xbf16>, vector<16x32x128xbf16> -> vector<16x128x128xbf16>
    "tpu.trace_start"() <{level = 10 : i32, message = "bnc,bkc->bnk"}> : () -> ()
    %cst_22 = arith.constant dense<0.000000e+00> : vector<16x32x128xf32>
    %60 = tpu.matmul %20, %42, %cst_22 {dimension_numbers = #tpu.dot_dimension_numbers<[2], [2], [1], [1], [0, 0, 0, 1, 1, 1], [0], [0]>} : vector<16x32x128xbf16>, vector<16x128x128xbf16>, vector<16x32x128xf32> -> vector<16x32x128xf32>
    "tpu.trace_stop"() : () -> ()
    %c0_23 = arith.constant 0 : index
    %c0_24 = arith.constant 0 : index
    %c0_25 = arith.constant 0 : index
    %61 = vector.load %arg7[%c0_23, %c0_24, %c0_25] : memref<2x32x128xf32, #tpu.memory_space<vmem>>, vector<2x32x128xf32>
    %62 = tpu.concatenate %61, %61, %61, %61, %61, %61, %61, %61 in 0 : vector<2x32x128xf32>, vector<2x32x128xf32>, vector<2x32x128xf32>, vector<2x32x128xf32>, vector<2x32x128xf32>, vector<2x32x128xf32>, vector<2x32x128xf32>, vector<2x32x128xf32> -> vector<16x32x128xf32>
    %63 = arith.addf %60, %62 : vector<16x32x128xf32>
    %64 = math.exp %63 : vector<16x32x128xf32>
    %65 = arith.truncf %64 : vector<16x32x128xf32> to vector<16x32x128xbf16>
    %66 = vector.shape_cast %65 : vector<16x32x128xbf16> to vector<512x128xbf16>
    %c0_26 = arith.constant 0 : index
    %c0_27 = arith.constant 0 : index
    %67 = vector.load %arg6[%c0_26, %c0_27] : memref<128x128xbf16, #tpu.memory_space<vmem>>, vector<128x128xbf16>
    %cst_28 = arith.constant dense<0.000000e+00> : vector<512x128xf32>
    %68 = tpu.matmul %66, %67, %cst_28 {dimension_numbers = #tpu.dot_dimension_numbers<[1], [0], [0], [1], [0, 0, 1, 1], [], []>} : vector<512x128xbf16>, vector<128x128xbf16>, vector<512x128xf32> -> vector<512x128xf32>
    "tpu.trace_start"() <{level = 10 : i32, message = "bnk,bkc->bnc"}> : () -> ()
    %cst_29 = arith.constant dense<0.000000e+00> : vector<16x32x128xf32>
    %69 = tpu.matmul %65, %59, %cst_29 {dimension_numbers = #tpu.dot_dimension_numbers<[2], [1], [1], [2], [0, 0, 0, 1, 1, 2], [0], [0]>} : vector<16x32x128xbf16>, vector<16x128x128xbf16>, vector<16x32x128xf32> -> vector<16x32x128xf32>
    "tpu.trace_stop"() : () -> ()
    %70 = vector.shape_cast %69 : vector<16x32x128xf32> to vector<512x128xf32>
    %cst_30 = arith.constant 1.000000e-30 : f32
    %71 = vector.broadcast %cst_30 : f32 to vector<512x128xf32>
    %72 = arith.maximumf %68, %71 : vector<512x128xf32>
    %73 = tpu.reciprocal %72 {approx = true} : vector<512x128xf32> -> vector<512x128xf32>
    %74 = arith.mulf %70, %73 : vector<512x128xf32>
    %75 = arith.truncf %74 : vector<512x128xf32> to vector<512x128xbf16>
    %c0_31 = arith.constant 0 : index
    %c0_32 = arith.constant 0 : index
    %76 = vector.load %arg8[%c0_31, %c0_32] : memref<128x128xbf16, #tpu.memory_space<vmem>>, vector<128x128xbf16>
    %cst_33 = arith.constant dense<0.000000e+00> : vector<512x128xf32>
    %77 = tpu.matmul %75, %76, %cst_33 {dimension_numbers = #tpu.dot_dimension_numbers<[1], [0], [0], [1], [0, 0, 1, 1], [], []>} : vector<512x128xbf16>, vector<128x128xbf16>, vector<512x128xf32> -> vector<512x128xf32>
    %c0_34 = arith.constant 0 : index
    %c0_35 = arith.constant 0 : index
    %78 = vector.load %arg9[%c0_34, %c0_35] : memref<1x128xf32, #tpu.memory_space<vmem>>, vector<1x128xf32>
    %79 = vector.broadcast %78 : vector<1x128xf32> to vector<512x128xf32>
    %80 = arith.addf %77, %79 : vector<512x128xf32>
    %c0_36 = arith.constant 0 : index
    %c0_37 = arith.constant 0 : index
    %81 = vector.load %arg10[%c0_36, %c0_37] : memref<512x128xf32, #tpu.memory_space<vmem>>, vector<512x128xf32>
    tpu.vector_store %arg10[%c0_36, %c0_37], %80 {strides = array<i32>} : memref<512x128xf32, #tpu.memory_space<vmem>>, vector<512x128xf32>,
    return
  }
  func.func @transform_0(%arg0: i32) -> (i32, i32) {
    %c0_i32 = arith.constant 0 : i32
    %c0_i32_0 = arith.constant 0 : i32
    return %arg0, %c0_i32 : i32, i32
  }
  func.func @transform_1(%arg0: i32) -> (i32, i32) {
    %c0_i32 = arith.constant 0 : i32
    %c0_i32_0 = arith.constant 0 : i32
    %c0_i32_1 = arith.constant 0 : i32
    return %c0_i32, %c0_i32_0 : i32, i32
  }
  func.func @transform_2(%arg0: i32) -> (i32, i32) {
    %c0_i32 = arith.constant 0 : i32
    %c0_i32_0 = arith.constant 0 : i32
    %c0_i32_1 = arith.constant 0 : i32
    return %c0_i32, %c0_i32_0 : i32, i32
  }
  func.func @transform_3(%arg0: i32) -> (i32, i32) {
    %c0_i32 = arith.constant 0 : i32
    %c0_i32_0 = arith.constant 0 : i32
    %c0_i32_1 = arith.constant 0 : i32
    return %c0_i32, %c0_i32_0 : i32, i32
  }
  func.func @transform_4(%arg0: i32) -> (i32, i32) {
    %c0_i32 = arith.constant 0 : i32
    %c0_i32_0 = arith.constant 0 : i32
    %c0_i32_1 = arith.constant 0 : i32
    return %c0_i32, %c0_i32_0 : i32, i32
  }
  func.func @transform_5(%arg0: i32) -> (i32, i32) {
    %c0_i32 = arith.constant 0 : i32
    %c0_i32_0 = arith.constant 0 : i32
    %c0_i32_1 = arith.constant 0 : i32
    return %c0_i32, %c0_i32_0 : i32, i32
  }
  func.func @transform_6(%arg0: i32) -> (i32, i32, i32) {
    %c0_i32 = arith.constant 0 : i32
    %c0_i32_0 = arith.constant 0 : i32
    %c0_i32_1 = arith.constant 0 : i32
    %c0_i32_2 = arith.constant 0 : i32
    return %c0_i32, %c0_i32_0, %c0_i32_1 : i32, i32, i32
  }
  func.func @transform_7(%arg0: i32) -> (i32, i32) {
    %c0_i32 = arith.constant 0 : i32
    %c0_i32_0 = arith.constant 0 : i32
    %c0_i32_1 = arith.constant 0 : i32
    return %c0_i32, %c0_i32_0 : i32, i32
  }
  func.func @transform_8(%arg0: i32) -> (i32, i32) {
    %c0_i32 = arith.constant 0 : i32
    %c0_i32_0 = arith.constant 0 : i32
    %c0_i32_1 = arith.constant 0 : i32
    return %c0_i32, %c0_i32_0 : i32, i32
  }
  func.func @transform_9(%arg0: i32) -> (i32, i32) {
    %c0_i32 = arith.constant 0 : i32
    %c0_i32_0 = arith.constant 0 : i32
    return %arg0, %c0_i32 : i32, i32
  }
}

</mosaic_0001>

<bundles_post_ra>
// kernel: tpu_custom_call.1
= control target key start
LH: loop header
LB: loop body
LE: loop exit
PB: predicated region body
PF: predicated region fallthrough
CT: control target
= control target key end

     0   :  { %s11809_s0 = inlined_call_operand.hbm [shape: bf16[1024,128], index: 0, kind: input, shape index: {}]   ;;  %s11810_s1 = inlined_call_operand.hbm [shape: bf16[128,384], index: 1, kind: input, shape index: {}]   ;;  %s11811_s2 = inlined_call_operand.hbm [shape: bf16[128,128], index: 2, kind: input, shape index: {}]   ;;  %s11812_s3 = inlined_call_operand.vmem [shape: f32[1,128], index: 3, kind: input, shape index: {}]   ;;  %s11813_s4 = inlined_call_operand.vmem [shape: bf16[4,128], index: 4, kind: input, shape index: {}]   ;;  %s11814_s5 = inlined_call_operand.hbm [shape: bf16[128,128], index: 5, kind: input, shape index: {}]   ;;  %s11815_s6 = inlined_call_operand.hbm [shape: f32[2,32,128], index: 6, kind: input, shape index: {}]   ;;  %s11816_s7 = inlined_call_operand.hbm [shape: bf16[128,128], index: 7, kind: input, shape index: {}]   ;;  %s11817_s8 = inlined_call_operand.vmem [shape: f32[1,128], index: 8, kind: input, shape index: {}]   ;;  %s11818_s9 = inlined_call_operand.hbm [shape: f32[1024,128], index: 9, kind: output, shape index: {}]  }
   0x1   :  { %12056 = sst [smem:[#allocation210_spill]] %s11810_s1 }
   0x2   :  { %12057 = sst [smem:[#allocation211_spill]] %s11811_s2 }
   0x3   :  { %12058 = sst [smem:[#allocation212_spill]] %s11818_s9 }
   0x4   :  { %14 = vsyncpa [#allocation3], 0 }
   0x5   :  { %16 = vsyncpa [#allocation3 + $0x1], 0 }
   0x6   :  { %17 = vsyncpa [#allocation6], 0 }
   0x7   :  { %18 = vsyncpa [#allocation9], 0 }
   0x8   :  { %19 = vsyncpa [#allocation12], 0 }
   0x9   :  { %20 = vsyncpa [#allocation4], 0 }
   0xa   :  { %22 = vsyncpa [#allocation4 + $0x1], 0  ;;  %s8685_s30 = smov 0   ;;  %s8687_s10 = smov 0  }
   0xb   :  { %s8689_s11 = smov 0   ;;  %s8691_s12 = smov 0  }
   0xc LB: > { %s8619_s13 = smov [#allocation5]   ;;  %s8706_s15 = sadd.s32 4294967295, %s8617_s12   ;;  %s8617_s12 = sphi %s8691_s12, %s12642_s12   ;;  %s8613_s11 = sphi %s8689_s11, %s12641_s11   ;;  %s8609_s10 = sphi %s8687_s10, %s12640_s10   ;;  %s8605_s30 = sphi %s8685_s30, %s12639_s30  }
   0xd   : > { %s265_s14 = sshll.u32 %s8619_s13, 4  ;;  %p5996_p0 = scmp.ge.s32.totalorder %s8617_s12, 1  ;;  %s8711_s14 = int_to_ptr.vmem [resolvable:$true] %s265_s14 }
   0xe   : > { %p11820_p1 = scmp.eq.s32.totalorder %s8706_s15, 0  ;;  %p253_p2 = scmp.lt.s32.totalorder %s8617_s12, 3 }
   0xf   : > { %s8620_s18 = smov [#allocation8]   ;;  %s8621_s20 = smov [#allocation7]  }
  0x10   : > { %p8713_p3 = pnand %p5996_p0, %p253_p2  ;;  %s297_s19 = sshll.u32 %s8620_s18, 4  ;;  %s8726_s19 = int_to_ptr.vmem [resolvable:$true] %s297_s19 }
  0x11   : > { %s8728_s21 = sshll.u32 %s8621_s20, 4  ;;  %s12061_s1 = sld [smem:[#allocation210_spill]]  ;;  %s279_s21 = int_to_ptr.vmem [resolvable:$true] %s8728_s21 }
  0x12   : > { %s12059_s16 = scalar_select %p8713_p3, 1, 0 }
  0x13   : > { %p7679_p5 = pneg %p8713_p3 }
  0x15   : > { %p8722_p6 = pnand %p7679_p5, %p11820_p1 }
  0x17   : > { %s8369_s24 = scalar_lea.hbm %s12061_s1, 3072  ;;  %p8738_p8 = pneg %p8722_p6 }
  0x18   : > { %p8370_p7 = scmp.ne.s32.totalorder %s12061_s1, %s8369_s24  ;;  %p8376_p11 = scmp.lt.u32.totalorder %s8369_s24, %s12061_s1 }
  0x1a   : > { %p8372_p9 = pnand %p8738_p8, %p8370_p7 }
  0x1c   : > { %p8373_p10 = pneg %p8372_p9 }
  0x1e   : > { %p8378_p12 = pnand %p8376_p11, %p8373_p10 }
  0x20   : > { %8381 = shalt.err (!%p8378_p12)
}
  0x21   : > { %s8382_s13 = scalar_lea.vmem %s8711_s14, 3072  ;;  %p8390_p5 = scmp.lt.s32.totalorder %s8711_s14, %s8711_s14 }
  0x22   : > { %p8383_p13 = scmp.ne.s32.totalorder %s8711_s14, %s8382_s13  ;;  %p8391_p4 = scmp.lt.s32.totalorder %s8382_s13, %s8382_s13 }
  0x24   : > { %p8385_p0 = pnand %p8383_p13, %p8738_p8  ;;  %p8392_p7 = por %p8391_p4, %p8390_p5 }
  0x26   : > { %p8386_p2 = pneg %p8385_p0 }
  0x28   : > { %p8393_p9 = pnand %p8392_p7, %p8386_p2 }
  0x2a   : > { %8396 = shalt.err (!%p8393_p9)
}
  0x2b   : > { %s8622_s18 = smov 192   ;;  %s8623_s20 = smov 12  }
  0x2c   : > { %7682 = dma.hbm_to_vmem [thread:$0]  (!%p8722_p6), %s12061_s1, 3072, %s8711_s14, [#allocation6], %s8622_s18, %s8622_s18, %s8623_s20  }
  0x2d   : > { %s8397_s26 = scalar_lea.hbm %s11814_s5, 1024 }
  0x2e   : > { %p8398_p4 = scmp.ne.s32.totalorder %s11814_s5, %s8397_s26  ;;  %p8404_p12 = scmp.lt.u32.totalorder %s8397_s26, %s11814_s5 }
  0x30   : > { %p8400_p10 = pnand %p8398_p4, %p8738_p8 }
  0x32   : > { %p8401_p11 = pneg %p8400_p10 }
  0x34   : > { %p8406_p13 = pnand %p8404_p12, %p8401_p11 }
  0x36   : > { %8409 = shalt.err (!%p8406_p13)
}
  0x37   : > { %s8410_s14 = scalar_lea.vmem %s8726_s19, 1024  ;;  %p8418_p7 = scmp.lt.s32.totalorder %s8726_s19, %s8726_s19 }
  0x38   : > { %p8411_p0 = scmp.ne.s32.totalorder %s8726_s19, %s8410_s14  ;;  %p8419_p9 = scmp.lt.s32.totalorder %s8410_s14, %s8410_s14 }
  0x3a   : > { %p8413_p2 = pnand %p8411_p0, %p8738_p8  ;;  %p8420_p4 = por %p8419_p9, %p8418_p7 }
  0x3c   : > { %p8414_p5 = pneg %p8413_p2 }
  0x3e   : > { %p8421_p10 = pnand %p8420_p4, %p8414_p5 }
  0x40   : > { %8424 = shalt.err (!%p8421_p10)
}
  0x41   : > { %s11822_s18 = smov 64   ;;  %s11824_s9 = smov 4  }
  0x42   : > { %7688 = dma.hbm_to_vmem [thread:$0]  (!%p8722_p6), %s11814_s5, 1024, %s8726_s19, [#allocation9], %s11822_s18, %s11822_s18, %s11824_s9  }
  0x43   : > { %s12063_s2 = sld [smem:[#allocation211_spill]] }
  0x49   : > { %s8425_s25 = scalar_lea.hbm %s12063_s2, 1024 }
  0x4a   : > { %p8426_p11 = scmp.ne.s32.totalorder %s12063_s2, %s8425_s25  ;;  %p8432_p0 = scmp.lt.u32.totalorder %s8425_s25, %s12063_s2 }
  0x4c   : > { %p8428_p12 = pnand %p8426_p11, %p8738_p8 }
  0x4e   : > { %p8429_p13 = pneg %p8428_p12 }
  0x50   : > { %p8434_p2 = pnand %p8432_p0, %p8429_p13 }
  0x52   : > { %8437 = shalt.err (!%p8434_p2)
}
  0x53   : > { %s8438_s14 = scalar_lea.vmem %s279_s21, 1024  ;;  %p8446_p4 = scmp.lt.s32.totalorder %s279_s21, %s279_s21 }
  0x54   : > { %p8439_p5 = scmp.ne.s32.totalorder %s279_s21, %s8438_s14  ;;  %p8447_p10 = scmp.lt.s32.totalorder %s8438_s14, %s8438_s14 }
  0x56   : > { %p8441_p7 = pnand %p8439_p5, %p8738_p8  ;;  %p8448_p1 = por %p8447_p10, %p8446_p4 }
  0x58   : > { %p8442_p9 = pneg %p8441_p7 }
  0x5a   : > { %p8449_p3 = pnand %p8448_p1, %p8442_p9 }
  0x5c   : > { %8452 = shalt.err (!%p8449_p3)
}
  0x5d   : > { %7685 = dma.hbm_to_vmem [thread:$0]  (!%p8722_p6), %s12063_s2, 1024, %s279_s21, [#allocation6], %s11822_s18, %s11822_s18, %s11824_s9  }
  0x5e   : > { %s8626_s22 = smov [#allocation10]   ;;  %s8453_s26 = scalar_lea.hbm %s11815_s6, 1024 }
  0x5f   : > { %s310_s23 = sshll.u32 %s8626_s22, 4  ;;  %p8454_p1 = scmp.ne.s32.totalorder %s11815_s6, %s8453_s26  ;;  %s311_s23 = int_to_ptr.vmem [resolvable:$true] %s310_s23 }
  0x60   : > { %p8460_p12 = scmp.lt.u32.totalorder %s8453_s26, %s11815_s6 }
  0x61   : > { %p8456_p3 = pnand %p8454_p1, %p8738_p8 }
  0x63   : > { %p8457_p11 = pneg %p8456_p3 }
  0x65   : > { %p8462_p13 = pnand %p8460_p12, %p8457_p11 }
  0x67   : > { %8465 = shalt.err (!%p8462_p13)
}
  0x68   : > { %s8466_s21 = scalar_lea.vmem %s311_s23, 1024  ;;  %p8474_p7 = scmp.lt.s32.totalorder %s311_s23, %s311_s23 }
  0x69   : > { %p8467_p0 = scmp.ne.s32.totalorder %s311_s23, %s8466_s21  ;;  %p8475_p9 = scmp.lt.s32.totalorder %s8466_s21, %s8466_s21 }
  0x6b   : > { %p8469_p2 = pnand %p8467_p0, %p8738_p8  ;;  %p8476_p4 = por %p8475_p9, %p8474_p7 }
  0x6d   : > { %p8470_p5 = pneg %p8469_p2 }
  0x6f   : > { %p8477_p10 = pnand %p8476_p4, %p8470_p5 }
  0x71   : > { %8480 = shalt.err (!%p8477_p10)
}
  0x72   : > { %s8627_s19 = smov 128   ;;  %s8628_s20 = smov 8  }
  0x73   : > { %7691 = dma.hbm_to_vmem [thread:$0]  (!%p8722_p6), %s11815_s6, 1024, %s311_s23, [#allocation9], %s8627_s19, %s8627_s19, %s8628_s20  }
  0x74   : > { %s8629_s25 = smov [#allocation11]   ;;  %s8481_s13 = scalar_lea.hbm %s11816_s7, 1024 }
  0x75   : > { %s323_s26 = sshll.u32 %s8629_s25, 4  ;;  %p8482_p1 = scmp.ne.s32.totalorder %s11816_s7, %s8481_s13  ;;  %s324_s26 = int_to_ptr.vmem [resolvable:$true] %s323_s26 }
  0x76   : > { %p8488_p12 = scmp.lt.u32.totalorder %s8481_s13, %s11816_s7 }
  0x77   : > { %p8484_p3 = pnand %p8482_p1, %p8738_p8 }
  0x79   : > { %p8485_p11 = pneg %p8484_p3 }
  0x7b   : > { %p8490_p13 = pnand %p8488_p12, %p8485_p11 }
  0x7d   : > { %8493 = shalt.err (!%p8490_p13)
}
  0x7e   : > { %s8494_s23 = scalar_lea.vmem %s324_s26, 1024  ;;  %p8502_p7 = scmp.lt.s32.totalorder %s324_s26, %s324_s26 }
  0x7f   : > { %p8495_p0 = scmp.ne.s32.totalorder %s324_s26, %s8494_s23  ;;  %p8503_p9 = scmp.lt.s32.totalorder %s8494_s23, %s8494_s23 }
  0x81   : > { %p8497_p2 = pnand %p8495_p0, %p8738_p8  ;;  %p8504_p4 = por %p8503_p9, %p8502_p7 }
  0x83   : > { %p8498_p5 = pneg %p8497_p2 }
  0x85   : > { %p8505_p10 = pnand %p8504_p4, %p8498_p5 }
  0x87   : > { %8508 = shalt.err (!%p8505_p10)
}
  0x88   : > { %s12064_s19 = smov 4   ;;  %s12065_s20 = smov 64  }
  0x89   : > { %7694 = dma.hbm_to_vmem [thread:$0]  (!%p8722_p6), %s11816_s7, 1024, %s324_s26, [#allocation12], %s12065_s20, %s12065_s20, %s12064_s19  }
  0x8a   : > { %s5995_s17 = sadd.s32 4294967294, %s8617_s12   ;;  %s8848_s27 = sadd.s32 1, %s8617_s12  }
  0x8b   : > { %s35_s22 = sadd.s32 1, %s8613_s11  ;;  %s32_s24 = ssub.s32 %s8617_s12, %s8848_s27 }
  0x8c   : > { %p42_p8 = scmp.ne.s32.totalorder %s8613_s11, %s8609_s10  ;;  %p33_p1 = scmp.eq.s32.totalorder %s32_s24, 0 }
  0x8d   : > { %p43_p3 = scmp.eq.s32.totalorder %s8617_s12, 0  ;;  %p48_p11 = scmp.ne.s32.totalorder %s8609_s10, %s8605_s30 }
  0x8e   : > { %p240_p12 = scmp.eq.s32.totalorder %s8706_s15, 1  ;;  %p12066_p0 = scmp.eq.s32.totalorder %s8706_s15, 0 }
  0x8f   : > { %s8860_s25 = scalar_select %p33_p1, %s8613_s11, %s35_s22  }
  0x90   : > { %p44_p13 = por %p43_p3, %p42_p8  ;;  %p8864_p2 = por %p12066_p0, %p48_p11 }
  0x91   : > { %p8868_p6 = por %p240_p12, %p42_p8  ;;  %p246_p5 = scmp.eq.s32.totalorder %s5995_s17, 1 }
  0x92   : > { %p7708_p7 = scmp.lt.s32.totalorder %s8617_s12, 2  ;;  %s340_s29 = sand.u32 1, %s8613_s11  }
  0x93   : > { %s12068_s26 = scalar_select %p8868_p6, 1, 0 }
  0x94   : > { %p8874_p9 = por %p246_p5, %p48_p11  ;;  %s6003_s14 = sshll.u32 %s340_s29, 8 }
  0x95   : > { %s6101_s21 = sshll.u32 %s8617_s12, 12  ;;  %s344_s22 = scalar_lea.vmem [#allocation2], %s6003_s14 }
  0x96   : > { %s12069_s13 = scalar_select %p8874_p9, 1, 0 }
  0x97   : > { %s8882_s9 = scalar_lea.hbm %s11809_s0, %s6101_s21  ;;  %s351_s24 = sshll.u32 %s344_s22, 4  ;;  %s8888_s24 = int_to_ptr.vmem [resolvable:$true] %s351_s24 }
  0x98   : > { %p8884_p4 = pnand %p7708_p7, %p44_p13  ;;  %s8890_s1 = scalar_lea.sflag [#allocation3], %s340_s29 }
  0x99   : > { %s8509_s2 = scalar_lea.hbm %s8882_s9, 4096  ;;  %s8514_s23 = scalar_lea.hbm %s11809_s0, 8192 }
  0x9a   : > { %p8510_p10 = scmp.ne.s32.totalorder %s8882_s9, %s8509_s2  ;;  %p8511_p8 = pneg %p8884_p4 }
  0x9b   : > { %p8515_p11 = scmp.lt.u32.totalorder %s8882_s9, %s11809_s0  ;;  %p8516_p12 = scmp.lt.u32.totalorder %s8514_s23, %s8509_s2 }
  0x9c   : > { %p8512_p1 = pnand %p8511_p8, %p8510_p10  ;;  %p8518_p0 = scmp.lt.u32.totalorder %s8509_s2, %s8882_s9 }
  0x9d   : > { %p8517_p13 = por %p8516_p12, %p8515_p11 }
  0x9e   : > { %p8513_p3 = pneg %p8512_p1 }
  0x9f   : > { %p8519_p5 = por %p8518_p0, %p8517_p13 }
  0xa1   : > { %p8520_p7 = pnand %p8519_p5, %p8513_p3 }
  0xa3   : > { %8523 = shalt.err (!%p8520_p7)
}
  0xa4   : > { %s8524_s29 = scalar_lea.vmem %s8888_s24, 4096  ;;  %s8630_s14 = smov [#allocation2]  }
  0xa5   : > { %p8525_p10 = scmp.ne.s32.totalorder %s8888_s24, %s8524_s29  ;;  %s8529_s21 = sshll.u32 %s8630_s14, 4  ;;  %s8530_s21 = int_to_ptr.vmem [resolvable:$false] %s8529_s21 }
  0xa6   : > { %s8531_s18 = scalar_lea.vmem %s8530_s21, 8192  ;;  %p8532_p6 = scmp.lt.s32.totalorder %s8888_s24, %s8530_s21 }
  0xa7   : > { %p8527_p1 = pnand %p8525_p10, %p8511_p8  ;;  %p8533_p11 = scmp.lt.s32.totalorder %s8531_s18, %s8524_s29 }
  0xa9   : > { %p8528_p9 = pneg %p8527_p1  ;;  %p8534_p12 = por %p8533_p11, %p8532_p6 }
  0xab   : > { %p8535_p13 = pnand %p8534_p12, %p8528_p9 }
  0xad   : > { %8538 = shalt.err (!%p8535_p13)
}
  0xae   : > { %7698 = dma.hbm_to_vmem [thread:$0]  (!%p8884_p4), %s8882_s9, 4096, %s8888_s24, %s8890_s1, %s12065_s20, %s12065_s20, %s12064_s19  }
  0xaf   : > { %p12071_p8 = scmp.ne.s32.totalorder %s12059_s16, 0 }
  0xb1   : > { %363 = sbr.rel (%p12071_p8) target bundleno = 2346 (0x92a), region = 56 }
  0xb8   : > { %s8924_s2 = sand.u32 1, %s8609_s10  }
  0xb9   : > { %s6007_s23 = sshll.u32 %s8924_s2, 8  ;;  %s366_s22 = scalar_lea.sflag [#allocation3], %s8924_s2 }
  0xba   : > { %s8928_s29 = scalar_lea.vmem [#allocation2], %s6007_s23 }
  0xbb   : > { %8584 = dma.done.wait (%p8864_p2), %s366_s22, 4096  }
  0xbc   : > { %8586 = vsyncadd (%p8864_p2), %s366_s22, 4294963200  ;;  %p12072_p6 = scmp.eq.s32.totalorder %s8706_s15, 0 }
  0xbe   : > { %8588 = dma.done.wait (%p12072_p6), [#allocation6], 4096   ;;  %p12073_p9 = pmov %p12072_p6 }
  0xbf   : > { %p12074_p4 = pmov %p12072_p6 }
  0xc0   : > { %8590 = vsyncadd (%p12073_p9), [#allocation6], 4294963200 }
  0xc1   : > { %8592 = dma.done.wait (%p12074_p4), [#allocation9], 2048   ;;  %p12075_p3 = pmov %p12074_p4 }
  0xc3   : > { %8594 = vsyncadd (%p12075_p3), [#allocation9], 4294965248  ;;  %p12076_p0 = pmov %p12075_p3 }
  0xc5   : > { %8596 = dma.done.wait (%p12076_p0), [#allocation12], 1024   ;;  %p12077_p5 = pmov %p12076_p0 }
  0xc6   : > { %v8631_v0 = vmov 0   ;;  %v7761_v1 = vld [vmem:[#allocation5 + $0x4] ss:$12 sps:$4 sm:$0xff]   ;;  %v7763_v2 = vld [vmem:[#allocation5] ss:$12 sps:$4 sm:$0xff]   ;;  %v8952_v19 = vld [vmem:[%s8928_s29 + $0xb8] sm:$0xff]  }
  0xc7   : > { %8598 = vsyncadd (%p12077_p5), [#allocation12], 4294966272  ;;  %875 = vmatprep.mubr.bf16.mxu0 %v8631_v0  ;;  %1105 = vmatprep.mubr.bf16.mxu1 %v8631_v0  ;;  %v7764_v3 = vld [vmem:[#allocation5 + $0x1c] ss:$12 sps:$4 sm:$0xff]   ;;  %v7766_v4 = vld [vmem:[#allocation5 + $0x18] ss:$12 sps:$4 sm:$0xff]  }
  0xc8   : > { %843 = vmatprep.subr.bf16.mxu0 %v7761_v1  ;;  %7639 = vmatprep.subr.bf16.mxu1 %v7761_v1  ;;  %v7767_v5 = vld [vmem:[#allocation5 + $0x34] ss:$12 sps:$4 sm:$0xff]   ;;  %v7769_v6 = vld [vmem:[#allocation5 + $0x30] ss:$12 sps:$4 sm:$0xff]   ;;  %v7770_v7 = vld [vmem:[#allocation5 + $0x4c] ss:$12 sps:$4 sm:$0xff]  }
  0xc9   : > { %844 = vmatpush1.bf16.msra.mxu0 %v7763_v2  ;;  %7647 = vmatpush1.bf16.msra.mxu1 %v7763_v2  ;;  %v7772_v8 = vld [vmem:[#allocation5 + $0x48] ss:$12 sps:$4 sm:$0xff]   ;;  %v7773_v9 = vld [vmem:[#allocation5 + $0x64] ss:$12 sps:$4 sm:$0xff]   ;;  %v7775_v10 = vld [vmem:[#allocation5 + $0x60] ss:$12 sps:$4 sm:$0xff]  }
  0xca   : > { %845 = vmatprep.subr.bf16.mxu0 %v7764_v3  ;;  %7640 = vmatprep.subr.bf16.mxu1 %v7764_v3  ;;  %v7776_v11 = vld [vmem:[#allocation5 + $0x7c] ss:$12 sps:$4 sm:$0xff]   ;;  %v7778_v12 = vld [vmem:[#allocation5 + $0x78] ss:$12 sps:$4 sm:$0xff]   ;;  %v7779_v13 = vld [vmem:[#allocation5 + $0x94] ss:$12 sps:$4 sm:$0xff]  }
  0xcb   : > { %v7781_v14 = vld [vmem:[#allocation5 + $0x90] ss:$12 sps:$4 sm:$0xff]   ;;  %v7782_v15 = vld [vmem:[#allocation5 + $0xac] ss:$12 sps:$4 sm:$0xff]   ;;  %v7784_v16 = vld [vmem:[#allocation5 + $0xa8] ss:$12 sps:$4 sm:$0xff]  }
  0xcc   : > { %v7800_v17 = vld [vmem:[#allocation5 + $0x8] ss:$12 sps:$4 sm:$0xff]   ;;  %v8949_v18 = vld [vmem:[%s8928_s29] sm:$0xff]   ;;  %v7805_v24 = vld [vmem:[#allocation5 + $0x50] ss:$12 sps:$4 sm:$0xff]   ;;  %s6013_s24 = sshll.u32 %s8924_s2, 9 }
  0xcd   : > { %846 = vmatpush1.bf16.msra.mxu0 %v7766_v4  ;;  %7648 = vmatpush1.bf16.msra.mxu1 %v7766_v4  ;;  %v7801_v20 = vld [vmem:[#allocation5 + $0x20] ss:$12 sps:$4 sm:$0xff]   ;;  %v7804_v22 = vld [vmem:[#allocation5 + $0x38] ss:$12 sps:$4 sm:$0xff]   ;;  %v8969_v25 = vld [vmem:[%s8928_s29 + $0x10] sm:$0xff]   ;;  %s11630_s21 = scalar_lea.vmem [#allocation13], %s6013_s24 }
  0xce   : > { %847 = vmatprep.subr.bf16.mxu0 %v7767_v5  ;;  %7641 = vmatprep.subr.bf16.mxu1 %v7767_v5  ;;  %v8959_v21 = vld [vmem:[%s8928_s29 + $0x8] sm:$0xff]   ;;  %v8962_v23 = vld [vmem:[%s8928_s29 + $0xc0] sm:$0xff]   ;;  %v7788_v30 = vld [vmem:[%s8928_s29 + $0x18] sm:$0xff]   ;;  %s6102_s18 = sshll.u32 %s8706_s15, 13  ;;  %s5874_s23 = sshll.u32 %s11630_s21, 4  ;;  %s11761_s23 = int_to_ptr.vmem [resolvable:$true] %s5874_s23 }
  0xcf   : > { %v7808_v26 = vld [vmem:[#allocation5 + $0x68] ss:$12 sps:$4 sm:$0xff]   ;;  %v7809_v28 = vld [vmem:[#allocation5 + $0x80] ss:$12 sps:$4 sm:$0xff]   ;;  %v7812_v29 = vld [vmem:[#allocation5 + $0x98] ss:$12 sps:$4 sm:$0xff]  }
  0xd0   : > { %v8972_v27 = vld [vmem:[%s8928_s29 + $0xc8] sm:$0xff]   ;;  %v8980_v31 = vld [vmem:[%s8928_s29 + $0xd0] sm:$0xff]   ;;  %v7790_v33 = vld [vmem:[%s8928_s29 + $0x20] sm:$0xff]   ;;  %s12635_s1 = sld [smem:[#allocation212_spill]]  ;;  %s5861_s15 = scalar_lea.sflag [#allocation4], %s8924_s2 }
  0xd1   : > { %848 = vmatpush1.bf16.msra.mxu0 %v7769_v6  ;;  %7649 = vmatpush1.bf16.msra.mxu1 %v7769_v6  ;;  %v7813_v32 = vld [vmem:[#allocation5 + $0xb0] ss:$12 sps:$4 sm:$0xff]   ;;  %v7792_v35 = vld [vmem:[%s8928_s29 + $0x28] sm:$0xff]   ;;  %v8994_v36 = vld [vmem:[%s8928_s29 + $0xe0] sm:$0xff]   ;;  %s8539_s19 = scalar_lea.vmem %s11761_s23, 8192  ;;  %p12636_p7 = scmp.ne.s32.totalorder %s12068_s26, 0 }
  0xd2   : > { %849 = vmatprep.subr.bf16.mxu0 %v7770_v7  ;;  %7642 = vmatprep.subr.bf16.mxu1 %v7770_v7  ;;  %v8987_v34 = vld [vmem:[%s8928_s29 + $0xd8] sm:$0xff]   ;;  %v7794_v37 = vld [vmem:[%s8928_s29 + $0x30] sm:$0xff]   ;;  %v9001_v38 = vld [vmem:[%s8928_s29 + $0xe8] sm:$0xff]   ;;  %p8540_p2 = scmp.ne.s32.totalorder %s11761_s23, %s8539_s19  ;;  %s8632_s20 = smov [#allocation13]  }
  0xd3   : > { %v7825_v39 = vld [vmem:[#allocation7] sm:$0xff]   ;;  %v7796_v40 = vld [vmem:[%s8928_s29 + $0x38] sm:$0xff]   ;;  %v9008_v41 = vld [vmem:[%s8928_s29 + $0xf0] sm:$0xff]   ;;  %s8543_s28 = sshll.u32 %s8632_s20, 4  ;;  %s8544_s28 = int_to_ptr.vmem [resolvable:$false] %s8543_s28 }
  0xd4   : > { %v7798_v42 = vld [vmem:[%s8928_s29 + $0x40] sm:$0xff]   ;;  %v9015_v43 = vld [vmem:[%s8928_s29 + $0xf8] sm:$0xff]   ;;  %v7802_v44 = vld [vmem:[%s8928_s29 + $0x48] sm:$0xff]   ;;  %p8541_p10 = pnand %p8540_p2, %p12636_p7  ;;  %s8545_s9 = scalar_lea.vmem %s8544_s28, 16384 }
  0xd5   : > { %850 = vmatpush1.bf16.msra.mxu0 %v7772_v8  ;;  %7650 = vmatpush1.bf16.msra.mxu1 %v7772_v8  ;;  %v7826_v45 = vld [vmem:[#allocation7 + $0x8] sm:$0xff]   ;;  %v7827_v46 = vld [vmem:[#allocation7 + $0x10] sm:$0xff]   ;;  %v7828_v48 = vld [vmem:[#allocation7 + $0x18] sm:$0xff]   ;;  %p8546_p11 = scmp.lt.s32.totalorder %s11761_s23, %s8544_s28  ;;  %p8547_p12 = scmp.lt.s32.totalorder %s8545_s9, %s8539_s19 }
  0xd6   : > { %851 = vmatprep.subr.bf16.mxu0 %v7773_v9  ;;  %7643 = vmatprep.subr.bf16.mxu1 %v7773_v9  ;;  %v7806_v47 = vld [vmem:[%s8928_s29 + $0x50] sm:$0xff]   ;;  %v7829_v49 = vld [vmem:[#allocation7 + $0x20] sm:$0xff]   ;;  %v7810_v50 = vld [vmem:[%s8928_s29 + $0x58] sm:$0xff]   ;;  %s11759_s16 = scalar_lea.hbm %s12635_s1, %s6102_s18  ;;  %p8542_p1 = pneg %p8541_p10 }
  0xd7   : > { %v7830_v51 = vld [vmem:[#allocation7 + $0x28] sm:$0xff]   ;;  %v7831_v52 = vld [vmem:[#allocation7 + $0x30] sm:$0xff]   ;;  %v7814_v53 = vld [vmem:[%s8928_s29 + $0x60] sm:$0xff]   ;;  %p8548_p13 = por %p8547_p12, %p8546_p11 }
  0xd8   : > { %v7832_v54 = vld [vmem:[#allocation7 + $0x38] sm:$0xff]   ;;  %v7815_v55 = vld [vmem:[%s8928_s29 + $0x68] sm:$0xff]   ;;  %v7816_v56 = vld [vmem:[%s8928_s29 + $0x70] sm:$0xff]  }
  0xd9   : > { %852 = vmatpush1.bf16.msra.mxu0 %v7775_v10  ;;  %7651 = vmatpush1.bf16.msra.mxu1 %v7775_v10  ;;  %v7817_v57 = vld [vmem:[%s8928_s29 + $0x78] sm:$0xff]   ;;  %v7818_v58 = vld [vmem:[%s8928_s29 + $0x80] sm:$0xff]   ;;  %v7819_v59 = vld [vmem:[%s8928_s29 + $0x88] sm:$0xff]   ;;  %p8549_p8 = pnand %p8548_p13, %p8542_p1 }
  0xda   : > { %853 = vmatprep.subr.bf16.mxu0 %v7776_v11  ;;  %7644 = vmatprep.subr.bf16.mxu1 %v7776_v11  ;;  %v7820_v60 = vld [vmem:[%s8928_s29 + $0x90] sm:$0xff]   ;;  %v7821_v61 = vld [vmem:[%s8928_s29 + $0x98] sm:$0xff]   ;;  %v7822_v62 = vld [vmem:[%s8928_s29 + $0xa0] sm:$0xff]  }
  0xdb   : > { %v7823_v63 = vld [vmem:[%s8928_s29 + $0xa8] sm:$0xff]   ;;  %v7824_v1 = vld [vmem:[%s8928_s29 + $0xb0] sm:$0xff]  }
  0xdd   : > { %854 = vmatpush1.bf16.msra.mxu0 %v7778_v12  ;;  %7652 = vmatpush1.bf16.msra.mxu1 %v7778_v12 }
  0xde   : > { %855 = vmatprep.subr.bf16.mxu0 %v7779_v13  ;;  %7645 = vmatprep.subr.bf16.mxu1 %v7779_v13 }
  0xe1   : > { %856 = vmatpush1.bf16.msra.mxu0 %v7781_v14  ;;  %7653 = vmatpush1.bf16.msra.mxu1 %v7781_v14 }
  0xe2   : > { %857 = vmatprep.subr.bf16.mxu0 %v7782_v15  ;;  %7646 = vmatprep.subr.bf16.mxu1 %v7782_v15 }
  0xe5   : > { %858 = vmatpush1.bf16.msra.mxu0 %v7784_v16  ;;  %7654 = vmatpush1.bf16.msra.mxu1 %v7784_v16 }
  0xe6   : > { %6615 = vmatprep.subr.bf16.mxu1 %v7800_v17 }
  0xe8   : > { %876 = vmatmul.mubr.bf16.vlgmr.msra.gmra.mrb[0].mxu0 %v8949_v18  ;;  %1106 = vmatmul.mubr.bf16.vlgmr.msra.gmra.mrb[0].mxu1 %v8952_v19 }
  0xe9   : > { %885 = vmatprep.mubr.bf16.mxu0 %v8631_v0  ;;  %1115 = vmatprep.mubr.bf16.mxu1 %v8631_v0 }
  0xea   : > { %6616 = vmatpush3.bf16.msra.mxu1 %v7800_v17 }
  0xeb   : > { %6617 = vmatprep.subr.bf16.mxu1 %v7801_v20 }
  0xee   : > { %6618 = vmatpush3.bf16.msra.mxu1 %v7801_v20 }
  0xef   : > { %6619 = vmatprep.subr.bf16.mxu1 %v7804_v22 }
  0xf0   : > { %886 = vmatmul.mubr.bf16.gmra.mrb[4].mxu0 %v8959_v21  ;;  %1116 = vmatmul.mubr.bf16.gmra.mrb[4].mxu1 %v8962_v23 }
  0xf1   : > { %895 = vmatprep.mubr.bf16.mxu0 %v8631_v0  ;;  %1125 = vmatprep.mubr.bf16.mxu1 %v8631_v0 }
  0xf2   : > { %6620 = vmatpush3.bf16.msra.mxu1 %v7804_v22 }
  0xf3   : > { %6621 = vmatprep.subr.bf16.mxu1 %v7805_v24 }
  0xf6   : > { %6622 = vmatpush3.bf16.msra.mxu1 %v7805_v24 }
  0xf7   : > { %6623 = vmatprep.subr.bf16.mxu1 %v7808_v26 }
  0xf8   : > { %896 = vmatmul.mubr.bf16.gmra.mrb[8].mxu0 %v8969_v25  ;;  %1126 = vmatmul.mubr.bf16.gmra.mrb[8].mxu1 %v8972_v27 }
  0xf9   : > { %905 = vmatprep.mubr.bf16.mxu0 %v8631_v0  ;;  %1135 = vmatprep.mubr.bf16.mxu1 %v8631_v0 }
  0xfa   : > { %6624 = vmatpush3.bf16.msra.mxu1 %v7808_v26 }
  0xfb   : > { %6625 = vmatprep.subr.bf16.mxu1 %v7809_v28 }
  0xfe   : > { %6626 = vmatpush3.bf16.msra.mxu1 %v7809_v28 }
  0xff   : > { %6627 = vmatprep.subr.bf16.mxu1 %v7812_v29 }
 0x100   : > { %906 = vmatmul.mubr.bf16.gmra.mrb[12].mxu0 %v7788_v30  ;;  %1136 = vmatmul.mubr.bf16.gmra.mrb[12].mxu1 %v8980_v31 }
 0x101   : > { %915 = vmatprep.mubr.bf16.mxu0 %v8631_v0  ;;  %1145 = vmatprep.mubr.bf16.mxu1 %v8631_v0 }
 0x102   : > { %6628 = vmatpush3.bf16.msra.mxu1 %v7812_v29 }
 0x103   : > { %6629 = vmatprep.subr.bf16.mxu1 %v7813_v32 }
 0x106   : > { %6630 = vmatpush3.bf16.msra.mxu1 %v7813_v32 }
 0x107   : > { %6695 = vmatprep.subr.bf16.mxu1 %v7825_v39 }
 0x108   : > { %916 = vmatmul.mubr.bf16.gmra.mrb[16].mxu0 %v7790_v33  ;;  %1146 = vmatmul.mubr.bf16.gmra.mrb[16].mxu1 %v8987_v34 }
 0x109   : > { %925 = vmatprep.mubr.bf16.mxu0 %v8631_v0  ;;  %1155 = vmatprep.mubr.bf16.mxu1 %v8631_v0 }
 0x110   : > { %926 = vmatmul.mubr.bf16.gmra.mrb[20].mxu0 %v7792_v35  ;;  %1156 = vmatmul.mubr.bf16.gmra.mrb[20].mxu1 %v8994_v36 }
 0x111   : > { %935 = vmatprep.mubr.bf16.mxu0 %v8631_v0  ;;  %1165 = vmatprep.mubr.bf16.mxu1 %v8631_v0 }
 0x118   : > { %936 = vmatmul.mubr.bf16.gmra.mrb[24].mxu0 %v7794_v37  ;;  %1166 = vmatmul.mubr.bf16.gmra.mrb[24].mxu1 %v9001_v38 }
 0x119   : > { %945 = vmatprep.mubr.bf16.mxu0 %v8631_v0  ;;  %1175 = vmatprep.mubr.bf16.mxu1 %v8631_v0 }
 0x120   : > { %946 = vmatmul.mubr.bf16.gmra.mrb[28].mxu0 %v7796_v40  ;;  %1176 = vmatmul.mubr.bf16.gmra.mrb[28].mxu1 %v9008_v41 }
 0x121   : > { %955 = vmatprep.mubr.bf16.mxu0 %v8631_v0  ;;  %1185 = vmatprep.mubr.bf16.mxu1 %v8631_v0 }
 0x128   : > { %956 = vmatmul.mubr.bf16.gmra.mrb[32].mxu0 %v7798_v42  ;;  %1186 = vmatmul.mubr.bf16.gmra.mrb[32].mxu1 %v9015_v43 }
 0x129   : > { %965 = vmatprep.mubr.bf16.mxu0 %v8631_v0  ;;  %6631 = vmatprep.mubr.bf16.mxu1 %v8949_v18 }
 0x130   : > { %966 = vmatmul.mubr.bf16.gmra.mrb[36].mxu0 %v7802_v44  ;;  %6632 = vmatmul.mubr.bf16.vlgmr.msra.gmra.mrb[36].mxu1 %v8959_v21 }
 0x131   : > { %975 = vmatprep.mubr.bf16.mxu0 %v8631_v0  ;;  %6635 = vmatprep.mubr.bf16.mxu1 %v8969_v25 }
 0x132   : > { %6696 = vmatpush3.bf16.msra.mxu1 %v7825_v39 }
 0x133   : > { %6697 = vmatprep.subr.bf16.mxu1 %v7826_v45 }
 0x136   : > { %6698 = vmatpush3.bf16.msra.mxu1 %v7826_v45 }
 0x137   : > { %6699 = vmatprep.subr.bf16.mxu1 %v7827_v46 }
 0x138   : > { %976 = vmatmul.mubr.bf16.gmra.mrb[40].mxu0 %v7806_v47  ;;  %6636 = vmatmul.mubr.bf16.gmra.mrb[40].mxu1 %v7788_v30 }
 0x139   : > { %985 = vmatprep.mubr.bf16.mxu0 %v8631_v0  ;;  %6639 = vmatprep.mubr.bf16.mxu1 %v7790_v33 }
 0x13a   : > { %6700 = vmatpush3.bf16.msra.mxu1 %v7827_v46 }
 0x13b   : > { %6701 = vmatprep.subr.bf16.mxu1 %v7828_v48 }
 0x13e   : > { %6702 = vmatpush3.bf16.msra.mxu1 %v7828_v48 }
 0x13f   : > { %6703 = vmatprep.subr.bf16.mxu1 %v7829_v49 }
 0x140   : > { %986 = vmatmul.mubr.bf16.gmra.mrb[44].mxu0 %v7810_v50  ;;  %6640 = vmatmul.mubr.bf16.gmra.mrb[44].mxu1 %v7792_v35 }
 0x141   : > { %995 = vmatprep.mubr.bf16.mxu0 %v8631_v0  ;;  %6643 = vmatprep.mubr.bf16.mxu1 %v7794_v37 }
 0x142   : > { %6704 = vmatpush3.bf16.msra.mxu1 %v7829_v49 }
 0x143   : > { %6705 = vmatprep.subr.bf16.mxu1 %v7830_v51 }
 0x146   : > { %6706 = vmatpush3.bf16.msra.mxu1 %v7830_v51 }
 0x147   : > { %6707 = vmatprep.subr.bf16.mxu1 %v7831_v52 }
 0x148   : > { %996 = vmatmul.mubr.bf16.gmra.mrb[48].mxu0 %v7814_v53  ;;  %6644 = vmatmul.mubr.bf16.gmra.mrb[48].mxu1 %v7796_v40 }
 0x149   : > { %1005 = vmatprep.mubr.bf16.mxu0 %v8631_v0  ;;  %6647 = vmatprep.mubr.bf16.mxu1 %v7798_v42 }
 0x14a   : > { %6708 = vmatpush3.bf16.msra.mxu1 %v7831_v52 }
 0x14b   : > { %6709 = vmatprep.subr.bf16.mxu1 %v7832_v54 }
 0x14e   : > { %6710 = vmatpush3.bf16.msra.mxu1 %v7832_v54 }
 0x150   : > { %1006 = vmatmul.mubr.bf16.gmra.mrb[52].mxu0 %v7815_v55  ;;  %6648 = vmatmul.mubr.bf16.gmra.mrb[52].mxu1 %v7802_v44 }
 0x151   : > { %1015 = vmatprep.mubr.bf16.mxu0 %v8631_v0  ;;  %6651 = vmatprep.mubr.bf16.mxu1 %v7806_v47 }
 0x158   : > { %1016 = vmatmul.mubr.bf16.gmra.mrb[56].mxu0 %v7816_v56  ;;  %6652 = vmatmul.mubr.bf16.gmra.mrb[56].mxu1 %v7810_v50 }
 0x159   : > { %1025 = vmatprep.mubr.bf16.mxu0 %v8631_v0  ;;  %6655 = vmatprep.mubr.bf16.mxu1 %v7814_v53 }
 0x160   : > { %1026 = vmatmul.mubr.bf16.gmra.mrb[60].mxu0 %v7817_v57  ;;  %6656 = vmatmul.mubr.bf16.gmra.mrb[60].mxu1 %v7815_v55 }
 0x161   : > { %1035 = vmatprep.mubr.bf16.mxu0 %v8631_v0  ;;  %6659 = vmatprep.mubr.bf16.mxu1 %v7816_v56 }
 0x168   : > { %1036 = vmatmul.mubr.bf16.gmra.mrb[64].mxu0 %v7818_v58  ;;  %6660 = vmatmul.mubr.bf16.gmra.mrb[64].mxu1 %v7817_v57 }
 0x169   : > { %1045 = vmatprep.mubr.bf16.mxu0 %v8631_v0  ;;  %6663 = vmatprep.mubr.bf16.mxu1 %v7818_v58 }
 0x170   : > { %1046 = vmatmul.mubr.bf16.gmra.mrb[68].mxu0 %v7819_v59  ;;  %6664 = vmatmul.mubr.bf16.gmra.mrb[68].mxu1 %v7819_v59 }
 0x171   : > { %1055 = vmatprep.mubr.bf16.mxu0 %v8631_v0  ;;  %6667 = vmatprep.mubr.bf16.mxu1 %v7820_v60 }
 0x178   : > { %1056 = vmatmul.mubr.bf16.gmra.mrb[72].mxu0 %v7820_v60  ;;  %6668 = vmatmul.mubr.bf16.gmra.mrb[72].mxu1 %v7821_v61 }
 0x179   : > { %1065 = vmatprep.mubr.bf16.mxu0 %v8631_v0  ;;  %6671 = vmatprep.mubr.bf16.mxu1 %v7822_v62 }
 0x180   : > { %1066 = vmatmul.mubr.bf16.gmra.mrb[76].mxu0 %v7821_v61  ;;  %6672 = vmatmul.mubr.bf16.gmra.mrb[76].mxu1 %v7823_v63 }
 0x181   : > { %1075 = vmatprep.mubr.bf16.mxu0 %v8631_v0  ;;  %6675 = vmatprep.mubr.bf16.mxu1 %v7824_v1 }
 0x188   : > { %1076 = vmatmul.mubr.bf16.gmra.mrb[80].mxu0 %v7822_v62  ;;  %6676 = vmatmul.mubr.bf16.gmra.mrb[80].mxu1 %v8952_v19 }
 0x189   : > { %1085 = vmatprep.mubr.bf16.mxu0 %v8631_v0  ;;  %6679 = vmatprep.mubr.bf16.mxu1 %v8962_v23 }
 0x190   : > { %1086 = vmatmul.mubr.bf16.gmra.mrb[84].mxu0 %v7823_v63  ;;  %6680 = vmatmul.mubr.bf16.gmra.mrb[84].mxu1 %v8972_v27 }
 0x191   : > { %1095 = vmatprep.mubr.bf16.mxu0 %v8631_v0  ;;  %6683 = vmatprep.mubr.bf16.mxu1 %v8980_v31 }
 0x198   : > { %1096 = vmatmul.mubr.bf16.gmra.mrb[88].mxu0 %v7824_v1  ;;  %6684 = vmatmul.mubr.bf16.gmra.mrb[88].mxu1 %v8987_v34 }
 0x199   : > { %6687 = vmatprep.mubr.bf16.mxu1 %v8994_v36 }
 0x1a0   : > { %6688 = vmatmul.mubr.bf16.gmra.mrb[92].mxu1 %v9001_v38 }
 0x1a1   : > { %6691 = vmatprep.mubr.bf16.mxu1 %v9008_v41 }
 0x1a8   : > { %6692 = vmatmul.mubr.bf16.gmra.mrb[96].mxu1 %v9015_v43 }
 0x1bb   : > { %v9058_v2 = vpop.f32.mrb[0].mxu0  ;;  %v9060_v3 = vpop.f32.mrb[0].mxu1 }
 0x1bc   : > { %12078 = vst [vmem:[#allocation19_spill] sm:$0xff] %v9060_v3  ;;  %v9062_v4 = vpop.f32.mrb[1].mxu0  ;;  %v9066_v0 = vmul.f32 %v9060_v3, %v9060_v3  ;;  %v9068_v5 = vpop.f32.mrb[1].mxu1  ;;  %v1485_v9 = vmul.f32 %v9058_v2, %v9058_v2 }
 0x1bd   : > { %12079 = vst [vmem:[#allocation20_spill] sm:$0xff] %v9062_v4  ;;  %12080 = vst [vmem:[#allocation21_spill] sm:$0xff] %v9068_v5  ;;  %v9070_v6 = vpop.f32.mrb[2].mxu0  ;;  %v9074_v7 = vmul.f32 %v9068_v5, %v9068_v5  ;;  %v9076_v8 = vpop.f32.mrb[2].mxu1  ;;  %v9092_v14 = vmul.f32 %v9062_v4, %v9062_v4 }
 0x1be   : > { %12082 = vst [vmem:[#allocation23_spill] sm:$0xff] %v9076_v8  ;;  %v1486_v10 = vmul.f32 %v9070_v6, %v9070_v6  ;;  %v9082_v11 = vpop.f32.mrb[3].mxu0  ;;  %v9086_v12 = vmul.f32 %v9076_v8, %v9076_v8  ;;  %v9088_v13 = vpop.f32.mrb[3].mxu1 }
 0x1bf   : > { %12081 = vst [vmem:[#allocation22_spill] sm:$0xff] %v9074_v7  ;;  %12083 = vst [vmem:[#allocation24_spill] sm:$0xff] %v9082_v11  ;;  %v9096_v15 = vmul.f32 %v9082_v11, %v9082_v11  ;;  %v9100_v16 = vmul.f32 %v9088_v13, %v9088_v13 }
 0x1c0   : > { %12084 = vst [vmem:[#allocation25_spill] sm:$0xff] %v9088_v13  ;;  %v1613_v17 = vpack.c.bf16 %v1486_v10, %v1485_v9 }
 0x1c1   : > { %12085 = vst [vmem:[#allocation26_spill] sm:$0xff] %v9100_v16 }
 0x1c2   : > { %6711 = vmatprep.mubr.bf16.mxu1 %v1613_v17 }
 0x1c3   : > { %v9108_v21 = vpop.f32.mrb[4].mxu0  ;;  %v9110_v22 = vpop.f32.mrb[4].mxu1 }
 0x1c4   : > { %12086 = vst [vmem:[#allocation27_spill] sm:$0xff] %v9110_v22  ;;  %v9112_v23 = vpop.f32.mrb[5].mxu0  ;;  %v9116_v24 = vmul.f32 %v9110_v22, %v9110_v22  ;;  %v9118_v25 = vpop.f32.mrb[5].mxu1  ;;  %v1487_v29 = vmul.f32 %v9108_v21, %v9108_v21 }
 0x1c5   : > { %12087 = vst [vmem:[#allocation28_spill] sm:$0xff] %v9112_v23  ;;  %12088 = vst [vmem:[#allocation29_spill] sm:$0xff] %v9118_v25  ;;  %v9120_v26 = vpop.f32.mrb[6].mxu0  ;;  %v9124_v27 = vmul.f32 %v9118_v25, %v9118_v25  ;;  %v9126_v28 = vpop.f32.mrb[6].mxu1  ;;  %v9142_v34 = vmul.f32 %v9112_v23, %v9112_v23 }
 0x1c6   : > { %12090 = vst [vmem:[#allocation31_spill] sm:$0xff] %v9126_v28  ;;  %v1488_v30 = vmul.f32 %v9120_v26, %v9120_v26  ;;  %v9132_v31 = vpop.f32.mrb[7].mxu0  ;;  %v9136_v32 = vmul.f32 %v9126_v28, %v9126_v28  ;;  %v9138_v33 = vpop.f32.mrb[7].mxu1 }
 0x1c7   : > { %12089 = vst [vmem:[#allocation30_spill] sm:$0xff] %v9124_v27  ;;  %12091 = vst [vmem:[#allocation32_spill] sm:$0xff] %v9132_v31  ;;  %v9146_v35 = vmul.f32 %v9132_v31, %v9132_v31  ;;  %v9150_v36 = vmul.f32 %v9138_v33, %v9138_v33 }
 0x1c8   : > { %12092 = vst [vmem:[#allocation33_spill] sm:$0xff] %v9138_v33  ;;  %v1614_v37 = vpack.c.bf16 %v1488_v30, %v1487_v29 }
 0x1c9   : > { %12093 = vst [vmem:[#allocation34_spill] sm:$0xff] %v9150_v36 }
 0x1ca   : > { %6712 = vmatmul.mubr.bf16.vlgmr.msra.gmra.mrb[100].mxu1 %v1614_v37 }
 0x1cb   : > { %v9158_v41 = vpop.f32.mrb[8].mxu0  ;;  %v9160_v42 = vpop.f32.mrb[8].mxu1 }
 0x1cc   : > { %12094 = vst [vmem:[#allocation35_spill] sm:$0xff] %v9160_v42  ;;  %v9162_v43 = vpop.f32.mrb[9].mxu0  ;;  %v9166_v44 = vmul.f32 %v9160_v42, %v9160_v42  ;;  %v9168_v45 = vpop.f32.mrb[9].mxu1  ;;  %v1489_v49 = vmul.f32 %v9158_v41, %v9158_v41 }
 0x1cd   : > { %12095 = vst [vmem:[#allocation36_spill] sm:$0xff] %v9162_v43  ;;  %12096 = vst [vmem:[#allocation37_spill] sm:$0xff] %v9168_v45  ;;  %v9170_v46 = vpop.f32.mrb[10].mxu0  ;;  %v9174_v47 = vmul.f32 %v9168_v45, %v9168_v45  ;;  %v9176_v48 = vpop.f32.mrb[10].mxu1  ;;  %v9192_v54 = vmul.f32 %v9162_v43, %v9162_v43 }
 0x1ce   : > { %12098 = vst [vmem:[#allocation39_spill] sm:$0xff] %v9176_v48  ;;  %v1490_v50 = vmul.f32 %v9170_v46, %v9170_v46  ;;  %v9182_v51 = vpop.f32.mrb[11].mxu0  ;;  %v9186_v52 = vmul.f32 %v9176_v48, %v9176_v48  ;;  %v9188_v53 = vpop.f32.mrb[11].mxu1 }
 0x1cf   : > { %12097 = vst [vmem:[#allocation38_spill] sm:$0xff] %v9174_v47  ;;  %12099 = vst [vmem:[#allocation40_spill] sm:$0xff] %v9182_v51  ;;  %v9196_v55 = vmul.f32 %v9182_v51, %v9182_v51  ;;  %v9200_v56 = vmul.f32 %v9188_v53, %v9188_v53 }
 0x1d0   : > { %12100 = vst [vmem:[#allocation41_spill] sm:$0xff] %v9188_v53  ;;  %v1615_v57 = vpack.c.bf16 %v1490_v50, %v1489_v49 }
 0x1d1   : > { %12101 = vst [vmem:[#allocation42_spill] sm:$0xff] %v9200_v56 }
 0x1d2   : > { %6715 = vmatprep.mubr.bf16.mxu1 %v1615_v57 }
 0x1d3   : > { %v9208_v61 = vpop.f32.mrb[12].mxu0  ;;  %v9210_v62 = vpop.f32.mrb[12].mxu1 }
 0x1d4   : > { %12102 = vst [vmem:[#allocation43_spill] sm:$0xff] %v9210_v62  ;;  %v9212_v63 = vpop.f32.mrb[13].mxu0  ;;  %v9216_v1 = vmul.f32 %v9210_v62, %v9210_v62  ;;  %v9218_v9 = vpop.f32.mrb[13].mxu1  ;;  %v1491_v30 = vmul.f32 %v9208_v61, %v9208_v61 }
 0x1d5   : > { %12103 = vst [vmem:[#allocation44_spill] sm:$0xff] %v9212_v63  ;;  %12104 = vst [vmem:[#allocation45_spill] sm:$0xff] %v9218_v9  ;;  %v9220_v10 = vpop.f32.mrb[14].mxu0  ;;  %v9224_v17 = vmul.f32 %v9218_v9, %v9218_v9  ;;  %v9226_v29 = vpop.f32.mrb[14].mxu1  ;;  %v9242_v60 = vmul.f32 %v9212_v63, %v9212_v63 }
 0x1d6   : > { %12106 = vst [vmem:[#allocation47_spill] sm:$0xff] %v9226_v29  ;;  %v1492_v37 = vmul.f32 %v9220_v10, %v9220_v10  ;;  %v9232_v49 = vpop.f32.mrb[15].mxu0  ;;  %v9236_v50 = vmul.f32 %v9226_v29, %v9226_v29  ;;  %v9238_v57 = vpop.f32.mrb[15].mxu1 }
 0x1d7   : > { %12105 = vst [vmem:[#allocation46_spill] sm:$0xff] %v9224_v17  ;;  %12107 = vst [vmem:[#allocation48_spill] sm:$0xff] %v9232_v49  ;;  %v9246_v40 = vmul.f32 %v9232_v49, %v9232_v49  ;;  %v9250_v20 = vmul.f32 %v9238_v57, %v9238_v57 }
 0x1d8   : > { %12108 = vst [vmem:[#allocation49_spill] sm:$0xff] %v9238_v57  ;;  %v1616_v59 = vpack.c.bf16 %v1492_v37, %v1491_v30 }
 0x1d9   : > { %12109 = vst [vmem:[#allocation50_spill] sm:$0xff] %v9250_v20 }
 0x1da   : > { %6716 = vmatmul.mubr.bf16.gmra.mrb[104].mxu1 %v1616_v59 }
 0x1db   : > { %v9258_v38 = vpop.f32.mrb[16].mxu0  ;;  %v9260_v18 = vpop.f32.mrb[16].mxu1 }
 0x1dc   : > { %12110 = vst [vmem:[#allocation51_spill] sm:$0xff] %v9258_v38  ;;  %12111 = vst [vmem:[#allocation52_spill] sm:$0xff] %v9260_v18  ;;  %v9262_v9 = vpop.f32.mrb[17].mxu0  ;;  %v9266_v57 = vmul.f32 %v9260_v18, %v9260_v18  ;;  %v9268_v30 = vpop.f32.mrb[17].mxu1  ;;  %v1493_v59 = vmul.f32 %v9258_v38, %v9258_v38 }
 0x1dd   : > { %12112 = vst [vmem:[#allocation53_spill] sm:$0xff] %v9262_v9  ;;  %12113 = vst [vmem:[#allocation54_spill] sm:$0xff] %v9268_v30  ;;  %v9270_v37 = vpop.f32.mrb[18].mxu0  ;;  %v9274_v19 = vmul.f32 %v9268_v30, %v9268_v30  ;;  %v9276_v58 = vpop.f32.mrb[18].mxu1  ;;  %v9292_v30 = vmul.f32 %v9262_v9, %v9262_v9 }
 0x1de   : > { %12114 = vst [vmem:[#allocation55_spill] sm:$0xff] %v9270_v37  ;;  %12116 = vst [vmem:[#allocation57_spill] sm:$0xff] %v9276_v58  ;;  %v1494_v39 = vmul.f32 %v9270_v37, %v9270_v37  ;;  %v9282_v33 = vpop.f32.mrb[19].mxu0  ;;  %v9286_v53 = vmul.f32 %v9276_v58, %v9276_v58  ;;  %v9288_v25 = vpop.f32.mrb[19].mxu1 }
 0x1df   : > { %12115 = vst [vmem:[#allocation56_spill] sm:$0xff] %v9274_v19  ;;  %12117 = vst [vmem:[#allocation58_spill] sm:$0xff] %v9282_v33  ;;  %v9296_v45 = vmul.f32 %v9282_v33, %v9282_v33  ;;  %v9300_v13 = vmul.f32 %v9288_v25, %v9288_v25 }
 0x1e0   : > { %12118 = vst [vmem:[#allocation59_spill] sm:$0xff] %v9288_v25  ;;  %v1617_v5 = vpack.c.bf16 %v1494_v39, %v1493_v59 }
 0x1e1   : > { %12119 = vst [vmem:[#allocation60_spill] sm:$0xff] %v9300_v13 }
 0x1e2   : > { %6719 = vmatprep.mubr.bf16.mxu1 %v1617_v5 }
 0x1e3   : > { %v9308_v9 = vpop.f32.mrb[20].mxu0  ;;  %v9310_v63 = vpop.f32.mrb[20].mxu1 }
 0x1e4   : > { %12120 = vst [vmem:[#allocation61_spill] sm:$0xff] %v9308_v9  ;;  %12121 = vst [vmem:[#allocation62_spill] sm:$0xff] %v9310_v63  ;;  %v9312_v33 = vpop.f32.mrb[21].mxu0  ;;  %v9316_v25 = vmul.f32 %v9310_v63, %v9310_v63  ;;  %v9318_v39 = vpop.f32.mrb[21].mxu1  ;;  %v1495_v5 = vmul.f32 %v9308_v9, %v9308_v9 }
 0x1e5   : > { %12122 = vst [vmem:[#allocation63_spill] sm:$0xff] %v9312_v33  ;;  %12123 = vst [vmem:[#allocation64_spill] sm:$0xff] %v9318_v39  ;;  %v9320_v59 = vpop.f32.mrb[22].mxu0  ;;  %v9324_v49 = vmul.f32 %v9318_v39, %v9318_v39  ;;  %v9326_v43 = vpop.f32.mrb[22].mxu1  ;;  %v9342_v39 = vmul.f32 %v9312_v33, %v9312_v33 }
 0x1e6   : > { %12124 = vst [vmem:[#allocation65_spill] sm:$0xff] %v9320_v59  ;;  %12126 = vst [vmem:[#allocation67_spill] sm:$0xff] %v9326_v43  ;;  %v1496_v51 = vmul.f32 %v9320_v59, %v9320_v59  ;;  %v9332_v11 = vpop.f32.mrb[23].mxu0  ;;  %v9336_v31 = vmul.f32 %v9326_v43, %v9326_v43  ;;  %v9338_v4 = vpop.f32.mrb[23].mxu1 }
 0x1e7   : > { %12125 = vst [vmem:[#allocation66_spill] sm:$0xff] %v9324_v49  ;;  %12127 = vst [vmem:[#allocation68_spill] sm:$0xff] %v9332_v11  ;;  %v9346_v23 = vmul.f32 %v9332_v11, %v9332_v11  ;;  %v9350_v63 = vmul.f32 %v9338_v4, %v9338_v4 }
 0x1e8   : > { %12128 = vst [vmem:[#allocation69_spill] sm:$0xff] %v9338_v4  ;;  %v1618_v29 = vpack.c.bf16 %v1496_v51, %v1495_v5 }
 0x1e9   : > { %12129 = vst [vmem:[#allocation70_spill] sm:$0xff] %v9350_v63 }
 0x1ea   : > { %6720 = vmatmul.mubr.bf16.gmra.mrb[108].mxu1 %v1618_v29 }
 0x1eb   : > { %v9358_v33 = vpop.f32.mrb[24].mxu0  ;;  %v9360_v18 = vpop.f32.mrb[24].mxu1 }
 0x1ec   : > { %12130 = vst [vmem:[#allocation71_spill] sm:$0xff] %v9358_v33  ;;  %12131 = vst [vmem:[#allocation72_spill] sm:$0xff] %v9360_v18  ;;  %v9362_v11 = vpop.f32.mrb[25].mxu0  ;;  %v9366_v4 = vmul.f32 %v9360_v18, %v9360_v18  ;;  %v9368_v51 = vpop.f32.mrb[25].mxu1  ;;  %v1497_v29 = vmul.f32 %v9358_v33, %v9358_v33 }
 0x1ed   : > { %12132 = vst [vmem:[#allocation73_spill] sm:$0xff] %v9362_v11  ;;  %12133 = vst [vmem:[#allocation74_spill] sm:$0xff] %v9368_v51  ;;  %v9370_v5 = vpop.f32.mrb[26].mxu0  ;;  %v9374_v43 = vmul.f32 %v9368_v51, %v9368_v51  ;;  %v9376_v62 = vpop.f32.mrb[26].mxu1  ;;  %v9392_v51 = vmul.f32 %v9362_v11, %v9362_v11 }
 0x1ee   : > { %12134 = vst [vmem:[#allocation75_spill] sm:$0xff] %v9370_v5  ;;  %12136 = vst [vmem:[#allocation77_spill] sm:$0xff] %v9376_v62  ;;  %v1498_v58 = vmul.f32 %v9370_v5, %v9370_v5  ;;  %v9382_v28 = vpop.f32.mrb[27].mxu0  ;;  %v9386_v18 = vmul.f32 %v9376_v62, %v9376_v62  ;;  %v9388_v48 = vpop.f32.mrb[27].mxu1 }
 0x1ef   : > { %12135 = vst [vmem:[#allocation76_spill] sm:$0xff] %v9374_v43  ;;  %12137 = vst [vmem:[#allocation78_spill] sm:$0xff] %v9382_v28  ;;  %v9396_v22 = vmul.f32 %v9382_v28, %v9382_v28  ;;  %v9400_v42 = vmul.f32 %v9388_v48, %v9388_v48 }
 0x1f0   : > { %12138 = vst [vmem:[#allocation79_spill] sm:$0xff] %v9388_v48  ;;  %v1619_v8 = vpack.c.bf16 %v1498_v58, %v1497_v29 }
 0x1f1   : > { %12139 = vst [vmem:[#allocation80_spill] sm:$0xff] %v9400_v42 }
 0x1f2   : > { %6723 = vmatprep.mubr.bf16.mxu1 %v1619_v8 }
 0x1f3   : > { %v9408_v11 = vpop.f32.mrb[28].mxu0  ;;  %v9410_v63 = vpop.f32.mrb[28].mxu1 }
 0x1f4   : > { %12140 = vst [vmem:[#allocation81_spill] sm:$0xff] %v9408_v11  ;;  %12141 = vst [vmem:[#allocation82_spill] sm:$0xff] %v9410_v63  ;;  %v9412_v28 = vpop.f32.mrb[29].mxu0  ;;  %v9416_v48 = vmul.f32 %v9410_v63, %v9410_v63  ;;  %v9418_v58 = vpop.f32.mrb[29].mxu1  ;;  %v1499_v8 = vmul.f32 %v9408_v11, %v9408_v11 }
 0x1f5   : > { %12142 = vst [vmem:[#allocation83_spill] sm:$0xff] %v9412_v28  ;;  %12143 = vst [vmem:[#allocation84_spill] sm:$0xff] %v9418_v58  ;;  %v9420_v29 = vpop.f32.mrb[30].mxu0  ;;  %v9424_v62 = vmul.f32 %v9418_v58, %v9418_v58  ;;  %v9426_v49 = vpop.f32.mrb[30].mxu1  ;;  %v9442_v58 = vmul.f32 %v9412_v28, %v9412_v28 }
 0x1f6   : > { %12144 = vst [vmem:[#allocation85_spill] sm:$0xff] %v9420_v29  ;;  %12146 = vst [vmem:[#allocation87_spill] sm:$0xff] %v9426_v49  ;;  %v1500_v3 = vmul.f32 %v9420_v29, %v9420_v29  ;;  %v9432_v43 = vpop.f32.mrb[31].mxu0  ;;  %v9436_v63 = vmul.f32 %v9426_v49, %v9426_v49  ;;  %v9438_v42 = vpop.f32.mrb[31].mxu1 }
 0x1f7   : > { %12145 = vst [vmem:[#allocation86_spill] sm:$0xff] %v9424_v62  ;;  %12147 = vst [vmem:[#allocation88_spill] sm:$0xff] %v9432_v43  ;;  %v9446_v19 = vmul.f32 %v9432_v43, %v9432_v43  ;;  %v9450_v13 = vmul.f32 %v9438_v42, %v9438_v42 }
 0x1f8   : > { %12148 = vst [vmem:[#allocation89_spill] sm:$0xff] %v9438_v42  ;;  %v1620_v17 = vpack.c.bf16 %v1500_v3, %v1499_v8 }
 0x1f9   : > { %12149 = vst [vmem:[#allocation90_spill] sm:$0xff] %v9450_v13 }
 0x1fa   : > { %6724 = vmatmul.mubr.bf16.gmra.mrb[112].mxu1 %v1620_v17 }
 0x1fb   : > { %v9458_v28 = vpop.f32.mrb[32].mxu0  ;;  %v9460_v56 = vpop.f32.mrb[32].mxu1 }
 0x1fc   : > { %12150 = vst [vmem:[#allocation91_spill] sm:$0xff] %v9458_v28  ;;  %12151 = vst [vmem:[#allocation92_spill] sm:$0xff] %v9460_v56  ;;  %v9462_v43 = vpop.f32.mrb[33].mxu0  ;;  %v9466_v42 = vmul.f32 %v9460_v56, %v9460_v56  ;;  %v9468_v3 = vpop.f32.mrb[33].mxu1  ;;  %v1501_v17 = vmul.f32 %v9458_v28, %v9458_v28 }
 0x1fd   : > { %12152 = vst [vmem:[#allocation93_spill] sm:$0xff] %v9462_v43  ;;  %12153 = vst [vmem:[#allocation94_spill] sm:$0xff] %v9468_v3  ;;  %v9470_v8 = vpop.f32.mrb[34].mxu0  ;;  %v9474_v49 = vmul.f32 %v9468_v3, %v9468_v3  ;;  %v9476_v47 = vpop.f32.mrb[34].mxu1  ;;  %v9492_v3 = vmul.f32 %v9462_v43, %v9462_v43 }
 0x1fe   : > { %12154 = vst [vmem:[#allocation95_spill] sm:$0xff] %v9470_v8  ;;  %12156 = vst [vmem:[#allocation97_spill] sm:$0xff] %v9476_v47  ;;  %v1502_v20 = vmul.f32 %v9470_v8, %v9470_v8  ;;  %v9482_v62 = vpop.f32.mrb[35].mxu0  ;;  %v9486_v56 = vmul.f32 %v9476_v47, %v9476_v47  ;;  %v9488_v13 = vpop.f32.mrb[35].mxu1 }
 0x1ff   : > { %12155 = vst [vmem:[#allocation96_spill] sm:$0xff] %v9474_v49  ;;  %12157 = vst [vmem:[#allocation98_spill] sm:$0xff] %v9482_v62  ;;  %v9496_v27 = vmul.f32 %v9482_v62, %v9482_v62  ;;  %v9500_v36 = vmul.f32 %v9488_v13, %v9488_v13 }
 0x200   : > { %12158 = vst [vmem:[#allocation99_spill] sm:$0xff] %v9488_v13  ;;  %v1621_v7 = vpack.c.bf16 %v1502_v20, %v1501_v17 }
 0x201   : > { %12159 = vst [vmem:[#allocation100_spill] sm:$0xff] %v9500_v36 }
 0x202   : > { %6727 = vmatprep.mubr.bf16.mxu1 %v1621_v7 }
 0x203   : > { %v9508_v43 = vpop.f32.mrb[36].mxu0  ;;  %v6633_v28 = vpop.f32.mrb[36].mxu1 }
 0x204   : > { %12160 = vst [vmem:[#allocation101_spill] sm:$0xff] %v9508_v43  ;;  %v9510_v62 = vpop.f32.mrb[37].mxu0  ;;  %v1230_v5 = vpop.f32.mrb[37].mxu1  ;;  %v1503_v20 = vmul.f32 %v9508_v43, %v9508_v43 }
 0x205   : > { %12161 = vst [vmem:[#allocation102_spill] sm:$0xff] %v9510_v62  ;;  %v9512_v29 = vpop.f32.mrb[38].mxu0  ;;  %v6634_v13 = vpop.f32.mrb[38].mxu1  ;;  %v9524_v8 = vmul.f32 %v9510_v62, %v9510_v62 }
 0x206   : > { %12162 = vst [vmem:[#allocation103_spill] sm:$0xff] %v9512_v29  ;;  %v1504_v17 = vmul.f32 %v9512_v29, %v9512_v29  ;;  %v9518_v47 = vpop.f32.mrb[39].mxu0  ;;  %v9520_v16 = vpack.c.bf16 %v6634_v13, %v6633_v28  ;;  %v1233_v7 = vpop.f32.mrb[39].mxu1 }
 0x207   : > { %12163 = vst [vmem:[#allocation104_spill] sm:$0xff] %v9518_v47  ;;  %v9528_v49 = vmul.f32 %v9518_v47, %v9518_v47  ;;  %v9530_v36 = vpack.c.bf16 %v1233_v7, %v1230_v5 }
 0x208   : > { %12164 = vst [vmem:[#allocation105_spill] sm:$0xff] %v9520_v16  ;;  %v1622_v33 = vpack.c.bf16 %v1504_v17, %v1503_v20 }
 0x209   : > { %12165 = vst [vmem:[#allocation106_spill] sm:$0xff] %v9530_v36 }
 0x20a   : > { %6728 = vmatmul.mubr.bf16.gmra.mrb[116].mxu1 %v1622_v33 }
 0x20b   : > { %v9534_v29 = vpop.f32.mrb[40].mxu0  ;;  %v6637_v13 = vpop.f32.mrb[40].mxu1 }
 0x20c   : > { %12166 = vst [vmem:[#allocation107_spill] sm:$0xff] %v9534_v29  ;;  %v9536_v28 = vpop.f32.mrb[41].mxu0  ;;  %v1246_v16 = vpop.f32.mrb[41].mxu1  ;;  %v1505_v47 = vmul.f32 %v9534_v29, %v9534_v29 }
 0x20d   : > { %12167 = vst [vmem:[#allocation108_spill] sm:$0xff] %v9536_v28  ;;  %v9538_v11 = vpop.f32.mrb[42].mxu0  ;;  %v6638_v62 = vpop.f32.mrb[42].mxu1  ;;  %v9550_v7 = vmul.f32 %v9536_v28, %v9536_v28 }
 0x20e   : > { %12168 = vst [vmem:[#allocation109_spill] sm:$0xff] %v9538_v11  ;;  %v1506_v5 = vmul.f32 %v9538_v11, %v9538_v11  ;;  %v9544_v20 = vpop.f32.mrb[43].mxu0  ;;  %v9546_v17 = vpack.c.bf16 %v6638_v62, %v6637_v13  ;;  %v1249_v33 = vpop.f32.mrb[43].mxu1 }
 0x20f   : > { %12169 = vst [vmem:[#allocation110_spill] sm:$0xff] %v9544_v20  ;;  %v9554_v43 = vmul.f32 %v9544_v20, %v9544_v20  ;;  %v9556_v36 = vpack.c.bf16 %v1249_v33, %v1246_v16 }
 0x210   : > { %12170 = vst [vmem:[#allocation111_spill] sm:$0xff] %v9546_v17  ;;  %v1623_v37 = vpack.c.bf16 %v1506_v5, %v1505_v47 }
 0x211   : > { %12171 = vst [vmem:[#allocation112_spill] sm:$0xff] %v9556_v36 }
 0x212   : > { %6731 = vmatprep.mubr.bf16.mxu1 %v1623_v37 }
 0x213   : > { %v9560_v11 = vpop.f32.mrb[44].mxu0  ;;  %v6641_v62 = vpop.f32.mrb[44].mxu1 }
 0x214   : > { %12172 = vst [vmem:[#allocation113_spill] sm:$0xff] %v9560_v11  ;;  %v9562_v13 = vpop.f32.mrb[45].mxu0  ;;  %v1262_v17 = vpop.f32.mrb[45].mxu1  ;;  %v1507_v20 = vmul.f32 %v9560_v11, %v9560_v11 }
 0x215   : > { %12173 = vst [vmem:[#allocation114_spill] sm:$0xff] %v9562_v13  ;;  %v9564_v59 = vpop.f32.mrb[46].mxu0  ;;  %v6642_v28 = vpop.f32.mrb[46].mxu1  ;;  %v9576_v33 = vmul.f32 %v9562_v13, %v9562_v13 }
 0x216   : > { %12174 = vst [vmem:[#allocation115_spill] sm:$0xff] %v9564_v59  ;;  %v1508_v16 = vmul.f32 %v9564_v59, %v9564_v59  ;;  %v9570_v47 = vpop.f32.mrb[47].mxu0  ;;  %v9572_v5 = vpack.c.bf16 %v6642_v28, %v6641_v62  ;;  %v1265_v37 = vpop.f32.mrb[47].mxu1 }
 0x217   : > { %12175 = vst [vmem:[#allocation116_spill] sm:$0xff] %v9570_v47  ;;  %12177 = vst [vmem:[#allocation118_spill] sm:$0xff] %v9576_v33  ;;  %v9580_v29 = vmul.f32 %v9570_v47, %v9570_v47  ;;  %v9582_v36 = vpack.c.bf16 %v1265_v37, %v1262_v17 }
 0x218   : > { %12176 = vst [vmem:[#allocation117_spill] sm:$0xff] %v9572_v5  ;;  %v1624_v38 = vpack.c.bf16 %v1508_v16, %v1507_v20 }
 0x219   : > { %12178 = vst [vmem:[#allocation119_spill] sm:$0xff] %v9580_v29  ;;  %12179 = vst [vmem:[#allocation120_spill] sm:$0xff] %v9582_v36 }
 0x21a   : > { %6732 = vmatmul.mubr.bf16.gmra.mrb[120].mxu1 %v1624_v38 }
 0x21b   : > { %v9586_v59 = vpop.f32.mrb[48].mxu0  ;;  %v6645_v28 = vpop.f32.mrb[48].mxu1 }
 0x21c   : > { %12180 = vst [vmem:[#allocation121_spill] sm:$0xff] %v9586_v59  ;;  %v9588_v62 = vpop.f32.mrb[49].mxu0  ;;  %v1278_v5 = vpop.f32.mrb[49].mxu1  ;;  %v1509_v47 = vmul.f32 %v9586_v59, %v9586_v59 }
 0x21d   : > { %12181 = vst [vmem:[#allocation122_spill] sm:$0xff] %v9588_v62  ;;  %v9590_v9 = vpop.f32.mrb[50].mxu0  ;;  %v6646_v13 = vpop.f32.mrb[50].mxu1  ;;  %v9602_v37 = vmul.f32 %v9588_v62, %v9588_v62 }
 0x21e   : > { %12182 = vst [vmem:[#allocation123_spill] sm:$0xff] %v9590_v9  ;;  %v1510_v17 = vmul.f32 %v9590_v9, %v9590_v9  ;;  %v9596_v20 = vpop.f32.mrb[51].mxu0  ;;  %v9598_v16 = vpack.c.bf16 %v6646_v13, %v6645_v28  ;;  %v1281_v38 = vpop.f32.mrb[51].mxu1 }
 0x21f   : > { %12183 = vst [vmem:[#allocation124_spill] sm:$0xff] %v9596_v20  ;;  %12185 = vst [vmem:[#allocation126_spill] sm:$0xff] %v9602_v37  ;;  %v9606_v11 = vmul.f32 %v9596_v20, %v9596_v20  ;;  %v9608_v36 = vpack.c.bf16 %v1281_v38, %v1278_v5 }
 0x220   : > { %12184 = vst [vmem:[#allocation125_spill] sm:$0xff] %v9598_v16  ;;  %v1625_v33 = vpack.c.bf16 %v1510_v17, %v1509_v47 }
 0x221   : > { %12186 = vst [vmem:[#allocation127_spill] sm:$0xff] %v9606_v11  ;;  %12187 = vst [vmem:[#allocation128_spill] sm:$0xff] %v9608_v36 }
 0x222   : > { %6735 = vmatprep.mubr.bf16.mxu1 %v1625_v33 }
 0x223   : > { %v9612_v9 = vpop.f32.mrb[52].mxu0  ;;  %v6649_v13 = vpop.f32.mrb[52].mxu1 }
 0x224   : > { %12188 = vst [vmem:[#allocation129_spill] sm:$0xff] %v9612_v9  ;;  %v9614_v28 = vpop.f32.mrb[53].mxu0  ;;  %v1294_v16 = vpop.f32.mrb[53].mxu1  ;;  %v1511_v20 = vmul.f32 %v9612_v9, %v9612_v9 }
 0x225   : > { %12189 = vst [vmem:[#allocation130_spill] sm:$0xff] %v9614_v28  ;;  %v9616_v29 = vpop.f32.mrb[54].mxu0  ;;  %v6650_v62 = vpop.f32.mrb[54].mxu1  ;;  %v9628_v38 = vmul.f32 %v9614_v28, %v9614_v28 }
 0x226   : > { %12190 = vst [vmem:[#allocation131_spill] sm:$0xff] %v9616_v29  ;;  %v1512_v5 = vmul.f32 %v9616_v29, %v9616_v29  ;;  %v9622_v47 = vpop.f32.mrb[55].mxu0  ;;  %v9624_v17 = vpack.c.bf16 %v6650_v62, %v6649_v13  ;;  %v1297_v33 = vpop.f32.mrb[55].mxu1 }
 0x227   : > { %12191 = vst [vmem:[#allocation132_spill] sm:$0xff] %v9622_v47  ;;  %12193 = vst [vmem:[#allocation134_spill] sm:$0xff] %v9628_v38  ;;  %v9632_v59 = vmul.f32 %v9622_v47, %v9622_v47  ;;  %v9634_v36 = vpack.c.bf16 %v1297_v33, %v1294_v16 }
 0x228   : > { %12192 = vst [vmem:[#allocation133_spill] sm:$0xff] %v9624_v17  ;;  %v1626_v37 = vpack.c.bf16 %v1512_v5, %v1511_v20 }
 0x229   : > { %12194 = vst [vmem:[#allocation135_spill] sm:$0xff] %v9632_v59  ;;  %12195 = vst [vmem:[#allocation136_spill] sm:$0xff] %v9634_v36 }
 0x22a   : > { %6736 = vmatmul.mubr.bf16.gmra.mrb[124].mxu1 %v1626_v37 }
 0x22b   : > { %v9638_v29 = vpop.f32.mrb[56].mxu0  ;;  %v6653_v62 = vpop.f32.mrb[56].mxu1 }
 0x22c   : > { %12196 = vst [vmem:[#allocation137_spill] sm:$0xff] %v9638_v29  ;;  %v9640_v13 = vpop.f32.mrb[57].mxu0  ;;  %v1310_v17 = vpop.f32.mrb[57].mxu1  ;;  %v1513_v47 = vmul.f32 %v9638_v29, %v9638_v29 }
 0x22d   : > { %12197 = vst [vmem:[#allocation138_spill] sm:$0xff] %v9640_v13  ;;  %v9642_v11 = vpop.f32.mrb[58].mxu0  ;;  %v6654_v28 = vpop.f32.mrb[58].mxu1  ;;  %v9654_v33 = vmul.f32 %v9640_v13, %v9640_v13 }
 0x22e   : > { %12198 = vst [vmem:[#allocation139_spill] sm:$0xff] %v9642_v11  ;;  %v1514_v16 = vmul.f32 %v9642_v11, %v9642_v11  ;;  %v9648_v20 = vpop.f32.mrb[59].mxu0  ;;  %v9650_v5 = vpack.c.bf16 %v6654_v28, %v6653_v62  ;;  %v1313_v37 = vpop.f32.mrb[59].mxu1 }
 0x22f   : > { %12199 = vst [vmem:[#allocation140_spill] sm:$0xff] %v9648_v20  ;;  %12201 = vst [vmem:[#allocation142_spill] sm:$0xff] %v9654_v33  ;;  %v9658_v9 = vmul.f32 %v9648_v20, %v9648_v20  ;;  %v9660_v36 = vpack.c.bf16 %v1313_v37, %v1310_v17 }
 0x230   : > { %12200 = vst [vmem:[#allocation141_spill] sm:$0xff] %v9650_v5  ;;  %v1627_v38 = vpack.c.bf16 %v1514_v16, %v1513_v47 }
 0x231   : > { %12202 = vst [vmem:[#allocation143_spill] sm:$0xff] %v9658_v9  ;;  %12203 = vst [vmem:[#allocation144_spill] sm:$0xff] %v9660_v36 }
 0x232   : > { %6739 = vmatprep.mubr.bf16.mxu1 %v1627_v38 }
 0x233   : > { %v9664_v11 = vpop.f32.mrb[60].mxu0  ;;  %v6657_v28 = vpop.f32.mrb[60].mxu1 }
 0x234   : > { %12204 = vst [vmem:[#allocation145_spill] sm:$0xff] %v9664_v11  ;;  %v9666_v62 = vpop.f32.mrb[61].mxu0  ;;  %v1326_v5 = vpop.f32.mrb[61].mxu1  ;;  %v1515_v20 = vmul.f32 %v9664_v11, %v9664_v11 }
 0x235   : > { %12205 = vst [vmem:[#allocation146_spill] sm:$0xff] %v9666_v62  ;;  %v9668_v59 = vpop.f32.mrb[62].mxu0  ;;  %v6658_v13 = vpop.f32.mrb[62].mxu1  ;;  %v9680_v37 = vmul.f32 %v9666_v62, %v9666_v62 }
 0x236   : > { %12206 = vst [vmem:[#allocation147_spill] sm:$0xff] %v9668_v59  ;;  %v1516_v17 = vmul.f32 %v9668_v59, %v9668_v59  ;;  %v9674_v47 = vpop.f32.mrb[63].mxu0  ;;  %v9676_v16 = vpack.c.bf16 %v6658_v13, %v6657_v28  ;;  %v1329_v38 = vpop.f32.mrb[63].mxu1 }
 0x237   : > { %12207 = vst [vmem:[#allocation148_spill] sm:$0xff] %v9674_v47  ;;  %12209 = vst [vmem:[#allocation150_spill] sm:$0xff] %v9680_v37  ;;  %v9684_v29 = vmul.f32 %v9674_v47, %v9674_v47  ;;  %v9686_v36 = vpack.c.bf16 %v1329_v38, %v1326_v5 }
 0x238   : > { %12208 = vst [vmem:[#allocation149_spill] sm:$0xff] %v9676_v16  ;;  %v1628_v33 = vpack.c.bf16 %v1516_v17, %v1515_v20 }
 0x239   : > { %12210 = vst [vmem:[#allocation151_spill] sm:$0xff] %v9684_v29  ;;  %12211 = vst [vmem:[#allocation152_spill] sm:$0xff] %v9686_v36 }
 0x23a   : > { %6740 = vmatmul.mubr.bf16.gmra.mrb[128].mxu1 %v1628_v33 }
 0x23b   : > { %v9690_v59 = vpop.f32.mrb[64].mxu0  ;;  %v6661_v13 = vpop.f32.mrb[64].mxu1 }
 0x23c   : > { %12212 = vst [vmem:[#allocation153_spill] sm:$0xff] %v9690_v59  ;;  %v9692_v28 = vpop.f32.mrb[65].mxu0  ;;  %v1342_v16 = vpop.f32.mrb[65].mxu1  ;;  %v1517_v47 = vmul.f32 %v9690_v59, %v9690_v59 }
 0x23d   : > { %12213 = vst [vmem:[#allocation154_spill] sm:$0xff] %v9692_v28  ;;  %v9694_v9 = vpop.f32.mrb[66].mxu0  ;;  %v6662_v62 = vpop.f32.mrb[66].mxu1  ;;  %v9706_v38 = vmul.f32 %v9692_v28, %v9692_v28 }
 0x23e   : > { %12214 = vst [vmem:[#allocation155_spill] sm:$0xff] %v9694_v9  ;;  %v1518_v5 = vmul.f32 %v9694_v9, %v9694_v9  ;;  %v9700_v20 = vpop.f32.mrb[67].mxu0  ;;  %v9702_v17 = vpack.c.bf16 %v6662_v62, %v6661_v13  ;;  %v1345_v33 = vpop.f32.mrb[67].mxu1 }
 0x23f   : > { %12215 = vst [vmem:[#allocation156_spill] sm:$0xff] %v9700_v20  ;;  %12217 = vst [vmem:[#allocation158_spill] sm:$0xff] %v9706_v38  ;;  %v9710_v11 = vmul.f32 %v9700_v20, %v9700_v20  ;;  %v9712_v36 = vpack.c.bf16 %v1345_v33, %v1342_v16 }
 0x240   : > { %12216 = vst [vmem:[#allocation157_spill] sm:$0xff] %v9702_v17  ;;  %v1629_v37 = vpack.c.bf16 %v1518_v5, %v1517_v47 }
 0x241   : > { %12218 = vst [vmem:[#allocation159_spill] sm:$0xff] %v9710_v11  ;;  %12219 = vst [vmem:[#allocation160_spill] sm:$0xff] %v9712_v36 }
 0x242   : > { %6743 = vmatprep.mubr.bf16.mxu1 %v1629_v37 }
 0x243   : > { %v9716_v9 = vpop.f32.mrb[68].mxu0  ;;  %v6665_v62 = vpop.f32.mrb[68].mxu1 }
 0x244   : > { %12220 = vst [vmem:[#allocation161_spill] sm:$0xff] %v9716_v9  ;;  %v9718_v13 = vpop.f32.mrb[69].mxu0  ;;  %v1358_v17 = vpop.f32.mrb[69].mxu1  ;;  %v1519_v20 = vmul.f32 %v9716_v9, %v9716_v9 }
 0x245   : > { %12221 = vst [vmem:[#allocation162_spill] sm:$0xff] %v9718_v13  ;;  %v9720_v29 = vpop.f32.mrb[70].mxu0  ;;  %v6666_v28 = vpop.f32.mrb[70].mxu1  ;;  %v9732_v33 = vmul.f32 %v9718_v13, %v9718_v13 }
 0x246   : > { %12222 = vst [vmem:[#allocation163_spill] sm:$0xff] %v9720_v29  ;;  %v1520_v16 = vmul.f32 %v9720_v29, %v9720_v29  ;;  %v9726_v47 = vpop.f32.mrb[71].mxu0  ;;  %v9728_v5 = vpack.c.bf16 %v6666_v28, %v6665_v62  ;;  %v1361_v37 = vpop.f32.mrb[71].mxu1 }
 0x247   : > { %12223 = vst [vmem:[#allocation164_spill] sm:$0xff] %v9726_v47  ;;  %12225 = vst [vmem:[#allocation166_spill] sm:$0xff] %v9732_v33  ;;  %v9736_v59 = vmul.f32 %v9726_v47, %v9726_v47  ;;  %v9738_v36 = vpack.c.bf16 %v1361_v37, %v1358_v17 }
 0x248   : > { %12224 = vst [vmem:[#allocation165_spill] sm:$0xff] %v9728_v5  ;;  %v1630_v38 = vpack.c.bf16 %v1520_v16, %v1519_v20 }
 0x249   : > { %12226 = vst [vmem:[#allocation167_spill] sm:$0xff] %v9736_v59  ;;  %12227 = vst [vmem:[#allocation168_spill] sm:$0xff] %v9738_v36 }
 0x24a   : > { %6744 = vmatmul.mubr.bf16.gmra.mrb[132].mxu1 %v1630_v38 }
 0x24b   : > { %v9742_v29 = vpop.f32.mrb[72].mxu0  ;;  %v6669_v28 = vpop.f32.mrb[72].mxu1 }
 0x24c   : > { %12228 = vst [vmem:[#allocation169_spill] sm:$0xff] %v9742_v29  ;;  %v9744_v62 = vpop.f32.mrb[73].mxu0  ;;  %v1374_v5 = vpop.f32.mrb[73].mxu1  ;;  %v1521_v47 = vmul.f32 %v9742_v29, %v9742_v29 }
 0x24d   : > { %12229 = vst [vmem:[#allocation170_spill] sm:$0xff] %v9744_v62  ;;  %v9746_v11 = vpop.f32.mrb[74].mxu0  ;;  %v6670_v13 = vpop.f32.mrb[74].mxu1  ;;  %v9758_v37 = vmul.f32 %v9744_v62, %v9744_v62 }
 0x24e   : > { %12230 = vst [vmem:[#allocation171_spill] sm:$0xff] %v9746_v11  ;;  %v1522_v17 = vmul.f32 %v9746_v11, %v9746_v11  ;;  %v9752_v20 = vpop.f32.mrb[75].mxu0  ;;  %v9754_v16 = vpack.c.bf16 %v6670_v13, %v6669_v28  ;;  %v1377_v38 = vpop.f32.mrb[75].mxu1 }
 0x24f   : > { %12231 = vst [vmem:[#allocation172_spill] sm:$0xff] %v9752_v20  ;;  %12233 = vst [vmem:[#allocation174_spill] sm:$0xff] %v9758_v37  ;;  %v9762_v9 = vmul.f32 %v9752_v20, %v9752_v20  ;;  %v9764_v36 = vpack.c.bf16 %v1377_v38, %v1374_v5 }
 0x250   : > { %12232 = vst [vmem:[#allocation173_spill] sm:$0xff] %v9754_v16  ;;  %v1631_v33 = vpack.c.bf16 %v1522_v17, %v1521_v47 }
 0x251   : > { %12234 = vst [vmem:[#allocation175_spill] sm:$0xff] %v9762_v9  ;;  %12235 = vst [vmem:[#allocation176_spill] sm:$0xff] %v9764_v36 }
 0x252   : > { %6747 = vmatprep.mubr.bf16.mxu1 %v1631_v33 }
 0x253   : > { %v9768_v11 = vpop.f32.mrb[76].mxu0  ;;  %v6673_v13 = vpop.f32.mrb[76].mxu1 }
 0x254   : > { %12236 = vst [vmem:[#allocation177_spill] sm:$0xff] %v9768_v11  ;;  %v9770_v28 = vpop.f32.mrb[77].mxu0  ;;  %v1390_v16 = vpop.f32.mrb[77].mxu1  ;;  %v1523_v20 = vmul.f32 %v9768_v11, %v9768_v11 }
 0x255   : > { %12237 = vst [vmem:[#allocation178_spill] sm:$0xff] %v9770_v28  ;;  %v9772_v59 = vpop.f32.mrb[78].mxu0  ;;  %v6674_v62 = vpop.f32.mrb[78].mxu1  ;;  %v9784_v38 = vmul.f32 %v9770_v28, %v9770_v28 }
 0x256   : > { %12238 = vst [vmem:[#allocation179_spill] sm:$0xff] %v9772_v59  ;;  %v1524_v5 = vmul.f32 %v9772_v59, %v9772_v59  ;;  %v9778_v47 = vpop.f32.mrb[79].mxu0  ;;  %v9780_v17 = vpack.c.bf16 %v6674_v62, %v6673_v13  ;;  %v1393_v33 = vpop.f32.mrb[79].mxu1 }
 0x257   : > { %12239 = vst [vmem:[#allocation180_spill] sm:$0xff] %v9778_v47  ;;  %12241 = vst [vmem:[#allocation182_spill] sm:$0xff] %v9784_v38  ;;  %v9788_v29 = vmul.f32 %v9778_v47, %v9778_v47  ;;  %v9790_v36 = vpack.c.bf16 %v1393_v33, %v1390_v16 }
 0x258   : > { %12240 = vst [vmem:[#allocation181_spill] sm:$0xff] %v9780_v17  ;;  %v1632_v37 = vpack.c.bf16 %v1524_v5, %v1523_v20 }
 0x259   : > { %12242 = vst [vmem:[#allocation183_spill] sm:$0xff] %v9788_v29  ;;  %12243 = vst [vmem:[#allocation184_spill] sm:$0xff] %v9790_v36 }
 0x25a   : > { %6748 = vmatmul.mubr.bf16.gmra.mrb[136].mxu1 %v1632_v37 }
 0x25b   : > { %v9794_v59 = vpop.f32.mrb[80].mxu0  ;;  %v6677_v62 = vpop.f32.mrb[80].mxu1 }
 0x25c   : > { %12244 = vst [vmem:[#allocation185_spill] sm:$0xff] %v9794_v59  ;;  %v9796_v13 = vpop.f32.mrb[81].mxu0  ;;  %v1406_v17 = vpop.f32.mrb[81].mxu1  ;;  %v1525_v47 = vmul.f32 %v9794_v59, %v9794_v59 }
 0x25d   : > { %12245 = vst [vmem:[#allocation186_spill] sm:$0xff] %v9796_v13  ;;  %v9798_v9 = vpop.f32.mrb[82].mxu0  ;;  %v6678_v28 = vpop.f32.mrb[82].mxu1  ;;  %v9810_v33 = vmul.f32 %v9796_v13, %v9796_v13 }
 0x25e   : > { %12246 = vst [vmem:[#allocation187_spill] sm:$0xff] %v9798_v9  ;;  %v1526_v16 = vmul.f32 %v9798_v9, %v9798_v9  ;;  %v9804_v20 = vpop.f32.mrb[83].mxu0  ;;  %v9806_v5 = vpack.c.bf16 %v6678_v28, %v6677_v62  ;;  %v1409_v37 = vpop.f32.mrb[83].mxu1 }
 0x25f   : > { %12247 = vst [vmem:[#allocation188_spill] sm:$0xff] %v9804_v20  ;;  %12249 = vst [vmem:[#allocation190_spill] sm:$0xff] %v9810_v33  ;;  %v9814_v11 = vmul.f32 %v9804_v20, %v9804_v20  ;;  %v9816_v36 = vpack.c.bf16 %v1409_v37, %v1406_v17 }
 0x260   : > { %12248 = vst [vmem:[#allocation189_spill] sm:$0xff] %v9806_v5  ;;  %v1633_v38 = vpack.c.bf16 %v1526_v16, %v1525_v47 }
 0x261   : > { %12250 = vst [vmem:[#allocation191_spill] sm:$0xff] %v9814_v11  ;;  %12251 = vst [vmem:[#allocation192_spill] sm:$0xff] %v9816_v36 }
 0x262   : > { %6751 = vmatprep.mubr.bf16.mxu1 %v1633_v38 }
 0x263   : > { %v9820_v9 = vpop.f32.mrb[84].mxu0  ;;  %v6681_v28 = vpop.f32.mrb[84].mxu1 }
 0x264   : > { %12252 = vst [vmem:[#allocation193_spill] sm:$0xff] %v9820_v9  ;;  %v9822_v62 = vpop.f32.mrb[85].mxu0  ;;  %v1422_v5 = vpop.f32.mrb[85].mxu1  ;;  %v1527_v20 = vmul.f32 %v9820_v9, %v9820_v9 }
 0x265   : > { %12253 = vst [vmem:[#allocation194_spill] sm:$0xff] %v9822_v62  ;;  %v9824_v29 = vpop.f32.mrb[86].mxu0  ;;  %v6682_v13 = vpop.f32.mrb[86].mxu1  ;;  %v9836_v37 = vmul.f32 %v9822_v62, %v9822_v62 }
 0x266   : > { %12254 = vst [vmem:[#allocation195_spill] sm:$0xff] %v9824_v29  ;;  %v1528_v17 = vmul.f32 %v9824_v29, %v9824_v29  ;;  %v9830_v47 = vpop.f32.mrb[87].mxu0  ;;  %v9832_v16 = vpack.c.bf16 %v6682_v13, %v6681_v28  ;;  %v1425_v38 = vpop.f32.mrb[87].mxu1 }
 0x267   : > { %12255 = vst [vmem:[#allocation196_spill] sm:$0xff] %v9830_v47  ;;  %12257 = vst [vmem:[#allocation198_spill] sm:$0xff] %v9836_v37  ;;  %v9840_v59 = vmul.f32 %v9830_v47, %v9830_v47  ;;  %v9842_v36 = vpack.c.bf16 %v1425_v38, %v1422_v5 }
 0x268   : > { %12256 = vst [vmem:[#allocation197_spill] sm:$0xff] %v9832_v16  ;;  %v1634_v33 = vpack.c.bf16 %v1528_v17, %v1527_v20 }
 0x269   : > { %12258 = vst [vmem:[#allocation199_spill] sm:$0xff] %v9842_v36 }
 0x26a   : > { %6752 = vmatmul.mubr.bf16.gmra.mrb[140].mxu1 %v1634_v33 }
 0x26b   : > { %v9846_v29 = vpop.f32.mrb[88].mxu0  ;;  %v6685_v13 = vpop.f32.mrb[88].mxu1 }
 0x26c   : > { %12259 = vst [vmem:[#allocation200_spill] sm:$0xff] %v9846_v29  ;;  %v9848_v28 = vpop.f32.mrb[89].mxu0  ;;  %v1438_v16 = vpop.f32.mrb[89].mxu1  ;;  %v1529_v47 = vmul.f32 %v9846_v29, %v9846_v29 }
 0x26d   : > { %12260 = vst [vmem:[#allocation201_spill] sm:$0xff] %v9848_v28  ;;  %v9850_v11 = vpop.f32.mrb[90].mxu0  ;;  %v6686_v62 = vpop.f32.mrb[90].mxu1  ;;  %v9862_v38 = vmul.f32 %v9848_v28, %v9848_v28 }
 0x26e   : > { %12261 = vst [vmem:[#allocation202_spill] sm:$0xff] %v9850_v11  ;;  %v1530_v5 = vmul.f32 %v9850_v11, %v9850_v11  ;;  %v9856_v20 = vpop.f32.mrb[91].mxu0  ;;  %v9858_v17 = vpack.c.bf16 %v6686_v62, %v6685_v13  ;;  %v1441_v33 = vpop.f32.mrb[91].mxu1  ;;  %v12265_v62 = vpack.c.bf16 %v9086_v12, %v9066_v0  ;;  %v12270_v0 = vpack.c.bf16 %v9236_v50, %v9216_v1 }
 0x26f   : > { %12262 = vst [vmem:[#allocation203_spill] sm:$0xff] %v9856_v20  ;;  %v9866_v9 = vmul.f32 %v9856_v20, %v9856_v20  ;;  %v9868_v36 = vpack.c.bf16 %v1441_v33, %v1438_v16  ;;  %v12276_v1 = vpack.c.bf16 %v9436_v63, %v9416_v48  ;;  %v12277_v50 = vpack.c.bf16 %v9486_v56, %v9466_v42 }
 0x270   : > { %12263 = vst [vmem:[#allocation204_spill] sm:$0xff] %v9858_v17  ;;  %v1635_v37 = vpack.c.bf16 %v1530_v5, %v1529_v47  ;;  %v12266_v17 = vpack.c.bf16 %v9136_v32, %v9116_v24  ;;  %v12269_v47 = vpack.c.bf16 %v9186_v52, %v9166_v44  ;;  %v12274_v44 = vpack.c.bf16 %v9336_v31, %v9316_v25 }
 0x271   : > { %12264 = vst [vmem:[#allocation205_spill] sm:$0xff] %v9868_v36  ;;  %v1667_v29 = vpack.c.bf16 %v9866_v9, %v9862_v38  ;;  %v12275_v52 = vpack.c.bf16 %v9386_v18, %v9366_v4  ;;  %v12279_v25 = vpack.c.bf16 %v9146_v35, %v9142_v34  ;;  %v12280_v4 = vpack.c.bf16 %v9196_v55, %v9192_v54 }
 0x272   : > { %6755 = vmatprep.mubr.bf16.mxu1 %v1635_v37  ;;  %v12283_v55 = vpack.c.bf16 %v9346_v23, %v9342_v39 }
 0x273   : > { %6756 = vmatmul.mubr.bf16.gmra.mrb[144].mxu1 %v12265_v62  ;;  %v6689_v13 = vpop.f32.mrb[92].mxu1 }
 0x274   : > { %6759 = vmatprep.mubr.bf16.mxu1 %v12266_v17  ;;  %v1454_v28 = vpop.f32.mrb[93].mxu1 }
 0x275   : > { %v6690_v11 = vpop.f32.mrb[94].mxu1 }
 0x276   : > { %v9878_v20 = vpack.c.bf16 %v6690_v11, %v6689_v13  ;;  %v1457_v16 = vpop.f32.mrb[95].mxu1  ;;  %v12273_v11 = vpack.c.bf16 %v9286_v53, %v9266_v57  ;;  %v12278_v53 = vpack.c.bf16 %v9096_v15, %v9092_v14  ;;  %v12281_v14 = vpack.c.bf16 %v9246_v40, %v9242_v60 }
 0x277   : > { %v9880_v33 = vpack.c.bf16 %v1457_v16, %v1454_v28  ;;  %v12282_v15 = vpack.c.bf16 %v9296_v45, %v9292_v30  ;;  %v12284_v13 = vpack.c.bf16 %v9396_v22, %v9392_v51  ;;  %v9933_v45 = vld [vmem:[%s11812_s3] ss:$0 sm:$0xff] }
 0x278   : > { %12267 = vst [vmem:[#allocation206_spill] sm:$0xff] %v9878_v20 }
 0x279   : > { %12268 = vst [vmem:[#allocation207_spill] sm:$0xff] %v9880_v33 }
 0x27b   : > { %6760 = vmatmul.mubr.bf16.gmra.mrb[148].mxu1 %v12269_v47  ;;  %v6693_v37 = vpop.f32.mrb[96].mxu1 }
 0x27c   : > { %6763 = vmatprep.mubr.bf16.mxu1 %v12270_v0  ;;  %v1470_v12 = vpop.f32.mrb[97].mxu1 }
 0x27d   : > { %v6694_v5 = vpop.f32.mrb[98].mxu1 }
 0x27e   : > { %v9888_v24 = vpack.c.bf16 %v6694_v5, %v6693_v37  ;;  %v1473_v32 = vpop.f32.mrb[99].mxu1 }
 0x27f   : > { %v9890_v17 = vpack.c.bf16 %v1473_v32, %v1470_v12 }
 0x280   : > { %12271 = vst [vmem:[#allocation208_spill] sm:$0xff] %v9888_v24 }
 0x281   : > { %12272 = vst [vmem:[#allocation209_spill] sm:$0xff] %v9890_v17  ;;  %v12410_v17 = vld [vmem:[#allocation31_spill] sm:$0xff] }
 0x283   : > { %6764 = vmatmul.mubr.bf16.gmra.mrb[152].mxu1 %v12273_v11  ;;  %v12285_v11 = vpack.c.bf16 %v9446_v19, %v9442_v58 }
 0x284   : > { %6767 = vmatprep.mubr.bf16.mxu1 %v12274_v44  ;;  %v12286_v44 = vpack.c.bf16 %v9496_v27, %v9492_v3 }
 0x28b   : > { %6768 = vmatmul.mubr.bf16.gmra.mrb[156].mxu1 %v12275_v52 }
 0x28c   : > { %6771 = vmatprep.mubr.bf16.mxu1 %v12276_v1 }
 0x293   : > { %6772 = vmatmul.mubr.bf16.gmra.mrb[160].mxu1 %v12277_v50  ;;  %v12287_v50 = vpack.c.bf16 %v9528_v49, %v9524_v8 }
 0x294   : > { %6775 = vmatprep.mubr.bf16.mxu1 %v12278_v53 }
 0x29b   : > { %6776 = vmatmul.mubr.bf16.gmra.mrb[164].mxu1 %v12279_v25 }
 0x29c   : > { %6779 = vmatprep.mubr.bf16.mxu1 %v12280_v4  ;;  %v12288_v4 = vpack.c.bf16 %v9554_v43, %v9550_v7 }
 0x29d   : > { %v6713_v18 = vpop.f32.mrb[100].mxu1 }
 0x29e   : > { %v2288_v31 = vmax.f32 %v6713_v18, 1e-24  ;;  %v1775_v48 = vpop.f32.mrb[101].mxu1 }
 0x29f   : > { %v2286_v63 = vmax.f32 %v1775_v48, 1e-24  ;;  %v6714_v57 = vpop.f32.mrb[102].mxu1 }
 0x2a0   : > { %7849 = vrsqrt.f32 %v2288_v31  ;;  %v2289_v42 = vmax.f32 %v6714_v57, 1e-24  ;;  %v1778_v56 = vpop.f32.mrb[103].mxu1 }
 0x2a1   : > { %7851 = vrsqrt.f32 %v2286_v63  ;;  %v2287_v28 = vmax.f32 %v1778_v56, 1e-24  ;;  %v12289_v56 = vld [vmem:[#allocation119_spill] sm:$0xff] }
 0x2a2   : > { %7853 = vrsqrt.f32 %v2289_v42 }
 0x2a3   : > { %7855 = vrsqrt.f32 %v2287_v28  ;;  %6780 = vmatmul.mubr.bf16.gmra.mrb[168].mxu1 %v12281_v14  ;;  %v12290_v28 = vld [vmem:[#allocation118_spill] sm:$0xff] }
 0x2a4   : > { %6783 = vmatprep.mubr.bf16.mxu1 %v12282_v15  ;;  %v12291_v14 = vpack.c.bf16 %v12289_v56, %v12290_v28  ;;  %v12292_v15 = vld [vmem:[#allocation127_spill] sm:$0xff]  ;;  %v12311_v28 = vld [vmem:[#allocation81_spill] sm:$0xff] }
 0x2aa   : > { %v7850_v34 = vpop.eup %7849 }
 0x2ab   : > { %v7852_v35 = vpop.eup %7851  ;;  %v2544_v54 = vmul.f32 %v7850_v34, %v9108_v21  ;;  %6784 = vmatmul.mubr.bf16.gmra.mrb[172].mxu1 %v12283_v55  ;;  %v12293_v34 = vld [vmem:[#allocation126_spill] sm:$0xff] }
 0x2ac   : > { %v7854_v62 = vpop.eup %7853  ;;  %6787 = vmatprep.mubr.bf16.mxu1 %v12284_v13  ;;  %v2542_v40 = vmul.f32 %v7852_v35, %v9058_v2  ;;  %v12294_v35 = vpack.c.bf16 %v12292_v15, %v12293_v34  ;;  %v12296_v13 = vld [vmem:[#allocation134_spill] sm:$0xff]  ;;  %v12312_v15 = vld [vmem:[#allocation167_spill] sm:$0xff] }
 0x2ad   : > { %v7856_v60 = vpop.eup %7855  ;;  %v2545_v30 = vmul.f32 %v7854_v62, %v9120_v26  ;;  %v6717_v21 = vpop.f32.mrb[104].mxu1  ;;  %v9938_v22 = vmul.f32 %v9933_v45, %v2544_v54  ;;  %v12295_v62 = vld [vmem:[#allocation135_spill] sm:$0xff]  ;;  %v12313_v34 = vld [vmem:[#allocation166_spill] sm:$0xff] }
 0x2ae   : > { %v2292_v16 = vmax.f32 %v6717_v21, 1e-24  ;;  %v1791_v47 = vpop.f32.mrb[105].mxu1  ;;  %v2543_v23 = vmul.f32 %v7856_v60, %v9070_v6  ;;  %v2677_v12 = vmul.f32 %v9933_v45, %v2542_v40  ;;  %v12297_v40 = vpack.c.bf16 %v12295_v62, %v12296_v13  ;;  %v12298_v60 = vld [vmem:[#allocation61_spill] sm:$0xff]  ;;  %v12316_v62 = vld [vmem:[#allocation174_spill] sm:$0xff] }
 0x2af   : > { %v2290_v39 = vmax.f32 %v1791_v47, 1e-24  ;;  %v6718_v37 = vpop.f32.mrb[106].mxu1  ;;  %v9941_v2 = vmul.f32 %v9933_v45, %v2545_v30  ;;  %v12300_v47 = vld [vmem:[#allocation142_spill] sm:$0xff] }
 0x2b0   : > { %7857 = vrsqrt.f32 %v2292_v16  ;;  %v2293_v51 = vmax.f32 %v6718_v37, 1e-24  ;;  %v1794_v0 = vpop.f32.mrb[107].mxu1  ;;  %v2678_v26 = vmul.f32 %v9933_v45, %v2543_v23  ;;  %v12299_v16 = vld [vmem:[#allocation143_spill] sm:$0xff] }
 0x2b1   : > { %7859 = vrsqrt.f32 %v2290_v39  ;;  %v2291_v5 = vmax.f32 %v1794_v0, 1e-24  ;;  %v12301_v23 = vpack.c.bf16 %v12299_v16, %v12300_v47  ;;  %v12302_v39 = vld [vmem:[#allocation51_spill] sm:$0xff] }
 0x2b2   : > { %7861 = vrsqrt.f32 %v2293_v51  ;;  %v2741_v32 = vpack.c.bf16 %v2678_v26, %v2677_v12  ;;  %v12303_v12 = vld [vmem:[#allocation65_spill] sm:$0xff] }
 0x2b3   : > { %7863 = vrsqrt.f32 %v2291_v5  ;;  %6788 = vmatmul.mubr.bf16.gmra.mrb[176].mxu1 %v12285_v11  ;;  %v12304_v11 = vld [vmem:[#allocation55_spill] sm:$0xff] }
 0x2b4   : > { %6791 = vmatprep.mubr.bf16.mxu1 %v12286_v44  ;;  %6855 = vmatprep.mubr.bf16.mxu0 %v2741_v32 }
 0x2ba   : > { %v7858_v52 = vpop.eup %7857 }
 0x2bb   : > { %v7860_v1 = vpop.eup %7859  ;;  %6792 = vmatmul.mubr.bf16.gmra.mrb[180].mxu1 %v12287_v50  ;;  %v2548_v53 = vmul.f32 %v7858_v52, %v9208_v61 }
 0x2bc   : > { %v7862_v25 = vpop.eup %7861  ;;  %6795 = vmatprep.mubr.bf16.mxu1 %v12288_v4  ;;  %v2546_v19 = vmul.f32 %v7860_v1, %v9158_v41 }
 0x2bd   : > { %v7864_v58 = vpop.eup %7863  ;;  %v6721_v18 = vpop.f32.mrb[108].mxu1  ;;  %v2549_v27 = vmul.f32 %v7862_v25, %v9220_v10  ;;  %v9964_v8 = vmul.f32 %v9933_v45, %v2548_v53 }
 0x2be   : > { %v2296_v3 = vmax.f32 %v6721_v18, 1e-24  ;;  %v1807_v31 = vpop.f32.mrb[109].mxu1  ;;  %v2547_v48 = vmul.f32 %v7864_v58, %v9170_v46  ;;  %v9970_v41 = vmul.f32 %v9933_v45, %v2546_v19 }
 0x2bf   : > { %v2294_v63 = vmax.f32 %v1807_v31, 1e-24  ;;  %v6722_v49 = vpop.f32.mrb[110].mxu1  ;;  %v9967_v61 = vmul.f32 %v9933_v45, %v2549_v27  ;;  %v12305_v31 = vld [vmem:[#allocation151_spill] sm:$0xff] }
 0x2c0   : > { %7865 = vrsqrt.f32 %v2296_v3  ;;  %v2297_v43 = vmax.f32 %v6722_v49, 1e-24  ;;  %v1810_v7 = vpop.f32.mrb[111].mxu1  ;;  %v9973_v10 = vmul.f32 %v9933_v45, %v2547_v48  ;;  %v12306_v48 = vld [vmem:[#allocation150_spill] sm:$0xff]  ;;  %v12308_v49 = vld [vmem:[#allocation159_spill] sm:$0xff] }
 0x2c1   : > { %7867 = vrsqrt.f32 %v2294_v63  ;;  %v2295_v57 = vmax.f32 %v1810_v7, 1e-24  ;;  %v12307_v63 = vpack.c.bf16 %v12305_v31, %v12306_v48  ;;  %v12322_v31 = vld [vmem:[#allocation182_spill] sm:$0xff]  ;;  %v12388_v27 = vld [vmem:[#allocation171_spill] sm:$0xff] }
 0x2c2   : > { %7869 = vrsqrt.f32 %v2297_v43  ;;  %v12309_v43 = vld [vmem:[#allocation158_spill] sm:$0xff]  ;;  %v12393_v3 = vld [vmem:[#allocation195_spill] sm:$0xff] }
 0x2c3   : > { %7871 = vrsqrt.f32 %v2295_v57  ;;  %6796 = vmatmul.mubr.bf16.gmra.mrb[184].mxu1 %v12291_v14  ;;  %v12310_v7 = vpack.c.bf16 %v12308_v49, %v12309_v43  ;;  %v12325_v49 = vld [vmem:[#allocation190_spill] sm:$0xff] }
 0x2c4   : > { %6799 = vmatprep.mubr.bf16.mxu1 %v12294_v35  ;;  %v12314_v35 = vpack.c.bf16 %v12312_v15, %v12313_v34 }
 0x2ca   : > { %v7866_v54 = vpop.eup %7865 }
 0x2cb   : > { %v7868_v55 = vpop.eup %7867  ;;  %6800 = vmatmul.mubr.bf16.gmra.mrb[188].mxu1 %v12297_v40  ;;  %v2552_v30 = vmul.f32 %v7866_v54, %v12298_v60  ;;  %v12318_v40 = vld [vmem:[#allocation71_spill] sm:$0xff] }
 0x2cc   : > { %v7870_v21 = vpop.eup %7869  ;;  %6803 = vmatprep.mubr.bf16.mxu1 %v12301_v23  ;;  %v2550_v37 = vmul.f32 %v7868_v55, %v12302_v39  ;;  %v12315_v55 = vld [vmem:[#allocation175_spill] sm:$0xff] }
 0x2cd   : > { %v7872_v51 = vpop.eup %7871  ;;  %v6725_v0 = vpop.f32.mrb[112].mxu1  ;;  %v2553_v26 = vmul.f32 %v7870_v21, %v12303_v12  ;;  %v9996_v50 = vmul.f32 %v9933_v45, %v2552_v30  ;;  %v12317_v13 = vpack.c.bf16 %v12315_v55, %v12316_v62  ;;  %v12319_v21 = vld [vmem:[#allocation85_spill] sm:$0xff] }
 0x2ce   : > { %v2300_v5 = vmax.f32 %v6725_v0, 1e-24  ;;  %v1823_v32 = vpop.f32.mrb[113].mxu1  ;;  %v2551_v44 = vmul.f32 %v7872_v51, %v12304_v11  ;;  %v10002_v19 = vmul.f32 %v9933_v45, %v2550_v37  ;;  %v12320_v37 = vld [vmem:[#allocation75_spill] sm:$0xff] }
 0x2cf   : > { %v2298_v52 = vmax.f32 %v1823_v32, 1e-24  ;;  %v6726_v1 = vpop.f32.mrb[114].mxu1  ;;  %v9999_v53 = vmul.f32 %v9933_v45, %v2553_v26 }
 0x2d0   : > { %7873 = vrsqrt.f32 %v2300_v5  ;;  %v2301_v25 = vmax.f32 %v6726_v1, 1e-24  ;;  %v1826_v4 = vpop.f32.mrb[115].mxu1  ;;  %v10005_v58 = vmul.f32 %v9933_v45, %v2551_v44 }
 0x2d1   : > { %7875 = vrsqrt.f32 %v2298_v52  ;;  %v2299_v18 = vmax.f32 %v1826_v4, 1e-24 }
 0x2d2   : > { %7877 = vrsqrt.f32 %v2301_v25 }
 0x2d3   : > { %7879 = vrsqrt.f32 %v2299_v18  ;;  %6804 = vmatmul.mubr.bf16.gmra.mrb[192].mxu1 %v12307_v63  ;;  %v12321_v18 = vld [vmem:[#allocation183_spill] sm:$0xff] }
 0x2d4   : > { %6807 = vmatprep.mubr.bf16.mxu1 %v12310_v7  ;;  %v12323_v48 = vpack.c.bf16 %v12321_v18, %v12322_v31  ;;  %v12324_v63 = vld [vmem:[#allocation191_spill] sm:$0xff]  ;;  %v12337_v18 = vld [vmem:[#allocation34_spill] sm:$0xff] }
 0x2d5   : > { %v12326_v43 = vpack.c.bf16 %v12324_v63, %v12325_v49  ;;  %v12338_v31 = vld [vmem:[#allocation30_spill] sm:$0xff] }
 0x2da   : > { %v7874_v57 = vpop.eup %7873 }
 0x2db   : > { %v7876_v56 = vpop.eup %7875  ;;  %v2556_v14 = vmul.f32 %v7874_v57, %v12311_v28  ;;  %6808 = vmatmul.mubr.bf16.gmra.mrb[196].mxu1 %v12314_v35  ;;  %v12330_v35 = vld [vmem:[#allocation91_spill] sm:$0xff] }
 0x2dc   : > { %v7878_v54 = vpop.eup %7877  ;;  %6811 = vmatprep.mubr.bf16.mxu1 %v12317_v13  ;;  %v2554_v60 = vmul.f32 %v7876_v56, %v12318_v40  ;;  %v12327_v56 = vld [vmem:[#allocation198_spill] sm:$0xff]  ;;  %v12331_v13 = vld [vmem:[#allocation103_spill] sm:$0xff] }
 0x2dd   : > { %v7880_v30 = vpop.eup %7879  ;;  %v2557_v16 = vmul.f32 %v7878_v54, %v12319_v21  ;;  %v6729_v47 = vpop.f32.mrb[116].mxu1  ;;  %v10028_v26 = vmul.f32 %v9933_v45, %v2556_v14  ;;  %v12328_v28 = vpack.c.bf16 %v9840_v59, %v12327_v56  ;;  %v12329_v14 = vld [vmem:[#allocation101_spill] sm:$0xff]  ;;  %v12332_v21 = vld [vmem:[#allocation95_spill] sm:$0xff] }
 0x2de   : > { %v2304_v23 = vmax.f32 %v6729_v47, 1e-24  ;;  %v1839_v39 = vpop.f32.mrb[117].mxu1  ;;  %v2555_v51 = vmul.f32 %v7880_v30, %v12320_v37  ;;  %v10034_v44 = vmul.f32 %v9933_v45, %v2554_v60  ;;  %v12343_v56 = vld [vmem:[#allocation113_spill] sm:$0xff] }
 0x2df   : > { %v2302_v0 = vmax.f32 %v1839_v39, 1e-24  ;;  %v6730_v12 = vpop.f32.mrb[118].mxu1  ;;  %v10031_v5 = vmul.f32 %v9933_v45, %v2557_v16 }
 0x2e0   : > { %7881 = vrsqrt.f32 %v2304_v23  ;;  %v2305_v32 = vmax.f32 %v6730_v12, 1e-24  ;;  %v1842_v11 = vpop.f32.mrb[119].mxu1  ;;  %v10037_v52 = vmul.f32 %v9933_v45, %v2555_v51 }
 0x2e1   : > { %7883 = vrsqrt.f32 %v2302_v0  ;;  %v2303_v1 = vmax.f32 %v1842_v11, 1e-24  ;;  %v12335_v11 = vld [vmem:[#allocation22_spill] sm:$0xff] }
 0x2e2   : > { %7885 = vrsqrt.f32 %v2305_v32  ;;  %v2747_v4 = vpack.c.bf16 %v10037_v52, %v10034_v44  ;;  %v12334_v32 = vld [vmem:[#allocation26_spill] sm:$0xff] }
 0x2e3   : > { %7887 = vrsqrt.f32 %v2303_v1  ;;  %6812 = vmatmul.mubr.bf16.gmra.mrb[200].mxu1 %v12323_v48  ;;  %v12336_v1 = vpack.c.bf16 %v12334_v32, %v12335_v11  ;;  %v12339_v48 = vpack.c.bf16 %v12337_v18, %v12338_v31 }
 0x2e4   : > { %6815 = vmatprep.mubr.bf16.mxu1 %v12326_v43  ;;  %v12340_v43 = vld [vmem:[#allocation42_spill] sm:$0xff] }
 0x2ea   : > { %v7882_v7 = vpop.eup %7881 }
 0x2eb   : > { %v7884_v57 = vpop.eup %7883  ;;  %6816 = vmatmul.mubr.bf16.gmra.mrb[204].mxu1 %v12328_v28  ;;  %v2560_v15 = vmul.f32 %v7882_v7, %v12329_v14  ;;  %v12341_v7 = vld [vmem:[#allocation38_spill] sm:$0xff] }
 0x2ec   : > { %v7886_v34 = vpop.eup %7885  ;;  %6819 = vmatprep.mubr.bf16.mxu1 %v1667_v29  ;;  %v2558_v54 = vmul.f32 %v7884_v57, %v12330_v35  ;;  %v12342_v57 = vpack.c.bf16 %v12340_v43, %v12341_v7  ;;  %v12351_v43 = vld [vmem:[#allocation56_spill] sm:$0xff] }
 0x2ed   : > { %v7888_v55 = vpop.eup %7887  ;;  %v6733_v62 = vpop.f32.mrb[120].mxu1  ;;  %v2561_v40 = vmul.f32 %v7886_v34, %v12331_v13  ;;  %v10060_v23 = vmul.f32 %v9933_v45, %v2560_v15  ;;  %v12344_v15 = vld [vmem:[#allocation50_spill] sm:$0xff] }
 0x2ee   : > { %v2308_v60 = vmax.f32 %v6733_v62, 1e-24  ;;  %v1855_v30 = vpop.f32.mrb[121].mxu1  ;;  %v2559_v16 = vmul.f32 %v7888_v55, %v12332_v21  ;;  %v10066_v38 = vmul.f32 %v9933_v45, %v2558_v54  ;;  %v12345_v34 = vld [vmem:[#allocation46_spill] sm:$0xff]  ;;  %v12347_v54 = vld [vmem:[#allocation107_spill] sm:$0xff] }
 0x2ef   : > { %v2306_v47 = vmax.f32 %v1855_v30, 1e-24  ;;  %v6734_v59 = vpop.f32.mrb[122].mxu1  ;;  %12333 = vst [vmem:[#allocation119_spill] sm:$0xff] %v10060_v23  ;;  %v10063_v39 = vmul.f32 %v9933_v45, %v2561_v40  ;;  %v12346_v35 = vpack.c.bf16 %v12344_v15, %v12345_v34  ;;  %v12348_v40 = vld [vmem:[#allocation115_spill] sm:$0xff]  ;;  %v12356_v34 = vld [vmem:[#allocation80_spill] sm:$0xff] }
 0x2f0   : > { %7889 = vrsqrt.f32 %v2308_v60  ;;  %v2309_v9 = vmax.f32 %v6734_v59, 1e-24  ;;  %v1858_v29 = vpop.f32.mrb[123].mxu1  ;;  %v10069_v37 = vmul.f32 %v9933_v45, %v2559_v16  ;;  %v12349_v16 = vld [vmem:[#allocation109_spill] sm:$0xff] }
 0x2f1   : > { %7891 = vrsqrt.f32 %v2306_v47  ;;  %v2307_v51 = vmax.f32 %v1858_v29, 1e-24 }
 0x2f2   : > { %7893 = vrsqrt.f32 %v2309_v9 }
 0x2f3   : > { %7895 = vrsqrt.f32 %v2307_v51  ;;  %6820 = vmatmul.mubr.bf16.gmra.mrb[208].mxu1 %v12336_v1 }
 0x2f4   : > { %6823 = vmatprep.mubr.bf16.mxu1 %v12339_v48  ;;  %v12392_v48 = vld [vmem:[#allocation185_spill] sm:$0xff] }
 0x2fa   : > { %v7890_v63 = vpop.eup %7889 }
 0x2fb   : > { %v7892_v49 = vpop.eup %7891  ;;  %6824 = vmatmul.mubr.bf16.gmra.mrb[212].mxu1 %v12342_v57  ;;  %v2564_v28 = vmul.f32 %v7890_v63, %v12343_v56  ;;  %v12353_v57 = vld [vmem:[#allocation70_spill] sm:$0xff] }
 0x2fc   : > { %v7894_v14 = vpop.eup %7893  ;;  %6827 = vmatprep.mubr.bf16.mxu1 %v12346_v35  ;;  %v2562_v55 = vmul.f32 %v7892_v49, %v12347_v54  ;;  %v12350_v49 = vld [vmem:[#allocation60_spill] sm:$0xff]  ;;  %v12354_v56 = vld [vmem:[#allocation66_spill] sm:$0xff] }
 0x2fd   : > { %v7896_v62 = vpop.eup %7895  ;;  %v6737_v13 = vpop.f32.mrb[124].mxu1  ;;  %v2565_v60 = vmul.f32 %v7894_v14, %v12348_v40  ;;  %v10092_v29 = vmul.f32 %v9933_v45, %v2564_v28  ;;  %v12352_v7 = vpack.c.bf16 %v12350_v49, %v12351_v43  ;;  %v12355_v28 = vpack.c.bf16 %v12353_v57, %v12354_v56  ;;  %v12357_v35 = vld [vmem:[#allocation76_spill] sm:$0xff]  ;;  %v12360_v40 = vld [vmem:[#allocation90_spill] sm:$0xff]  ;;  %v12365_v49 = vld [vmem:[#allocation123_spill] sm:$0xff] }
 0x2fe   : > { %v2312_v30 = vmax.f32 %v6737_v13, 1e-24  ;;  %v1871_v21 = vpop.f32.mrb[125].mxu1  ;;  %v2563_v47 = vmul.f32 %v7896_v62, %v12349_v16  ;;  %v10098_v1 = vmul.f32 %v9933_v45, %v2562_v55  ;;  %v12358_v54 = vpack.c.bf16 %v12356_v34, %v12357_v35  ;;  %v12359_v55 = vld [vmem:[#allocation129_spill] sm:$0xff] }
 0x2ff   : > { %v2310_v59 = vmax.f32 %v1871_v21, 1e-24  ;;  %v6738_v9 = vpop.f32.mrb[126].mxu1  ;;  %v10095_v51 = vmul.f32 %v9933_v45, %v2565_v60  ;;  %v12361_v60 = vld [vmem:[#allocation86_spill] sm:$0xff]  ;;  %v12363_v21 = vld [vmem:[#allocation121_spill] sm:$0xff] }
 0x300   : > { %7897 = vrsqrt.f32 %v2312_v30  ;;  %v2313_v32 = vmax.f32 %v6738_v9, 1e-24  ;;  %v1874_v11 = vpop.f32.mrb[127].mxu1  ;;  %v10101_v18 = vmul.f32 %v9933_v45, %v2563_v47  ;;  %v12362_v30 = vpack.c.bf16 %v12360_v40, %v12361_v60  ;;  %v12364_v9 = vld [vmem:[#allocation131_spill] sm:$0xff]  ;;  %v12371_v40 = vld [vmem:[#allocation96_spill] sm:$0xff] }
 0x301   : > { %7899 = vrsqrt.f32 %v2310_v59  ;;  %v2311_v31 = vmax.f32 %v1874_v11, 1e-24 }
 0x302   : > { %7901 = vrsqrt.f32 %v2313_v32 }
 0x303   : > { %7903 = vrsqrt.f32 %v2311_v31  ;;  %6828 = vmatmul.mubr.bf16.gmra.mrb[216].mxu1 %v12352_v7 }
 0x304   : > { %6831 = vmatprep.mubr.bf16.mxu1 %v12355_v28 }
 0x30a   : > { %v7898_v14 = vpop.eup %7897 }
 0x30b   : > { %v7900_v15 = vpop.eup %7899  ;;  %6832 = vmatmul.mubr.bf16.gmra.mrb[220].mxu1 %v12358_v54  ;;  %v2568_v62 = vmul.f32 %v7898_v14, %v12359_v55 }
 0x30c   : > { %v7902_v13 = vpop.eup %7901  ;;  %6835 = vmatprep.mubr.bf16.mxu1 %v12362_v30  ;;  %v2566_v16 = vmul.f32 %v7900_v15, %v12363_v21 }
 0x30d   : > { %v7904_v47 = vpop.eup %7903  ;;  %v6741_v59 = vpop.f32.mrb[128].mxu1  ;;  %v2569_v32 = vmul.f32 %v7902_v13, %v12364_v9  ;;  %v10124_v56 = vmul.f32 %v9933_v45, %v2568_v62  ;;  %v12370_v13 = vld [vmem:[#allocation100_spill] sm:$0xff]  ;;  %v12374_v9 = vld [vmem:[#allocation137_spill] sm:$0xff] }
 0x30e   : > { %v2316_v11 = vmax.f32 %v6741_v59, 1e-24  ;;  %v1887_v31 = vpop.f32.mrb[129].mxu1  ;;  %v2567_v43 = vmul.f32 %v7904_v47, %v12365_v49  ;;  %v10130_v15 = vmul.f32 %v9933_v45, %v2566_v16  ;;  %v12372_v60 = vpack.c.bf16 %v12370_v13, %v12371_v40  ;;  %v12373_v16 = vld [vmem:[#allocation145_spill] sm:$0xff]  ;;  %v12375_v49 = vld [vmem:[#allocation147_spill] sm:$0xff] }
 0x30f   : > { %v2314_v7 = vmax.f32 %v1887_v31, 1e-24  ;;  %v6742_v57 = vpop.f32.mrb[130].mxu1  ;;  %12366 = vst [vmem:[#allocation118_spill] sm:$0xff] %v10124_v56  ;;  %v10127_v28 = vmul.f32 %v9933_v45, %v2569_v32 }
 0x310   : > { %7905 = vrsqrt.f32 %v2316_v11  ;;  %v2317_v14 = vmax.f32 %v6742_v57, 1e-24  ;;  %v1890_v34 = vpop.f32.mrb[131].mxu1  ;;  %12368 = vst [vmem:[#allocation126_spill] sm:$0xff] %v10130_v15  ;;  %v10133_v35 = vmul.f32 %v9933_v45, %v2567_v43 }
 0x311   : > { %12367 = vst [vmem:[#allocation127_spill] sm:$0xff] %v10127_v28  ;;  %7907 = vrsqrt.f32 %v2314_v7  ;;  %v2315_v54 = vmax.f32 %v1890_v34, 1e-24 }
 0x312   : > { %12369 = vst [vmem:[#allocation135_spill] sm:$0xff] %v10133_v35  ;;  %7909 = vrsqrt.f32 %v2317_v14  ;;  %v12376_v14 = vld [vmem:[#allocation139_spill] sm:$0xff] }
 0x313   : > { %7911 = vrsqrt.f32 %v2315_v54  ;;  %6836 = vmatmul.mubr.bf16.gmra.mrb[224].mxu1 %v12372_v60 }
 0x314   : > { %6915 = vmatprep.mubr.bf16.mxu1 %v2747_v4 }
 0x31a   : > { %v7906_v30 = vpop.eup %7905 }
 0x31b   : > { %v7908_v21 = vpop.eup %7907  ;;  %v2572_v47 = vmul.f32 %v7906_v30, %v12373_v16  ;;  %v12387_v16 = vld [vmem:[#allocation179_spill] sm:$0xff] }
 0x31c   : > { %v7910_v59 = vpop.eup %7909  ;;  %v2570_v32 = vmul.f32 %v7908_v21, %v12374_v9 }
 0x31d   : > { %v7912_v11 = vpop.eup %7911  ;;  %v6745_v31 = vpop.f32.mrb[132].mxu1  ;;  %v2573_v43 = vmul.f32 %v7910_v59, %v12375_v49  ;;  %v10150_v44 = vmul.f32 %v9933_v45, %v2572_v47 }
 0x31e   : > { %v2320_v7 = vmax.f32 %v6745_v31, 1e-24  ;;  %v1903_v57 = vpop.f32.mrb[133].mxu1  ;;  %v2571_v34 = vmul.f32 %v7912_v11, %v12376_v14  ;;  %v10156_v60 = vmul.f32 %v9933_v45, %v2570_v32  ;;  %v12377_v11 = vld [vmem:[#allocation161_spill] sm:$0xff]  ;;  %v12379_v14 = vld [vmem:[#allocation163_spill] sm:$0xff] }
 0x31f   : > { %v2318_v54 = vmax.f32 %v1903_v57, 1e-24  ;;  %v6746_v13 = vpop.f32.mrb[134].mxu1  ;;  %v10153_v52 = vmul.f32 %v9933_v45, %v2573_v43  ;;  %v12378_v32 = vld [vmem:[#allocation153_spill] sm:$0xff] }
 0x320   : > { %7913 = vrsqrt.f32 %v2320_v7  ;;  %v2321_v4 = vmax.f32 %v6746_v13, 1e-24  ;;  %v1906_v40 = vpop.f32.mrb[135].mxu1  ;;  %v10159_v30 = vmul.f32 %v9933_v45, %v2571_v34 }
 0x321   : > { %7915 = vrsqrt.f32 %v2318_v54  ;;  %v2319_v21 = vmax.f32 %v1906_v40, 1e-24  ;;  %v12380_v40 = vld [vmem:[#allocation155_spill] sm:$0xff] }
 0x322   : > { %7917 = vrsqrt.f32 %v2321_v4 }
 0x323   : > { %7919 = vrsqrt.f32 %v2319_v21 }
 0x32a   : > { %v7914_v59 = vpop.eup %7913 }
 0x32b   : > { %v7916_v9 = vpop.eup %7915  ;;  %v2576_v31 = vmul.f32 %v7914_v59, %v12377_v11 }
 0x32c   : > { %v7918_v49 = vpop.eup %7917  ;;  %v2574_v43 = vmul.f32 %v7916_v9, %v12378_v32 }
 0x32d   : > { %v7920_v7 = vpop.eup %7919  ;;  %v6749_v57 = vpop.f32.mrb[136].mxu1  ;;  %v2577_v34 = vmul.f32 %v7918_v49, %v12379_v14  ;;  %v10170_v0 = vmul.f32 %v9933_v45, %v2576_v31 }
 0x32e   : > { %v2324_v54 = vmax.f32 %v6749_v57, 1e-24  ;;  %v1919_v13 = vpop.f32.mrb[137].mxu1  ;;  %v2575_v55 = vmul.f32 %v7920_v7, %v12380_v40  ;;  %v10176_v9 = vmul.f32 %v9933_v45, %v2574_v43  ;;  %v12386_v43 = vld [vmem:[#allocation169_spill] sm:$0xff] }
 0x32f   : > { %v2322_v4 = vmax.f32 %v1919_v13, 1e-24  ;;  %v6750_v62 = vpop.f32.mrb[138].mxu1  ;;  %12381 = vst [vmem:[#allocation134_spill] sm:$0xff] %v10170_v0  ;;  %v10173_v21 = vmul.f32 %v9933_v45, %v2577_v34 }
 0x330   : > { %7921 = vrsqrt.f32 %v2324_v54  ;;  %v2325_v59 = vmax.f32 %v6750_v62, 1e-24  ;;  %v1922_v11 = vpop.f32.mrb[139].mxu1  ;;  %12383 = vst [vmem:[#allocation143_spill] sm:$0xff] %v10176_v9  ;;  %v10179_v49 = vmul.f32 %v9933_v45, %v2575_v55  ;;  %v12385_v62 = vld [vmem:[#allocation177_spill] sm:$0xff] }
 0x331   : > { %12382 = vst [vmem:[#allocation61_spill] sm:$0xff] %v10173_v21  ;;  %7923 = vrsqrt.f32 %v2322_v4  ;;  %v2323_v32 = vmax.f32 %v1922_v11, 1e-24 }
 0x332   : > { %12384 = vst [vmem:[#allocation142_spill] sm:$0xff] %v10179_v49  ;;  %7925 = vrsqrt.f32 %v2325_v59  ;;  %v12455_v49 = vld [vmem:[#allocation102_spill] sm:$0xff] }
 0x333   : > { %7927 = vrsqrt.f32 %v2323_v32 }
 0x33a   : > { %v7922_v57 = vpop.eup %7921 }
 0x33b   : > { %v7924_v14 = vpop.eup %7923  ;;  %v2580_v34 = vmul.f32 %v7922_v57, %v12385_v62 }
 0x33c   : > { %v7926_v54 = vpop.eup %7925  ;;  %v2578_v13 = vmul.f32 %v7924_v14, %v12386_v43 }
 0x33d   : > { %v7928_v40 = vpop.eup %7927  ;;  %v6753_v55 = vpop.f32.mrb[140].mxu1  ;;  %v2581_v4 = vmul.f32 %v7926_v54, %v12387_v16  ;;  %v10190_v31 = vmul.f32 %v9933_v45, %v2580_v34 }
 0x33e   : > { %v2328_v11 = vmax.f32 %v6753_v55, 1e-24  ;;  %v1935_v12 = vpop.f32.mrb[141].mxu1  ;;  %v2579_v7 = vmul.f32 %v7928_v40, %v12388_v27  ;;  %v10196_v14 = vmul.f32 %v9933_v45, %v2578_v13 }
 0x33f   : > { %v2326_v59 = vmax.f32 %v1935_v12, 1e-24  ;;  %v6754_v47 = vpop.f32.mrb[142].mxu1  ;;  %12389 = vst [vmem:[#allocation51_spill] sm:$0xff] %v10190_v31  ;;  %v10193_v32 = vmul.f32 %v9933_v45, %v2581_v4 }
 0x340   : > { %7929 = vrsqrt.f32 %v2328_v11  ;;  %v2329_v57 = vmax.f32 %v6754_v47, 1e-24  ;;  %v1938_v62 = vpop.f32.mrb[143].mxu1  ;;  %v10199_v16 = vmul.f32 %v9933_v45, %v2579_v7 }
 0x341   : > { %12390 = vst [vmem:[#allocation65_spill] sm:$0xff] %v10193_v32  ;;  %7931 = vrsqrt.f32 %v2326_v59  ;;  %v2327_v54 = vmax.f32 %v1938_v62, 1e-24  ;;  %v12391_v62 = vld [vmem:[#allocation193_spill] sm:$0xff] }
 0x342   : > { %7933 = vrsqrt.f32 %v2329_v57 }
 0x343   : > { %7935 = vrsqrt.f32 %v2327_v54 }
 0x346   : > { %v6757_v34 = vpop.f32.mrb[144].mxu1 }
 0x347   : > { %v2332_v43 = vmax.f32 %v6757_v34, 1e-24  ;;  %v1951_v47 = vpop.f32.mrb[145].mxu1 }
 0x348   : > { %v2330_v40 = vmax.f32 %v1951_v47, 1e-24  ;;  %v6758_v55 = vpop.f32.mrb[146].mxu1  ;;  %v12394_v47 = vld [vmem:[#allocation187_spill] sm:$0xff] }
 0x349   : > { %7937 = vrsqrt.f32 %v2332_v43  ;;  %v2333_v13 = vmax.f32 %v6758_v55, 1e-24  ;;  %v1954_v4 = vpop.f32.mrb[147].mxu1 }
 0x34a   : > { %v7930_v7 = vpop.eup %7929  ;;  %7939 = vrsqrt.f32 %v2330_v40  ;;  %v2331_v11 = vmax.f32 %v1954_v4, 1e-24 }
 0x34b   : > { %v7932_v59 = vpop.eup %7931  ;;  %7941 = vrsqrt.f32 %v2333_v13  ;;  %v2584_v27 = vmul.f32 %v7930_v7, %v12391_v62 }
 0x34c   : > { %v7934_v57 = vpop.eup %7933  ;;  %7943 = vrsqrt.f32 %v2331_v11  ;;  %v2582_v12 = vmul.f32 %v7932_v59, %v12392_v48 }
 0x34d   : > { %v7936_v54 = vpop.eup %7935  ;;  %v2585_v34 = vmul.f32 %v7934_v57, %v12393_v3  ;;  %v10210_v25 = vmul.f32 %v9933_v45, %v2584_v27 }
 0x34e   : > { %v6761_v46 = vpop.f32.mrb[148].mxu1  ;;  %v2583_v63 = vmul.f32 %v7936_v54, %v12394_v47  ;;  %v10216_v7 = vmul.f32 %v9933_v45, %v2582_v12  ;;  %v12399_v12 = vld [vmem:[#allocation19_spill] sm:$0xff] }
 0x34f   : > { %v2336_v43 = vmax.f32 %v6761_v46, 1e-24  ;;  %v1967_v55 = vpop.f32.mrb[149].mxu1  ;;  %12395 = vst [vmem:[#allocation55_spill] sm:$0xff] %v10210_v25  ;;  %v10213_v40 = vmul.f32 %v9933_v45, %v2585_v34 }
 0x350   : > { %v2334_v13 = vmax.f32 %v1967_v55, 1e-24  ;;  %v6762_v4 = vpop.f32.mrb[150].mxu1  ;;  %12397 = vst [vmem:[#allocation150_spill] sm:$0xff] %v10216_v7  ;;  %v10219_v48 = vmul.f32 %v9933_v45, %v2583_v63  ;;  %v12400_v63 = vld [vmem:[#allocation200_spill] sm:$0xff]  ;;  %v12418_v7 = vld [vmem:[#allocation47_spill] sm:$0xff] }
 0x351   : > { %12396 = vst [vmem:[#allocation151_spill] sm:$0xff] %v10213_v40  ;;  %7945 = vrsqrt.f32 %v2336_v43  ;;  %v2337_v3 = vmax.f32 %v6762_v4, 1e-24  ;;  %v1970_v11 = vpop.f32.mrb[151].mxu1  ;;  %v12401_v4 = vld [vmem:[#allocation23_spill] sm:$0xff] }
 0x352   : > { %12398 = vst [vmem:[#allocation159_spill] sm:$0xff] %v10219_v48  ;;  %7947 = vrsqrt.f32 %v2334_v13  ;;  %v2335_v27 = vmax.f32 %v1970_v11, 1e-24  ;;  %v12402_v13 = vld [vmem:[#allocation202_spill] sm:$0xff] }
 0x353   : > { %v7938_v62 = vpop.eup %7937  ;;  %7949 = vrsqrt.f32 %v2337_v3 }
 0x354   : > { %v7940_v57 = vpop.eup %7939  ;;  %7951 = vrsqrt.f32 %v2335_v27  ;;  %v2588_v54 = vmul.f32 %v7938_v62, %v12399_v12 }
 0x355   : > { %v7942_v34 = vpop.eup %7941  ;;  %v2586_v47 = vmul.f32 %v7940_v57, %v12400_v63 }
 0x356   : > { %v7944_v43 = vpop.eup %7943  ;;  %v6765_v55 = vpop.f32.mrb[152].mxu1  ;;  %v2589_v42 = vmul.f32 %v7942_v34, %v12401_v4  ;;  %v10230_v59 = vmul.f32 %v9933_v45, %v2588_v54 }
 0x357   : > { %v2340_v6 = vmax.f32 %v6765_v55, 1e-24  ;;  %v1983_v46 = vpop.f32.mrb[153].mxu1  ;;  %v2587_v11 = vmul.f32 %v7944_v43, %v12402_v13  ;;  %v10236_v57 = vmul.f32 %v9933_v45, %v2586_v47  ;;  %v12408_v47 = vld [vmem:[#allocation27_spill] sm:$0xff] }
 0x358   : > { %v2338_v20 = vmax.f32 %v1983_v46, 1e-24  ;;  %v6766_v33 = vpop.f32.mrb[154].mxu1  ;;  %12403 = vst [vmem:[#allocation158_spill] sm:$0xff] %v10230_v59  ;;  %v10233_v3 = vmul.f32 %v9933_v45, %v2589_v42  ;;  %v12417_v42 = vld [vmem:[#allocation57_spill] sm:$0xff] }
 0x359   : > { %7953 = vrsqrt.f32 %v2340_v6  ;;  %v2341_v27 = vmax.f32 %v6766_v33, 1e-24  ;;  %v1986_v62 = vpop.f32.mrb[155].mxu1  ;;  %12405 = vst [vmem:[#allocation167_spill] sm:$0xff] %v10236_v57  ;;  %v10239_v12 = vmul.f32 %v9933_v45, %v2587_v11  ;;  %v12407_v33 = vld [vmem:[#allocation35_spill] sm:$0xff] }
 0x35a   : > { %12404 = vst [vmem:[#allocation81_spill] sm:$0xff] %v10233_v3  ;;  %7955 = vrsqrt.f32 %v2338_v20  ;;  %v2339_v34 = vmax.f32 %v1986_v62, 1e-24  ;;  %v12409_v11 = vld [vmem:[#allocation39_spill] sm:$0xff] }
 0x35b   : > { %12406 = vst [vmem:[#allocation166_spill] sm:$0xff] %v10239_v12  ;;  %v7946_v63 = vpop.eup %7945  ;;  %7957 = vrsqrt.f32 %v2341_v27 }
 0x35c   : > { %v7948_v54 = vpop.eup %7947  ;;  %7959 = vrsqrt.f32 %v2339_v34  ;;  %v2592_v6 = vmul.f32 %v7946_v63, %v12407_v33 }
 0x35d   : > { %v7950_v43 = vpop.eup %7949  ;;  %v2590_v55 = vmul.f32 %v7948_v54, %v12408_v47 }
 0x35e   : > { %v7952_v4 = vpop.eup %7951  ;;  %v6769_v13 = vpop.f32.mrb[156].mxu1  ;;  %v2593_v20 = vmul.f32 %v7950_v43, %v12409_v11  ;;  %v10250_v25 = vmul.f32 %v9933_v45, %v2592_v6  ;;  %v12425_v6 = vld [vmem:[#allocation77_spill] sm:$0xff] }
 0x35f   : > { %v2344_v62 = vmax.f32 %v6769_v13, 1e-24  ;;  %v1999_v24 = vpop.f32.mrb[157].mxu1  ;;  %v2591_v46 = vmul.f32 %v7952_v4, %v12410_v17  ;;  %v10256_v54 = vmul.f32 %v9933_v45, %v2590_v55  ;;  %v12415_v13 = vld [vmem:[#allocation52_spill] sm:$0xff]  ;;  %v12416_v55 = vld [vmem:[#allocation43_spill] sm:$0xff] }
 0x360   : > { %v2342_v36 = vmax.f32 %v1999_v24, 1e-24  ;;  %v6770_v27 = vpop.f32.mrb[158].mxu1  ;;  %12411 = vst [vmem:[#allocation175_spill] sm:$0xff] %v10250_v25  ;;  %v10253_v34 = vmul.f32 %v9933_v45, %v2593_v20 }
 0x361   : > { %7961 = vrsqrt.f32 %v2344_v62  ;;  %v2345_v63 = vmax.f32 %v6770_v27, 1e-24  ;;  %v2002_v33 = vpop.f32.mrb[159].mxu1  ;;  %12413 = vst [vmem:[#allocation71_spill] sm:$0xff] %v10256_v54  ;;  %v10259_v43 = vmul.f32 %v9933_v45, %v2591_v46 }
 0x362   : > { %12412 = vst [vmem:[#allocation174_spill] sm:$0xff] %v10253_v34  ;;  %7963 = vrsqrt.f32 %v2342_v36  ;;  %v2343_v47 = vmax.f32 %v2002_v33, 1e-24 }
 0x363   : > { %12414 = vst [vmem:[#allocation85_spill] sm:$0xff] %v10259_v43  ;;  %v7954_v17 = vpop.eup %7953  ;;  %7965 = vrsqrt.f32 %v2345_v63  ;;  %v12426_v43 = vld [vmem:[#allocation67_spill] sm:$0xff] }
 0x364   : > { %v7956_v4 = vpop.eup %7955  ;;  %7967 = vrsqrt.f32 %v2343_v47  ;;  %v2596_v11 = vmul.f32 %v7954_v17, %v12415_v13 }
 0x365   : > { %v7958_v20 = vpop.eup %7957  ;;  %v2594_v62 = vmul.f32 %v7956_v4, %v12416_v55 }
 0x366   : > { %v7960_v27 = vpop.eup %7959  ;;  %v6773_v46 = vpop.f32.mrb[160].mxu1  ;;  %v2597_v36 = vmul.f32 %v7958_v20, %v12417_v42  ;;  %v10270_v34 = vmul.f32 %v9933_v45, %v2596_v11 }
 0x367   : > { %v2348_v33 = vmax.f32 %v6773_v46, 1e-24  ;;  %v2015_v40 = vpop.f32.mrb[161].mxu1  ;;  %v2595_v24 = vmul.f32 %v7960_v27, %v12418_v7  ;;  %v10276_v4 = vmul.f32 %v9933_v45, %v2594_v62  ;;  %v12423_v27 = vld [vmem:[#allocation72_spill] sm:$0xff]  ;;  %v12424_v62 = vld [vmem:[#allocation62_spill] sm:$0xff] }
 0x368   : > { %v2346_v25 = vmax.f32 %v2015_v40, 1e-24  ;;  %v6774_v63 = vpop.f32.mrb[162].mxu1  ;;  %12419 = vst [vmem:[#allocation75_spill] sm:$0xff] %v10270_v34  ;;  %v10273_v47 = vmul.f32 %v9933_v45, %v2597_v36 }
 0x369   : > { %7969 = vrsqrt.f32 %v2348_v33  ;;  %v2349_v17 = vmax.f32 %v6774_v63, 1e-24  ;;  %v2018_v13 = vpop.f32.mrb[163].mxu1  ;;  %12421 = vst [vmem:[#allocation182_spill] sm:$0xff] %v10276_v4  ;;  %v10279_v42 = vmul.f32 %v9933_v45, %v2595_v24 }
 0x36a   : > { %12420 = vst [vmem:[#allocation183_spill] sm:$0xff] %v10273_v47  ;;  %7971 = vrsqrt.f32 %v2346_v25  ;;  %v2347_v20 = vmax.f32 %v2018_v13, 1e-24 }
 0x36b   : > { %12422 = vst [vmem:[#allocation191_spill] sm:$0xff] %v10279_v42  ;;  %v7962_v7 = vpop.eup %7961  ;;  %7973 = vrsqrt.f32 %v2349_v17 }
 0x36c   : > { %v7964_v55 = vpop.eup %7963  ;;  %7975 = vrsqrt.f32 %v2347_v20  ;;  %v2600_v46 = vmul.f32 %v7962_v7, %v12423_v27 }
 0x36d   : > { %v7966_v36 = vpop.eup %7965  ;;  %v2598_v33 = vmul.f32 %v7964_v55, %v12424_v62 }
 0x36e   : > { %v7968_v63 = vpop.eup %7967  ;;  %v6777_v24 = vpop.f32.mrb[164].mxu1  ;;  %v2601_v25 = vmul.f32 %v7966_v36, %v12425_v6  ;;  %v10290_v47 = vmul.f32 %v9933_v45, %v2600_v46 }
 0x36f   : > { %v2352_v13 = vmax.f32 %v6777_v24, 1e-24  ;;  %v2031_v54 = vpop.f32.mrb[165].mxu1  ;;  %v2599_v40 = vmul.f32 %v7968_v63, %v12426_v43  ;;  %v10296_v55 = vmul.f32 %v9933_v45, %v2598_v33  ;;  %v2841_v63 = vlaneseq  ;;  %v12431_v24 = vld [vmem:[#allocation92_spill] sm:$0xff] }
 0x370   : > { %v2350_v34 = vmax.f32 %v2031_v54, 1e-24  ;;  %v6778_v17 = vpop.f32.mrb[166].mxu1  ;;  %12427 = vst [vmem:[#allocation190_spill] sm:$0xff] %v10290_v47  ;;  %v10293_v20 = vmul.f32 %v9933_v45, %v2601_v25  ;;  %v12434_v54 = vld [vmem:[#allocation87_spill] sm:$0xff] }
 0x371   : > { %7977 = vrsqrt.f32 %v2352_v13  ;;  %v2353_v7 = vmax.f32 %v6778_v17, 1e-24  ;;  %v2034_v27 = vpop.f32.mrb[167].mxu1  ;;  %12429 = vst [vmem:[#allocation101_spill] sm:$0xff] %v10296_v55  ;;  %v10299_v6 = vmul.f32 %v9933_v45, %v2599_v40  ;;  %v12432_v13 = vld [vmem:[#allocation82_spill] sm:$0xff]  ;;  %v10309_v21 = vshrl.u32 %v2841_v63, 7 }
 0x372   : > { %12428 = vst [vmem:[#allocation198_spill] sm:$0xff] %v10293_v20  ;;  %7979 = vrsqrt.f32 %v2350_v34  ;;  %v2351_v36 = vmax.f32 %v2034_v27, 1e-24  ;;  %v12433_v34 = vld [vmem:[#allocation97_spill] sm:$0xff] }
 0x373   : > { %12430 = vst [vmem:[#allocation91_spill] sm:$0xff] %v10299_v6  ;;  %v7970_v43 = vpop.eup %7969  ;;  %7981 = vrsqrt.f32 %v2353_v7 }
 0x374   : > { %v7972_v62 = vpop.eup %7971  ;;  %7983 = vrsqrt.f32 %v2351_v36  ;;  %v2604_v25 = vmul.f32 %v7970_v43, %v12431_v24 }
 0x375   : > { %v7974_v33 = vpop.eup %7973  ;;  %v2602_v17 = vmul.f32 %v7972_v62, %v12432_v13 }
 0x376   : > { %v7976_v40 = vpop.eup %7975  ;;  %v6781_v11 = vpop.f32.mrb[168].mxu1  ;;  %v2605_v27 = vmul.f32 %v7974_v33, %v12433_v34  ;;  %v10312_v36 = vmul.f32 %v9933_v45, %v2604_v25 }
 0x377   : > { %v2356_v48 = vmax.f32 %v6781_v11, 1e-24  ;;  %v2047_v0 = vpop.f32.mrb[169].mxu1  ;;  %v2603_v47 = vmul.f32 %v7976_v40, %v12434_v54  ;;  %v10318_v13 = vmul.f32 %v9933_v45, %v2602_v17  ;;  %v2837_v17 = vld [vmem:[%s11813_s4] sm:$0x1]  ;;  %v12442_v54 = vld [vmem:[#allocation24_spill] sm:$0xff] }
 0x378   : > { %v2354_v7 = vmax.f32 %v2047_v0, 1e-24  ;;  %v6782_v20 = vpop.f32.mrb[170].mxu1  ;;  %12435 = vst [vmem:[#allocation103_spill] sm:$0xff] %v10312_v36  ;;  %v10315_v43 = vmul.f32 %v9933_v45, %v2605_v27  ;;  %v2839_v34 = vpack.i.b16 %v2837_v17, %v2837_v17  ;;  %v2843_v27 = vsub.s32 0, %v10309_v21 }
 0x379   : > { %7985 = vrsqrt.f32 %v2356_v48  ;;  %v2357_v62 = vmax.f32 %v6782_v20, 1e-24  ;;  %v2050_v24 = vpop.f32.mrb[171].mxu1  ;;  %12437 = vst [vmem:[#allocation26_spill] sm:$0xff] %v10318_v13  ;;  %v10321_v11 = vmul.f32 %v9933_v45, %v2603_v47  ;;  %v12439_v48 = vld [vmem:[#allocation28_spill] sm:$0xff] }
 0x37a   : > { %12436 = vst [vmem:[#allocation95_spill] sm:$0xff] %v10315_v43  ;;  %7987 = vrsqrt.f32 %v2354_v7  ;;  %v2355_v0 = vmax.f32 %v2050_v24, 1e-24  ;;  %v12440_v47 = vld [vmem:[#allocation20_spill] sm:$0xff] }
 0x37b   : > { %12438 = vst [vmem:[#allocation22_spill] sm:$0xff] %v10321_v11  ;;  %v7978_v63 = vpop.eup %7977  ;;  %7989 = vrsqrt.f32 %v2357_v62  ;;  %v12441_v24 = vld [vmem:[#allocation32_spill] sm:$0xff] }
 0x37c   : > { %v7980_v33 = vpop.eup %7979  ;;  %v2608_v20 = vmul.f32 %v7978_v63, %v12439_v48  ;;  %7991 = vrsqrt.f32 %v2355_v0 }
 0x37d   : > { %v7982_v45 = vpop.eup %7981  ;;  %v2606_v40 = vmul.f32 %v7980_v33, %v12440_v47  ;;  %v10339_v33 = vrot.slane %v2839_v34, %v2843_v27  ;;  %v12445_v34 = vld [vmem:[#allocation48_spill] sm:$0xff] }
 0x37e   : > { %v7984_v7 = vpop.eup %7983  ;;  %v2609_v62 = vmul.f32 %v7982_v45, %v12441_v24  ;;  %v6785_v46 = vpop.f32.mrb[172].mxu1 }
 0x37f   : > { %v2607_v25 = vmul.f32 %v7984_v7, %v12442_v54  ;;  %v2360_v55 = vmax.f32 %v6785_v46, 1e-24  ;;  %v2063_v6 = vpop.f32.mrb[173].mxu1  ;;  %v2877_v46 = vshrl.u32 %v2837_v17, 16 }
 0x380   : > { %v2358_v63 = vmax.f32 %v2063_v6, 1e-24  ;;  %v6786_v0 = vpop.f32.mrb[174].mxu1  ;;  %v10335_v48 = vpack.c.bf16 %v2609_v62, %v2608_v20  ;;  %v12443_v6 = vld [vmem:[#allocation44_spill] sm:$0xff] }
 0x381   : > { %7993 = vrsqrt.f32 %v2360_v55  ;;  %v2361_v36 = vmax.f32 %v6786_v0, 1e-24  ;;  %v2066_v43 = vpop.f32.mrb[175].mxu1  ;;  %v10337_v13 = vpack.c.bf16 %v2607_v25, %v2606_v40  ;;  %v12444_v55 = vld [vmem:[#allocation36_spill] sm:$0xff]  ;;  %v2878_v4 = vpack.i.b16 %v2877_v46, %v2877_v46 }
 0x382   : > { %7995 = vrsqrt.f32 %v2358_v63  ;;  %v2359_v47 = vmax.f32 %v2066_v43, 1e-24  ;;  %v2846_v25 = vmul.bf16 %v10339_v33, %v10335_v48 }
 0x383   : > { %v7986_v11 = vpop.eup %7985  ;;  %7997 = vrsqrt.f32 %v2361_v36  ;;  %v2845_v54 = vmul.bf16 %v10339_v33, %v10337_v13  ;;  %v12446_v36 = vld [vmem:[#allocation40_spill] sm:$0xff] }
 0x384   : > { %v7988_v45 = vpop.eup %7987  ;;  %v2612_v7 = vmul.f32 %v7986_v11, %v12443_v6  ;;  %7999 = vrsqrt.f32 %v2359_v47 }
 0x385   : > { %v7990_v20 = vpop.eup %7989  ;;  %v2610_v24 = vmul.f32 %v7988_v45, %v12444_v55  ;;  %6839 = vmatprep.subr.bf16.mxu0 %v2845_v54 }
 0x386   : > { %v7992_v40 = vpop.eup %7991  ;;  %v2613_v43 = vmul.f32 %v7990_v20, %v12445_v34  ;;  %v6789_v62 = vpop.f32.mrb[176].mxu1  ;;  %6840 = vmatpush3.bf16.xpose.msra.mxu0 %v2845_v54  ;;  %v10353_v54 = vrot.slane %v2878_v4, %v2843_v27  ;;  %v12447_v34 = vld [vmem:[#allocation63_spill] sm:$0xff] }
 0x387   : > { %v2611_v63 = vmul.f32 %v7992_v40, %v12446_v36  ;;  %v2364_v0 = vmax.f32 %v6789_v62, 1e-24  ;;  %v2079_v17 = vpop.f32.mrb[177].mxu1  ;;  %6841 = vmatprep.subr.bf16.mxu0 %v2846_v25  ;;  %v12448_v36 = vld [vmem:[#allocation53_spill] sm:$0xff] }
 0x388   : > { %v2362_v11 = vmax.f32 %v2079_v17, 1e-24  ;;  %v6790_v47 = vpop.f32.mrb[178].mxu1  ;;  %v10349_v6 = vpack.c.bf16 %v2613_v43, %v2612_v7  ;;  %v2884_v7 = vmul.bf16 %v10353_v54, %v10337_v13 }
 0x389   : > { %8001 = vrsqrt.f32 %v2364_v0  ;;  %v2365_v45 = vmax.f32 %v6790_v47, 1e-24  ;;  %v2082_v55 = vpop.f32.mrb[179].mxu1  ;;  %v10351_v42 = vpack.c.bf16 %v2611_v63, %v2610_v24  ;;  %v12449_v0 = vld [vmem:[#allocation68_spill] sm:$0xff] }
 0x38a   : > { %8003 = vrsqrt.f32 %v2362_v11  ;;  %v2363_v59 = vmax.f32 %v2082_v55, 1e-24  ;;  %v12450_v11 = vld [vmem:[#allocation58_spill] sm:$0xff] }
 0x38b   : > { %v7994_v20 = vpop.eup %7993  ;;  %8005 = vrsqrt.f32 %v2365_v45 }
 0x38c   : > { %v7996_v40 = vpop.eup %7995  ;;  %v2616_v62 = vmul.f32 %v7994_v20, %v12447_v34  ;;  %8007 = vrsqrt.f32 %v2363_v59 }
 0x38d   : > { %v7998_v46 = vpop.eup %7997  ;;  %v2614_v17 = vmul.f32 %v7996_v40, %v12448_v36 }
 0x38e   : > { %v8000_v43 = vpop.eup %7999  ;;  %v2617_v24 = vmul.f32 %v7998_v46, %v12449_v0  ;;  %v6793_v63 = vpop.f32.mrb[180].mxu1  ;;  %6842 = vmatpush3.bf16.xpose.msra.mxu0 %v2846_v25  ;;  %v12451_v25 = vld [vmem:[#allocation83_spill] sm:$0xff] }
 0x38f   : > { %v2615_v47 = vmul.f32 %v8000_v43, %v12450_v11  ;;  %v2368_v45 = vmax.f32 %v6793_v63, 1e-24  ;;  %v2095_v4 = vpop.f32.mrb[181].mxu1  ;;  %6843 = vmatprep.subr.bf16.mxu0 %v2884_v7  ;;  %v12452_v63 = vld [vmem:[#allocation73_spill] sm:$0xff] }
 0x390   : > { %v2366_v27 = vmax.f32 %v2095_v4, 1e-24  ;;  %v6794_v55 = vpop.f32.mrb[182].mxu1  ;;  %v10361_v20 = vpack.c.bf16 %v2617_v24, %v2616_v62  ;;  %v2885_v62 = vmul.bf16 %v10353_v54, %v10335_v48 }
 0x391   : > { %8009 = vrsqrt.f32 %v2368_v45  ;;  %v2369_v59 = vmax.f32 %v6794_v55, 1e-24  ;;  %v2098_v40 = vpop.f32.mrb[183].mxu1  ;;  %v10363_v34 = vpack.c.bf16 %v2615_v47, %v2614_v17  ;;  %v12453_v45 = vld [vmem:[#allocation88_spill] sm:$0xff]  ;;  %v10373_v17 = vld [vmem:[%s11813_s4] sm:$0x2] }
 0x392   : > { %8011 = vrsqrt.f32 %v2366_v27  ;;  %v2367_v36 = vmax.f32 %v2098_v40, 1e-24  ;;  %v12454_v47 = vld [vmem:[#allocation78_spill] sm:$0xff]  ;;  %v2918_v40 = vpack.i.b16 %v10373_v17, %v10373_v17 }
 0x393   : > { %v8002_v3 = vpop.eup %8001  ;;  %8013 = vrsqrt.f32 %v2369_v59 }
 0x394   : > { %v8004_v46 = vpop.eup %8003  ;;  %v2620_v0 = vmul.f32 %v8002_v3, %v12451_v25  ;;  %8015 = vrsqrt.f32 %v2367_v36  ;;  %v12045_v36 = vsub.s32 1, %v10309_v21 }
 0x395   : > { %v8006_v43 = vpop.eup %8005  ;;  %v2618_v11 = vmul.f32 %v8004_v46, %v12452_v63 }
 0x396   : > { %v8008_v24 = vpop.eup %8007  ;;  %v2621_v4 = vmul.f32 %v8006_v43, %v12453_v45  ;;  %v6797_v55 = vpop.f32.mrb[184].mxu1  ;;  %6844 = vmatpush3.bf16.xpose.msra.mxu0 %v2884_v7 }
 0x397   : > { %v2619_v27 = vmul.f32 %v8008_v24, %v12454_v47  ;;  %v2372_v3 = vmax.f32 %v6797_v55, 1e-24  ;;  %v2111_v59 = vpop.f32.mrb[185].mxu1  ;;  %6845 = vmatprep.subr.bf16.mxu0 %v2885_v62  ;;  %v10387_v47 = vrot.slane %v2918_v40, %v12045_v36  ;;  %v12458_v40 = vld [vmem:[#allocation98_spill] sm:$0xff] }
 0x398   : > { %v2370_v46 = vmax.f32 %v2111_v59, 1e-24  ;;  %v6798_v25 = vpop.f32.mrb[186].mxu1  ;;  %v10379_v43 = vpack.c.bf16 %v2621_v4, %v2620_v0 }
 0x399   : > { %8017 = vrsqrt.f32 %v2372_v3  ;;  %v2373_v7 = vmax.f32 %v6798_v25, 1e-24  ;;  %v2114_v63 = vpop.f32.mrb[187].mxu1  ;;  %v10381_v45 = vpack.c.bf16 %v2619_v27, %v2618_v11  ;;  %v12456_v3 = vld [vmem:[#allocation93_spill] sm:$0xff]  ;;  %v2924_v11 = vmul.bf16 %v10387_v47, %v10337_v13 }
 0x39a   : > { %8019 = vrsqrt.f32 %v2370_v46  ;;  %v2371_v9 = vmax.f32 %v2114_v63, 1e-24  ;;  %v2852_v27 = vmul.bf16 %v10339_v33, %v10379_v43 }
 0x39b   : > { %v8010_v24 = vpop.eup %8009  ;;  %8021 = vrsqrt.f32 %v2373_v7  ;;  %v2851_v55 = vmul.bf16 %v10339_v33, %v10381_v45  ;;  %v12457_v7 = vld [vmem:[#allocation104_spill] sm:$0xff] }
 0x39c   : > { %v8012_v59 = vpop.eup %8011  ;;  %v2624_v0 = vmul.f32 %v8010_v24, %v12455_v49  ;;  %8023 = vrsqrt.f32 %v2371_v9 }
 0x39d   : > { %v8014_v4 = vpop.eup %8013  ;;  %v2622_v25 = vmul.f32 %v8012_v59, %v12456_v3  ;;  %6899 = vmatprep.subr.bf16.mxu1 %v2851_v55 }
 0x39e   : > { %v8016_v46 = vpop.eup %8015  ;;  %v2625_v63 = vmul.f32 %v8014_v4, %v12457_v7  ;;  %v6801_v56 = vpop.f32.mrb[188].mxu1  ;;  %6846 = vmatpush3.bf16.xpose.msra.mxu0 %v2885_v62  ;;  %6900 = vmatpush3.bf16.xpose.msra.mxu1 %v2851_v55  ;;  %v2956_v62 = vshrl.u32 %v10373_v17, 16 }
 0x39f   : > { %v2623_v36 = vmul.f32 %v8016_v46, %v12458_v40  ;;  %v2376_v49 = vmax.f32 %v6801_v56, 1e-24  ;;  %v2127_v9 = vpop.f32.mrb[189].mxu1  ;;  %6847 = vmatprep.subr.bf16.mxu0 %v2924_v11  ;;  %6901 = vmatprep.subr.bf16.mxu1 %v2852_v27  ;;  %v12459_v56 = vld [vmem:[#allocation114_spill] sm:$0xff] }
 0x3a0   : > { %v2374_v24 = vmax.f32 %v2127_v9, 1e-24  ;;  %v6802_v59 = vpop.f32.mrb[190].mxu1  ;;  %v10397_v3 = vpack.c.bf16 %v2625_v63, %v2624_v0  ;;  %v12460_v9 = vld [vmem:[#allocation108_spill] sm:$0xff]  ;;  %v2925_v0 = vmul.bf16 %v10387_v47, %v10335_v48 }
 0x3a1   : > { %8025 = vrsqrt.f32 %v2376_v49  ;;  %v2377_v28 = vmax.f32 %v6802_v59, 1e-24  ;;  %v2130_v57 = vpop.f32.mrb[191].mxu1  ;;  %v10399_v12 = vpack.c.bf16 %v2623_v36, %v2622_v25  ;;  %v2890_v36 = vmul.bf16 %v10353_v54, %v10381_v45  ;;  %v12461_v63 = vld [vmem:[#allocation116_spill] sm:$0xff] }
 0x3a2   : > { %8027 = vrsqrt.f32 %v2374_v24  ;;  %v2375_v4 = vmax.f32 %v2130_v57, 1e-24 }
 0x3a3   : > { %v8018_v7 = vpop.eup %8017  ;;  %8029 = vrsqrt.f32 %v2377_v28  ;;  %v12462_v28 = vld [vmem:[#allocation110_spill] sm:$0xff] }
 0x3a4   : > { %v8020_v55 = vpop.eup %8019  ;;  %v2628_v46 = vmul.f32 %v8018_v7, %v12459_v56  ;;  %8031 = vrsqrt.f32 %v2375_v4  ;;  %v2957_v4 = vpack.i.b16 %v2956_v62, %v2956_v62 }
 0x3a5   : > { %v8022_v40 = vpop.eup %8021  ;;  %v2626_v31 = vmul.f32 %v8020_v55, %v12460_v9 }
 0x3a6   : > { %v8024_v25 = vpop.eup %8023  ;;  %v2629_v57 = vmul.f32 %v8022_v40, %v12461_v63  ;;  %v6805_v49 = vpop.f32.mrb[192].mxu1  ;;  %6848 = vmatpush3.bf16.xpose.msra.mxu0 %v2924_v11  ;;  %6902 = vmatpush3.bf16.xpose.msra.mxu1 %v2852_v27  ;;  %v12463_v27 = vsub.s32 1, %v10309_v21  ;;  %v12467_v21 = vld [vmem:[#allocation124_spill] sm:$0xff] }
 0x3a7   : > { %v2627_v17 = vmul.f32 %v8024_v25, %v12462_v28  ;;  %v2380_v24 = vmax.f32 %v6805_v49, 1e-24  ;;  %v2143_v59 = vpop.f32.mrb[193].mxu1  ;;  %6849 = vmatprep.subr.bf16.mxu0 %v2925_v0  ;;  %6903 = vmatprep.subr.bf16.mxu1 %v2890_v36  ;;  %v12464_v49 = vld [vmem:[#allocation130_spill] sm:$0xff] }
 0x3a8   : > { %v2378_v7 = vmax.f32 %v2143_v59, 1e-24  ;;  %v6806_v55 = vpop.f32.mrb[194].mxu1  ;;  %v10410_v56 = vpack.c.bf16 %v2629_v57, %v2628_v46  ;;  %v10416_v25 = vrot.slane %v2957_v4, %v12463_v27  ;;  %v12465_v46 = vld [vmem:[#allocation122_spill] sm:$0xff] }
 0x3a9   : > { %8033 = vrsqrt.f32 %v2380_v24  ;;  %v2381_v9 = vmax.f32 %v6806_v55, 1e-24  ;;  %v2146_v32 = vpop.f32.mrb[195].mxu1  ;;  %v10412_v15 = vpack.c.bf16 %v2627_v17, %v2626_v31  ;;  %v2891_v31 = vmul.bf16 %v10353_v54, %v10379_v43  ;;  %v12466_v17 = vld [vmem:[#allocation132_spill] sm:$0xff] }
 0x3aa   : > { %8035 = vrsqrt.f32 %v2378_v7  ;;  %v2379_v40 = vmax.f32 %v2146_v32, 1e-24  ;;  %v2963_v24 = vmul.bf16 %v10416_v25, %v10337_v13 }
 0x3ab   : > { %v8026_v11 = vpop.eup %8025  ;;  %8037 = vrsqrt.f32 %v2381_v9 }
 0x3ac   : > { %v8028_v63 = vpop.eup %8027  ;;  %v2632_v62 = vmul.f32 %v8026_v11, %v12464_v49  ;;  %8039 = vrsqrt.f32 %v2379_v40 }
 0x3ad   : > { %v8030_v28 = vpop.eup %8029  ;;  %v2630_v57 = vmul.f32 %v8028_v63, %v12465_v46 }
 0x3ae   : > { %v8032_v32 = vpop.eup %8031  ;;  %v2633_v59 = vmul.f32 %v8030_v28, %v12466_v17  ;;  %v6809_v7 = vpop.f32.mrb[196].mxu1  ;;  %6850 = vmatpush3.bf16.xpose.msra.mxu0 %v2925_v0  ;;  %6904 = vmatpush3.bf16.xpose.msra.mxu1 %v2890_v36  ;;  %v12469_v36 = vld [vmem:[#allocation146_spill] sm:$0xff] }
 0x3af   : > { %v2631_v4 = vmul.f32 %v8032_v32, %v12467_v21  ;;  %v2384_v55 = vmax.f32 %v6809_v7, 1e-24  ;;  %v2159_v9 = vpop.f32.mrb[197].mxu1  ;;  %6851 = vmatprep.subr.bf16.mxu0 %v2963_v24  ;;  %6905 = vmatprep.subr.bf16.mxu1 %v2891_v31  ;;  %v12470_v7 = vld [vmem:[#allocation138_spill] sm:$0xff] }
 0x3b0   : > { %v2382_v40 = vmax.f32 %v2159_v9, 1e-24  ;;  %v6810_v11 = vpop.f32.mrb[198].mxu1  ;;  %v10426_v27 = vpack.c.bf16 %v2633_v59, %v2632_v62  ;;  %v2964_v62 = vmul.bf16 %v10416_v25, %v10335_v48  ;;  %v2930_v59 = vmul.bf16 %v10387_v47, %v10381_v45 }
 0x3b1   : > { %8041 = vrsqrt.f32 %v2384_v55  ;;  %v2385_v13 = vmax.f32 %v6810_v11, 1e-24  ;;  %v2162_v63 = vpop.f32.mrb[199].mxu1  ;;  %v10428_v49 = vpack.c.bf16 %v2631_v4, %v2630_v57  ;;  %v12471_v57 = vld [vmem:[#allocation148_spill] sm:$0xff] }
 0x3b2   : > { %12468 = vst [vmem:[#allocation34_spill] sm:$0xff] %v10426_v27  ;;  %8043 = vrsqrt.f32 %v2382_v40  ;;  %v2383_v28 = vmax.f32 %v2162_v63, 1e-24  ;;  %v12472_v40 = vld [vmem:[#allocation140_spill] sm:$0xff] }
 0x3b3   : > { %v8034_v46 = vpop.eup %8033  ;;  %8045 = vrsqrt.f32 %v2385_v13 }
 0x3b4   : > { %v8036_v0 = vpop.eup %8035  ;;  %v2636_v32 = vmul.f32 %v8034_v46, %v12469_v36  ;;  %8047 = vrsqrt.f32 %v2383_v28 }
 0x3b5   : > { %v8038_v17 = vpop.eup %8037  ;;  %v2634_v21 = vmul.f32 %v8036_v0, %v12470_v7 }
 0x3b6   : > { %v8040_v55 = vpop.eup %8039  ;;  %v2637_v4 = vmul.f32 %v8038_v17, %v12471_v57  ;;  %v6813_v9 = vpop.f32.mrb[200].mxu1  ;;  %6852 = vmatpush3.bf16.xpose.msra.mxu0 %v2963_v24  ;;  %6906 = vmatpush3.bf16.xpose.msra.mxu1 %v2891_v31  ;;  %v12473_v31 = vld [vmem:[#allocation162_spill] sm:$0xff] }
 0x3b7   : > { %v2635_v11 = vmul.f32 %v8040_v55, %v12472_v40  ;;  %v2388_v13 = vmax.f32 %v6813_v9, 1e-24  ;;  %v2175_v63 = vpop.f32.mrb[201].mxu1  ;;  %6853 = vmatprep.subr.bf16.mxu0 %v2964_v62  ;;  %6907 = vmatprep.subr.bf16.mxu1 %v2930_v59  ;;  %v12474_v40 = vld [vmem:[#allocation154_spill] sm:$0xff] }
 0x3b8   : > { %v2386_v28 = vmax.f32 %v2175_v63, 1e-24  ;;  %v6814_v46 = vpop.f32.mrb[202].mxu1  ;;  %v10438_v0 = vpack.c.bf16 %v2637_v4, %v2636_v32  ;;  %v2847_v32 = vmul.bf16 %v10339_v33, %v10351_v42  ;;  %v2931_v4 = vmul.bf16 %v10387_v47, %v10379_v43 }
 0x3b9   : > { %8049 = vrsqrt.f32 %v2388_v13  ;;  %v2389_v48 = vmax.f32 %v6814_v46, 1e-24  ;;  %v2178_v36 = vpop.f32.mrb[203].mxu1  ;;  %v10440_v7 = vpack.c.bf16 %v2635_v11, %v2634_v21  ;;  %v12475_v21 = vld [vmem:[#allocation164_spill] sm:$0xff] }
 0x3ba   : > { %8051 = vrsqrt.f32 %v2386_v28  ;;  %v2387_v17 = vmax.f32 %v2178_v36, 1e-24  ;;  %v12476_v28 = vld [vmem:[#allocation156_spill] sm:$0xff] }
 0x3bb   : > { %v8042_v57 = vpop.eup %8041  ;;  %8053 = vrsqrt.f32 %v2389_v48 }
 0x3bc   : > { %v8044_v24 = vpop.eup %8043  ;;  %v2640_v55 = vmul.f32 %v8042_v57, %v12473_v31  ;;  %8055 = vrsqrt.f32 %v2387_v17 }
 0x3bd   : > { %v8046_v9 = vpop.eup %8045  ;;  %v2638_v35 = vmul.f32 %v8044_v24, %v12474_v40 }
 0x3be   : > { %v8048_v13 = vpop.eup %8047  ;;  %v2641_v11 = vmul.f32 %v8046_v9, %v12475_v21  ;;  %v6817_v63 = vpop.f32.mrb[204].mxu1  ;;  %6854 = vmatpush3.bf16.xpose.msra.mxu0 %v2964_v62  ;;  %6908 = vmatpush3.bf16.xpose.msra.mxu1 %v2930_v59  ;;  %v12477_v59 = vld [vmem:[#allocation178_spill] sm:$0xff] }
 0x3bf   : > { %v2639_v46 = vmul.f32 %v8048_v13, %v12476_v28  ;;  %v2392_v48 = vmax.f32 %v6817_v63, 1e-24  ;;  %v2191_v36 = vpop.f32.mrb[205].mxu1  ;;  %6859 = vmatprep.subr.bf16.mxu0 %v2847_v32  ;;  %6909 = vmatprep.subr.bf16.mxu1 %v2931_v4  ;;  %v12478_v28 = vld [vmem:[#allocation170_spill] sm:$0xff] }
 0x3c0   : > { %v2390_v17 = vmax.f32 %v2191_v36, 1e-24  ;;  %v6818_v57 = vpop.f32.mrb[206].mxu1  ;;  %v10450_v24 = vpack.c.bf16 %v2641_v11, %v2640_v55  ;;  %v12479_v55 = vpack.c.bf16 %v9941_v2, %v9938_v22  ;;  %v2848_v11 = vmul.bf16 %v10339_v33, %v10349_v6 }
 0x3c1   : > { %8057 = vrsqrt.f32 %v2392_v48  ;;  %v2393_v31 = vmax.f32 %v6818_v57, 1e-24  ;;  %v2194_v40 = vpop.f32.mrb[207].mxu1  ;;  %v10452_v27 = vpack.c.bf16 %v2639_v46, %v2638_v35  ;;  %v12480_v46 = vld [vmem:[#allocation180_spill] sm:$0xff]  ;;  %v2969_v57 = vmul.bf16 %v10416_v25, %v10381_v45 }
 0x3c2   : > { %8059 = vrsqrt.f32 %v2390_v17  ;;  %v2391_v9 = vmax.f32 %v2194_v40, 1e-24  ;;  %v12481_v17 = vpack.c.bf16 %v9973_v10, %v9970_v41 }
 0x3c3   : > { %v8050_v21 = vpop.eup %8049  ;;  %8061 = vrsqrt.f32 %v2393_v31  ;;  %v12482_v31 = vld [vmem:[#allocation172_spill] sm:$0xff] }
 0x3c4   : > { %v8052_v62 = vpop.eup %8051  ;;  %v2644_v13 = vmul.f32 %v8050_v21, %v12477_v59  ;;  %8063 = vrsqrt.f32 %v2391_v9 }
 0x3c5   : > { %v8054_v63 = vpop.eup %8053  ;;  %v2642_v23 = vmul.f32 %v8052_v62, %v12478_v28  ;;  %6856 = vmatmul.mubr.bf16.vlgmr.msra.gmra.mrb[92].mxu0 %v12479_v55  ;;  %v12483_v28 = vld [vmem:[#allocation194_spill] sm:$0xff] }
 0x3c6   : > { %v8056_v35 = vpop.eup %8055  ;;  %v2645_v48 = vmul.f32 %v8054_v63, %v12480_v46  ;;  %v6821_v36 = vpop.f32.mrb[208].mxu1  ;;  %6860 = vmatpush3.bf16.xpose.msra.mxu0 %v2847_v32  ;;  %6875 = vmatprep.mubr.bf16.mxu0 %v12481_v17 }
 0x3c7   : > { %v2643_v40 = vmul.f32 %v8056_v35, %v12482_v31  ;;  %v2396_v9 = vmax.f32 %v6821_v36, 1e-24  ;;  %6910 = vmatpush3.bf16.xpose.msra.mxu1 %v2931_v4  ;;  %v2207_v22 = vpop.f32.mrb[209].mxu1  ;;  %6861 = vmatprep.subr.bf16.mxu0 %v2848_v11  ;;  %v12484_v35 = vld [vmem:[#allocation186_spill] sm:$0xff]  ;;  %v12485_v36 = vld [vmem:[#allocation196_spill] sm:$0xff] }
 0x3c8   : > { %v2394_v2 = vmax.f32 %v2207_v22, 1e-24  ;;  %6911 = vmatprep.subr.bf16.mxu1 %v2969_v57  ;;  %v6822_v21 = vpop.f32.mrb[210].mxu1  ;;  %v10468_v62 = vpack.c.bf16 %v2645_v48, %v2644_v13  ;;  %v2886_v13 = vmul.bf16 %v10353_v54, %v10351_v42 }
 0x3c9   : > { %8065 = vrsqrt.f32 %v2396_v9  ;;  %v2397_v32 = vmax.f32 %v6822_v21, 1e-24  ;;  %v2210_v59 = vpop.f32.mrb[211].mxu1  ;;  %v10470_v63 = vpack.c.bf16 %v2643_v40, %v2642_v23  ;;  %v2970_v23 = vmul.bf16 %v10416_v25, %v10379_v43  ;;  %v12486_v40 = vld [vmem:[#allocation188_spill] sm:$0xff] }
 0x3ca   : > { %8067 = vrsqrt.f32 %v2394_v2  ;;  %v2395_v41 = vmax.f32 %v2210_v59, 1e-24 }
 0x3cb   : > { %v8058_v10 = vpop.eup %8057  ;;  %8069 = vrsqrt.f32 %v2397_v32 }
 0x3cc   : > { %v8060_v45 = vpop.eup %8059  ;;  %v2648_v55 = vmul.f32 %v8058_v10, %v12483_v28  ;;  %8071 = vrsqrt.f32 %v2395_v41 }
 0x3cd   : > { %v8062_v4 = vpop.eup %8061  ;;  %v2646_v46 = vmul.f32 %v8060_v45, %v12484_v35 }
 0x3ce   : > { %v8064_v48 = vpop.eup %8063  ;;  %v2649_v17 = vmul.f32 %v8062_v4, %v12485_v36  ;;  %v6825_v31 = vpop.f32.mrb[212].mxu1  ;;  %6862 = vmatpush3.bf16.xpose.msra.mxu0 %v2848_v11  ;;  %v12488_v4 = vld [vmem:[#allocation21_spill] sm:$0xff] }
 0x3cf   : > { %v2647_v9 = vmul.f32 %v8064_v48, %v12486_v40  ;;  %v2400_v22 = vmax.f32 %v6825_v31, 1e-24  ;;  %6912 = vmatpush3.bf16.xpose.msra.mxu1 %v2969_v57  ;;  %v2223_v2 = vpop.f32.mrb[213].mxu1  ;;  %6863 = vmatprep.subr.bf16.mxu0 %v2886_v13  ;;  %v12489_v48 = vld [vmem:[#allocation201_spill] sm:$0xff] }
 0x3d0   : > { %v2398_v21 = vmax.f32 %v2223_v2, 1e-24  ;;  %6913 = vmatprep.subr.bf16.mxu1 %v2970_v23  ;;  %v6826_v32 = vpop.f32.mrb[214].mxu1  ;;  %v10480_v59 = vpack.c.bf16 %v2649_v17, %v2648_v55  ;;  %v2887_v55 = vmul.bf16 %v10353_v54, %v10349_v6  ;;  %v12490_v31 = vld [vmem:[#allocation25_spill] sm:$0xff] }
 0x3d1   : > { %8073 = vrsqrt.f32 %v2400_v22  ;;  %v2401_v41 = vmax.f32 %v6826_v32, 1e-24  ;;  %v2226_v10 = vpop.f32.mrb[215].mxu1  ;;  %v10482_v45 = vpack.c.bf16 %v2647_v9, %v2646_v46  ;;  %v2855_v46 = vmul.bf16 %v10339_v33, %v10412_v15  ;;  %v12491_v9 = vld [vmem:[#allocation203_spill] sm:$0xff] }
 0x3d2   : > { %12487 = vst [vmem:[#allocation30_spill] sm:$0xff] %v10480_v59  ;;  %8075 = vrsqrt.f32 %v2398_v21  ;;  %v2399_v11 = vmax.f32 %v2226_v10, 1e-24  ;;  %v12494_v59 = vld [vmem:[#allocation41_spill] sm:$0xff] }
 0x3d3   : > { %v8066_v28 = vpop.eup %8065  ;;  %8077 = vrsqrt.f32 %v2401_v41 }
 0x3d4   : > { %v8068_v43 = vpop.eup %8067  ;;  %v2652_v35 = vmul.f32 %v8066_v28, %v12488_v4  ;;  %8079 = vrsqrt.f32 %v2399_v11 }
 0x3d5   : > { %v8070_v57 = vpop.eup %8069  ;;  %v2650_v36 = vmul.f32 %v8068_v43, %v12489_v48 }
 0x3d6   : > { %v8072_v17 = vpop.eup %8071  ;;  %v2653_v40 = vmul.f32 %v8070_v57, %v12490_v31  ;;  %v6829_v22 = vpop.f32.mrb[216].mxu1  ;;  %6864 = vmatpush3.bf16.xpose.msra.mxu0 %v2886_v13 }
 0x3d7   : > { %v2651_v2 = vmul.f32 %v8072_v17, %v12491_v9  ;;  %v2404_v21 = vmax.f32 %v6829_v22, 1e-24  ;;  %6914 = vmatpush3.bf16.xpose.msra.mxu1 %v2970_v23  ;;  %v2239_v32 = vpop.f32.mrb[217].mxu1  ;;  %6865 = vmatprep.subr.bf16.mxu0 %v2887_v55  ;;  %v12492_v17 = vld [vmem:[#allocation37_spill] sm:$0xff] }
 0x3d8   : > { %v2402_v41 = vmax.f32 %v2239_v32, 1e-24  ;;  %6939 = vmatprep.subr.bf16.mxu1 %v2855_v46  ;;  %v6830_v10 = vpop.f32.mrb[218].mxu1  ;;  %v10492_v11 = vpack.c.bf16 %v2653_v40, %v2652_v35  ;;  %v12493_v22 = vld [vmem:[#allocation29_spill] sm:$0xff]  ;;  %v12495_v40 = vpack.c.bf16 %v10031_v5, %v10028_v26 }
 0x3d9   : > { %8081 = vrsqrt.f32 %v2404_v21  ;;  %v2405_v28 = vmax.f32 %v6830_v10, 1e-24  ;;  %v2242_v43 = vpop.f32.mrb[219].mxu1  ;;  %v10494_v4 = vpack.c.bf16 %v2651_v2, %v2650_v36  ;;  %v2926_v2 = vmul.bf16 %v10387_v47, %v10351_v42 }
 0x3da   : > { %8083 = vrsqrt.f32 %v2402_v41  ;;  %v2403_v13 = vmax.f32 %v2242_v43, 1e-24  ;;  %v2856_v21 = vmul.bf16 %v10339_v33, %v10410_v56  ;;  %v12496_v41 = vld [vmem:[#allocation33_spill] sm:$0xff]  ;;  %v12497_v43 = vpack.c.bf16 %v10101_v18, %v10098_v1 }
 0x3db   : > { %v8074_v57 = vpop.eup %8073  ;;  %8085 = vrsqrt.f32 %v2405_v28 }
 0x3dc   : > { %v8076_v48 = vpop.eup %8075  ;;  %v2656_v31 = vmul.f32 %v8074_v57, %v12492_v17  ;;  %8087 = vrsqrt.f32 %v2403_v13 }
 0x3dd   : > { %v8078_v23 = vpop.eup %8077  ;;  %v2654_v9 = vmul.f32 %v8076_v48, %v12493_v22  ;;  %v12498_v22 = vld [vmem:[#allocation54_spill] sm:$0xff] }
 0x3de   : > { %v8080_v32 = vpop.eup %8079  ;;  %v2657_v35 = vmul.f32 %v8078_v23, %v12494_v59  ;;  %6916 = vmatmul.mubr.bf16.vlgmr.msra.gmra.mrb[228].mxu1 %v12495_v40  ;;  %v6833_v36 = vpop.f32.mrb[220].mxu1  ;;  %6866 = vmatpush3.bf16.xpose.msra.mxu0 %v2887_v55 }
 0x3df   : > { %v2655_v10 = vmul.f32 %v8080_v32, %v12496_v41  ;;  %v2408_v28 = vmax.f32 %v6833_v36, 1e-24  ;;  %6940 = vmatpush3.bf16.xpose.msra.mxu1 %v2855_v46  ;;  %6955 = vmatprep.mubr.bf16.mxu1 %v12497_v43  ;;  %v2255_v59 = vpop.f32.mrb[221].mxu1  ;;  %v12499_v32 = vld [vmem:[#allocation45_spill] sm:$0xff]  ;;  %v12500_v36 = vld [vmem:[#allocation59_spill] sm:$0xff] }
 0x3e0   : > { %v2406_v13 = vmax.f32 %v2255_v59, 1e-24  ;;  %6867 = vmatprep.subr.bf16.mxu0 %v2926_v2  ;;  %6941 = vmatprep.subr.bf16.mxu1 %v2856_v21  ;;  %v6834_v26 = vpop.f32.mrb[222].mxu1  ;;  %v10510_v5 = vpack.c.bf16 %v2657_v35, %v2656_v31  ;;  %v2927_v31 = vmul.bf16 %v10387_v47, %v10349_v6 }
 0x3e1   : > { %8089 = vrsqrt.f32 %v2408_v28  ;;  %v2409_v55 = vmax.f32 %v6834_v26, 1e-24  ;;  %v2258_v57 = vpop.f32.mrb[223].mxu1  ;;  %v10512_v48 = vpack.c.bf16 %v2655_v10, %v2654_v9  ;;  %v2894_v9 = vmul.bf16 %v10353_v54, %v10412_v15  ;;  %v12501_v10 = vld [vmem:[#allocation49_spill] sm:$0xff] }
 0x3e2   : > { %8091 = vrsqrt.f32 %v2406_v13  ;;  %v2407_v17 = vmax.f32 %v2258_v57, 1e-24 }
 0x3e3   : > { %v8082_v23 = vpop.eup %8081  ;;  %8093 = vrsqrt.f32 %v2409_v55 }
 0x3e4   : > { %v8084_v46 = vpop.eup %8083  ;;  %v2660_v1 = vmul.f32 %v8082_v23, %v12498_v22  ;;  %8095 = vrsqrt.f32 %v2407_v17 }
 0x3e5   : > { %v8086_v18 = vpop.eup %8085  ;;  %v2658_v40 = vmul.f32 %v8084_v46, %v12499_v32  ;;  %v12502_v32 = vld [vmem:[#allocation74_spill] sm:$0xff] }
 0x3e6   : > { %v8088_v35 = vpop.eup %8087  ;;  %v2661_v41 = vmul.f32 %v8086_v18, %v12500_v36  ;;  %v6837_v28 = vpop.f32.mrb[224].mxu1  ;;  %6868 = vmatpush3.bf16.xpose.msra.mxu0 %v2926_v2  ;;  %v12503_v36 = vld [vmem:[#allocation64_spill] sm:$0xff] }
 0x3e7   : > { %v2659_v43 = vmul.f32 %v8088_v35, %v12501_v10  ;;  %v2412_v59 = vmax.f32 %v6837_v28, 1e-24  ;;  %6942 = vmatpush3.bf16.xpose.msra.mxu1 %v2856_v21  ;;  %v2271_v13 = vpop.f32.mrb[225].mxu1  ;;  %6869 = vmatprep.subr.bf16.mxu0 %v2927_v31  ;;  %v12504_v10 = vld [vmem:[#allocation79_spill] sm:$0xff] }
 0x3e8   : > { %v2410_v26 = vmax.f32 %v2271_v13, 1e-24  ;;  %6943 = vmatprep.subr.bf16.mxu1 %v2894_v9  ;;  %v6838_v55 = vpop.f32.mrb[226].mxu1  ;;  %v10522_v57 = vpack.c.bf16 %v2661_v41, %v2660_v1  ;;  %v2965_v1 = vmul.bf16 %v10416_v25, %v10351_v42 }
 0x3e9   : > { %8097 = vrsqrt.f32 %v2412_v59  ;;  %v2413_v17 = vmax.f32 %v6838_v55, 1e-24  ;;  %v2274_v23 = vpop.f32.mrb[227].mxu1  ;;  %v10524_v46 = vpack.c.bf16 %v2659_v43, %v2658_v40  ;;  %v2895_v40 = vmul.bf16 %v10353_v54, %v10410_v56  ;;  %v12505_v43 = vld [vmem:[#allocation69_spill] sm:$0xff] }
 0x3ea   : > { %8099 = vrsqrt.f32 %v2410_v26  ;;  %v2411_v2 = vmax.f32 %v2274_v23, 1e-24 }
 0x3eb   : > { %v8090_v22 = vpop.eup %8089  ;;  %8101 = vrsqrt.f32 %v2413_v17 }
 0x3ec   : > { %v8092_v18 = vpop.eup %8091  ;;  %v2664_v35 = vmul.f32 %v8090_v22, %v12502_v32  ;;  %8103 = vrsqrt.f32 %v2411_v2  ;;  %v12506_v2 = vld [vmem:[#allocation94_spill] sm:$0xff] }
 0x3ed   : > { %v8094_v21 = vpop.eup %8093  ;;  %v2662_v28 = vmul.f32 %v8092_v18, %v12503_v36  ;;  %v12507_v18 = vld [vmem:[#allocation84_spill] sm:$0xff]  ;;  %v12508_v36 = vld [vmem:[#allocation99_spill] sm:$0xff] }
 0x3ee   : > { %v8096_v41 = vpop.eup %8095  ;;  %v2665_v59 = vmul.f32 %v8094_v21, %v12504_v10  ;;  %6870 = vmatpush3.bf16.xpose.msra.mxu0 %v2927_v31  ;;  %v2966_v31 = vmul.bf16 %v10416_v25, %v10349_v6  ;;  %v2935_v6 = vmul.bf16 %v10387_v47, %v10410_v56 }
 0x3ef   : > { %v2663_v13 = vmul.f32 %v8096_v41, %v12505_v43  ;;  %6944 = vmatpush3.bf16.xpose.msra.mxu1 %v2894_v9  ;;  %6871 = vmatprep.subr.bf16.mxu0 %v2965_v1  ;;  %v2934_v9 = vmul.bf16 %v10387_v47, %v10412_v15  ;;  %v2849_v43 = vmul.bf16 %v10339_v33, %v10363_v34 }
 0x3f0   : > { %6945 = vmatprep.subr.bf16.mxu1 %v2895_v40  ;;  %v10534_v26 = vpack.c.bf16 %v2665_v59, %v2664_v35  ;;  %v12509_v35 = vld [vmem:[#allocation89_spill] sm:$0xff] }
 0x3f1   : > { %v10536_v55 = vpack.c.bf16 %v2663_v13, %v2662_v28  ;;  %v12511_v13 = vpack.c.bf16 %v10005_v58, %v10002_v19  ;;  %v2859_v19 = vmul.bf16 %v10339_v33, %v10440_v7  ;;  %v12512_v58 = vpack.c.bf16 %v10095_v51, %v10092_v29 }
 0x3f2   : > { %v2898_v29 = vmul.bf16 %v10353_v54, %v10440_v7  ;;  %v2967_v51 = vmul.bf16 %v10416_v25, %v10363_v34 }
 0x3f3   : > { %v8098_v17 = vpop.eup %8097 }
 0x3f4   : > { %v8100_v23 = vpop.eup %8099  ;;  %v2668_v42 = vmul.f32 %v8098_v17, %v12506_v2  ;;  %v2973_v17 = vmul.bf16 %v10416_v25, %v10412_v15  ;;  %v2928_v15 = vmul.bf16 %v10387_v47, %v10363_v34  ;;  %v12513_v2 = vpack.c.bf16 %v10159_v30, %v10156_v60 }
 0x3f5   : > { %v8102_v22 = vpop.eup %8101  ;;  %v2666_v32 = vmul.f32 %v8100_v23, %v12507_v18  ;;  %v2888_v23 = vmul.bf16 %v10353_v54, %v10363_v34  ;;  %v2899_v60 = vmul.bf16 %v10353_v54, %v10438_v0  ;;  %v2968_v30 = vmul.bf16 %v10416_v25, %v10361_v20 }
 0x3f6   : > { %v8104_v21 = vpop.eup %8103  ;;  %v2669_v41 = vmul.f32 %v8102_v22, %v12508_v36  ;;  %6872 = vmatpush3.bf16.xpose.msra.mxu0 %v2965_v1  ;;  %v12510_v1 = vpack.c.bf16 %v9967_v61, %v9964_v8  ;;  %v2974_v8 = vmul.bf16 %v10416_v25, %v10410_v56  ;;  %v2889_v61 = vmul.bf16 %v10353_v54, %v10361_v20 }
 0x3f7   : > { %v2667_v28 = vmul.f32 %v8104_v21, %v12509_v35  ;;  %6946 = vmatpush3.bf16.xpose.msra.mxu1 %v2895_v40  ;;  %6873 = vmatprep.subr.bf16.mxu0 %v2966_v31  ;;  %v2850_v40 = vmul.bf16 %v10339_v33, %v10361_v20  ;;  %v2860_v56 = vmul.bf16 %v10339_v33, %v10438_v0 }
 0x3f8   : > { %6947 = vmatprep.subr.bf16.mxu1 %v2934_v9  ;;  %v10546_v10 = vpack.c.bf16 %v2669_v41, %v2668_v42  ;;  %v2929_v42 = vmul.bf16 %v10387_v47, %v10361_v20  ;;  %v2938_v22 = vmul.bf16 %v10387_v47, %v10440_v7  ;;  %v2853_v34 = vmul.bf16 %v10339_v33, %v10399_v12 }
 0x3f9   : > { %v10548_v59 = vpack.c.bf16 %v2667_v28, %v2666_v32  ;;  %v2939_v18 = vmul.bf16 %v10387_v47, %v10438_v0  ;;  %v12514_v20 = vpack.c.bf16 %v9999_v53, %v9996_v50  ;;  %v2854_v32 = vmul.bf16 %v10339_v33, %v10397_v3 }
 0x3fa   : > { %v2977_v21 = vmul.bf16 %v10416_v25, %v10440_v7  ;;  %v2892_v36 = vmul.bf16 %v10353_v54, %v10399_v12  ;;  %v2978_v50 = vmul.bf16 %v10416_v25, %v10438_v0  ;;  %v2893_v53 = vmul.bf16 %v10353_v54, %v10397_v3 }
 0x3fb   : > { %v2932_v0 = vmul.bf16 %v10387_v47, %v10399_v12  ;;  %v2864_v7 = vmul.bf16 %v10339_v33, %v10468_v62  ;;  %v12517_v41 = vpack.c.bf16 %v10199_v16, %v10196_v14  ;;  %v2903_v14 = vmul.bf16 %v10353_v54, %v10468_v62 }
 0x3fc   : > { %v2972_v16 = vmul.bf16 %v10416_v25, %v10397_v3  ;;  %v2942_v35 = vmul.bf16 %v10387_v47, %v10470_v63  ;;  %v2943_v28 = vmul.bf16 %v10387_v47, %v10468_v62 }
 0x3fe   : > { %6874 = vmatpush3.bf16.xpose.msra.mxu0 %v2966_v31  ;;  %v12515_v31 = vpack.c.bf16 %v10069_v37, %v10066_v38  ;;  %v2863_v38 = vmul.bf16 %v10339_v33, %v10470_v63  ;;  %v12516_v37 = vpack.c.bf16 %v10153_v52, %v10150_v44  ;;  %v2902_v44 = vmul.bf16 %v10353_v54, %v10470_v63 }
 0x3ff   : > { %6948 = vmatpush3.bf16.xpose.msra.mxu1 %v2934_v9  ;;  %6879 = vmatprep.subr.bf16.mxu0 %v2849_v43  ;;  %v2933_v9 = vmul.bf16 %v10387_v47, %v10397_v3  ;;  %v2971_v52 = vmul.bf16 %v10416_v25, %v10399_v12  ;;  %v2857_v12 = vmul.bf16 %v10339_v33, %v10428_v49 }
 0x400   : > { %6949 = vmatprep.subr.bf16.mxu1 %v2935_v6 }
 0x405   : > { %6876 = vmatmul.mubr.bf16.vlgmr.msra.gmra.mrb[96].mxu0 %v12510_v1 }
 0x406   : > { %6880 = vmatpush3.bf16.xpose.msra.mxu0 %v2849_v43  ;;  %6895 = vmatprep.mubr.bf16.mxu0 %v12511_v13  ;;  %v12518_v43 = vld [vmem:[#allocation119_spill] sm:$0xff]  ;;  %v12522_v13 = vld [vmem:[#allocation126_spill] sm:$0xff] }
 0x407   : > { %6950 = vmatpush3.bf16.xpose.msra.mxu1 %v2935_v6  ;;  %6881 = vmatprep.subr.bf16.mxu0 %v2850_v40  ;;  %v12519_v3 = vpack.c.bf16 %v10063_v39, %v12518_v43  ;;  %v12520_v6 = vld [vmem:[#allocation34_spill] sm:$0xff]  ;;  %v2982_v39 = vmul.bf16 %v10416_v25, %v10468_v62  ;;  %v10694_v43 = vld [vmem:[#allocation10 + $0x30] sm:$0xff] }
 0x408   : > { %6951 = vmatprep.subr.bf16.mxu1 %v2973_v17  ;;  %v2858_v1 = vmul.bf16 %v10339_v33, %v12520_v6 }
 0x40e   : > { %6882 = vmatpush3.bf16.xpose.msra.mxu0 %v2850_v40  ;;  %v12521_v40 = vld [vmem:[#allocation135_spill] sm:$0xff] }
 0x40f   : > { %6952 = vmatpush3.bf16.xpose.msra.mxu1 %v2973_v17  ;;  %6883 = vmatprep.subr.bf16.mxu0 %v2888_v23  ;;  %v12523_v17 = vpack.c.bf16 %v12521_v40, %v12522_v13  ;;  %v10698_v40 = vld [vmem:[#allocation10 + $0x38] sm:$0xff] }
 0x410   : > { %6953 = vmatprep.subr.bf16.mxu1 %v2974_v8 }
 0x416   : > { %6884 = vmatpush3.bf16.xpose.msra.mxu0 %v2888_v23  ;;  %v2981_v23 = vmul.bf16 %v10416_v25, %v10470_v63  ;;  %v2867_v63 = vmul.bf16 %v10339_v33, %v10494_v4 }
 0x417   : > { %6954 = vmatpush3.bf16.xpose.msra.mxu1 %v2974_v8  ;;  %6885 = vmatprep.subr.bf16.mxu0 %v2889_v61  ;;  %v2896_v8 = vmul.bf16 %v10353_v54, %v10428_v49 }
 0x418   : > { %6979 = vmatprep.subr.bf16.mxu1 %v2859_v19 }
 0x41e   : > { %6956 = vmatmul.mubr.bf16.vlgmr.msra.gmra.mrb[232].mxu1 %v12512_v58  ;;  %6886 = vmatpush3.bf16.xpose.msra.mxu0 %v2889_v61  ;;  %v2897_v61 = vmul.bf16 %v10353_v54, %v12520_v6  ;;  %v10662_v58 = vld [vmem:[#allocation10] sm:$0xff] }
 0x41f   : > { %6980 = vmatpush3.bf16.xpose.msra.mxu1 %v2859_v19  ;;  %6995 = vmatprep.mubr.bf16.mxu1 %v12513_v2  ;;  %v10660_v19 = vld [vmem:[#allocation10 + $0x10] sm:$0xff] }
 0x420   : > { %6887 = vmatprep.subr.bf16.mxu0 %v2928_v15  ;;  %6981 = vmatprep.subr.bf16.mxu1 %v2860_v56 }
 0x426   : > { %6888 = vmatpush3.bf16.xpose.msra.mxu0 %v2928_v15 }
 0x427   : > { %6982 = vmatpush3.bf16.xpose.msra.mxu1 %v2860_v56  ;;  %6889 = vmatprep.subr.bf16.mxu0 %v2929_v42  ;;  %v10664_v56 = vld [vmem:[#allocation10 + $0x18] sm:$0xff] }
 0x428   : > { %6983 = vmatprep.subr.bf16.mxu1 %v2898_v29 }
 0x42e   : > { %6890 = vmatpush3.bf16.xpose.msra.mxu0 %v2929_v42  ;;  %v10667_v42 = vld [vmem:[#allocation10 + $0x8] sm:$0xff] }
 0x42f   : > { %6984 = vmatpush3.bf16.xpose.msra.mxu1 %v2898_v29  ;;  %6891 = vmatprep.subr.bf16.mxu0 %v2967_v51 }
 0x430   : > { %6985 = vmatprep.subr.bf16.mxu1 %v2899_v60 }
 0x436   : > { %6892 = vmatpush3.bf16.xpose.msra.mxu0 %v2967_v51 }
 0x437   : > { %6986 = vmatpush3.bf16.xpose.msra.mxu1 %v2899_v60  ;;  %6893 = vmatprep.subr.bf16.mxu0 %v2968_v30 }
 0x438   : > { %6987 = vmatprep.subr.bf16.mxu1 %v2938_v22 }
 0x43e   : > { %6894 = vmatpush3.bf16.xpose.msra.mxu0 %v2968_v30 }
 0x43f   : > { %6988 = vmatpush3.bf16.xpose.msra.mxu1 %v2938_v22  ;;  %6919 = vmatprep.subr.bf16.mxu0 %v2853_v34 }
 0x440   : > { %6989 = vmatprep.subr.bf16.mxu1 %v2939_v18 }
 0x445   : > { %6896 = vmatmul.mubr.bf16.vlgmr.msra.gmra.mrb[100].mxu0 %v12514_v20 }
 0x446   : > { %6920 = vmatpush3.bf16.xpose.msra.mxu0 %v2853_v34  ;;  %6935 = vmatprep.mubr.bf16.mxu0 %v12515_v31  ;;  %v12524_v31 = vld [vmem:[#allocation65_spill] sm:$0xff] }
 0x447   : > { %6990 = vmatpush3.bf16.xpose.msra.mxu1 %v2939_v18  ;;  %6921 = vmatprep.subr.bf16.mxu0 %v2854_v32 }
 0x448   : > { %6991 = vmatprep.subr.bf16.mxu1 %v2977_v21 }
 0x44e   : > { %6922 = vmatpush3.bf16.xpose.msra.mxu0 %v2854_v32 }
 0x44f   : > { %6992 = vmatpush3.bf16.xpose.msra.mxu1 %v2977_v21  ;;  %6923 = vmatprep.subr.bf16.mxu0 %v2892_v36  ;;  %v12525_v21 = vld [vmem:[#allocation51_spill] sm:$0xff] }
 0x450   : > { %6993 = vmatprep.subr.bf16.mxu1 %v2978_v50 }
 0x456   : > { %6924 = vmatpush3.bf16.xpose.msra.mxu0 %v2892_v36  ;;  %v12526_v36 = vpack.c.bf16 %v12524_v31, %v12525_v21  ;;  %v12530_v21 = vld [vmem:[#allocation127_spill] sm:$0xff] }
 0x457   : > { %6994 = vmatpush3.bf16.xpose.msra.mxu1 %v2978_v50  ;;  %6925 = vmatprep.subr.bf16.mxu0 %v2893_v53  ;;  %v2936_v50 = vmul.bf16 %v10387_v47, %v10428_v49 }
 0x458   : > { %7019 = vmatprep.subr.bf16.mxu1 %v2863_v38 }
 0x45e   : > { %6996 = vmatmul.mubr.bf16.vlgmr.msra.gmra.mrb[236].mxu1 %v12516_v37  ;;  %6926 = vmatpush3.bf16.xpose.msra.mxu0 %v2893_v53  ;;  %v2868_v53 = vmul.bf16 %v10339_v33, %v10492_v11  ;;  %v12528_v37 = vld [vmem:[#allocation167_spill] sm:$0xff] }
 0x45f   : > { %7020 = vmatpush3.bf16.xpose.msra.mxu1 %v2863_v38  ;;  %7035 = vmatprep.mubr.bf16.mxu1 %v12517_v41  ;;  %v12527_v38 = vld [vmem:[#allocation166_spill] sm:$0xff]  ;;  %v2906_v41 = vmul.bf16 %v10353_v54, %v10494_v4 }
 0x460   : > { %6927 = vmatprep.subr.bf16.mxu0 %v2932_v0  ;;  %7021 = vmatprep.subr.bf16.mxu1 %v2864_v7 }
 0x466   : > { %6928 = vmatpush3.bf16.xpose.msra.mxu0 %v2932_v0  ;;  %v12529_v0 = vpack.c.bf16 %v12527_v38, %v12528_v37  ;;  %v12533_v38 = vld [vmem:[#allocation142_spill] sm:$0xff]  ;;  %v12534_v37 = vld [vmem:[#allocation143_spill] sm:$0xff] }
 0x467   : > { %7022 = vmatpush3.bf16.xpose.msra.mxu1 %v2864_v7  ;;  %6929 = vmatprep.subr.bf16.mxu0 %v2933_v9  ;;  %v2937_v7 = vmul.bf16 %v10387_v47, %v12520_v6 }
 0x468   : > { %7023 = vmatprep.subr.bf16.mxu1 %v2902_v44 }
 0x46e   : > { %6930 = vmatpush3.bf16.xpose.msra.mxu0 %v2933_v9 }
 0x46f   : > { %7024 = vmatpush3.bf16.xpose.msra.mxu1 %v2902_v44  ;;  %6931 = vmatprep.subr.bf16.mxu0 %v2971_v52 }
 0x470   : > { %7025 = vmatprep.subr.bf16.mxu1 %v2903_v14 }
 0x476   : > { %6932 = vmatpush3.bf16.xpose.msra.mxu0 %v2971_v52 }
 0x477   : > { %7026 = vmatpush3.bf16.xpose.msra.mxu1 %v2903_v14  ;;  %6933 = vmatprep.subr.bf16.mxu0 %v2972_v16 }
 0x478   : > { %7027 = vmatprep.subr.bf16.mxu1 %v2942_v35 }
 0x47e   : > { %6934 = vmatpush3.bf16.xpose.msra.mxu0 %v2972_v16 }
 0x47f   : > { %7028 = vmatpush3.bf16.xpose.msra.mxu1 %v2942_v35  ;;  %6959 = vmatprep.subr.bf16.mxu0 %v2857_v12 }
 0x480   : > { %7029 = vmatprep.subr.bf16.mxu1 %v2943_v28 }
 0x485   : > { %6936 = vmatmul.mubr.bf16.vlgmr.msra.gmra.mrb[104].mxu0 %v12519_v3  ;;  %v10696_v3 = vld [vmem:[#allocation10 + $0x20] sm:$0xff] }
 0x486   : > { %6960 = vmatpush3.bf16.xpose.msra.mxu0 %v2857_v12  ;;  %6975 = vmatprep.mubr.bf16.mxu0 %v12523_v17  ;;  %v2975_v12 = vmul.bf16 %v10416_v25, %v10428_v49 }
 0x487   : > { %7030 = vmatpush3.bf16.xpose.msra.mxu1 %v2943_v28  ;;  %6961 = vmatprep.subr.bf16.mxu0 %v2858_v1  ;;  %v2907_v28 = vmul.bf16 %v10353_v54, %v10492_v11 }
 0x488   : > { %7031 = vmatprep.subr.bf16.mxu1 %v2981_v23 }
 0x48e   : > { %6962 = vmatpush3.bf16.xpose.msra.mxu0 %v2858_v1 }
 0x48f   : > { %7032 = vmatpush3.bf16.xpose.msra.mxu1 %v2981_v23  ;;  %6963 = vmatprep.subr.bf16.mxu0 %v2896_v8  ;;  %v10701_v23 = vld [vmem:[#allocation10 + $0x28] sm:$0xff] }
 0x490   : > { %7033 = vmatprep.subr.bf16.mxu1 %v2982_v39 }
 0x496   : > { %6964 = vmatpush3.bf16.xpose.msra.mxu0 %v2896_v8 }
 0x497   : > { %7034 = vmatpush3.bf16.xpose.msra.mxu1 %v2982_v39  ;;  %6965 = vmatprep.subr.bf16.mxu0 %v2897_v61 }
 0x498   : > { %7059 = vmatprep.subr.bf16.mxu1 %v2867_v63  ;;  %v6857_v15 = vpop.f32.mrb[92].mxu0 }
 0x499   : > { %v3174_v62 = vadd.f32 %v6857_v15, %v10660_v19  ;;  %v3165_v2 = vpop.f32.mrb[93].mxu0 }
 0x49a   : > { %v3166_v29 = vadd.f32 %v3165_v2, %v10662_v58  ;;  %v6858_v51 = vpop.f32.mrb[94].mxu0  ;;  %v2976_v2 = vmul.bf16 %v10416_v25, %v12520_v6  ;;  %v2947_v6 = vmul.bf16 %v10387_v47, %v10492_v11 }
 0x49b   : > { %v3919_v60 = vmul.f32 1.442695, %v3174_v62  ;;  %v3177_v30 = vadd.f32 %v6858_v51, %v10664_v56  ;;  %v3168_v22 = vpop.f32.mrb[95].mxu0  ;;  %v2946_v51 = vmul.bf16 %v10387_v47, %v10494_v4 }
 0x49c   : > { %v3915_v34 = vmul.f32 1.442695, %v3166_v29  ;;  %v3169_v18 = vadd.f32 %v3168_v22, %v10667_v42 }
 0x49d   : > { %8105 = vpow2.f32 %v3919_v60  ;;  %v3921_v20 = vmul.f32 1.442695, %v3177_v30  ;;  %v2861_v30 = vmul.bf16 %v10339_v33, %v10452_v27 }
 0x49e   : > { %8107 = vpow2.f32 %v3915_v34  ;;  %v3917_v32 = vmul.f32 1.442695, %v3169_v18  ;;  %7036 = vmatmul.mubr.bf16.vlgmr.msra.gmra.mrb[240].mxu1 %v12526_v36  ;;  %6966 = vmatpush3.bf16.xpose.msra.mxu0 %v2897_v61  ;;  %v12531_v36 = vld [vmem:[#allocation118_spill] sm:$0xff] }
 0x49f   : > { %8109 = vpow2.f32 %v3921_v20  ;;  %7060 = vmatpush3.bf16.xpose.msra.mxu1 %v2867_v63  ;;  %7075 = vmatprep.mubr.bf16.mxu1 %v12529_v0  ;;  %v12535_v0 = vpack.c.bf16 %v12533_v38, %v12534_v37  ;;  %v2911_v38 = vmul.bf16 %v10353_v54, %v10522_v57 }
 0x4a0   : > { %8111 = vpow2.f32 %v3917_v32  ;;  %6967 = vmatprep.subr.bf16.mxu0 %v2936_v50  ;;  %7061 = vmatprep.subr.bf16.mxu1 %v2868_v53 }
 0x4a6   : > { %6968 = vmatpush3.bf16.xpose.msra.mxu0 %v2936_v50  ;;  %v12532_v50 = vpack.c.bf16 %v12530_v21, %v12531_v36 }
 0x4a7   : > { %v8106_v9 = vpop.eup %8105  ;;  %7062 = vmatpush3.bf16.xpose.msra.mxu1 %v2868_v53  ;;  %6969 = vmatprep.subr.bf16.mxu0 %v2937_v7  ;;  %v2862_v53 = vmul.bf16 %v10339_v33, %v10450_v24 }
 0x4a8   : > { %v8108_v44 = vpop.eup %8107  ;;  %7063 = vmatprep.subr.bf16.mxu1 %v2906_v41 }
 0x4a9   : > { %v8110_v52 = vpop.eup %8109 }
 0x4aa   : > { %v8112_v14 = vpop.eup %8111  ;;  %v10686_v16 = vpack.c.bf16 %v8110_v52, %v8106_v9  ;;  %v2986_v9 = vmul.bf16 %v10416_v25, %v10492_v11 }
 0x4ab   : > { %v10688_v35 = vpack.c.bf16 %v8112_v14, %v8108_v44  ;;  %v2901_v44 = vmul.bf16 %v10353_v54, %v10450_v24 }
 0x4ae   : > { %6970 = vmatpush3.bf16.xpose.msra.mxu0 %v2937_v7  ;;  %v2985_v7 = vmul.bf16 %v10416_v25, %v10494_v4  ;;  %v2871_v4 = vmul.bf16 %v10339_v33, %v10524_v46 }
 0x4af   : > { %7064 = vmatpush3.bf16.xpose.msra.mxu1 %v2906_v41  ;;  %6971 = vmatprep.subr.bf16.mxu0 %v2975_v12  ;;  %v2900_v41 = vmul.bf16 %v10353_v54, %v10452_v27 }
 0x4b0   : > { %7065 = vmatprep.subr.bf16.mxu1 %v2907_v28 }
 0x4b1   : > { %v6917_v1 = vpop.f32.mrb[228].mxu1 }
 0x4b2   : > { %v3321_v13 = vadd.f32 %v6917_v1, %v10694_v43  ;;  %v3312_v17 = vpop.f32.mrb[229].mxu1 }
 0x4b3   : > { %v3313_v49 = vadd.f32 %v3312_v17, %v10696_v3  ;;  %v6918_v8 = vpop.f32.mrb[230].mxu1 }
 0x4b4   : > { %v3943_v39 = vmul.f32 1.442695, %v3321_v13  ;;  %v3324_v61 = vadd.f32 %v6918_v8, %v10698_v40  ;;  %v3315_v63 = vpop.f32.mrb[231].mxu1 }
 0x4b5   : > { %v3939_v15 = vmul.f32 1.442695, %v3313_v49  ;;  %v3316_v62 = vadd.f32 %v3315_v63, %v10701_v23  ;;  %v12536_v63 = vld [vmem:[#allocation81_spill] sm:$0xff] }
 0x4b6   : > { %8113 = vpow2.f32 %v3943_v39  ;;  %v3945_v29 = vmul.f32 1.442695, %v3324_v61  ;;  %6972 = vmatpush3.bf16.xpose.msra.mxu0 %v2975_v12 }
 0x4b7   : > { %8115 = vpow2.f32 %v3939_v15  ;;  %v3941_v60 = vmul.f32 1.442695, %v3316_v62  ;;  %7066 = vmatpush3.bf16.xpose.msra.mxu1 %v2907_v28  ;;  %6973 = vmatprep.subr.bf16.mxu0 %v2976_v2  ;;  %v12537_v15 = vld [vmem:[#allocation158_spill] sm:$0xff] }
 0x4b8   : > { %8117 = vpow2.f32 %v3945_v29  ;;  %7067 = vmatprep.subr.bf16.mxu1 %v2946_v51  ;;  %v12538_v62 = vpack.c.bf16 %v12536_v63, %v12537_v15  ;;  %v2872_v29 = vmul.bf16 %v10339_v33, %v10522_v57  ;;  %v12542_v15 = vld [vmem:[#allocation61_spill] sm:$0xff] }
 0x4b9   : > { %8119 = vpow2.f32 %v3941_v60  ;;  %v12540_v60 = vld [vmem:[#allocation182_spill] sm:$0xff] }
 0x4be   : > { %6974 = vmatpush3.bf16.xpose.msra.mxu0 %v2976_v2  ;;  %v2940_v2 = vmul.bf16 %v10387_v47, %v10452_v27 }
 0x4bf   : > { %7068 = vmatpush3.bf16.xpose.msra.mxu1 %v2946_v51  ;;  %6999 = vmatprep.subr.bf16.mxu0 %v2861_v30  ;;  %v12539_v51 = vld [vmem:[#allocation191_spill] sm:$0xff] }
 0x4c0   : > { %v8114_v22 = vpop.eup %8113  ;;  %7069 = vmatprep.subr.bf16.mxu1 %v2947_v6 }
 0x4c1   : > { %v8116_v34 = vpop.eup %8115 }
 0x4c2   : > { %v8118_v18 = vpop.eup %8117 }
 0x4c3   : > { %v8120_v20 = vpop.eup %8119  ;;  %v10714_v32 = vpack.c.bf16 %v8118_v18, %v8114_v22  ;;  %v2910_v22 = vmul.bf16 %v10353_v54, %v10524_v46 }
 0x4c4   : > { %v10716_v31 = vpack.c.bf16 %v8120_v20, %v8116_v34 }
 0x4c5   : > { %6976 = vmatmul.mubr.bf16.vlgmr.msra.gmra.mrb[108].mxu0 %v12532_v50 }
 0x4c6   : > { %7000 = vmatpush3.bf16.xpose.msra.mxu0 %v2861_v30  ;;  %7015 = vmatprep.mubr.bf16.mxu0 %v12535_v0  ;;  %v12541_v30 = vpack.c.bf16 %v12539_v51, %v12540_v60  ;;  %v12546_v60 = vld [vmem:[#allocation159_spill] sm:$0xff] }
 0x4c7   : > { %7070 = vmatpush3.bf16.xpose.msra.mxu1 %v2947_v6  ;;  %7001 = vmatprep.subr.bf16.mxu0 %v2862_v53  ;;  %v2941_v6 = vmul.bf16 %v10387_v47, %v10450_v24 }
 0x4c8   : > { %7071 = vmatprep.subr.bf16.mxu1 %v2985_v7 }
 0x4ce   : > { %7002 = vmatpush3.bf16.xpose.msra.mxu0 %v2862_v53  ;;  %v2979_v53 = vmul.bf16 %v10416_v25, %v10452_v27 }
 0x4cf   : > { %7072 = vmatpush3.bf16.xpose.msra.mxu1 %v2985_v7  ;;  %7003 = vmatprep.subr.bf16.mxu0 %v2900_v41 }
 0x4d0   : > { %7073 = vmatprep.subr.bf16.mxu1 %v2986_v9 }
 0x4d6   : > { %7004 = vmatpush3.bf16.xpose.msra.mxu0 %v2900_v41 }
 0x4d7   : > { %7074 = vmatpush3.bf16.xpose.msra.mxu1 %v2986_v9  ;;  %7005 = vmatprep.subr.bf16.mxu0 %v2901_v44 }
 0x4d8   : > { %7099 = vmatprep.subr.bf16.mxu1 %v2871_v4  ;;  %v6877_v52 = vpop.f32.mrb[96].mxu0 }
 0x4d9   : > { %v3223_v14 = vadd.f32 %v6877_v52, %v10694_v43  ;;  %v3214_v12 = vpop.f32.mrb[97].mxu0 }
 0x4da   : > { %v3215_v28 = vadd.f32 %v3214_v12, %v10696_v3  ;;  %v6878_v11 = vpop.f32.mrb[98].mxu0  ;;  %v2980_v12 = vmul.bf16 %v10416_v25, %v10450_v24  ;;  %v2951_v24 = vmul.bf16 %v10387_v47, %v10522_v57 }
 0x4db   : > { %v3927_v1 = vmul.f32 1.442695, %v3223_v14  ;;  %v3226_v13 = vadd.f32 %v6878_v11, %v10698_v40  ;;  %v3217_v17 = vpop.f32.mrb[99].mxu0  ;;  %v2950_v11 = vmul.bf16 %v10387_v47, %v10524_v46 }
 0x4dc   : > { %v3923_v49 = vmul.f32 1.442695, %v3215_v28  ;;  %v3218_v8 = vadd.f32 %v3217_v17, %v10701_v23 }
 0x4dd   : > { %8121 = vpow2.f32 %v3927_v1  ;;  %v3929_v39 = vmul.f32 1.442695, %v3226_v13  ;;  %v2865_v13 = vmul.bf16 %v10339_v33, %v10482_v45 }
 0x4de   : > { %8123 = vpow2.f32 %v3923_v49  ;;  %v3925_v61 = vmul.f32 1.442695, %v3218_v8  ;;  %7076 = vmatmul.mubr.bf16.vlgmr.msra.gmra.mrb[244].mxu1 %v12538_v62  ;;  %7006 = vmatpush3.bf16.xpose.msra.mxu0 %v2901_v44  ;;  %v12543_v62 = vld [vmem:[#allocation134_spill] sm:$0xff] }
 0x4df   : > { %8125 = vpow2.f32 %v3929_v39  ;;  %7100 = vmatpush3.bf16.xpose.msra.mxu1 %v2871_v4  ;;  %7115 = vmatprep.mubr.bf16.mxu1 %v12541_v30  ;;  %v12547_v30 = vld [vmem:[#allocation150_spill] sm:$0xff] }
 0x4e0   : > { %8127 = vpow2.f32 %v3925_v61  ;;  %7007 = vmatprep.subr.bf16.mxu0 %v2940_v2  ;;  %7101 = vmatprep.subr.bf16.mxu1 %v2872_v29 }
 0x4e6   : > { %7008 = vmatpush3.bf16.xpose.msra.mxu0 %v2940_v2  ;;  %v12544_v2 = vpack.c.bf16 %v12542_v15, %v12543_v62 }
 0x4e7   : > { %v8122_v34 = vpop.eup %8121  ;;  %7102 = vmatpush3.bf16.xpose.msra.mxu1 %v2872_v29  ;;  %7009 = vmatprep.subr.bf16.mxu0 %v2941_v6  ;;  %v12545_v29 = vld [vmem:[#allocation30_spill] sm:$0xff] }
 0x4e8   : > { %v8124_v18 = vpop.eup %8123  ;;  %7103 = vmatprep.subr.bf16.mxu1 %v2910_v22  ;;  %v2866_v51 = vmul.bf16 %v10339_v33, %v12545_v29 }
 0x4e9   : > { %v8126_v20 = vpop.eup %8125 }
 0x4ea   : > { %v8128_v21 = vpop.eup %8127  ;;  %v10754_v36 = vpack.c.bf16 %v8126_v20, %v8122_v34  ;;  %v2904_v34 = vmul.bf16 %v10353_v54, %v10482_v45  ;;  %v2905_v20 = vmul.bf16 %v10353_v54, %v12545_v29 }
 0x4eb   : > { %v10756_v50 = vpack.c.bf16 %v8128_v21, %v8124_v18  ;;  %v2990_v18 = vmul.bf16 %v10416_v25, %v10522_v57 }
 0x4ee   : > { %7010 = vmatpush3.bf16.xpose.msra.mxu0 %v2941_v6  ;;  %v12548_v6 = vpack.c.bf16 %v12546_v60, %v12547_v30  ;;  %v2983_v60 = vmul.bf16 %v10416_v25, %v10482_v45  ;;  %v2915_v30 = vmul.bf16 %v10353_v54, %v10546_v10 }
 0x4ef   : > { %7104 = vmatpush3.bf16.xpose.msra.mxu1 %v2910_v22  ;;  %7011 = vmatprep.subr.bf16.mxu0 %v2979_v53  ;;  %v2989_v22 = vmul.bf16 %v10416_v25, %v10524_v46  ;;  %v2875_v46 = vmul.bf16 %v10339_v33, %v10548_v59 }
 0x4f0   : > { %7105 = vmatprep.subr.bf16.mxu1 %v2911_v38 }
 0x4f1   : > { %v6957_v37 = vpop.f32.mrb[232].mxu1 }
 0x4f2   : > { %v3419_v0 = vadd.f32 %v6957_v37, %v10694_v43  ;;  %v3410_v7 = vpop.f32.mrb[233].mxu1 }
 0x4f3   : > { %v3411_v41 = vadd.f32 %v3410_v7, %v10696_v3  ;;  %v6958_v9 = vpop.f32.mrb[234].mxu1 }
 0x4f4   : > { %v3959_v44 = vmul.f32 1.442695, %v3419_v0  ;;  %v3422_v4 = vadd.f32 %v6958_v9, %v10698_v40  ;;  %v3413_v52 = vpop.f32.mrb[235].mxu1 }
 0x4f5   : > { %v3955_v14 = vmul.f32 1.442695, %v3411_v41  ;;  %v3414_v27 = vadd.f32 %v3413_v52, %v10701_v23 }
 0x4f6   : > { %8129 = vpow2.f32 %v3959_v44  ;;  %v3961_v28 = vmul.f32 1.442695, %v3422_v4  ;;  %7012 = vmatpush3.bf16.xpose.msra.mxu0 %v2979_v53 }
 0x4f7   : > { %8131 = vpow2.f32 %v3955_v14  ;;  %v3957_v1 = vmul.f32 1.442695, %v3414_v27  ;;  %7106 = vmatpush3.bf16.xpose.msra.mxu1 %v2911_v38  ;;  %7013 = vmatprep.subr.bf16.mxu0 %v2980_v12  ;;  %v12549_v14 = vld [vmem:[#allocation183_spill] sm:$0xff] }
 0x4f8   : > { %8133 = vpow2.f32 %v3961_v28  ;;  %7107 = vmatprep.subr.bf16.mxu1 %v2950_v11  ;;  %v12550_v27 = vld [vmem:[#allocation75_spill] sm:$0xff]  ;;  %v2944_v28 = vmul.bf16 %v10387_v47, %v10482_v45 }
 0x4f9   : > { %8135 = vpow2.f32 %v3957_v1  ;;  %v12552_v1 = vld [vmem:[#allocation22_spill] sm:$0xff] }
 0x4fe   : > { %7014 = vmatpush3.bf16.xpose.msra.mxu0 %v2980_v12  ;;  %v12551_v12 = vpack.c.bf16 %v12549_v14, %v12550_v27 }
 0x4ff   : > { %7108 = vmatpush3.bf16.xpose.msra.mxu1 %v2950_v11  ;;  %7039 = vmatprep.subr.bf16.mxu0 %v2865_v13  ;;  %v2876_v11 = vmul.bf16 %v10339_v33, %v10546_v10 }
 0x500   : > { %v8130_v17 = vpop.eup %8129  ;;  %7109 = vmatprep.subr.bf16.mxu1 %v2951_v24 }
 0x501   : > { %v8132_v49 = vpop.eup %8131 }
 0x502   : > { %v8134_v8 = vpop.eup %8133 }
 0x503   : > { %v8136_v39 = vpop.eup %8135  ;;  %v10774_v61 = vpack.c.bf16 %v8134_v8, %v8130_v17  ;;  %v2945_v17 = vmul.bf16 %v10387_v47, %v12545_v29 }
 0x504   : > { %v10776_v63 = vpack.c.bf16 %v8136_v39, %v8132_v49  ;;  %v2914_v49 = vmul.bf16 %v10353_v54, %v10548_v59 }
 0x505   : > { %7016 = vmatmul.mubr.bf16.vlgmr.msra.gmra.mrb[112].mxu0 %v12544_v2 }
 0x506   : > { %7040 = vmatpush3.bf16.xpose.msra.mxu0 %v2865_v13  ;;  %7055 = vmatprep.mubr.bf16.mxu0 %v12548_v6  ;;  %v12553_v13 = vld [vmem:[#allocation26_spill] sm:$0xff] }
 0x507   : > { %7110 = vmatpush3.bf16.xpose.msra.mxu1 %v2951_v24  ;;  %7041 = vmatprep.subr.bf16.mxu0 %v2866_v51  ;;  %v12554_v24 = vpack.c.bf16 %v12552_v1, %v12553_v13  ;;  %v2870_v1 = vmul.bf16 %v10339_v33, %v10510_v5  ;;  %v12558_v13 = vld [vmem:[#allocation85_spill] sm:$0xff] }
 0x508   : > { %7111 = vmatprep.subr.bf16.mxu1 %v2989_v22 }
 0x50e   : > { %7042 = vmatpush3.bf16.xpose.msra.mxu0 %v2866_v51 }
 0x50f   : > { %7112 = vmatpush3.bf16.xpose.msra.mxu1 %v2989_v22  ;;  %7043 = vmatprep.subr.bf16.mxu0 %v2904_v34 }
 0x510   : > { %7113 = vmatprep.subr.bf16.mxu1 %v2990_v18 }
 0x516   : > { %7044 = vmatpush3.bf16.xpose.msra.mxu0 %v2904_v34 }
 0x517   : > { %7114 = vmatpush3.bf16.xpose.msra.mxu1 %v2990_v18  ;;  %7045 = vmatprep.subr.bf16.mxu0 %v2905_v20 }
 0x518   : > { %7139 = vmatprep.subr.bf16.mxu1 %v2875_v46  ;;  %v6897_v21 = vpop.f32.mrb[100].mxu0 }
 0x519   : > { %v3272_v53 = vadd.f32 %v6897_v21, %v10660_v19  ;;  %v3263_v38 = vpop.f32.mrb[101].mxu0 }
 0x51a   : > { %v3264_v37 = vadd.f32 %v3263_v38, %v10662_v58  ;;  %v6898_v57 = vpop.f32.mrb[102].mxu0 }
 0x51b   : > { %v3935_v0 = vmul.f32 1.442695, %v3272_v53  ;;  %v3275_v7 = vadd.f32 %v6898_v57, %v10664_v56  ;;  %v3266_v41 = vpop.f32.mrb[103].mxu0 }
 0x51c   : > { %v3931_v9 = vmul.f32 1.442695, %v3264_v37  ;;  %v3267_v44 = vadd.f32 %v3266_v41, %v10667_v42  ;;  %v2984_v37 = vmul.bf16 %v10416_v25, %v12545_v29  ;;  %v2869_v41 = vmul.bf16 %v10339_v33, %v10512_v48 }
 0x51d   : > { %8137 = vpow2.f32 %v3935_v0  ;;  %v3937_v4 = vmul.f32 1.442695, %v3275_v7  ;;  %v2954_v0 = vmul.bf16 %v10387_v47, %v10548_v59  ;;  %v2955_v29 = vmul.bf16 %v10387_v47, %v10546_v10 }
 0x51e   : > { %8139 = vpow2.f32 %v3931_v9  ;;  %v3933_v52 = vmul.f32 1.442695, %v3267_v44  ;;  %7116 = vmatmul.mubr.bf16.vlgmr.msra.gmra.mrb[248].mxu1 %v12551_v12  ;;  %7046 = vmatpush3.bf16.xpose.msra.mxu0 %v2905_v20  ;;  %v12555_v12 = vld [vmem:[#allocation151_spill] sm:$0xff] }
 0x51f   : > { %8141 = vpow2.f32 %v3937_v4  ;;  %7140 = vmatpush3.bf16.xpose.msra.mxu1 %v2875_v46  ;;  %7155 = vmatprep.mubr.bf16.mxu1 %v12554_v24  ;;  %v12559_v24 = vld [vmem:[#allocation71_spill] sm:$0xff] }
 0x520   : > { %8143 = vpow2.f32 %v3933_v52  ;;  %7047 = vmatprep.subr.bf16.mxu0 %v2944_v28  ;;  %7141 = vmatprep.subr.bf16.mxu1 %v2876_v11 }
 0x526   : > { %7048 = vmatpush3.bf16.xpose.msra.mxu0 %v2944_v28  ;;  %v12556_v28 = vld [vmem:[#allocation55_spill] sm:$0xff] }
 0x527   : > { %v8138_v8 = vpop.eup %8137  ;;  %7142 = vmatpush3.bf16.xpose.msra.mxu1 %v2876_v11  ;;  %7049 = vmatprep.subr.bf16.mxu0 %v2945_v17  ;;  %v12557_v11 = vpack.c.bf16 %v12555_v12, %v12556_v28 }
 0x528   : > { %v8140_v39 = vpop.eup %8139  ;;  %7143 = vmatprep.subr.bf16.mxu1 %v2914_v49 }
 0x529   : > { %v8142_v15 = vpop.eup %8141 }
 0x52a   : > { %v8144_v62 = vpop.eup %8143  ;;  %v10814_v2 = vpack.c.bf16 %v8142_v15, %v8138_v8  ;;  %v2908_v8 = vmul.bf16 %v10353_v54, %v10512_v48  ;;  %v2909_v15 = vmul.bf16 %v10353_v54, %v10510_v5 }
 0x52b   : > { %v10816_v51 = vpack.c.bf16 %v8144_v62, %v8140_v39  ;;  %v2994_v39 = vmul.bf16 %v10416_v25, %v10546_v10  ;;  %v12561_v62 = vld [vmem:[#allocation106_spill] sm:$0xff] }
 0x52e   : > { %7050 = vmatpush3.bf16.xpose.msra.mxu0 %v2945_v17  ;;  %v12560_v17 = vpack.c.bf16 %v12558_v13, %v12559_v24  ;;  %v2987_v24 = vmul.bf16 %v10416_v25, %v10512_v48 }
 0x52f   : > { %7144 = vmatpush3.bf16.xpose.msra.mxu1 %v2914_v49  ;;  %7051 = vmatprep.subr.bf16.mxu0 %v2983_v60  ;;  %v2993_v49 = vmul.bf16 %v10416_v25, %v10548_v59  ;;  %v2995_v59 = vmul.bf16 %v10339_v33, %v12561_v62 }
 0x530   : > { %7145 = vmatprep.subr.bf16.mxu1 %v2915_v30 }
 0x531   : > { %v6997_v6 = vpop.f32.mrb[236].mxu1 }
 0x532   : > { %v3517_v22 = vadd.f32 %v6997_v6, %v10694_v43  ;;  %v3508_v34 = vpop.f32.mrb[237].mxu1 }
 0x533   : > { %v3509_v18 = vadd.f32 %v3508_v34, %v10696_v3  ;;  %v6998_v20 = vpop.f32.mrb[238].mxu1 }
 0x534   : > { %v3975_v46 = vmul.f32 1.442695, %v3517_v22  ;;  %v3520_v21 = vadd.f32 %v6998_v20, %v10698_v40  ;;  %v3511_v53 = vpop.f32.mrb[239].mxu1 }
 0x535   : > { %v3971_v38 = vmul.f32 1.442695, %v3509_v18  ;;  %v3512_v45 = vadd.f32 %v3511_v53, %v10701_v23 }
 0x536   : > { %8145 = vpow2.f32 %v3975_v46  ;;  %v3977_v57 = vmul.f32 1.442695, %v3520_v21  ;;  %7052 = vmatpush3.bf16.xpose.msra.mxu0 %v2983_v60 }
 0x537   : > { %8147 = vpow2.f32 %v3971_v38  ;;  %v3973_v7 = vmul.f32 1.442695, %v3512_v45  ;;  %7146 = vmatpush3.bf16.xpose.msra.mxu1 %v2915_v30  ;;  %7053 = vmatprep.subr.bf16.mxu0 %v2984_v37  ;;  %v12562_v45 = vld [vmem:[#allocation95_spill] sm:$0xff] }
 0x538   : > { %8149 = vpow2.f32 %v3977_v57  ;;  %7147 = vmatprep.subr.bf16.mxu1 %v2954_v0 }
 0x539   : > { %8151 = vpow2.f32 %v3973_v7  ;;  %v12565_v7 = vld [vmem:[#allocation105_spill] sm:$0xff] }
 0x53e   : > { %7054 = vmatpush3.bf16.xpose.msra.mxu0 %v2984_v37  ;;  %v12563_v37 = vld [vmem:[#allocation103_spill] sm:$0xff] }
 0x53f   : > { %7148 = vmatpush3.bf16.xpose.msra.mxu1 %v2954_v0  ;;  %7079 = vmatprep.subr.bf16.mxu0 %v2869_v41  ;;  %v12564_v57 = vpack.c.bf16 %v12562_v45, %v12563_v37  ;;  %v2948_v0 = vmul.bf16 %v10387_v47, %v10512_v48 }
 0x540   : > { %v8146_v9 = vpop.eup %8145  ;;  %7149 = vmatprep.subr.bf16.mxu1 %v2955_v29 }
 0x541   : > { %v8148_v44 = vpop.eup %8147 }
 0x542   : > { %v8150_v4 = vpop.eup %8149 }
 0x543   : > { %v8152_v52 = vpop.eup %8151  ;;  %v10834_v14 = vpack.c.bf16 %v8150_v4, %v8146_v9  ;;  %v2949_v9 = vmul.bf16 %v10387_v47, %v10510_v5 }
 0x544   : > { %v10836_v27 = vpack.c.bf16 %v8152_v52, %v8148_v44  ;;  %v3028_v44 = vmul.bf16 %v10353_v54, %v12565_v7 }
 0x545   : > { %7056 = vmatmul.mubr.bf16.vlgmr.msra.gmra.mrb[116].mxu0 %v12557_v11  ;;  %v3059_v11 = vmul.bf16 %v10387_v47, %v12561_v62 }
 0x546   : > { %7080 = vmatpush3.bf16.xpose.msra.mxu0 %v2869_v41  ;;  %7095 = vmatprep.mubr.bf16.mxu0 %v12560_v17  ;;  %v2996_v41 = vmul.bf16 %v10339_v33, %v12565_v7  ;;  %v3060_v17 = vmul.bf16 %v10387_v47, %v12565_v7 }
 0x547   : > { %7150 = vmatpush3.bf16.xpose.msra.mxu1 %v2955_v29  ;;  %7081 = vmatprep.subr.bf16.mxu0 %v2870_v1  ;;  %v3027_v29 = vmul.bf16 %v10353_v54, %v12561_v62 }
 0x548   : > { %7151 = vmatprep.subr.bf16.mxu1 %v2993_v49 }
 0x54e   : > { %7082 = vmatpush3.bf16.xpose.msra.mxu0 %v2870_v1 }
 0x54f   : > { %7152 = vmatpush3.bf16.xpose.msra.mxu1 %v2993_v49  ;;  %7083 = vmatprep.subr.bf16.mxu0 %v2908_v8 }
 0x550   : > { %7153 = vmatprep.subr.bf16.mxu1 %v2994_v39 }
 0x556   : > { %7084 = vmatpush3.bf16.xpose.msra.mxu0 %v2908_v8 }
 0x557   : > { %7154 = vmatpush3.bf16.xpose.msra.mxu1 %v2994_v39  ;;  %7085 = vmatprep.subr.bf16.mxu0 %v2909_v15 }
 0x558   : > { %7239 = vmatprep.subr.bf16.mxu1 %v2995_v59  ;;  %v6937_v60 = vpop.f32.mrb[104].mxu0 }
 0x559   : > { %v3370_v30 = vadd.f32 %v6937_v60, %v10660_v19  ;;  %v3361_v6 = vpop.f32.mrb[105].mxu0 }
 0x55a   : > { %v3362_v22 = vadd.f32 %v3361_v6, %v10662_v58  ;;  %v6938_v10 = vpop.f32.mrb[106].mxu0 }
 0x55b   : > { %v3951_v34 = vmul.f32 1.442695, %v3370_v30  ;;  %v3373_v18 = vadd.f32 %v6938_v10, %v10664_v56  ;;  %v3364_v20 = vpop.f32.mrb[107].mxu0 }
 0x55c   : > { %v3947_v46 = vmul.f32 1.442695, %v3362_v22  ;;  %v3365_v21 = vadd.f32 %v3364_v20, %v10667_v42 }
 0x55d   : > { %8153 = vpow2.f32 %v3951_v34  ;;  %v3953_v53 = vmul.f32 1.442695, %v3373_v18  ;;  %v2988_v34 = vmul.bf16 %v10416_v25, %v10510_v5  ;;  %v2873_v5 = vmul.bf16 %v10339_v33, %v10536_v55 }
 0x55e   : > { %8155 = vpow2.f32 %v3947_v46  ;;  %v3949_v38 = vmul.f32 1.442695, %v3365_v21  ;;  %7156 = vmatmul.mubr.bf16.vlgmr.msra.gmra.mrb[252].mxu1 %v12564_v57  ;;  %7086 = vmatpush3.bf16.xpose.msra.mxu0 %v2909_v15  ;;  %v3091_v15 = vmul.bf16 %v10416_v25, %v12561_v62  ;;  %v3092_v62 = vmul.bf16 %v10416_v25, %v12565_v7  ;;  %v12566_v46 = vld [vmem:[#allocation112_spill] sm:$0xff] }
 0x55f   : > { %8157 = vpow2.f32 %v3953_v53  ;;  %7240 = vmatpush3.bf16.msra.mxu1 %v2995_v59  ;;  %7255 = vmatprep.mubr.bf16.mxu1 %v10688_v35  ;;  %v2997_v21 = vmul.bf16 %v10339_v33, %v12566_v46  ;;  %v12567_v53 = vld [vmem:[#allocation111_spill] sm:$0xff] }
 0x560   : > { %8159 = vpow2.f32 %v3949_v38  ;;  %7087 = vmatprep.subr.bf16.mxu0 %v2948_v0  ;;  %7241 = vmatprep.subr.bf16.mxu1 %v2996_v41  ;;  %v2998_v38 = vmul.bf16 %v10339_v33, %v12567_v53 }
 0x563   : > { %7242 = vmatpush3.bf16.msra.mxu1 %v2996_v41 }
 0x564   : > { %7243 = vmatprep.subr.bf16.mxu1 %v3027_v29 }
 0x566   : > { %7088 = vmatpush3.bf16.xpose.msra.mxu0 %v2948_v0  ;;  %v3029_v0 = vmul.bf16 %v10353_v54, %v12566_v46 }
 0x567   : > { %v8154_v4 = vpop.eup %8153  ;;  %7244 = vmatpush3.bf16.msra.mxu1 %v3027_v29  ;;  %7089 = vmatprep.subr.bf16.mxu0 %v2949_v9 }
 0x568   : > { %v8156_v52 = vpop.eup %8155  ;;  %7245 = vmatprep.subr.bf16.mxu1 %v3028_v44 }
 0x569   : > { %v8158_v12 = vpop.eup %8157 }
 0x56a   : > { %v8160_v28 = vpop.eup %8159  ;;  %v10876_v1 = vpack.c.bf16 %v8158_v12, %v8154_v4  ;;  %v12571_v12 = vld [vmem:[#allocation91_spill] sm:$0xff] }
 0x56b   : > { %7246 = vmatpush3.bf16.msra.mxu1 %v3028_v44  ;;  %v10878_v13 = vpack.c.bf16 %v8160_v28, %v8156_v52  ;;  %v12569_v44 = vld [vmem:[#allocation175_spill] sm:$0xff]  ;;  %v2874_v52 = vmul.bf16 %v10339_v33, %v10534_v26  ;;  %v12572_v28 = vld [vmem:[#allocation101_spill] sm:$0xff] }
 0x56c   : > { %7247 = vmatprep.subr.bf16.mxu1 %v3059_v11 }
 0x56e   : > { %7090 = vmatpush3.bf16.xpose.msra.mxu0 %v2949_v9  ;;  %v12568_v9 = vld [vmem:[#allocation174_spill] sm:$0xff] }
 0x56f   : > { %7248 = vmatpush3.bf16.msra.mxu1 %v3059_v11  ;;  %7091 = vmatprep.subr.bf16.mxu0 %v2987_v24  ;;  %v12570_v4 = vpack.c.bf16 %v12568_v9, %v12569_v44  ;;  %v12573_v11 = vpack.c.bf16 %v12571_v12, %v12572_v28 }
 0x570   : > { %7249 = vmatprep.subr.bf16.mxu1 %v3060_v17 }
 0x571   : > { %v7037_v49 = vpop.f32.mrb[240].mxu1 }
 0x572   : > { %v3615_v8 = vadd.f32 %v7037_v49, %v10694_v43  ;;  %v3606_v39 = vpop.f32.mrb[241].mxu1  ;;  %v2912_v49 = vmul.bf16 %v10353_v54, %v10536_v55 }
 0x573   : > { %v3607_v59 = vadd.f32 %v3606_v39, %v10696_v3  ;;  %v7038_v60 = vpop.f32.mrb[242].mxu1  ;;  %7250 = vmatpush3.bf16.msra.mxu1 %v3060_v17  ;;  %v3061_v17 = vmul.bf16 %v10387_v47, %v12566_v46  ;;  %v3093_v39 = vmul.bf16 %v10416_v25, %v12566_v46 }
 0x574   : > { %v3991_v30 = vmul.f32 1.442695, %v3615_v8  ;;  %v3618_v48 = vadd.f32 %v7038_v60, %v10698_v40  ;;  %v3609_v6 = vpop.f32.mrb[243].mxu1  ;;  %7251 = vmatprep.subr.bf16.mxu1 %v3091_v15  ;;  %v3062_v8 = vmul.bf16 %v10387_v47, %v12567_v53 }
 0x575   : > { %v3987_v22 = vmul.f32 1.442695, %v3607_v59  ;;  %v3610_v10 = vadd.f32 %v3609_v6, %v10701_v23  ;;  %v3094_v59 = vmul.bf16 %v10416_v25, %v12567_v53 }
 0x576   : > { %8161 = vpow2.f32 %v3991_v30  ;;  %v3993_v18 = vmul.f32 1.442695, %v3618_v48  ;;  %7092 = vmatpush3.bf16.xpose.msra.mxu0 %v2987_v24  ;;  %v3030_v24 = vmul.bf16 %v10353_v54, %v12567_v53  ;;  %v12575_v53 = vld [vmem:[#allocation117_spill] sm:$0xff] }
 0x577   : > { %8163 = vpow2.f32 %v3987_v22  ;;  %v3989_v20 = vmul.f32 1.442695, %v3610_v10  ;;  %7252 = vmatpush3.bf16.msra.mxu1 %v3091_v15  ;;  %7093 = vmatprep.subr.bf16.mxu0 %v2988_v34  ;;  %v2913_v15 = vmul.bf16 %v10353_v54, %v10534_v26  ;;  %v12574_v10 = vld [vmem:[#allocation120_spill] sm:$0xff]  ;;  %v3064_v12 = vmul.bf16 %v10387_v47, %v12575_v53 }
 0x578   : > { %8165 = vpow2.f32 %v3993_v18  ;;  %7253 = vmatprep.subr.bf16.mxu1 %v3092_v62  ;;  %v3063_v9 = vmul.bf16 %v10387_v47, %v12574_v10 }
 0x579   : > { %8167 = vpow2.f32 %v3989_v20 }
 0x57b   : > { %7254 = vmatpush3.bf16.msra.mxu1 %v3092_v62 }
 0x57c   : > { %7259 = vmatprep.subr.bf16.mxu1 %v2997_v21 }
 0x57e   : > { %7256 = vmatmul.mubr.bf16.vlgmr.msra.gmra.mrb[0].mxu1 %v10686_v16  ;;  %7094 = vmatpush3.bf16.xpose.msra.mxu0 %v2988_v34  ;;  %v2999_v34 = vmul.bf16 %v10339_v33, %v12574_v10 }
 0x57f   : > { %7260 = vmatpush3.bf16.msra.mxu1 %v2997_v21  ;;  %7275 = vmatprep.mubr.bf16.mxu1 %v10756_v50 }
 0x580   : > { %v8162_v45 = vpop.eup %8161  ;;  %7119 = vmatprep.subr.bf16.mxu0 %v2873_v5  ;;  %7261 = vmatprep.subr.bf16.mxu1 %v2998_v38 }
 0x581   : > { %v8164_v37 = vpop.eup %8163 }
 0x582   : > { %v8166_v57 = vpop.eup %8165 }
 0x583   : > { %v8168_v7 = vpop.eup %8167  ;;  %7262 = vmatpush3.bf16.msra.mxu1 %v2998_v38  ;;  %v10904_v41 = vpack.c.bf16 %v8166_v57, %v8162_v45  ;;  %v3000_v38 = vmul.bf16 %v10339_v33, %v12575_v53  ;;  %v3032_v45 = vmul.bf16 %v10353_v54, %v12575_v53 }
 0x584   : > { %7263 = vmatprep.subr.bf16.mxu1 %v3029_v0  ;;  %v10906_v29 = vpack.c.bf16 %v8168_v7, %v8164_v37 }
 0x585   : > { %7096 = vmatmul.mubr.bf16.vlgmr.msra.gmra.mrb[120].mxu0 %v12570_v4 }
 0x586   : > { %7120 = vmatpush3.bf16.xpose.msra.mxu0 %v2873_v5  ;;  %7135 = vmatprep.mubr.bf16.mxu0 %v12573_v11 }
 0x587   : > { %7264 = vmatpush3.bf16.msra.mxu1 %v3029_v0  ;;  %7121 = vmatprep.subr.bf16.mxu0 %v2874_v52 }
 0x588   : > { %7265 = vmatprep.subr.bf16.mxu1 %v3030_v24 }
 0x58b   : > { %7266 = vmatpush3.bf16.msra.mxu1 %v3030_v24 }
 0x58c   : > { %7267 = vmatprep.subr.bf16.mxu1 %v3061_v17 }
 0x58e   : > { %7122 = vmatpush3.bf16.xpose.msra.mxu0 %v2874_v52  ;;  %v2991_v52 = vmul.bf16 %v10416_v25, %v10536_v55 }
 0x58f   : > { %7268 = vmatpush3.bf16.msra.mxu1 %v3061_v17  ;;  %7123 = vmatprep.subr.bf16.mxu0 %v2912_v49  ;;  %v3095_v17 = vmul.bf16 %v10416_v25, %v12574_v10 }
 0x590   : > { %7269 = vmatprep.subr.bf16.mxu1 %v3062_v8 }
 0x593   : > { %7270 = vmatpush3.bf16.msra.mxu1 %v3062_v8 }
 0x594   : > { %7271 = vmatprep.subr.bf16.mxu1 %v3093_v39 }
 0x596   : > { %7124 = vmatpush3.bf16.xpose.msra.mxu0 %v2912_v49 }
 0x597   : > { %7272 = vmatpush3.bf16.msra.mxu1 %v3093_v39  ;;  %7125 = vmatprep.subr.bf16.mxu0 %v2913_v15 }
 0x598   : > { %7273 = vmatprep.subr.bf16.mxu1 %v3094_v59  ;;  %v6977_v60 = vpop.f32.mrb[108].mxu0 }
 0x599   : > { %v3468_v30 = vadd.f32 %v6977_v60, %v10660_v19  ;;  %v3459_v48 = vpop.f32.mrb[109].mxu0 }
 0x59a   : > { %v3460_v6 = vadd.f32 %v3459_v48, %v10662_v58  ;;  %v6978_v22 = vpop.f32.mrb[110].mxu0  ;;  %v2952_v58 = vmul.bf16 %v10387_v47, %v10536_v55  ;;  %v3096_v48 = vmul.bf16 %v10416_v25, %v12575_v53 }
 0x59b   : > { %v3967_v18 = vmul.f32 1.442695, %v3468_v30  ;;  %v3471_v62 = vadd.f32 %v6978_v22, %v10664_v56  ;;  %7274 = vmatpush3.bf16.msra.mxu1 %v3094_v59  ;;  %v3462_v20 = vpop.f32.mrb[111].mxu0  ;;  %v3031_v56 = vmul.bf16 %v10353_v54, %v12574_v10  ;;  %v2992_v30 = vmul.bf16 %v10416_v25, %v10534_v26 }
 0x59c   : > { %v3963_v46 = vmul.f32 1.442695, %v3460_v6  ;;  %v3463_v21 = vadd.f32 %v3462_v20, %v10667_v42  ;;  %7279 = vmatprep.subr.bf16.mxu1 %v2999_v34  ;;  %v2953_v42 = vmul.bf16 %v10387_v47, %v10534_v26  ;;  %v12577_v26 = vld [vmem:[#allocation125_spill] sm:$0xff] }
 0x59d   : > { %8169 = vpow2.f32 %v3967_v18  ;;  %v3969_v5 = vmul.f32 1.442695, %v3471_v62  ;;  %v3002_v22 = vmul.bf16 %v10339_v33, %v12577_v26 }
 0x59e   : > { %8171 = vpow2.f32 %v3963_v46  ;;  %v3965_v19 = vmul.f32 1.442695, %v3463_v21  ;;  %7276 = vmatmul.mubr.bf16.vlgmr.msra.gmra.mrb[4].mxu1 %v10754_v36  ;;  %7126 = vmatpush3.bf16.xpose.msra.mxu0 %v2913_v15  ;;  %v7834_v46 = vld [vmem:[#allocation8 + $0x8] sm:$0xff]  }
 0x59f   : > { %8173 = vpow2.f32 %v3969_v5  ;;  %7280 = vmatpush3.bf16.msra.mxu1 %v2999_v34  ;;  %7295 = vmatprep.mubr.bf16.mxu1 %v10816_v51 }
 0x5a0   : > { %8175 = vpow2.f32 %v3965_v19  ;;  %7127 = vmatprep.subr.bf16.mxu0 %v2952_v58  ;;  %7281 = vmatprep.subr.bf16.mxu1 %v3000_v38  ;;  %v12578_v19 = vld [vmem:[#allocation198_spill] sm:$0xff] }
 0x5a3   : > { %7282 = vmatpush3.bf16.msra.mxu1 %v3000_v38  ;;  %v3034_v38 = vmul.bf16 %v10353_v54, %v12577_v26 }
 0x5a4   : > { %7283 = vmatprep.subr.bf16.mxu1 %v3031_v56 }
 0x5a6   : > { %7128 = vmatpush3.bf16.xpose.msra.mxu0 %v2952_v58  ;;  %v12579_v58 = vld [vmem:[#allocation190_spill] sm:$0xff] }
 0x5a7   : > { %v8170_v37 = vpop.eup %8169  ;;  %7284 = vmatpush3.bf16.msra.mxu1 %v3031_v56  ;;  %7129 = vmatprep.subr.bf16.mxu0 %v2953_v42  ;;  %v12580_v53 = vpack.c.bf16 %v12578_v19, %v12579_v58  ;;  %v7835_v56 = vld [vmem:[#allocation8 + $0x10] sm:$0xff]  }
 0x5a8   : > { %v8172_v57 = vpop.eup %8171  ;;  %7285 = vmatprep.subr.bf16.mxu1 %v3032_v45 }
 0x5a9   : > { %v8174_v0 = vpop.eup %8173 }
 0x5aa   : > { %v8176_v7 = vpop.eup %8175  ;;  %v10950_v44 = vpack.c.bf16 %v8174_v0, %v8170_v37  ;;  %v3066_v37 = vmul.bf16 %v10387_v47, %v12577_v26  ;;  %v7838_v0 = vld [vmem:[#allocation8 + $0x28] sm:$0xff]  }
 0x5ab   : > { %7286 = vmatpush3.bf16.msra.mxu1 %v3032_v45  ;;  %v10952_v4 = vpack.c.bf16 %v8176_v7, %v8172_v57  ;;  %v7836_v45 = vld [vmem:[#allocation8 + $0x18] sm:$0xff]   ;;  %v3098_v7 = vmul.bf16 %v10416_v25, %v12577_v26 }
 0x5ac   : > { %7287 = vmatprep.subr.bf16.mxu1 %v3063_v9 }
 0x5ae   : > { %7130 = vmatpush3.bf16.xpose.msra.mxu0 %v2953_v42 }
 0x5af   : > { %7288 = vmatpush3.bf16.msra.mxu1 %v3063_v9  ;;  %7131 = vmatprep.subr.bf16.mxu0 %v2991_v52  ;;  %v7839_v9 = vld [vmem:[#allocation8 + $0x30] sm:$0xff]  }
 0x5b0   : > { %7289 = vmatprep.subr.bf16.mxu1 %v3064_v12 }
 0x5b1   : > { %v7077_v28 = vpop.f32.mrb[244].mxu1 }
 0x5b2   : > { %v3713_v11 = vadd.f32 %v7077_v28, %v10694_v43  ;;  %v3704_v24 = vpop.f32.mrb[245].mxu1 }
 0x5b3   : > { %v3705_v49 = vadd.f32 %v3704_v24, %v10696_v3  ;;  %v7078_v8 = vpop.f32.mrb[246].mxu1  ;;  %7290 = vmatpush3.bf16.msra.mxu1 %v3064_v12  ;;  %v10994_v12 = vld [vmem:[#allocation10 + $0x10] sm:$0xff]  ;;  %v10997_v24 = vld [vmem:[#allocation10] sm:$0xff] }
 0x5b4   : > { %v4007_v39 = vmul.f32 1.442695, %v3713_v11  ;;  %v3716_v55 = vadd.f32 %v7078_v8, %v10698_v40  ;;  %v3707_v15 = vpop.f32.mrb[247].mxu1  ;;  %7291 = vmatprep.subr.bf16.mxu1 %v3095_v17  ;;  %v12576_v40 = vld [vmem:[#allocation128_spill] sm:$0xff] }
 0x5b5   : > { %v4003_v59 = vmul.f32 1.442695, %v3705_v49  ;;  %v3708_v60 = vadd.f32 %v3707_v15, %v10701_v23  ;;  %v3001_v6 = vmul.bf16 %v10339_v33, %v12576_v40  ;;  %v7833_v23 = vld [vmem:[#allocation8] sm:$0xff]   ;;  %v3033_v62 = vmul.bf16 %v10353_v54, %v12576_v40  ;;  %v12581_v8 = vld [vmem:[#allocation144_spill] sm:$0xff]  ;;  %v11002_v15 = vld [vmem:[#allocation10 + $0x18] sm:$0xff] }
 0x5b6   : > { %8177 = vpow2.f32 %v4007_v39  ;;  %v4009_v43 = vmul.f32 1.442695, %v3716_v55  ;;  %7132 = vmatpush3.bf16.xpose.msra.mxu0 %v2991_v52  ;;  %v3065_v42 = vmul.bf16 %v10387_v47, %v12576_v40  ;;  %v3097_v57 = vmul.bf16 %v10416_v25, %v12576_v40 }
 0x5b7   : > { %8179 = vpow2.f32 %v4003_v59  ;;  %v4005_v3 = vmul.f32 1.442695, %v3708_v60  ;;  %7292 = vmatpush3.bf16.msra.mxu1 %v3095_v17  ;;  %7133 = vmatprep.subr.bf16.mxu0 %v2992_v30  ;;  %v3005_v39 = vmul.bf16 %v10339_v33, %v12581_v8 }
 0x5b8   : > { %8181 = vpow2.f32 %v4009_v43  ;;  %7293 = vmatprep.subr.bf16.mxu1 %v3096_v48  ;;  %v11005_v43 = vld [vmem:[#allocation10 + $0x8] sm:$0xff] }
 0x5b9   : > { %8183 = vpow2.f32 %v4005_v3  ;;  %v7840_v3 = vld [vmem:[#allocation8 + $0x38] sm:$0xff]  }
 0x5bb   : > { %7294 = vmatpush3.bf16.msra.mxu1 %v3096_v48 }
 0x5bc   : > { %7299 = vmatprep.subr.bf16.mxu1 %v3001_v6 }
 0x5be   : > { %7296 = vmatmul.mubr.bf16.vlgmr.msra.gmra.mrb[8].mxu1 %v10814_v2  ;;  %7134 = vmatpush3.bf16.xpose.msra.mxu0 %v2992_v30 }
 0x5bf   : > { %7300 = vmatpush3.bf16.msra.mxu1 %v3001_v6  ;;  %7315 = vmatprep.mubr.bf16.mxu1 %v10716_v31 }
 0x5c0   : > { %v8178_v10 = vpop.eup %8177  ;;  %7301 = vmatprep.subr.bf16.mxu1 %v3002_v22  ;;  %7159 = vmatprep.subr.bf16.mxu0 %v7833_v23 }
 0x5c1   : > { %v8180_v34 = vpop.eup %8179 }
 0x5c2   : > { %v8182_v18 = vpop.eup %8181 }
 0x5c3   : > { %v8184_v20 = vpop.eup %8183  ;;  %7302 = vmatpush3.bf16.msra.mxu1 %v3002_v22  ;;  %v10976_v21 = vpack.c.bf16 %v8182_v18, %v8178_v10  ;;  %v12583_v22 = vld [vmem:[#allocation136_spill] sm:$0xff]  ;;  %v12584_v18 = vld [vmem:[#allocation133_spill] sm:$0xff] }
 0x5c4   : > { %7303 = vmatprep.subr.bf16.mxu1 %v3033_v62  ;;  %v10978_v5 = vpack.c.bf16 %v8184_v20, %v8180_v34  ;;  %v3003_v10 = vmul.bf16 %v10339_v33, %v12583_v22  ;;  %v3037_v34 = vmul.bf16 %v10353_v54, %v12581_v8 }
 0x5c5   : > { %7136 = vmatmul.mubr.bf16.vlgmr.msra.gmra.mrb[124].mxu0 %v12580_v53  ;;  %v3035_v53 = vmul.bf16 %v10353_v54, %v12583_v22 }
 0x5c6   : > { %7160 = vmatpush3.bf16.msra.mxu0 %v7833_v23  ;;  %7175 = vmatprep.mubr.bf16.mxu0 %v10688_v35  ;;  %v7837_v35 = vld [vmem:[#allocation8 + $0x20] sm:$0xff]   ;;  %v12582_v23 = vld [vmem:[#allocation141_spill] sm:$0xff] }
 0x5c7   : > { %7304 = vmatpush3.bf16.msra.mxu1 %v3033_v62  ;;  %7161 = vmatprep.subr.bf16.mxu0 %v7834_v46  ;;  %v3006_v26 = vmul.bf16 %v10339_v33, %v12582_v23  ;;  %v3004_v62 = vmul.bf16 %v10339_v33, %v12584_v18  ;;  %v3038_v20 = vmul.bf16 %v10353_v54, %v12582_v23 }
 0x5c8   : > { %7305 = vmatprep.subr.bf16.mxu1 %v3034_v38 }
 0x5ca   : > { %7162 = vmatpush3.bf16.msra.mxu0 %v7834_v46 }
 0x5cb   : > { %7306 = vmatpush3.bf16.msra.mxu1 %v3034_v38  ;;  %7163 = vmatprep.subr.bf16.mxu0 %v7835_v56 }
 0x5cc   : > { %7307 = vmatprep.subr.bf16.mxu1 %v3065_v42 }
 0x5ce   : > { %7164 = vmatpush3.bf16.msra.mxu0 %v7835_v56 }
 0x5cf   : > { %7308 = vmatpush3.bf16.msra.mxu1 %v3065_v42  ;;  %7165 = vmatprep.subr.bf16.mxu0 %v7836_v45  ;;  %v3036_v42 = vmul.bf16 %v10353_v54, %v12584_v18 }
 0x5d0   : > { %7309 = vmatprep.subr.bf16.mxu1 %v3066_v37 }
 0x5d2   : > { %7166 = vmatpush3.bf16.msra.mxu0 %v7836_v45  ;;  %v3070_v45 = vmul.bf16 %v10387_v47, %v12582_v23 }
 0x5d3   : > { %7310 = vmatpush3.bf16.msra.mxu1 %v3066_v37  ;;  %7167 = vmatprep.subr.bf16.mxu0 %v7837_v35 }
 0x5d4   : > { %7311 = vmatprep.subr.bf16.mxu1 %v3097_v57 }
 0x5d6   : > { %7168 = vmatpush3.bf16.msra.mxu0 %v7837_v35  ;;  %v3067_v35 = vmul.bf16 %v10387_v47, %v12583_v22 }
 0x5d7   : > { %7312 = vmatpush3.bf16.msra.mxu1 %v3097_v57  ;;  %7169 = vmatprep.subr.bf16.mxu0 %v7838_v0  ;;  %v11038_v57 = vld [vmem:[#allocation10 + $0x30] sm:$0xff] }
 0x5d8   : > { %7313 = vmatprep.subr.bf16.mxu1 %v3098_v7  ;;  %v7017_v52 = vpop.f32.mrb[112].mxu0 }
 0x5d9   : > { %v3566_v28 = vadd.f32 %v10994_v12, %v7017_v52  ;;  %v3557_v11 = vpop.f32.mrb[113].mxu0 }
 0x5da   : > { %v3558_v17 = vadd.f32 %v10997_v24, %v3557_v11  ;;  %v7018_v49 = vpop.f32.mrb[114].mxu0  ;;  %7170 = vmatpush3.bf16.msra.mxu0 %v7838_v0  ;;  %v11046_v11 = vld [vmem:[#allocation10 + $0x38] sm:$0xff] }
 0x5db   : > { %v3983_v55 = vmul.f32 1.442695, %v3566_v28  ;;  %v3569_v59 = vadd.f32 %v11002_v15, %v7018_v49  ;;  %7314 = vmatpush3.bf16.msra.mxu1 %v3098_v7  ;;  %v3560_v60 = vpop.f32.mrb[115].mxu0  ;;  %7171 = vmatprep.subr.bf16.mxu0 %v7839_v9  ;;  %v11043_v7 = vld [vmem:[#allocation10 + $0x20] sm:$0xff] }
 0x5dc   : > { %v3979_v30 = vmul.f32 1.442695, %v3558_v17  ;;  %v3561_v48 = vadd.f32 %v11005_v43, %v3560_v60  ;;  %7339 = vmatprep.subr.bf16.mxu1 %v3005_v39 }
 0x5dd   : > { %8185 = vpow2.f32 %v3983_v55  ;;  %v3985_v40 = vmul.f32 1.442695, %v3569_v59  ;;  %v11049_v55 = vld [vmem:[#allocation10 + $0x28] sm:$0xff] }
 0x5de   : > { %8187 = vpow2.f32 %v3979_v30  ;;  %v3981_v6 = vmul.f32 1.442695, %v3561_v48  ;;  %7316 = vmatmul.mubr.bf16.vlgmr.msra.gmra.mrb[12].mxu1 %v10714_v32  ;;  %7172 = vmatpush3.bf16.msra.mxu0 %v7839_v9  ;;  %v3102_v30 = vmul.bf16 %v10416_v25, %v12582_v23 }
 0x5df   : > { %8189 = vpow2.f32 %v3985_v40  ;;  %7340 = vmatpush3.bf16.msra.mxu1 %v3005_v39  ;;  %7355 = vmatprep.mubr.bf16.mxu1 %v10776_v63 }
 0x5e0   : > { %8191 = vpow2.f32 %v3981_v6  ;;  %7341 = vmatprep.subr.bf16.mxu1 %v3006_v26  ;;  %7173 = vmatprep.subr.bf16.mxu0 %v7840_v3  ;;  %v12586_v6 = vld [vmem:[#allocation157_spill] sm:$0xff] }
 0x5e1   : > { %v3010_v23 = vmul.bf16 %v10339_v33, %v12586_v6 }
 0x5e2   : > { %7174 = vmatpush3.bf16.msra.mxu0 %v7840_v3  ;;  %v12585_v3 = vld [vmem:[#allocation160_spill] sm:$0xff] }
 0x5e3   : > { %7342 = vmatpush3.bf16.msra.mxu1 %v3006_v26  ;;  %7319 = vmatprep.subr.bf16.mxu0 %v3003_v10  ;;  %v3009_v40 = vmul.bf16 %v10339_v33, %v12585_v3 }
 0x5e4   : > { %7343 = vmatprep.subr.bf16.mxu1 %v3037_v34 }
 0x5e5   : > { %7176 = vmatmul.mubr.bf16.vlgmr.msra.gmra.mrb[128].mxu0 %v10686_v16  ;;  %v3069_v16 = vmul.bf16 %v10387_v47, %v12581_v8 }
 0x5e6   : > { %7179 = vmatprep.mubr.bf16.mxu0 %v10756_v50  ;;  %7320 = vmatpush3.bf16.msra.mxu0 %v3003_v10 }
 0x5e7   : > { %v8186_v46 = vpop.eup %8185  ;;  %7344 = vmatpush3.bf16.msra.mxu1 %v3037_v34  ;;  %7321 = vmatprep.subr.bf16.mxu0 %v3004_v62 }
 0x5e8   : > { %v8188_v19 = vpop.eup %8187  ;;  %7345 = vmatprep.subr.bf16.mxu1 %v3038_v20 }
 0x5e9   : > { %v8190_v58 = vpop.eup %8189 }
 0x5ea   : > { %v8192_v38 = vpop.eup %8191  ;;  %7322 = vmatpush3.bf16.msra.mxu0 %v3004_v62  ;;  %v11026_v56 = vpack.c.bf16 %v8190_v58, %v8186_v46  ;;  %v3041_v62 = vmul.bf16 %v10353_v54, %v12585_v3  ;;  %v3073_v58 = vmul.bf16 %v10387_v47, %v12585_v3 }
 0x5eb   : > { %7346 = vmatpush3.bf16.msra.mxu1 %v3038_v20  ;;  %7323 = vmatprep.subr.bf16.mxu0 %v3035_v53  ;;  %v11028_v50 = vpack.c.bf16 %v8192_v38, %v8188_v19  ;;  %v3042_v19 = vmul.bf16 %v10353_v54, %v12586_v6  ;;  %v3106_v38 = vmul.bf16 %v10416_v25, %v12586_v6 }
 0x5ec   : > { %7347 = vmatprep.subr.bf16.mxu1 %v3069_v16 }
 0x5ed   : > { %7180 = vmatmul.mubr.bf16.gmra.mrb[132].mxu0 %v10754_v36 }
 0x5ee   : > { %7183 = vmatprep.mubr.bf16.mxu0 %v10816_v51  ;;  %7324 = vmatpush3.bf16.msra.mxu0 %v3035_v53  ;;  %v3101_v51 = vmul.bf16 %v10416_v25, %v12581_v8  ;;  %v3068_v8 = vmul.bf16 %v10387_v47, %v12584_v18  ;;  %v3074_v53 = vmul.bf16 %v10387_v47, %v12586_v6 }
 0x5ef   : > { %7348 = vmatpush3.bf16.msra.mxu1 %v3069_v16  ;;  %7325 = vmatprep.subr.bf16.mxu0 %v3036_v42 }
 0x5f0   : > { %7349 = vmatprep.subr.bf16.mxu1 %v3070_v45 }
 0x5f1   : > { %v7117_v37 = vpop.f32.mrb[248].mxu1 }
 0x5f2   : > { %v3811_v36 = vadd.f32 %v11038_v57, %v7117_v37  ;;  %v3802_v0 = vpop.f32.mrb[249].mxu1  ;;  %7326 = vmatpush3.bf16.msra.mxu0 %v3036_v42 }
 0x5f3   : > { %v3803_v9 = vadd.f32 %v11043_v7, %v3802_v0  ;;  %v7118_v52 = vpop.f32.mrb[250].mxu1  ;;  %7350 = vmatpush3.bf16.msra.mxu1 %v3070_v45  ;;  %7327 = vmatprep.subr.bf16.mxu0 %v3067_v35 }
 0x5f4   : > { %v4023_v28 = vmul.f32 1.442695, %v3811_v36  ;;  %v3814_v17 = vadd.f32 %v11046_v11, %v7118_v52  ;;  %v3805_v49 = vpop.f32.mrb[251].mxu1  ;;  %7351 = vmatprep.subr.bf16.mxu1 %v3101_v51 }
 0x5f5   : > { %v4019_v39 = vmul.f32 1.442695, %v3803_v9  ;;  %v3806_v59 = vadd.f32 %v11049_v55, %v3805_v49  ;;  %7184 = vmatmul.mubr.bf16.gmra.mrb[136].mxu0 %v10814_v2  ;;  %v3099_v2 = vmul.bf16 %v10416_v25, %v12583_v22  ;;  %v12589_v49 = vld [vmem:[#allocation173_spill] sm:$0xff] }
 0x5f6   : > { %8193 = vpow2.f32 %v4023_v28  ;;  %v4025_v60 = vmul.f32 1.442695, %v3814_v17  ;;  %7187 = vmatprep.mubr.bf16.mxu0 %v10716_v31  ;;  %7328 = vmatpush3.bf16.msra.mxu0 %v3067_v35  ;;  %v3100_v31 = vmul.bf16 %v10416_v25, %v12584_v18  ;;  %v12588_v35 = vld [vmem:[#allocation176_spill] sm:$0xff] }
 0x5f7   : > { %8195 = vpow2.f32 %v4019_v39  ;;  %v4021_v48 = vmul.f32 1.442695, %v3806_v59  ;;  %7352 = vmatpush3.bf16.msra.mxu1 %v3101_v51  ;;  %7329 = vmatprep.subr.bf16.mxu0 %v3068_v8  ;;  %v3013_v36 = vmul.bf16 %v10339_v33, %v12588_v35  ;;  %v3014_v39 = vmul.bf16 %v10339_v33, %v12589_v49 }
 0x5f8   : > { %8197 = vpow2.f32 %v4025_v60  ;;  %7353 = vmatprep.subr.bf16.mxu1 %v3102_v30  ;;  %v3045_v59 = vmul.bf16 %v10353_v54, %v12588_v35 }
 0x5f9   : > { %8199 = vpow2.f32 %v4021_v48 }
 0x5fa   : > { %7330 = vmatpush3.bf16.msra.mxu0 %v3068_v8 }
 0x5fb   : > { %7354 = vmatpush3.bf16.msra.mxu1 %v3102_v30  ;;  %7331 = vmatprep.subr.bf16.mxu0 %v3099_v2 }
 0x5fc   : > { %7379 = vmatprep.subr.bf16.mxu1 %v3009_v40 }
 0x5fd   : > { %7188 = vmatmul.mubr.bf16.gmra.mrb[140].mxu0 %v10714_v32  ;;  %v12587_v32 = vld [vmem:[#allocation152_spill] sm:$0xff] }
 0x5fe   : > { %7356 = vmatmul.mubr.bf16.vlgmr.msra.gmra.mrb[16].mxu1 %v10774_v61  ;;  %7191 = vmatprep.mubr.bf16.mxu0 %v10878_v13  ;;  %v11072_v34 = vmul.bf16 %v10339_v33, %v12587_v32 }
 0x5ff   : > { %7332 = vmatpush3.bf16.msra.mxu0 %v3099_v2  ;;  %7380 = vmatpush3.bf16.msra.mxu1 %v3009_v40  ;;  %v3077_v2 = vmul.bf16 %v10387_v47, %v12588_v35 }
 0x600   : > { %v8194_v26 = vpop.eup %8193  ;;  %7395 = vmatprep.mubr.bf16.mxu1 %v10836_v27  ;;  %7333 = vmatprep.subr.bf16.mxu0 %v3100_v31 }
 0x601   : > { %v8196_v22 = vpop.eup %8195  ;;  %7381 = vmatprep.subr.bf16.mxu1 %v3010_v23 }
 0x602   : > { %v8198_v10 = vpop.eup %8197 }
 0x603   : > { %v8200_v18 = vpop.eup %8199  ;;  %7334 = vmatpush3.bf16.msra.mxu0 %v3100_v31  ;;  %7382 = vmatpush3.bf16.msra.mxu1 %v3010_v23  ;;  %v11076_v20 = vpack.c.bf16 %v8198_v10, %v8194_v26  ;;  %v3109_v26 = vmul.bf16 %v10416_v25, %v12588_v35 }
 0x604   : > { %7359 = vmatprep.subr.bf16.mxu0 %v11072_v34  ;;  %7383 = vmatprep.subr.bf16.mxu1 %v3041_v62  ;;  %v11079_v46 = vpack.c.bf16 %v8200_v18, %v8196_v22 }
 0x605   : > { %7192 = vmatmul.mubr.bf16.gmra.mrb[144].mxu0 %v10876_v1 }
 0x606   : > { %7195 = vmatprep.mubr.bf16.mxu0 %v10776_v63  ;;  %v3105_v63 = vmul.bf16 %v10416_v25, %v12585_v3 }
 0x607   : > { %7384 = vmatpush3.bf16.msra.mxu1 %v3041_v62 }
 0x608   : > { %7385 = vmatprep.subr.bf16.mxu1 %v3042_v19 }
 0x60b   : > { %7386 = vmatpush3.bf16.msra.mxu1 %v3042_v19 }
 0x60c   : > { %7387 = vmatprep.subr.bf16.mxu1 %v3073_v58 }
 0x60d   : > { %7196 = vmatmul.mubr.bf16.gmra.mrb[148].mxu0 %v10774_v61 }
 0x60e   : > { %7199 = vmatprep.mubr.bf16.mxu0 %v10952_v4 }
 0x60f   : > { %7388 = vmatpush3.bf16.msra.mxu1 %v3073_v58 }
 0x610   : > { %7389 = vmatprep.subr.bf16.mxu1 %v3074_v53 }
 0x613   : > { %7390 = vmatpush3.bf16.msra.mxu1 %v3074_v53 }
 0x614   : > { %7391 = vmatprep.subr.bf16.mxu1 %v3105_v63 }
 0x615   : > { %7200 = vmatmul.mubr.bf16.gmra.mrb[152].mxu0 %v10950_v44 }
 0x616   : > { %7203 = vmatprep.mubr.bf16.mxu0 %v10836_v27 }
 0x617   : > { %7392 = vmatpush3.bf16.msra.mxu1 %v3105_v63  ;;  %v3110_v63 = vmul.bf16 %v10416_v25, %v12589_v49 }
 0x618   : > { %7393 = vmatprep.subr.bf16.mxu1 %v3106_v38  ;;  %v7057_v61 = vpop.f32.mrb[116].mxu0 }
 0x619   : > { %v3664_v16 = vadd.f32 %v10994_v12, %v7057_v61  ;;  %v3655_v42 = vpop.f32.mrb[117].mxu0 }
 0x61a   : > { %v3656_v45 = vadd.f32 %v10997_v24, %v3655_v42  ;;  %v7058_v37 = vpop.f32.mrb[118].mxu0 }
 0x61b   : > { %v3999_v0 = vmul.f32 1.442695, %v3664_v16  ;;  %v3667_v51 = vadd.f32 %v11002_v15, %v7058_v37  ;;  %7394 = vmatpush3.bf16.msra.mxu1 %v3106_v38  ;;  %v3658_v27 = vpop.f32.mrb[119].mxu0 }
 0x61c   : > { %v3995_v9 = vmul.f32 1.442695, %v3656_v45  ;;  %v3659_v52 = vadd.f32 %v11005_v43, %v3658_v27  ;;  %7419 = vmatprep.subr.bf16.mxu1 %v3013_v36 }
 0x61d   : > { %8201 = vpow2.f32 %v3999_v0  ;;  %v4001_v28 = vmul.f32 1.442695, %v3667_v51  ;;  %7204 = vmatmul.mubr.bf16.gmra.mrb[156].mxu0 %v10834_v14 }
 0x61e   : > { %8203 = vpow2.f32 %v3995_v9  ;;  %v3997_v17 = vmul.f32 1.442695, %v3659_v52  ;;  %7396 = vmatmul.mubr.bf16.vlgmr.msra.gmra.mrb[20].mxu1 %v10834_v14  ;;  %7207 = vmatprep.mubr.bf16.mxu0 %v11028_v50  ;;  %v3046_v14 = vmul.bf16 %v10353_v54, %v12589_v49 }
 0x61f   : > { %8205 = vpow2.f32 %v4001_v28  ;;  %7420 = vmatpush3.bf16.msra.mxu1 %v3013_v36  ;;  %7435 = vmatprep.mubr.bf16.mxu1 %v10906_v29 }
 0x620   : > { %8207 = vpow2.f32 %v3997_v17  ;;  %7421 = vmatprep.subr.bf16.mxu1 %v3014_v39 }
 0x623   : > { %7422 = vmatpush3.bf16.msra.mxu1 %v3014_v39 }
 0x624   : > { %7423 = vmatprep.subr.bf16.mxu1 %v3045_v59 }
 0x625   : > { %7208 = vmatmul.mubr.bf16.gmra.mrb[160].mxu0 %v11026_v56 }
 0x626   : > { %7211 = vmatprep.mubr.bf16.mxu0 %v10906_v29  ;;  %v3078_v29 = vmul.bf16 %v10387_v47, %v12589_v49 }
 0x627   : > { %v8202_v8 = vpop.eup %8201  ;;  %7424 = vmatpush3.bf16.msra.mxu1 %v3045_v59 }
 0x628   : > { %v8204_v60 = vpop.eup %8203  ;;  %7425 = vmatprep.subr.bf16.mxu1 %v3046_v14 }
 0x629   : > { %v8206_v30 = vpop.eup %8205 }
 0x62a   : > { %v8208_v48 = vpop.eup %8207  ;;  %v11117_v3 = vpack.c.bf16 %v8206_v30, %v8202_v8  ;;  %v12592_v30 = vld [vmem:[#allocation205_spill] sm:$0xff] }
 0x62b   : > { %7426 = vmatpush3.bf16.msra.mxu1 %v3046_v14  ;;  %v11119_v40 = vpack.c.bf16 %v8208_v48, %v8204_v60  ;;  %v3021_v48 = vmul.bf16 %v10339_v33, %v12592_v30 }
 0x62c   : > { %7427 = vmatprep.subr.bf16.mxu1 %v3077_v2 }
 0x62d   : > { %7212 = vmatmul.mubr.bf16.gmra.mrb[164].mxu0 %v10904_v41 }
 0x62e   : > { %7215 = vmatprep.mubr.bf16.mxu0 %v11119_v40 }
 0x62f   : > { %7428 = vmatpush3.bf16.msra.mxu1 %v3077_v2 }
 0x630   : > { %7429 = vmatprep.subr.bf16.mxu1 %v3078_v29 }
 0x631   : > { %v7157_v31 = vpop.f32.mrb[252].mxu1 }
 0x632   : > { %v3909_v6 = vadd.f32 %v11038_v57, %v7157_v31  ;;  %v3900_v23 = vpop.f32.mrb[253].mxu1 }
 0x633   : > { %v3901_v22 = vadd.f32 %v11043_v7, %v3900_v23  ;;  %v7158_v10 = vpop.f32.mrb[254].mxu1  ;;  %7430 = vmatpush3.bf16.msra.mxu1 %v3078_v29 }
 0x634   : > { %v4039_v62 = vmul.f32 1.442695, %v3909_v6  ;;  %v3912_v18 = vadd.f32 %v11046_v11, %v7158_v10  ;;  %v3903_v19 = vpop.f32.mrb[255].mxu1  ;;  %7431 = vmatprep.subr.bf16.mxu1 %v3109_v26  ;;  %v12590_v11 = vld [vmem:[#allocation192_spill] sm:$0xff] }
 0x635   : > { %v4035_v58 = vmul.f32 1.442695, %v3901_v22  ;;  %v3904_v53 = vadd.f32 %v11049_v55, %v3903_v19  ;;  %7216 = vmatmul.mubr.bf16.gmra.mrb[168].mxu0 %v11117_v3  ;;  %v3017_v38 = vmul.bf16 %v10339_v33, %v12590_v11  ;;  %v12591_v55 = vld [vmem:[#allocation189_spill] sm:$0xff]  ;;  %v3049_v37 = vmul.bf16 %v10353_v54, %v12590_v11  ;;  %v12593_v10 = vld [vmem:[#allocation204_spill] sm:$0xff] }
 0x636   : > { %8209 = vpow2.f32 %v4039_v62  ;;  %v4041_v57 = vmul.f32 1.442695, %v3912_v18  ;;  %7219 = vmatprep.mubr.bf16.mxu0 %v10978_v5  ;;  %v3018_v61 = vmul.bf16 %v10339_v33, %v12591_v55  ;;  %v3082_v51 = vmul.bf16 %v10387_v47, %v12591_v55 }
 0x637   : > { %8211 = vpow2.f32 %v4035_v58  ;;  %v4037_v7 = vmul.f32 1.442695, %v3904_v53  ;;  %7432 = vmatpush3.bf16.msra.mxu1 %v3109_v26  ;;  %v3113_v52 = vmul.bf16 %v10416_v25, %v12590_v11  ;;  %v3114_v49 = vmul.bf16 %v10416_v25, %v12591_v55 }
 0x638   : > { %8213 = vpow2.f32 %v4041_v57  ;;  %7433 = vmatprep.subr.bf16.mxu1 %v3110_v63  ;;  %v3022_v62 = vmul.bf16 %v10339_v33, %v12593_v10  ;;  %v3053_v18 = vmul.bf16 %v10353_v54, %v12592_v30  ;;  %v3054_v19 = vmul.bf16 %v10353_v54, %v12593_v10 }
 0x639   : > { %8215 = vpow2.f32 %v4037_v7 }
 0x63b   : > { %7434 = vmatpush3.bf16.msra.mxu1 %v3110_v63  ;;  %v3085_v63 = vmul.bf16 %v10387_v47, %v12592_v30 }
 0x63c   : > { %7459 = vmatprep.subr.bf16.mxu1 %v3017_v38 }
 0x63d   : > { %7220 = vmatmul.mubr.bf16.gmra.mrb[172].mxu0 %v10976_v21 }
 0x63e   : > { %7436 = vmatmul.mubr.bf16.vlgmr.msra.gmra.mrb[24].mxu1 %v10904_v41  ;;  %v3050_v41 = vmul.bf16 %v10353_v54, %v12591_v55 }
 0x63f   : > { %7460 = vmatpush3.bf16.msra.mxu1 %v3017_v38  ;;  %7475 = vmatprep.mubr.bf16.mxu1 %v10978_v5  ;;  %v3081_v5 = vmul.bf16 %v10387_v47, %v12590_v11  ;;  %v3086_v38 = vmul.bf16 %v10387_v47, %v12593_v10 }
 0x640   : > { %v8210_v16 = vpop.eup %8209  ;;  %7461 = vmatprep.subr.bf16.mxu1 %v3018_v61 }
 0x641   : > { %v8212_v42 = vpop.eup %8211 }
 0x642   : > { %v8214_v45 = vpop.eup %8213 }
 0x643   : > { %v8216_v35 = vpop.eup %8215  ;;  %v11144_v36 = vpack.c.bf16 %v8214_v45, %v8210_v16  ;;  %7462 = vmatpush3.bf16.msra.mxu1 %v3018_v61  ;;  %v3117_v16 = vmul.bf16 %v10416_v25, %v12592_v30 }
 0x644   : > { %7463 = vmatprep.subr.bf16.mxu1 %v3049_v37  ;;  %v11146_v0 = vpack.c.bf16 %v8216_v35, %v8212_v42 }
 0x647   : > { %7464 = vmatpush3.bf16.msra.mxu1 %v3049_v37  ;;  %v3118_v37 = vmul.bf16 %v10416_v25, %v12593_v10 }
 0x648   : > { %7465 = vmatprep.subr.bf16.mxu1 %v3050_v41 }
 0x64b   : > { %7466 = vmatpush3.bf16.msra.mxu1 %v3050_v41  ;;  %v12595_v41 = vld [vmem:[#allocation208_spill] sm:$0xff] }
 0x64c   : > { %7467 = vmatprep.subr.bf16.mxu1 %v3081_v5  ;;  %v3122_v30 = vmul.bf16 %v10416_v25, %v12595_v41 }
 0x64f   : > { %7468 = vmatpush3.bf16.msra.mxu1 %v3081_v5  ;;  %v3026_v5 = vmul.bf16 %v10339_v33, %v12595_v41 }
 0x650   : > { %7469 = vmatprep.subr.bf16.mxu1 %v3082_v51 }
 0x651   : > { %v11154_v27 = vpop.f32.mrb[0].mxu1 }
 0x652   : > { %v11156_v9 = vpop.f32.mrb[1].mxu1 }
 0x653   : > { %v11160_v28 = vpop.f32.mrb[2].mxu1  ;;  %7470 = vmatpush3.bf16.msra.mxu1 %v3082_v51 }
 0x654   : > { %v11162_v17 = vpop.f32.mrb[3].mxu1  ;;  %7471 = vmatprep.subr.bf16.mxu1 %v3113_v52 }
 0x657   : > { %7472 = vmatpush3.bf16.msra.mxu1 %v3113_v52  ;;  %v3058_v52 = vmul.bf16 %v10353_v54, %v12595_v41 }
 0x658   : > { %7473 = vmatprep.subr.bf16.mxu1 %v3114_v49  ;;  %v7097_v39 = vpop.f32.mrb[120].mxu0 }
 0x659   : > { %v3762_v59 = vadd.f32 %v10994_v12, %v7097_v39  ;;  %v3753_v14 = vpop.f32.mrb[121].mxu0 }
 0x65a   : > { %v3754_v8 = vadd.f32 %v10997_v24, %v3753_v14  ;;  %v7098_v60 = vpop.f32.mrb[122].mxu0 }
 0x65b   : > { %v4015_v2 = vmul.f32 1.442695, %v3762_v59  ;;  %v3765_v29 = vadd.f32 %v11002_v15, %v7098_v60  ;;  %7474 = vmatpush3.bf16.msra.mxu1 %v3114_v49  ;;  %v3756_v31 = vpop.f32.mrb[123].mxu0  ;;  %v3090_v49 = vmul.bf16 %v10387_v47, %v12595_v41 }
 0x65c   : > { %v4011_v6 = vmul.f32 1.442695, %v3754_v8  ;;  %v3757_v23 = vadd.f32 %v11005_v43, %v3756_v31  ;;  %7499 = vmatprep.subr.bf16.mxu1 %v3021_v48 }
 0x65d   : > { %8217 = vpow2.f32 %v4015_v2  ;;  %v4017_v26 = vmul.f32 1.442695, %v3765_v29 }
 0x65e   : > { %8219 = vpow2.f32 %v4011_v6  ;;  %v4013_v22 = vmul.f32 1.442695, %v3757_v23  ;;  %7476 = vmatmul.mubr.bf16.vlgmr.msra.gmra.mrb[28].mxu1 %v10976_v21 }
 0x65f   : > { %8221 = vpow2.f32 %v4017_v26  ;;  %7500 = vmatpush3.bf16.msra.mxu1 %v3021_v48  ;;  %7515 = vmatprep.mubr.bf16.mxu1 %v11079_v46 }
 0x660   : > { %8223 = vpow2.f32 %v4013_v22  ;;  %7501 = vmatprep.subr.bf16.mxu1 %v3022_v62 }
 0x663   : > { %7502 = vmatpush3.bf16.msra.mxu1 %v3022_v62 }
 0x664   : > { %7503 = vmatprep.subr.bf16.mxu1 %v3053_v18 }
 0x667   : > { %v8218_v58 = vpop.eup %8217  ;;  %7504 = vmatpush3.bf16.msra.mxu1 %v3053_v18 }
 0x668   : > { %v8220_v21 = vpop.eup %8219  ;;  %7505 = vmatprep.subr.bf16.mxu1 %v3054_v19 }
 0x669   : > { %v8222_v53 = vpop.eup %8221 }
 0x66a   : > { %v8224_v57 = vpop.eup %8223  ;;  %v11182_v7 = vpack.c.bf16 %v8222_v53, %v8218_v58 }
 0x66b   : > { %7506 = vmatpush3.bf16.msra.mxu1 %v3054_v19  ;;  %v11184_v11 = vpack.c.bf16 %v8224_v57, %v8220_v21 }
 0x66c   : > { %7507 = vmatprep.subr.bf16.mxu1 %v3085_v63 }
 0x66d   : > { %7223 = vmatprep.mubr.bf16.mxu0 %v11184_v11 }
 0x66e   : > { %7224 = vmatmul.mubr.bf16.gmra.mrb[176].mxu0 %v11182_v7 }
 0x66f   : > { %7508 = vmatpush3.bf16.msra.mxu1 %v3085_v63  ;;  %7227 = vmatprep.mubr.bf16.mxu0 %v11079_v46  ;;  %v12594_v46 = vld [vmem:[#allocation209_spill] sm:$0xff] }
 0x670   : > { %7509 = vmatprep.subr.bf16.mxu1 %v3086_v38  ;;  %v3025_v35 = vmul.bf16 %v10339_v33, %v12594_v46  ;;  %v3057_v51 = vmul.bf16 %v10353_v54, %v12594_v46  ;;  %v3121_v14 = vmul.bf16 %v10416_v25, %v12594_v46 }
 0x671   : > { %v11191_v55 = vpop.f32.mrb[4].mxu1 }
 0x672   : > { %v11193_v61 = vpop.f32.mrb[5].mxu1 }
 0x673   : > { %v11197_v42 = vpop.f32.mrb[6].mxu1  ;;  %7510 = vmatpush3.bf16.msra.mxu1 %v3086_v38 }
 0x674   : > { %v11199_v45 = vpop.f32.mrb[7].mxu1  ;;  %7511 = vmatprep.subr.bf16.mxu1 %v3117_v16 }
 0x676   : > { %7228 = vmatmul.mubr.bf16.gmra.mrb[180].mxu0 %v11076_v20 }
 0x677   : > { %7512 = vmatpush3.bf16.msra.mxu1 %v3117_v16 }
 0x678   : > { %7513 = vmatprep.subr.bf16.mxu1 %v3118_v37 }
 0x67b   : > { %7514 = vmatpush3.bf16.msra.mxu1 %v3118_v37 }
 0x67c   : > { %7539 = vmatprep.subr.bf16.mxu1 %v3025_v35 }
 0x67e   : > { %7516 = vmatmul.mubr.bf16.vlgmr.msra.gmra.mrb[32].mxu1 %v11076_v20  ;;  %v3089_v20 = vmul.bf16 %v10387_v47, %v12594_v46 }
 0x67f   : > { %7540 = vmatpush3.bf16.msra.mxu1 %v3025_v35  ;;  %7555 = vmatprep.mubr.bf16.mxu1 %v11146_v0 }
 0x680   : > { %7541 = vmatprep.subr.bf16.mxu1 %v3026_v5 }
 0x683   : > { %7542 = vmatpush3.bf16.msra.mxu1 %v3026_v5 }
 0x684   : > { %7543 = vmatprep.subr.bf16.mxu1 %v3057_v51 }
 0x687   : > { %7544 = vmatpush3.bf16.msra.mxu1 %v3057_v51 }
 0x688   : > { %7545 = vmatprep.subr.bf16.mxu1 %v3058_v52 }
 0x68b   : > { %7546 = vmatpush3.bf16.msra.mxu1 %v3058_v52  ;;  %v12596_v52 = vld [vmem:[#allocation149_spill] sm:$0xff] }
 0x68c   : > { %7547 = vmatprep.subr.bf16.mxu1 %v3089_v20 }
 0x68f   : > { %7548 = vmatpush3.bf16.msra.mxu1 %v3089_v20  ;;  %v3008_v20 = vmul.bf16 %v10339_v33, %v12596_v52 }
 0x690   : > { %7549 = vmatprep.subr.bf16.mxu1 %v3090_v49 }
 0x691   : > { %v11218_v39 = vpop.f32.mrb[8].mxu1 }
 0x692   : > { %v11220_v59 = vpop.f32.mrb[9].mxu1 }
 0x693   : > { %v11224_v8 = vpop.f32.mrb[10].mxu1  ;;  %7550 = vmatpush3.bf16.msra.mxu1 %v3090_v49 }
 0x694   : > { %v11226_v60 = vpop.f32.mrb[11].mxu1  ;;  %7551 = vmatprep.subr.bf16.mxu1 %v3121_v14 }
 0x697   : > { %7552 = vmatpush3.bf16.msra.mxu1 %v3121_v14 }
 0x698   : > { %7553 = vmatprep.subr.bf16.mxu1 %v3122_v30  ;;  %v7137_v48 = vpop.f32.mrb[124].mxu0 }
 0x699   : > { %v3860_v2 = vadd.f32 %v10994_v12, %v7137_v48  ;;  %v3851_v29 = vpop.f32.mrb[125].mxu0  ;;  %v3039_v48 = vmul.bf16 %v10353_v54, %v12587_v32 }
 0x69a   : > { %v3852_v31 = vadd.f32 %v10997_v24, %v3851_v29  ;;  %v7138_v6 = vpop.f32.mrb[126].mxu0 }
 0x69b   : > { %v4031_v23 = vmul.f32 1.442695, %v3860_v2  ;;  %v3863_v26 = vadd.f32 %v11002_v15, %v7138_v6  ;;  %7554 = vmatpush3.bf16.msra.mxu1 %v3122_v30  ;;  %v3854_v22 = vpop.f32.mrb[127].mxu0 }
 0x69c   : > { %v4027_v10 = vmul.f32 1.442695, %v3852_v31  ;;  %v3855_v62 = vadd.f32 %v11005_v43, %v3854_v22 }
 0x69d   : > { %8225 = vpow2.f32 %v4031_v23  ;;  %v4033_v18 = vmul.f32 1.442695, %v3863_v26 }
 0x69e   : > { %8227 = vpow2.f32 %v4027_v10  ;;  %v4029_v19 = vmul.f32 1.442695, %v3855_v62  ;;  %7556 = vmatmul.mubr.bf16.vlgmr.msra.gmra.mrb[36].mxu1 %v11144_v36 }
 0x69f   : > { %8229 = vpow2.f32 %v4033_v18 }
 0x6a0   : > { %8231 = vpow2.f32 %v4029_v19 }
 0x6a7   : > { %v8226_v12 = vpop.eup %8225 }
 0x6a8   : > { %v8228_v58 = vpop.eup %8227 }
 0x6a9   : > { %v8230_v24 = vpop.eup %8229 }
 0x6aa   : > { %v8232_v21 = vpop.eup %8231  ;;  %v11235_v53 = vpack.c.bf16 %v8230_v24, %v8226_v12 }
 0x6ab   : > { %v11237_v15 = vpack.c.bf16 %v8232_v21, %v8228_v58 }
 0x6ad   : > { %7231 = vmatprep.mubr.bf16.mxu0 %v11237_v15 }
 0x6ae   : > { %7232 = vmatmul.mubr.bf16.gmra.mrb[184].mxu0 %v11235_v53 }
 0x6af   : > { %7235 = vmatprep.mubr.bf16.mxu0 %v11146_v0 }
 0x6b1   : > { %v11242_v43 = vpop.f32.mrb[12].mxu1 }
 0x6b2   : > { %v11244_v57 = vpop.f32.mrb[13].mxu1 }
 0x6b3   : > { %v11246_v63 = vpop.f32.mrb[14].mxu1 }
 0x6b4   : > { %v11248_v38 = vpop.f32.mrb[15].mxu1 }
 0x6b6   : > { %7236 = vmatmul.mubr.bf16.gmra.mrb[188].mxu0 %v11144_v36 }
 0x6b7   : > { %7335 = vmatprep.mubr.bf16.mxu0 %v10878_v13 }
 0x6b8   : > { %v7177_v16 = vpop.f32.mrb[128].mxu0 }
 0x6b9   : > { %v5214_v37 = vmax.f32 %v7177_v16, 1e-30  ;;  %v4173_v46 = vpop.f32.mrb[129].mxu0 }
 0x6ba   : > { %v5212_v35 = vmax.f32 %v4173_v46, 1e-30  ;;  %v7178_v41 = vpop.f32.mrb[130].mxu0 }
 0x6bb   : > { %8233 = vrcp.f32 %v5214_v37  ;;  %v5215_v5 = vmax.f32 %v7178_v41, 1e-30  ;;  %v4176_v0 = vpop.f32.mrb[131].mxu0 }
 0x6bc   : > { %8235 = vrcp.f32 %v5212_v35  ;;  %v5213_v51 = vmax.f32 %v4176_v0, 1e-30  ;;  %v3072_v35 = vmul.bf16 %v10387_v47, %v12596_v52 }
 0x6bd   : > { %8237 = vrcp.f32 %v5215_v5 }
 0x6be   : > { %8239 = vrcp.f32 %v5213_v51  ;;  %7336 = vmatmul.mubr.bf16.vlgmr.msra.gmra.mrb[192].mxu0 %v10876_v1 }
 0x6bf   : > { %7360 = vmatpush3.bf16.msra.mxu0 %v11072_v34  ;;  %7375 = vmatprep.mubr.bf16.mxu0 %v10952_v4  ;;  %v3040_v4 = vmul.bf16 %v10353_v54, %v12596_v52 }
 0x6c0   : > { %7361 = vmatprep.subr.bf16.mxu0 %v3008_v20  ;;  %v7181_v13 = vpop.f32.mrb[132].mxu0 }
 0x6c1   : > { %v5218_v36 = vmax.f32 %v7181_v13, 1e-30  ;;  %v4189_v49 = vpop.f32.mrb[133].mxu0 }
 0x6c2   : > { %v5216_v14 = vmax.f32 %v4189_v49, 1e-30  ;;  %v7182_v30 = vpop.f32.mrb[134].mxu0 }
 0x6c3   : > { %8241 = vrcp.f32 %v5218_v36  ;;  %v5219_v2 = vmax.f32 %v7182_v30, 1e-30  ;;  %7362 = vmatpush3.bf16.msra.mxu0 %v3008_v20  ;;  %v4192_v1 = vpop.f32.mrb[135].mxu0 }
 0x6c4   : > { %8243 = vrcp.f32 %v5216_v14  ;;  %v5217_v29 = vmax.f32 %v4192_v1, 1e-30  ;;  %7363 = vmatprep.subr.bf16.mxu0 %v3039_v48 }
 0x6c5   : > { %v8234_v31 = vpop.eup %8233  ;;  %8245 = vrcp.f32 %v5219_v2 }
 0x6c6   : > { %v8236_v34 = vpop.eup %8235  ;;  %8247 = vrcp.f32 %v5217_v29  ;;  %v11262_v6 = vmul.f32 %v8234_v31, %v11154_v27  ;;  %v3071_v27 = vmul.bf16 %v10387_v47, %v12587_v32 }
 0x6c7   : > { %v8238_v23 = vpop.eup %8237  ;;  %7364 = vmatpush3.bf16.msra.mxu0 %v3039_v48  ;;  %v11265_v26 = vmul.f32 %v8236_v34, %v11156_v9 }
 0x6c8   : > { %v8240_v22 = vpop.eup %8239  ;;  %7365 = vmatprep.subr.bf16.mxu0 %v3040_v4  ;;  %v7185_v10 = vpop.f32.mrb[136].mxu0  ;;  %v11268_v62 = vmul.f32 %v8238_v23, %v11160_v28 }
 0x6c9   : > { %v5222_v18 = vmax.f32 %v7185_v10, 1e-30  ;;  %v4205_v19 = vpop.f32.mrb[137].mxu0  ;;  %v11271_v12 = vmul.f32 %v8240_v22, %v11162_v17  ;;  %v3104_v22 = vmul.bf16 %v10416_v25, %v12596_v52 }
 0x6ca   : > { %v5220_v58 = vmax.f32 %v4205_v19, 1e-30  ;;  %v7186_v24 = vpop.f32.mrb[138].mxu0 }
 0x6cb   : > { %8249 = vrcp.f32 %v5222_v18  ;;  %v5223_v21 = vmax.f32 %v7186_v24, 1e-30  ;;  %7366 = vmatpush3.bf16.msra.mxu0 %v3040_v4  ;;  %v4208_v16 = vpop.f32.mrb[139].mxu0 }
 0x6cc   : > { %8251 = vrcp.f32 %v5220_v58  ;;  %v5221_v37 = vmax.f32 %v4208_v16, 1e-30  ;;  %7367 = vmatprep.subr.bf16.mxu0 %v3071_v27 }
 0x6cd   : > { %v8242_v17 = vpop.eup %8241  ;;  %8253 = vrcp.f32 %v5223_v21 }
 0x6ce   : > { %v8244_v46 = vpop.eup %8243  ;;  %8255 = vrcp.f32 %v5221_v37  ;;  %v11282_v41 = vmul.f32 %v8242_v17, %v11191_v55 }
 0x6cf   : > { %v8246_v5 = vpop.eup %8245  ;;  %7368 = vmatpush3.bf16.msra.mxu0 %v3071_v27  ;;  %v11285_v0 = vmul.f32 %v8244_v46, %v11193_v61  ;;  %v3103_v61 = vmul.bf16 %v10416_v25, %v12587_v32 }
 0x6d0   : > { %v8248_v51 = vpop.eup %8247  ;;  %7369 = vmatprep.subr.bf16.mxu0 %v3072_v35  ;;  %v7189_v20 = vpop.f32.mrb[140].mxu0  ;;  %v11288_v13 = vmul.f32 %v8246_v5, %v11197_v42 }
 0x6d1   : > { %v5226_v36 = vmax.f32 %v7189_v20, 1e-30  ;;  %v11290_v49 = vpop.f32.mrb[16].mxu1  ;;  %v4221_v14 = vpop.f32.mrb[141].mxu0  ;;  %v11293_v30 = vmul.f32 %v8248_v51, %v11199_v45 }
 0x6d2   : > { %v5224_v55 = vmax.f32 %v4221_v14, 1e-30  ;;  %v11295_v48 = vpop.f32.mrb[17].mxu1  ;;  %v7190_v2 = vpop.f32.mrb[142].mxu0 }
 0x6d3   : > { %8257 = vrcp.f32 %v5226_v36  ;;  %v5227_v42 = vmax.f32 %v7190_v2, 1e-30  ;;  %v11301_v29 = vpop.f32.mrb[18].mxu1  ;;  %7370 = vmatpush3.bf16.msra.mxu0 %v3072_v35  ;;  %v4224_v31 = vpop.f32.mrb[143].mxu0 }
 0x6d4   : > { %8259 = vrcp.f32 %v5224_v55  ;;  %v5225_v34 = vmax.f32 %v4224_v31, 1e-30  ;;  %v11305_v4 = vpop.f32.mrb[19].mxu1  ;;  %7371 = vmatprep.subr.bf16.mxu0 %v3103_v61 }
 0x6d5   : > { %v8250_v23 = vpop.eup %8249  ;;  %8261 = vrcp.f32 %v5227_v42 }
 0x6d6   : > { %v8252_v32 = vpop.eup %8251  ;;  %8263 = vrcp.f32 %v5225_v34  ;;  %v11310_v10 = vmul.f32 %v8250_v23, %v11218_v39  ;;  %v12597_v39 = vld [vmem:[#allocation168_spill] sm:$0xff] }
 0x6d7   : > { %v8254_v18 = vpop.eup %8253  ;;  %7372 = vmatpush3.bf16.msra.mxu0 %v3103_v61  ;;  %v11313_v19 = vmul.f32 %v8252_v32, %v11220_v59  ;;  %v3011_v37 = vmul.bf16 %v10339_v33, %v12597_v39  ;;  %v3043_v34 = vmul.bf16 %v10353_v54, %v12597_v39 }
 0x6d8   : > { %v8256_v58 = vpop.eup %8255  ;;  %7373 = vmatprep.subr.bf16.mxu0 %v3104_v22  ;;  %v11315_v24 = vpop.f32.mrb[144].mxu0  ;;  %v11318_v27 = vmul.f32 %v8254_v18, %v11224_v8 }
 0x6d9   : > { %v11320_v21 = vpop.f32.mrb[145].mxu0  ;;  %v11323_v16 = vmul.f32 %v8256_v58, %v11226_v60  ;;  %v12598_v60 = vld [vmem:[#allocation165_spill] sm:$0xff] }
 0x6da   : > { %v11325_v52 = vpop.f32.mrb[146].mxu0  ;;  %v3012_v5 = vmul.bf16 %v10339_v33, %v12598_v60 }
 0x6db   : > { %7374 = vmatpush3.bf16.msra.mxu0 %v3104_v22  ;;  %v11331_v17 = vpop.f32.mrb[147].mxu0 }
 0x6dc   : > { %7399 = vmatprep.subr.bf16.mxu0 %v3011_v37 }
 0x6dd   : > { %v8258_v46 = vpop.eup %8257 }
 0x6de   : > { %v8260_v35 = vpop.eup %8259  ;;  %7376 = vmatmul.mubr.bf16.vlgmr.msra.gmra.mrb[196].mxu0 %v10950_v44  ;;  %v11339_v51 = vmul.f32 %v8258_v46, %v11242_v43 }
 0x6df   : > { %v8262_v20 = vpop.eup %8261  ;;  %7400 = vmatpush3.bf16.msra.mxu0 %v3011_v37  ;;  %7415 = vmatprep.mubr.bf16.mxu0 %v11028_v50  ;;  %v11343_v36 = vmul.f32 %v8260_v35, %v11244_v57  ;;  %v3075_v37 = vmul.bf16 %v10387_v47, %v12597_v39 }
 0x6e0   : > { %v8264_v14 = vpop.eup %8263  ;;  %7401 = vmatprep.subr.bf16.mxu0 %v3012_v5  ;;  %v7197_v55 = vpop.f32.mrb[148].mxu0  ;;  %v11346_v2 = vmul.f32 %v8262_v20, %v11246_v63  ;;  %v3076_v20 = vmul.bf16 %v10387_v47, %v12598_v60 }
 0x6e1   : > { %v5234_v44 = vmax.f32 %v7197_v55, 1e-30  ;;  %v4253_v61 = vpop.f32.mrb[149].mxu0  ;;  %v11349_v42 = vmul.f32 %v8264_v14, %v11248_v38  ;;  %v3044_v38 = vmul.bf16 %v10353_v54, %v12598_v60 }
 0x6e2   : > { %v5232_v43 = vmax.f32 %v4253_v61, 1e-30  ;;  %v7198_v31 = vpop.f32.mrb[150].mxu0 }
 0x6e3   : > { %8265 = vrcp.f32 %v5234_v44  ;;  %v5235_v57 = vmax.f32 %v7198_v31, 1e-30  ;;  %7402 = vmatpush3.bf16.msra.mxu0 %v3012_v5  ;;  %v4256_v23 = vpop.f32.mrb[151].mxu0 }
 0x6e4   : > { %8267 = vrcp.f32 %v5232_v43  ;;  %v5233_v32 = vmax.f32 %v4256_v23, 1e-30  ;;  %7403 = vmatprep.subr.bf16.mxu0 %v3043_v34 }
 0x6e5   : > { %8269 = vrcp.f32 %v5235_v57 }
 0x6e6   : > { %8271 = vrcp.f32 %v5233_v32 }
 0x6e7   : > { %7404 = vmatpush3.bf16.msra.mxu0 %v3043_v34 }
 0x6e8   : > { %7405 = vmatprep.subr.bf16.mxu0 %v3044_v38  ;;  %v11359_v22 = vpop.f32.mrb[152].mxu0 }
 0x6e9   : > { %v11361_v18 = vpop.f32.mrb[153].mxu0 }
 0x6ea   : > { %v11363_v58 = vpop.f32.mrb[154].mxu0 }
 0x6eb   : > { %7406 = vmatpush3.bf16.msra.mxu0 %v3044_v38  ;;  %v11367_v46 = vpop.f32.mrb[155].mxu0 }
 0x6ec   : > { %7407 = vmatprep.subr.bf16.mxu0 %v3075_v37 }
 0x6ed   : > { %v8266_v35 = vpop.eup %8265 }
 0x6ee   : > { %v8268_v5 = vpop.eup %8267  ;;  %v11372_v14 = vmul.f32 %v8266_v35, %v11290_v49 }
 0x6ef   : > { %v8270_v55 = vpop.eup %8269  ;;  %7408 = vmatpush3.bf16.msra.mxu0 %v3075_v37  ;;  %v11375_v44 = vmul.f32 %v8268_v5, %v11295_v48  ;;  %v3107_v37 = vmul.bf16 %v10416_v25, %v12597_v39  ;;  %v3108_v39 = vmul.bf16 %v10416_v25, %v12598_v60  ;;  %v12601_v60 = vld [vmem:[#allocation181_spill] sm:$0xff] }
 0x6f0   : > { %v8272_v61 = vpop.eup %8271  ;;  %7409 = vmatprep.subr.bf16.mxu0 %v3076_v20  ;;  %v7205_v43 = vpop.f32.mrb[156].mxu0  ;;  %v11378_v31 = vmul.f32 %v8270_v55, %v11301_v29 }
 0x6f1   : > { %v5242_v34 = vmax.f32 %v7205_v43, 1e-30  ;;  %v7397_v57 = vpop.f32.mrb[20].mxu1  ;;  %v4285_v23 = vpop.f32.mrb[157].mxu0  ;;  %v11381_v32 = vmul.f32 %v8272_v61, %v11305_v4 }
 0x6f2   : > { %v5240_v38 = vmax.f32 %v4285_v23, 1e-30  ;;  %v4805_v49 = vpop.f32.mrb[21].mxu1  ;;  %v7206_v35 = vpop.f32.mrb[158].mxu0  ;;  %v12599_v23 = vld [vmem:[#allocation184_spill] sm:$0xff] }
 0x6f3   : > { %8273 = vrcp.f32 %v5242_v34  ;;  %v5243_v5 = vmax.f32 %v7206_v35, 1e-30  ;;  %v7398_v50 = vpop.f32.mrb[22].mxu1  ;;  %7410 = vmatpush3.bf16.msra.mxu0 %v3076_v20  ;;  %v4288_v29 = vpop.f32.mrb[159].mxu0  ;;  %v3015_v35 = vmul.bf16 %v10339_v33, %v12599_v23  ;;  %v3047_v1 = vmul.bf16 %v10353_v54, %v12599_v23 }
 0x6f4   : > { %8275 = vrcp.f32 %v5240_v38  ;;  %v5241_v4 = vmax.f32 %v4288_v29, 1e-30  ;;  %v4808_v61 = vpop.f32.mrb[23].mxu1  ;;  %7411 = vmatprep.subr.bf16.mxu0 %v3107_v37 }
 0x6f5   : > { %8277 = vrcp.f32 %v5243_v5 }
 0x6f6   : > { %8279 = vrcp.f32 %v5241_v4 }
 0x6f7   : > { %7412 = vmatpush3.bf16.msra.mxu0 %v3107_v37  ;;  %v3016_v37 = vmul.bf16 %v10339_v33, %v12601_v60 }
 0x6f8   : > { %7413 = vmatprep.subr.bf16.mxu0 %v3108_v39  ;;  %v11391_v43 = vpop.f32.mrb[160].mxu0 }
 0x6f9   : > { %v11393_v34 = vpop.f32.mrb[161].mxu0 }
 0x6fa   : > { %v11395_v20 = vpop.f32.mrb[162].mxu0 }
 0x6fb   : > { %7414 = vmatpush3.bf16.msra.mxu0 %v3108_v39  ;;  %v11399_v38 = vpop.f32.mrb[163].mxu0 }
 0x6fc   : > { %12600 = vst [vmem:[#allocation42_spill] sm:$0xff] %v11399_v38  ;;  %7439 = vmatprep.subr.bf16.mxu0 %v3015_v35 }
 0x6fd   : > { %v8274_v5 = vpop.eup %8273 }
 0x6fe   : > { %v8276_v29 = vpop.eup %8275  ;;  %v11401_v4 = vmul.f32 %v8274_v5, %v7397_v57  ;;  %7416 = vmatmul.mubr.bf16.vlgmr.msra.gmra.mrb[200].mxu0 %v11026_v56 }
 0x6ff   : > { %v8278_v48 = vpop.eup %8277  ;;  %v11406_v55 = vmul.f32 %v8276_v29, %v4805_v49  ;;  %7440 = vmatpush3.bf16.msra.mxu0 %v3015_v35  ;;  %7455 = vmatprep.mubr.bf16.mxu0 %v11119_v40 }
 0x700   : > { %v8280_v63 = vpop.eup %8279  ;;  %v11409_v39 = vmul.f32 %v8278_v48, %v7398_v50  ;;  %7441 = vmatprep.subr.bf16.mxu0 %v3016_v37  ;;  %v7213_v59 = vpop.f32.mrb[164].mxu0 }
 0x701   : > { %v11411_v8 = vmul.f32 %v8280_v63, %v4808_v61  ;;  %v4317_v57 = vpop.f32.mrb[165].mxu0  ;;  %v5250_v35 = vmax.f32 %v7213_v59, 1e-30  ;;  %v3048_v63 = vmul.bf16 %v10353_v54, %v12601_v60 }
 0x702   : > { %v7214_v5 = vpop.f32.mrb[166].mxu0  ;;  %v5248_v50 = vmax.f32 %v4317_v57, 1e-30 }
 0x703   : > { %7442 = vmatpush3.bf16.msra.mxu0 %v3016_v37  ;;  %v4320_v40 = vpop.f32.mrb[167].mxu0  ;;  %v5251_v48 = vmax.f32 %v7214_v5, 1e-30  ;;  %8281 = vrcp.f32 %v5250_v35  ;;  %v3079_v37 = vmul.bf16 %v10387_v47, %v12599_v23 }
 0x704   : > { %7443 = vmatprep.subr.bf16.mxu0 %v3047_v1  ;;  %v5249_v29 = vmax.f32 %v4320_v40, 1e-30  ;;  %8283 = vrcp.f32 %v5248_v50 }
 0x705   : > { %8285 = vrcp.f32 %v5251_v48 }
 0x706   : > { %8287 = vrcp.f32 %v5249_v29 }
 0x707   : > { %7444 = vmatpush3.bf16.msra.mxu0 %v3047_v1  ;;  %v3080_v1 = vmul.bf16 %v10387_v47, %v12601_v60 }
 0x708   : > { %7445 = vmatprep.subr.bf16.mxu0 %v3048_v63  ;;  %v11421_v61 = vpop.f32.mrb[168].mxu0 }
 0x709   : > { %12602 = vst [vmem:[#allocation38_spill] sm:$0xff] %v11421_v61  ;;  %v11423_v56 = vpop.f32.mrb[169].mxu0 }
 0x70a   : > { %12603 = vst [vmem:[#allocation113_spill] sm:$0xff] %v11423_v56  ;;  %v11425_v59 = vpop.f32.mrb[170].mxu0 }
 0x70b   : > { %12604 = vst [vmem:[#allocation50_spill] sm:$0xff] %v11425_v59  ;;  %7446 = vmatpush3.bf16.msra.mxu0 %v3048_v63  ;;  %v11429_v57 = vpop.f32.mrb[171].mxu0  ;;  %v3111_v63 = vmul.bf16 %v10416_v25, %v12599_v23 }
 0x70c   : > { %12605 = vst [vmem:[#allocation46_spill] sm:$0xff] %v11429_v57  ;;  %7447 = vmatprep.subr.bf16.mxu0 %v3079_v37 }
 0x70d   : > { %v8282_v35 = vpop.eup %8281 }
 0x70e   : > { %v8284_v48 = vpop.eup %8283 }
 0x70f   : > { %7448 = vmatpush3.bf16.msra.mxu0 %v3079_v37  ;;  %v8286_v9 = vpop.eup %8285 }
 0x710   : > { %7449 = vmatprep.subr.bf16.mxu0 %v3080_v1  ;;  %v7221_v5 = vpop.f32.mrb[172].mxu0  ;;  %v8288_v37 = vpop.eup %8287 }
 0x711   : > { %v7437_v40 = vpop.f32.mrb[24].mxu1  ;;  %v4349_v50 = vpop.f32.mrb[173].mxu0 }
 0x712   : > { %v11433_v29 = vmul.f32 %v8282_v35, %v7437_v40  ;;  %v4903_v49 = vpop.f32.mrb[25].mxu1  ;;  %v7222_v45 = vpop.f32.mrb[174].mxu0  ;;  %v3112_v40 = vmul.bf16 %v10416_v25, %v12601_v60 }
 0x713   : > { %v11437_v28 = vmul.f32 %v8284_v48, %v4903_v49  ;;  %v7438_v57 = vpop.f32.mrb[26].mxu1  ;;  %7450 = vmatpush3.bf16.msra.mxu0 %v3080_v1  ;;  %v4352_v59 = vpop.f32.mrb[175].mxu0  ;;  %v12606_v49 = vld [vmem:[#allocation199_spill] sm:$0xff]  ;;  %v5256_v48 = vmax.f32 %v4349_v50, 1e-30 }
 0x714   : > { %v11439_v56 = vmul.f32 %v8286_v9, %v7438_v57  ;;  %v4906_v61 = vpop.f32.mrb[27].mxu1  ;;  %7451 = vmatprep.subr.bf16.mxu0 %v3111_v63  ;;  %v3019_v1 = vmul.bf16 %v10339_v33, %v12606_v49  ;;  %v12607_v9 = vld [vmem:[#allocation197_spill] sm:$0xff]  ;;  %v3051_v60 = vmul.bf16 %v10353_v54, %v12606_v49  ;;  %v5258_v57 = vmax.f32 %v7221_v5, 1e-30 }
 0x715   : > { %v11441_v38 = vmul.f32 %v8288_v37, %v4906_v61  ;;  %v3020_v61 = vmul.bf16 %v10339_v33, %v12607_v9  ;;  %v5257_v37 = vmax.f32 %v4352_v59, 1e-30 }
 0x716   : > { %8289 = vrcp.f32 %v5258_v57 }
 0x717   : > { %7452 = vmatpush3.bf16.msra.mxu0 %v3111_v63  ;;  %v5259_v63 = vmax.f32 %v7222_v45, 1e-30  ;;  %8291 = vrcp.f32 %v5256_v48 }
 0x718   : > { %7453 = vmatprep.subr.bf16.mxu0 %v3112_v40 }
 0x719   : > { %8293 = vrcp.f32 %v5259_v63 }
 0x71a   : > { %8295 = vrcp.f32 %v5257_v37 }
 0x71b   : > { %7454 = vmatpush3.bf16.msra.mxu0 %v3112_v40  ;;  %v3052_v40 = vmul.bf16 %v10353_v54, %v12607_v9 }
 0x71c   : > { %7479 = vmatprep.subr.bf16.mxu0 %v3019_v1 }
 0x71e   : > { %7456 = vmatmul.mubr.bf16.vlgmr.msra.gmra.mrb[204].mxu0 %v11117_v3  ;;  %v3083_v3 = vmul.bf16 %v10387_v47, %v12606_v49 }
 0x71f   : > { %7480 = vmatpush3.bf16.msra.mxu0 %v3019_v1  ;;  %7495 = vmatprep.mubr.bf16.mxu0 %v11184_v11  ;;  %v3084_v11 = vmul.bf16 %v10387_v47, %v12607_v9 }
 0x720   : > { %7481 = vmatprep.subr.bf16.mxu0 %v3020_v61  ;;  %v8290_v45 = vpop.eup %8289 }
 0x721   : > { %v8292_v5 = vpop.eup %8291 }
 0x723   : > { %7482 = vmatpush3.bf16.msra.mxu0 %v3020_v61  ;;  %v3115_v61 = vmul.bf16 %v10416_v25, %v12606_v49 }
 0x724   : > { %7483 = vmatprep.subr.bf16.mxu0 %v3051_v60 }
 0x727   : > { %7484 = vmatpush3.bf16.msra.mxu0 %v3051_v60  ;;  %v8294_v60 = vpop.eup %8293 }
 0x728   : > { %7485 = vmatprep.subr.bf16.mxu0 %v3052_v40  ;;  %v8296_v63 = vpop.eup %8295 }
 0x72b   : > { %7486 = vmatpush3.bf16.msra.mxu0 %v3052_v40 }
 0x72c   : > { %7487 = vmatprep.subr.bf16.mxu0 %v3083_v3 }
 0x72f   : > { %7488 = vmatpush3.bf16.msra.mxu0 %v3083_v3 }
 0x730   : > { %7489 = vmatprep.subr.bf16.mxu0 %v3084_v11 }
 0x731   : > { %v7477_v59 = vpop.f32.mrb[28].mxu1 }
 0x732   : > { %v11463_v50 = vmul.f32 %v8290_v45, %v7477_v59  ;;  %v5001_v1 = vpop.f32.mrb[29].mxu1  ;;  %v3116_v59 = vmul.bf16 %v10416_v25, %v12607_v9 }
 0x733   : > { %v11467_v57 = vmul.f32 %v8292_v5, %v5001_v1  ;;  %v7478_v48 = vpop.f32.mrb[30].mxu1  ;;  %7490 = vmatpush3.bf16.msra.mxu0 %v3084_v11  ;;  %v12608_v5 = vld [vmem:[#allocation207_spill] sm:$0xff]  ;;  %v12609_v1 = vld [vmem:[#allocation206_spill] sm:$0xff] }
 0x734   : > { %v11469_v37 = vmul.f32 %v8294_v60, %v7478_v48  ;;  %v5004_v40 = vpop.f32.mrb[31].mxu1  ;;  %7491 = vmatprep.subr.bf16.mxu0 %v3115_v61  ;;  %v3023_v11 = vmul.bf16 %v10339_v33, %v12608_v5  ;;  %v3024_v60 = vmul.bf16 %v10339_v33, %v12609_v1  ;;  %v3056_v33 = vmul.bf16 %v10353_v54, %v12609_v1 }
 0x735   : > { %v11471_v3 = vmul.f32 %v8296_v63, %v5004_v40 }
 0x737   : > { %7492 = vmatpush3.bf16.msra.mxu0 %v3115_v61  ;;  %v3055_v61 = vmul.bf16 %v10353_v54, %v12608_v5  ;;  %v3088_v54 = vmul.bf16 %v10387_v47, %v12609_v1 }
 0x738   : > { %7493 = vmatprep.subr.bf16.mxu0 %v3116_v59 }
 0x73b   : > { %7494 = vmatpush3.bf16.msra.mxu0 %v3116_v59 }
 0x73c   : > { %7519 = vmatprep.subr.bf16.mxu0 %v3023_v11 }
 0x73e   : > { %7496 = vmatmul.mubr.bf16.vlgmr.msra.gmra.mrb[208].mxu0 %v11182_v7 }
 0x73f   : > { %7520 = vmatpush3.bf16.msra.mxu0 %v3023_v11  ;;  %7535 = vmatprep.mubr.bf16.mxu0 %v11237_v15  ;;  %v3087_v11 = vmul.bf16 %v10387_v47, %v12608_v5 }
 0x740   : > { %7521 = vmatprep.subr.bf16.mxu0 %v3024_v60 }
 0x741   : > { %v11485_v9 = vpop.f32.mrb[176].mxu0 }
 0x742   : > { %v11487_v48 = vpop.f32.mrb[177].mxu0 }
 0x743   : > { %7522 = vmatpush3.bf16.msra.mxu0 %v3024_v60  ;;  %v11491_v63 = vpop.f32.mrb[178].mxu0 }
 0x744   : > { %12610 = vst [vmem:[#allocation107_spill] sm:$0xff] %v11491_v63  ;;  %7523 = vmatprep.subr.bf16.mxu0 %v3055_v61  ;;  %v11493_v40 = vpop.f32.mrb[179].mxu0 }
 0x745   : > { %12611 = vst [vmem:[#allocation115_spill] sm:$0xff] %v11493_v40 }
 0x747   : > { %7524 = vmatpush3.bf16.msra.mxu0 %v3055_v61 }
 0x748   : > { %7525 = vmatprep.subr.bf16.mxu0 %v3056_v33 }
 0x749   : > { %v7229_v7 = vpop.f32.mrb[180].mxu0 }
 0x74a   : > { %v5266_v15 = vmax.f32 %v7229_v7, 1e-30  ;;  %v4381_v59 = vpop.f32.mrb[181].mxu0 }
 0x74b   : > { %v5264_v45 = vmax.f32 %v4381_v59, 1e-30  ;;  %7526 = vmatpush3.bf16.msra.mxu0 %v3056_v33  ;;  %v7230_v49 = vpop.f32.mrb[182].mxu0  ;;  %v3119_v59 = vmul.bf16 %v10416_v25, %v12608_v5 }
 0x74c   : > { %8297 = vrcp.f32 %v5266_v15  ;;  %v5267_v60 = vmax.f32 %v7230_v49, 1e-30  ;;  %7527 = vmatprep.subr.bf16.mxu0 %v3087_v11  ;;  %v4384_v35 = vpop.f32.mrb[183].mxu0 }
 0x74d   : > { %8299 = vrcp.f32 %v5264_v45  ;;  %v5265_v23 = vmax.f32 %v4384_v35, 1e-30  ;;  %v3120_v35 = vmul.bf16 %v10416_v25, %v12609_v1  ;;  %v7842_v1 = vld [vmem:[#allocation11 + $0x8] sm:$0xff]  }
 0x74e   : > { %8301 = vrcp.f32 %v5267_v60 }
 0x74f   : > { %8303 = vrcp.f32 %v5265_v23  ;;  %7528 = vmatpush3.bf16.msra.mxu0 %v3087_v11  ;;  %v7841_v11 = vld [vmem:[#allocation11] sm:$0xff]  }
 0x750   : > { %7529 = vmatprep.subr.bf16.mxu0 %v3088_v54 }
 0x751   : > { %v7517_v61 = vpop.f32.mrb[32].mxu1 }
 0x752   : > { %v5099_v7 = vpop.f32.mrb[33].mxu1 }
 0x753   : > { %v7518_v33 = vpop.f32.mrb[34].mxu1  ;;  %7530 = vmatpush3.bf16.msra.mxu0 %v3088_v54 }
 0x754   : > { %v5102_v15 = vpop.f32.mrb[35].mxu1  ;;  %7531 = vmatprep.subr.bf16.mxu0 %v3119_v59 }
 0x756   : > { %v8298_v49 = vpop.eup %8297 }
 0x757   : > { %v8300_v45 = vpop.eup %8299  ;;  %v11505_v60 = vmul.f32 %v8298_v49, %v7517_v61  ;;  %7532 = vmatpush3.bf16.msra.mxu0 %v3119_v59  ;;  %v12612_v61 = vpack.c.bf16 %v11271_v12, %v11265_v26  ;;  %v7845_v59 = vld [vmem:[#allocation11 + $0x20] sm:$0xff]   ;;  %v7848_v12 = vld [vmem:[#allocation11 + $0x38] sm:$0xff]  }
 0x758   : > { %v8302_v47 = vpop.eup %8301  ;;  %v11507_v23 = vmul.f32 %v8300_v45, %v5099_v7  ;;  %7533 = vmatprep.subr.bf16.mxu0 %v3120_v35  ;;  %v7843_v7 = vld [vmem:[#allocation11 + $0x10] sm:$0xff]   ;;  %v12613_v45 = vpack.c.bf16 %v11268_v62, %v11262_v6  ;;  %v5229_v6 = vmax.f32 %v11331_v17, 1e-30  ;;  %v12615_v62 = vpack.c.bf16 %v11288_v13, %v11282_v41 }
 0x759   : > { %v8304_v40 = vpop.eup %8303  ;;  %v11509_v63 = vmul.f32 %v8302_v47, %v7518_v33  ;;  %v7846_v33 = vld [vmem:[#allocation11 + $0x28] sm:$0xff]   ;;  %v12614_v47 = vpack.c.bf16 %v11293_v30, %v11285_v0  ;;  %v12616_v0 = vpack.c.bf16 %v11323_v16, %v11313_v19  ;;  %v12617_v41 = vpack.c.bf16 %v11318_v27, %v11310_v10 }
 0x75a   : > { %v11511_v5 = vmul.f32 %v8304_v40, %v5102_v15  ;;  %v7844_v40 = vld [vmem:[#allocation11 + $0x18] sm:$0xff]   ;;  %v7847_v15 = vld [vmem:[#allocation11 + $0x30] sm:$0xff]   ;;  %v12618_v13 = vpack.c.bf16 %v11349_v42, %v11343_v36  ;;  %v12619_v27 = vpack.c.bf16 %v11346_v2, %v11339_v51  ;;  %v12620_v2 = vpack.c.bf16 %v11381_v32, %v11375_v44 }
 0x75b   : > { %v5431_v54 = vpack.c.bf16 %v11509_v63, %v11505_v60  ;;  %7534 = vmatpush3.bf16.msra.mxu0 %v3120_v35 }
 0x75c   : > { %v5430_v25 = vpack.c.bf16 %v11511_v5, %v11507_v23  ;;  %7559 = vmatprep.subr.bf16.mxu0 %v7841_v11 }
 0x75e   : > { %7536 = vmatmul.mubr.bf16.vlgmr.msra.gmra.mrb[212].mxu0 %v11235_v53 }
 0x75f   : > { %7560 = vmatpush3.bf16.msra.mxu0 %v7841_v11  ;;  %7575 = vmatprep.mubr.bf16.mxu0 %v12612_v61  ;;  %v5230_v61 = vmax.f32 %v11315_v24, 1e-30 }
 0x760   : > { %7561 = vmatprep.subr.bf16.mxu0 %v7842_v1 }
 0x761   : > { %8305 = vrcp.f32 %v5230_v61 }
 0x763   : > { %7562 = vmatpush3.bf16.msra.mxu0 %v7842_v1 }
 0x764   : > { %7563 = vmatprep.subr.bf16.mxu0 %v7843_v7 }
 0x767   : > { %7564 = vmatpush3.bf16.msra.mxu0 %v7843_v7 }
 0x768   : > { %7565 = vmatprep.subr.bf16.mxu0 %v7844_v40 }
 0x76b   : > { %7566 = vmatpush3.bf16.msra.mxu0 %v7844_v40  ;;  %v5228_v40 = vmax.f32 %v11320_v21, 1e-30  ;;  %v8306_v19 = vpop.eup %8305 }
 0x76c   : > { %7567 = vmatprep.subr.bf16.mxu0 %v7845_v59 }
 0x76d   : > { %8307 = vrcp.f32 %v5228_v40 }
 0x76f   : > { %7568 = vmatpush3.bf16.msra.mxu0 %v7845_v59 }
 0x770   : > { %7569 = vmatprep.subr.bf16.mxu0 %v7846_v33 }
 0x771   : > { %v7557_v53 = vpop.f32.mrb[36].mxu1 }
 0x772   : > { %v5197_v49 = vpop.f32.mrb[37].mxu1 }
 0x773   : > { %v7558_v35 = vpop.f32.mrb[38].mxu1  ;;  %7570 = vmatpush3.bf16.msra.mxu0 %v7846_v33  ;;  %v5231_v33 = vmax.f32 %v11325_v52, 1e-30 }
 0x774   : > { %v5200_v26 = vpop.f32.mrb[39].mxu1  ;;  %7571 = vmatprep.subr.bf16.mxu0 %v7847_v15 }
 0x775   : > { %8309 = vrcp.f32 %v5231_v33 }
 0x776   : > { %8311 = vrcp.f32 %v5229_v6 }
 0x777   : > { %7572 = vmatpush3.bf16.msra.mxu0 %v7847_v15 }
 0x778   : > { %7573 = vmatprep.subr.bf16.mxu0 %v7848_v12 }
 0x77b   : > { %7574 = vmatpush3.bf16.msra.mxu0 %v7848_v12 }
 0x77e   : > { %7576 = vmatmul.mubr.bf16.vlgmr.msra.gmra.mrb[216].mxu0 %v12613_v45 }
 0x77f   : > { %7579 = vmatprep.mubr.bf16.mxu0 %v12614_v47  ;;  %v8308_v47 = vpop.eup %8307 }
 0x780   : > { %v8310_v33 = vpop.eup %8309 }
 0x781   : > { %v11527_v11 = vpop.f32.mrb[184].mxu0 }
 0x782   : > { %v11529_v1 = vpop.f32.mrb[185].mxu0 }
 0x783   : > { %v11532_v7 = vpop.f32.mrb[186].mxu0 }
 0x784   : > { %v11535_v59 = vpop.f32.mrb[187].mxu0 }
 0x786   : > { %7580 = vmatmul.mubr.bf16.gmra.mrb[220].mxu0 %v12615_v62 }
 0x787   : > { %7583 = vmatprep.mubr.bf16.mxu0 %v12616_v0  ;;  %v8312_v0 = vpop.eup %8311 }
 0x789   : > { %v7237_v30 = vpop.f32.mrb[188].mxu0 }
 0x78a   : > { %v5274_v24 = vmax.f32 %v7237_v30, 1e-30  ;;  %v4413_v21 = vpop.f32.mrb[189].mxu0 }
 0x78b   : > { %v5272_v15 = vmax.f32 %v4413_v21, 1e-30  ;;  %v7238_v12 = vpop.f32.mrb[190].mxu0 }
 0x78c   : > { %8313 = vrcp.f32 %v5274_v24  ;;  %v5275_v52 = vmax.f32 %v7238_v12, 1e-30  ;;  %v4416_v17 = vpop.f32.mrb[191].mxu0 }
 0x78d   : > { %8315 = vrcp.f32 %v5272_v15  ;;  %v5273_v45 = vmax.f32 %v4416_v17, 1e-30 }
 0x78e   : > { %8317 = vrcp.f32 %v5275_v52  ;;  %7584 = vmatmul.mubr.bf16.gmra.mrb[224].mxu0 %v12617_v41 }
 0x78f   : > { %8319 = vrcp.f32 %v5273_v45  ;;  %7587 = vmatprep.mubr.bf16.mxu0 %v12618_v13 }
 0x791   : > { %v7337_v16 = vpop.f32.mrb[192].mxu0 }
 0x792   : > { %v5358_v61 = vmul.f32 %v8306_v19, %v7337_v16  ;;  %v4658_v40 = vpop.f32.mrb[193].mxu0  ;;  %v12621_v16 = vpack.c.bf16 %v11378_v31, %v11372_v14  ;;  %v12622_v14 = vpack.c.bf16 %v11411_v8, %v11406_v55  ;;  %v12623_v31 = vpack.c.bf16 %v11409_v39, %v11401_v4 }
 0x793   : > { %v5356_v6 = vmul.f32 %v8308_v47, %v4658_v40  ;;  %v7338_v62 = vpop.f32.mrb[194].mxu0 }
 0x794   : > { %v5359_v30 = vmul.f32 %v8310_v33, %v7338_v62  ;;  %v4661_v24 = vpop.f32.mrb[195].mxu0 }
 0x795   : > { %v5357_v21 = vmul.f32 %v8312_v0, %v4661_v24  ;;  %v5246_v24 = vmax.f32 %v11391_v43, 1e-30 }
 0x796   : > { %v8314_v15 = vpop.eup %8313  ;;  %v5413_v10 = vpack.c.bf16 %v5359_v30, %v5358_v61  ;;  %7588 = vmatmul.mubr.bf16.gmra.mrb[228].mxu0 %v12619_v27 }
 0x797   : > { %v8316_v36 = vpop.eup %8315  ;;  %v11554_v42 = vmul.f32 %v8314_v15, %v7557_v53  ;;  %v5412_v12 = vpack.c.bf16 %v5357_v21, %v5356_v6  ;;  %v5238_v53 = vmax.f32 %v11359_v22, 1e-30  ;;  %v5244_v21 = vmax.f32 %v11393_v34, 1e-30 }
 0x798   : > { %v8318_v52 = vpop.eup %8317  ;;  %v11556_v17 = vmul.f32 %v8316_v36, %v5197_v49  ;;  %v5236_v49 = vmax.f32 %v11361_v18, 1e-30  ;;  %v5247_v15 = vmax.f32 %v11395_v20, 1e-30 }
 0x799   : > { %v8320_v45 = vpop.eup %8319  ;;  %v11558_v41 = vmul.f32 %v8318_v52, %v7558_v35  ;;  %7591 = vmatprep.mubr.bf16.mxu0 %v5412_v12  ;;  %v5239_v35 = vmax.f32 %v11363_v58, 1e-30  ;;  %8321 = vrcp.f32 %v5238_v53 }
 0x79a   : > { %v11560_v13 = vmul.f32 %v8320_v45, %v5200_v26  ;;  %v5237_v26 = vmax.f32 %v11367_v46, 1e-30  ;;  %8323 = vrcp.f32 %v5236_v49 }
 0x79b   : > { %v5435_v19 = vpack.c.bf16 %v11558_v41, %v11554_v42  ;;  %8325 = vrcp.f32 %v5239_v35  ;;  %v12625_v35 = vpack.c.bf16 %v11441_v38, %v11437_v28 }
 0x79c   : > { %v5434_v51 = vpack.c.bf16 %v11560_v13, %v11556_v17  ;;  %8327 = vrcp.f32 %v5237_v26  ;;  %v12626_v26 = vpack.c.bf16 %v11439_v56, %v11433_v29 }
 0x79d   : > { %8329 = vrcp.f32 %v5246_v24 }
 0x79e   : > { %7592 = vmatmul.mubr.bf16.gmra.mrb[232].mxu0 %v5413_v10  ;;  %v12624_v10 = vld [vmem:[#allocation42_spill] sm:$0xff]  ;;  %8331 = vrcp.f32 %v5244_v21  ;;  %v12631_v21 = vpack.c.bf16 %v11471_v3, %v11467_v57 }
 0x79f   : > { %7595 = vmatprep.mubr.bf16.mxu0 %v12620_v2  ;;  %v5245_v27 = vmax.f32 %v12624_v10, 1e-30  ;;  %8333 = vrcp.f32 %v5247_v15  ;;  %v12632_v15 = vpack.c.bf16 %v11469_v37, %v11463_v50  ;;  %v5262_v10 = vmax.f32 %v11485_v9, 1e-30 }
 0x7a1   : > { %8335 = vrcp.f32 %v5245_v27  ;;  %v5260_v27 = vmax.f32 %v11487_v48, 1e-30 }
 0x7a3   : > { %v8322_v47 = vpop.eup %8321 }
 0x7a4   : > { %v8324_v44 = vpop.eup %8323 }
 0x7a5   : > { %v8326_v22 = vpop.eup %8325 }
 0x7a6   : > { %7596 = vmatmul.mubr.bf16.gmra.mrb[236].mxu0 %v12621_v16  ;;  %v8328_v6 = vpop.eup %8327  ;;  %v12627_v16 = vld [vmem:[#allocation38_spill] sm:$0xff] }
 0x7a7   : > { %v8330_v36 = vpop.eup %8329 }
 0x7a8   : > { %v8332_v8 = vpop.eup %8331 }
 0x7a9   : > { %v8334_v45 = vpop.eup %8333 }
 0x7ab   : > { %v8336_v2 = vpop.eup %8335 }
 0x7b1   : > { %v7377_v61 = vpop.f32.mrb[196].mxu0 }
 0x7b2   : > { %v5366_v32 = vmul.f32 %v8322_v47, %v7377_v61  ;;  %v4756_v40 = vpop.f32.mrb[197].mxu0  ;;  %v5254_v47 = vmax.f32 %v12627_v16, 1e-30  ;;  %v12628_v61 = vld [vmem:[#allocation113_spill] sm:$0xff] }
 0x7b3   : > { %v5364_v33 = vmul.f32 %v8324_v44, %v4756_v40  ;;  %v7378_v18 = vpop.f32.mrb[198].mxu0  ;;  %v5252_v44 = vmax.f32 %v12628_v61, 1e-30 }
 0x7b4   : > { %v5367_v58 = vmul.f32 %v8326_v22, %v7378_v18  ;;  %v4759_v62 = vpop.f32.mrb[199].mxu0  ;;  %v12630_v22 = vld [vmem:[#allocation46_spill] sm:$0xff]  ;;  %8337 = vrcp.f32 %v5254_v47 }
 0x7b5   : > { %v5365_v46 = vmul.f32 %v8328_v6, %v4759_v62  ;;  %8339 = vrcp.f32 %v5252_v44 }
 0x7b6   : > { %v5417_v0 = vpack.c.bf16 %v5367_v58, %v5366_v32  ;;  %v12629_v32 = vld [vmem:[#allocation50_spill] sm:$0xff] }
 0x7b7   : > { %v5416_v30 = vpack.c.bf16 %v5365_v46, %v5364_v33  ;;  %v5255_v40 = vmax.f32 %v12629_v32, 1e-30  ;;  %v5253_v33 = vmax.f32 %v12630_v22, 1e-30 }
 0x7b9   : > { %7599 = vmatprep.mubr.bf16.mxu0 %v5416_v30  ;;  %8341 = vrcp.f32 %v5255_v40 }
 0x7ba   : > { %7600 = vmatmul.mubr.bf16.gmra.mrb[240].mxu0 %v5417_v0  ;;  %8343 = vrcp.f32 %v5253_v33 }
 0x7bb   : > { %7603 = vmatprep.mubr.bf16.mxu0 %v12622_v14  ;;  %8345 = vrcp.f32 %v5262_v10 }
 0x7bc   : > { %8347 = vrcp.f32 %v5260_v27 }
 0x7be   : > { %v8338_v18 = vpop.eup %8337 }
 0x7bf   : > { %v8340_v28 = vpop.eup %8339 }
 0x7c2   : > { %7604 = vmatmul.mubr.bf16.gmra.mrb[244].mxu0 %v12623_v31 }
 0x7c3   : > { %v8342_v62 = vpop.eup %8341 }
 0x7c4   : > { %v8344_v46 = vpop.eup %8343 }
 0x7d1   : > { %v7417_v12 = vpop.f32.mrb[200].mxu0 }
 0x7d2   : > { %v5374_v55 = vmul.f32 %v8330_v36, %v7417_v12  ;;  %v4854_v52 = vpop.f32.mrb[201].mxu0  ;;  %v12633_v36 = vld [vmem:[#allocation107_spill] sm:$0xff] }
 0x7d3   : > { %v5372_v4 = vmul.f32 %v8332_v8, %v4854_v52  ;;  %v7418_v39 = vpop.f32.mrb[202].mxu0  ;;  %v5263_v12 = vmax.f32 %v12633_v36, 1e-30  ;;  %v12634_v8 = vld [vmem:[#allocation115_spill] sm:$0xff]  ;;  %v8346_v52 = vpop.eup %8345 }
 0x7d4   : > { %v5375_v43 = vmul.f32 %v8334_v45, %v7418_v39  ;;  %v4857_v53 = vpop.f32.mrb[203].mxu0  ;;  %v8348_v57 = vpop.eup %8347 }
 0x7d5   : > { %v5373_v34 = vmul.f32 %v8336_v2, %v4857_v53  ;;  %8349 = vrcp.f32 %v5263_v12 }
 0x7d6   : > { %v5421_v49 = vpack.c.bf16 %v5375_v43, %v5374_v55  ;;  %v5261_v55 = vmax.f32 %v12634_v8, 1e-30 }
 0x7d7   : > { %v5420_v20 = vpack.c.bf16 %v5373_v34, %v5372_v4 }
 0x7d8   : > { %8351 = vrcp.f32 %v5261_v55 }
 0x7d9   : > { %7607 = vmatprep.mubr.bf16.mxu0 %v5420_v20  ;;  %v5268_v20 = vmax.f32 %v11529_v1, 1e-30 }
 0x7da   : > { %7608 = vmatmul.mubr.bf16.gmra.mrb[248].mxu0 %v5421_v49  ;;  %v5270_v49 = vmax.f32 %v11527_v11, 1e-30 }
 0x7db   : > { %7611 = vmatprep.mubr.bf16.mxu0 %v12625_v35  ;;  %v5271_v35 = vmax.f32 %v11532_v7, 1e-30 }
 0x7dc   : > { %8353 = vrcp.f32 %v5270_v49 }
 0x7dd   : > { %8355 = vrcp.f32 %v5268_v20 }
 0x7de   : > { %8357 = vrcp.f32 %v5271_v35 }
 0x7df   : > { %v8350_v39 = vpop.eup %8349 }
 0x7e2   : > { %7612 = vmatmul.mubr.bf16.gmra.mrb[252].mxu0 %v12626_v26  ;;  %v8352_v2 = vpop.eup %8351  ;;  %v5269_v26 = vmax.f32 %v11535_v59, 1e-30  ;;  %v11626_v59 = vld [vmem:[%s11817_s8] ss:$0 sm:$0xff] }
 0x7e4   : > { %8359 = vrcp.f32 %v5269_v26 }
 0x7e6   : > { %v8354_v16 = vpop.eup %8353 }
 0x7e7   : > { %v8356_v23 = vpop.eup %8355 }
 0x7e8   : > { %v8358_v63 = vpop.eup %8357 }
 0x7ee   : > { %v8360_v11 = vpop.eup %8359 }
 0x7f1   : > { %v7457_v6 = vpop.f32.mrb[204].mxu0 }
 0x7f2   : > { %v5382_v38 = vmul.f32 %v8338_v18, %v7457_v6  ;;  %v4952_v58 = vpop.f32.mrb[205].mxu0 }
 0x7f3   : > { %v5380_v56 = vmul.f32 %v8340_v28, %v4952_v58  ;;  %v7458_v29 = vpop.f32.mrb[206].mxu0 }
 0x7f4   : > { %v5383_v0 = vmul.f32 %v8342_v62, %v7458_v29  ;;  %v4955_v30 = vpop.f32.mrb[207].mxu0 }
 0x7f5   : > { %v5381_v14 = vmul.f32 %v8344_v46, %v4955_v30 }
 0x7f6   : > { %v5425_v31 = vpack.c.bf16 %v5383_v0, %v5382_v38 }
 0x7f7   : > { %v5424_v24 = vpack.c.bf16 %v5381_v14, %v5380_v56 }
 0x7f9   : > { %7615 = vmatprep.mubr.bf16.mxu0 %v5424_v24 }
 0x7fa   : > { %7616 = vmatmul.mubr.bf16.gmra.mrb[0].mxu0 %v5425_v31 }
 0x7fb   : > { %7619 = vmatprep.mubr.bf16.mxu0 %v12631_v21 }
 0x802   : > { %7620 = vmatmul.mubr.bf16.gmra.mrb[4].mxu0 %v12632_v15 }
 0x811   : > { %v7497_v45 = vpop.f32.mrb[208].mxu0 }
 0x812   : > { %v5390_v3 = vmul.f32 %v8346_v52, %v7497_v45  ;;  %v5050_v4 = vpop.f32.mrb[209].mxu0 }
 0x813   : > { %v5388_v50 = vmul.f32 %v8348_v57, %v5050_v4  ;;  %v7498_v37 = vpop.f32.mrb[210].mxu0 }
 0x814   : > { %v5391_v9 = vmul.f32 %v8350_v39, %v7498_v37  ;;  %v5053_v43 = vpop.f32.mrb[211].mxu0 }
 0x815   : > { %v5389_v48 = vmul.f32 %v8352_v2, %v5053_v43 }
 0x816   : > { %v5429_v53 = vpack.c.bf16 %v5391_v9, %v5390_v3 }
 0x817   : > { %v5428_v34 = vpack.c.bf16 %v5389_v48, %v5388_v50 }
 0x819   : > { %7623 = vmatprep.mubr.bf16.mxu0 %v5428_v34 }
 0x81a   : > { %7624 = vmatmul.mubr.bf16.gmra.mrb[8].mxu0 %v5429_v53 }
 0x81b   : > { %7627 = vmatprep.mubr.bf16.mxu0 %v5430_v25 }
 0x822   : > { %7628 = vmatmul.mubr.bf16.gmra.mrb[12].mxu0 %v5431_v54 }
 0x831   : > { %v7537_v47 = vpop.f32.mrb[212].mxu0 }
 0x832   : > { %v5398_v5 = vmul.f32 %v8354_v16, %v7537_v47  ;;  %v5148_v25 = vpop.f32.mrb[213].mxu0 }
 0x833   : > { %v5396_v60 = vmul.f32 %v8356_v23, %v5148_v25  ;;  %v7538_v54 = vpop.f32.mrb[214].mxu0 }
 0x834   : > { %v5399_v61 = vmul.f32 %v8358_v63, %v7538_v54  ;;  %v5151_v1 = vpop.f32.mrb[215].mxu0 }
 0x835   : > { %v5397_v44 = vmul.f32 %v8360_v11, %v5151_v1 }
 0x836   : > { %v5433_v7 = vpack.c.bf16 %v5399_v61, %v5398_v5 }
 0x837   : > { %v5432_v32 = vpack.c.bf16 %v5397_v44, %v5396_v60 }
 0x839   : > { %7631 = vmatprep.mubr.bf16.mxu0 %v5432_v32 }
 0x83a   : > { %7632 = vmatmul.mubr.bf16.gmra.mrb[16].mxu0 %v5433_v7 }
 0x83b   : > { %7635 = vmatprep.mubr.bf16.mxu0 %v5434_v51 }
 0x842   : > { %7636 = vmatmul.mubr.bf16.gmra.mrb[20].mxu0 %v5435_v19 }
 0x851   : > { %v7577_v40 = vpop.f32.mrb[216].mxu0 }
 0x852   : > { %v5550_v22 = vadd.f32 %v7577_v40, %v11626_v59  ;;  %v5541_v33 = vpop.f32.mrb[217].mxu0 }
 0x853   : > { %v5542_v18 = vadd.f32 %v11626_v59, %v5541_v33  ;;  %v7578_v6 = vpop.f32.mrb[218].mxu0 }
 0x854   : > { %5798 = vst [vmem:[%s11630_s21 + $0x10] sm:$0xff] %v5550_v22  ;;  %v5553_v42 = vadd.f32 %v7578_v6, %v11626_v59  ;;  %v5544_v17 = vpop.f32.mrb[219].mxu0 }
 0x855   : > { %5796 = vst [vmem:[%s11630_s21] sm:$0xff] %v5542_v18  ;;  %v5545_v41 = vadd.f32 %v11626_v59, %v5544_v17 }
 0x856   : > { %5799 = vst [vmem:[%s11630_s21 + $0x18] sm:$0xff] %v5553_v42 }
 0x857   : > { %5797 = vst [vmem:[%s11630_s21 + $0x8] sm:$0xff] %v5545_v41 }
 0x859   : > { %v7581_v13 = vpop.f32.mrb[220].mxu0 }
 0x85a   : > { %v5566_v19 = vadd.f32 %v7581_v13, %v11626_v59  ;;  %v5557_v51 = vpop.f32.mrb[221].mxu0 }
 0x85b   : > { %v5558_v28 = vadd.f32 %v11626_v59, %v5557_v51  ;;  %v7582_v38 = vpop.f32.mrb[222].mxu0 }
 0x85c   : > { %5802 = vst [vmem:[%s11630_s21 + $0x30] sm:$0xff] %v5566_v19  ;;  %v5569_v58 = vadd.f32 %v7582_v38, %v11626_v59  ;;  %v5560_v62 = vpop.f32.mrb[223].mxu0 }
 0x85d   : > { %5800 = vst [vmem:[%s11630_s21 + $0x20] sm:$0xff] %v5558_v28  ;;  %v5561_v56 = vadd.f32 %v11626_v59, %v5560_v62 }
 0x85e   : > { %5803 = vst [vmem:[%s11630_s21 + $0x38] sm:$0xff] %v5569_v58 }
 0x85f   : > { %5801 = vst [vmem:[%s11630_s21 + $0x28] sm:$0xff] %v5561_v56 }
 0x861   : > { %v7585_v29 = vpop.f32.mrb[224].mxu0 }
 0x862   : > { %v5582_v46 = vadd.f32 %v7585_v29, %v11626_v59  ;;  %v5573_v0 = vpop.f32.mrb[225].mxu0 }
 0x863   : > { %v5574_v30 = vadd.f32 %v11626_v59, %v5573_v0  ;;  %v7586_v14 = vpop.f32.mrb[226].mxu0 }
 0x864   : > { %5806 = vst [vmem:[%s11630_s21 + $0x50] sm:$0xff] %v5582_v46  ;;  %v5585_v31 = vadd.f32 %v7586_v14, %v11626_v59  ;;  %v5576_v24 = vpop.f32.mrb[227].mxu0 }
 0x865   : > { %5804 = vst [vmem:[%s11630_s21 + $0x40] sm:$0xff] %v5574_v30  ;;  %v5577_v21 = vadd.f32 %v11626_v59, %v5576_v24 }
 0x866   : > { %5807 = vst [vmem:[%s11630_s21 + $0x58] sm:$0xff] %v5585_v31 }
 0x867   : > { %5805 = vst [vmem:[%s11630_s21 + $0x48] sm:$0xff] %v5577_v21 }
 0x869   : > { %v7589_v15 = vpop.f32.mrb[228].mxu0 }
 0x86a   : > { %v5598_v10 = vadd.f32 %v7589_v15, %v11626_v59  ;;  %v5589_v27 = vpop.f32.mrb[229].mxu0 }
 0x86b   : > { %v5590_v36 = vadd.f32 %v11626_v59, %v5589_v27  ;;  %v7590_v12 = vpop.f32.mrb[230].mxu0 }
 0x86c   : > { %5810 = vst [vmem:[%s11630_s21 + $0x70] sm:$0xff] %v5598_v10  ;;  %v5601_v8 = vadd.f32 %v7590_v12, %v11626_v59  ;;  %v5592_v55 = vpop.f32.mrb[231].mxu0 }
 0x86d   : > { %5808 = vst [vmem:[%s11630_s21 + $0x60] sm:$0xff] %v5590_v36  ;;  %v5593_v52 = vadd.f32 %v11626_v59, %v5592_v55 }
 0x86e   : > { %5811 = vst [vmem:[%s11630_s21 + $0x78] sm:$0xff] %v5601_v8 }
 0x86f   : > { %5809 = vst [vmem:[%s11630_s21 + $0x68] sm:$0xff] %v5593_v52 }
 0x871   : > { %v7593_v45 = vpop.f32.mrb[232].mxu0 }
 0x872   : > { %v5614_v57 = vadd.f32 %v7593_v45, %v11626_v59  ;;  %v5605_v3 = vpop.f32.mrb[233].mxu0 }
 0x873   : > { %v5606_v4 = vadd.f32 %v11626_v59, %v5605_v3  ;;  %v7594_v39 = vpop.f32.mrb[234].mxu0 }
 0x874   : > { %5814 = vst [vmem:[%s11630_s21 + $0x90] sm:$0xff] %v5614_v57  ;;  %v5617_v50 = vadd.f32 %v7594_v39, %v11626_v59  ;;  %v5608_v37 = vpop.f32.mrb[235].mxu0 }
 0x875   : > { %5812 = vst [vmem:[%s11630_s21 + $0x80] sm:$0xff] %v5606_v4  ;;  %v5609_v2 = vadd.f32 %v11626_v59, %v5608_v37 }
 0x876   : > { %5815 = vst [vmem:[%s11630_s21 + $0x98] sm:$0xff] %v5617_v50 }
 0x877   : > { %5813 = vst [vmem:[%s11630_s21 + $0x88] sm:$0xff] %v5609_v2 }
 0x879   : > { %v7597_v9 = vpop.f32.mrb[236].mxu0 }
 0x87a   : > { %v5630_v43 = vadd.f32 %v7597_v9, %v11626_v59  ;;  %v5621_v48 = vpop.f32.mrb[237].mxu0 }
 0x87b   : > { %v5622_v53 = vadd.f32 %v11626_v59, %v5621_v48  ;;  %v7598_v34 = vpop.f32.mrb[238].mxu0 }
 0x87c   : > { %5818 = vst [vmem:[%s11630_s21 + $0xb0] sm:$0xff] %v5630_v43  ;;  %v5633_v49 = vadd.f32 %v7598_v34, %v11626_v59  ;;  %v5624_v20 = vpop.f32.mrb[239].mxu0 }
 0x87d   : > { %5816 = vst [vmem:[%s11630_s21 + $0xa0] sm:$0xff] %v5622_v53  ;;  %v5625_v35 = vadd.f32 %v11626_v59, %v5624_v20 }
 0x87e   : > { %5819 = vst [vmem:[%s11630_s21 + $0xb8] sm:$0xff] %v5633_v49 }
 0x87f   : > { %5817 = vst [vmem:[%s11630_s21 + $0xa8] sm:$0xff] %v5625_v35 }
 0x88d   : > { %v7601_v26 = vpop.f32.mrb[240].mxu0 }
 0x88e   : > { %v5646_v16 = vadd.f32 %v7601_v26, %v11626_v59  ;;  %v5637_v47 = vpop.f32.mrb[241].mxu0 }
 0x88f   : > { %v5638_v23 = vadd.f32 %v11626_v59, %v5637_v47  ;;  %v7602_v5 = vpop.f32.mrb[242].mxu0 }
 0x890   : > { %5822 = vst [vmem:[%s11630_s21 + $0xd0] sm:$0xff] %v5646_v16  ;;  %v5649_v25 = vadd.f32 %v7602_v5, %v11626_v59  ;;  %v5640_v63 = vpop.f32.mrb[243].mxu0 }
 0x891   : > { %5820 = vst [vmem:[%s11630_s21 + $0xc0] sm:$0xff] %v5638_v23  ;;  %v5641_v60 = vadd.f32 %v11626_v59, %v5640_v63 }
 0x892   : > { %5823 = vst [vmem:[%s11630_s21 + $0xd8] sm:$0xff] %v5649_v25 }
 0x893   : > { %5821 = vst [vmem:[%s11630_s21 + $0xc8] sm:$0xff] %v5641_v60 }
 0x895   : > { %v7605_v54 = vpop.f32.mrb[244].mxu0 }
 0x896   : > { %v5662_v11 = vadd.f32 %v7605_v54, %v11626_v59  ;;  %v5653_v61 = vpop.f32.mrb[245].mxu0 }
 0x897   : > { %v5654_v1 = vadd.f32 %v11626_v59, %v5653_v61  ;;  %v7606_v44 = vpop.f32.mrb[246].mxu0 }
 0x898   : > { %5826 = vst [vmem:[%s11630_s21 + $0xf0] sm:$0xff] %v5662_v11  ;;  %v5665_v7 = vadd.f32 %v7606_v44, %v11626_v59  ;;  %v5656_v32 = vpop.f32.mrb[247].mxu0 }
 0x899   : > { %5824 = vst [vmem:[%s11630_s21 + $0xe0] sm:$0xff] %v5654_v1  ;;  %v5657_v40 = vadd.f32 %v11626_v59, %v5656_v32 }
 0x89a   : > { %5827 = vst [vmem:[%s11630_s21 + $0xf8] sm:$0xff] %v5665_v7 }
 0x89b   : > { %5825 = vst [vmem:[%s11630_s21 + $0xe8] sm:$0xff] %v5657_v40 }
 0x8ad   : > { %v7609_v22 = vpop.f32.mrb[248].mxu0 }
 0x8ae   : > { %v5678_v33 = vadd.f32 %v7609_v22, %v11626_v59  ;;  %v5669_v18 = vpop.f32.mrb[249].mxu0 }
 0x8af   : > { %v5670_v6 = vadd.f32 %v11626_v59, %v5669_v18  ;;  %v7610_v42 = vpop.f32.mrb[250].mxu0 }
 0x8b0   : > { %5830 = vst [vmem:[%s11630_s21 + $0x110] sm:$0xff] %v5678_v33  ;;  %v5681_v17 = vadd.f32 %v7610_v42, %v11626_v59  ;;  %v5672_v41 = vpop.f32.mrb[251].mxu0 }
 0x8b1   : > { %5828 = vst [vmem:[%s11630_s21 + $0x100] sm:$0xff] %v5670_v6  ;;  %v5673_v13 = vadd.f32 %v11626_v59, %v5672_v41 }
 0x8b2   : > { %5831 = vst [vmem:[%s11630_s21 + $0x118] sm:$0xff] %v5681_v17 }
 0x8b3   : > { %5829 = vst [vmem:[%s11630_s21 + $0x108] sm:$0xff] %v5673_v13 }
 0x8b5   : > { %v7613_v19 = vpop.f32.mrb[252].mxu0 }
 0x8b6   : > { %v5694_v51 = vadd.f32 %v7613_v19, %v11626_v59  ;;  %v5685_v28 = vpop.f32.mrb[253].mxu0 }
 0x8b7   : > { %v5686_v38 = vadd.f32 %v11626_v59, %v5685_v28  ;;  %v7614_v58 = vpop.f32.mrb[254].mxu0 }
 0x8b8   : > { %5834 = vst [vmem:[%s11630_s21 + $0x130] sm:$0xff] %v5694_v51  ;;  %v5697_v62 = vadd.f32 %v7614_v58, %v11626_v59  ;;  %v5688_v56 = vpop.f32.mrb[255].mxu0 }
 0x8b9   : > { %5832 = vst [vmem:[%s11630_s21 + $0x120] sm:$0xff] %v5686_v38  ;;  %v5689_v29 = vadd.f32 %v11626_v59, %v5688_v56 }
 0x8ba   : > { %5835 = vst [vmem:[%s11630_s21 + $0x138] sm:$0xff] %v5697_v62 }
 0x8bb   : > { %5833 = vst [vmem:[%s11630_s21 + $0x128] sm:$0xff] %v5689_v29 }
 0x8cd   : > { %v7617_v46 = vpop.f32.mrb[0].mxu0 }
 0x8ce   : > { %v5710_v0 = vadd.f32 %v7617_v46, %v11626_v59  ;;  %v5701_v30 = vpop.f32.mrb[1].mxu0 }
 0x8cf   : > { %v5702_v14 = vadd.f32 %v11626_v59, %v5701_v30  ;;  %v7618_v31 = vpop.f32.mrb[2].mxu0 }
 0x8d0   : > { %5838 = vst [vmem:[%s11630_s21 + $0x150] sm:$0xff] %v5710_v0  ;;  %v5713_v24 = vadd.f32 %v7618_v31, %v11626_v59  ;;  %v5704_v21 = vpop.f32.mrb[3].mxu0 }
 0x8d1   : > { %5836 = vst [vmem:[%s11630_s21 + $0x140] sm:$0xff] %v5702_v14  ;;  %v5705_v15 = vadd.f32 %v11626_v59, %v5704_v21 }
 0x8d2   : > { %5839 = vst [vmem:[%s11630_s21 + $0x158] sm:$0xff] %v5713_v24 }
 0x8d3   : > { %5837 = vst [vmem:[%s11630_s21 + $0x148] sm:$0xff] %v5705_v15 }
 0x8d5   : > { %v7621_v10 = vpop.f32.mrb[4].mxu0 }
 0x8d6   : > { %v5726_v27 = vadd.f32 %v7621_v10, %v11626_v59  ;;  %v5717_v36 = vpop.f32.mrb[5].mxu0 }
 0x8d7   : > { %v5718_v12 = vadd.f32 %v11626_v59, %v5717_v36  ;;  %v7622_v8 = vpop.f32.mrb[6].mxu0 }
 0x8d8   : > { %5842 = vst [vmem:[%s11630_s21 + $0x170] sm:$0xff] %v5726_v27  ;;  %v5729_v55 = vadd.f32 %v7622_v8, %v11626_v59  ;;  %v5720_v52 = vpop.f32.mrb[7].mxu0 }
 0x8d9   : > { %5840 = vst [vmem:[%s11630_s21 + $0x160] sm:$0xff] %v5718_v12  ;;  %v5721_v45 = vadd.f32 %v11626_v59, %v5720_v52 }
 0x8da   : > { %5843 = vst [vmem:[%s11630_s21 + $0x178] sm:$0xff] %v5729_v55 }
 0x8db   : > { %5841 = vst [vmem:[%s11630_s21 + $0x168] sm:$0xff] %v5721_v45 }
 0x8ed   : > { %v7625_v57 = vpop.f32.mrb[8].mxu0 }
 0x8ee   : > { %v5742_v3 = vadd.f32 %v7625_v57, %v11626_v59  ;;  %v5733_v4 = vpop.f32.mrb[9].mxu0 }
 0x8ef   : > { %v5734_v39 = vadd.f32 %v11626_v59, %v5733_v4  ;;  %v7626_v50 = vpop.f32.mrb[10].mxu0 }
 0x8f0   : > { %5846 = vst [vmem:[%s11630_s21 + $0x190] sm:$0xff] %v5742_v3  ;;  %v5745_v37 = vadd.f32 %v7626_v50, %v11626_v59  ;;  %v5736_v2 = vpop.f32.mrb[11].mxu0 }
 0x8f1   : > { %5844 = vst [vmem:[%s11630_s21 + $0x180] sm:$0xff] %v5734_v39  ;;  %v5737_v9 = vadd.f32 %v11626_v59, %v5736_v2 }
 0x8f2   : > { %5847 = vst [vmem:[%s11630_s21 + $0x198] sm:$0xff] %v5745_v37 }
 0x8f3   : > { %5845 = vst [vmem:[%s11630_s21 + $0x188] sm:$0xff] %v5737_v9 }
 0x8f5   : > { %v7629_v43 = vpop.f32.mrb[12].mxu0 }
 0x8f6   : > { %v5758_v48 = vadd.f32 %v7629_v43, %v11626_v59  ;;  %v5749_v53 = vpop.f32.mrb[13].mxu0 }
 0x8f7   : > { %v5750_v34 = vadd.f32 %v11626_v59, %v5749_v53  ;;  %v7630_v49 = vpop.f32.mrb[14].mxu0 }
 0x8f8   : > { %5850 = vst [vmem:[%s11630_s21 + $0x1b0] sm:$0xff] %v5758_v48  ;;  %v5761_v20 = vadd.f32 %v7630_v49, %v11626_v59  ;;  %v5752_v35 = vpop.f32.mrb[15].mxu0 }
 0x8f9   : > { %5848 = vst [vmem:[%s11630_s21 + $0x1a0] sm:$0xff] %v5750_v34  ;;  %v5753_v26 = vadd.f32 %v11626_v59, %v5752_v35 }
 0x8fa   : > { %5851 = vst [vmem:[%s11630_s21 + $0x1b8] sm:$0xff] %v5761_v20 }
 0x8fb   : > { %5849 = vst [vmem:[%s11630_s21 + $0x1a8] sm:$0xff] %v5753_v26 }
 0x90d   : > { %v7633_v16 = vpop.f32.mrb[16].mxu0 }
 0x90e   : > { %v5774_v47 = vadd.f32 %v7633_v16, %v11626_v59  ;;  %v5765_v23 = vpop.f32.mrb[17].mxu0 }
 0x90f   : > { %v5766_v5 = vadd.f32 %v11626_v59, %v5765_v23  ;;  %v7634_v25 = vpop.f32.mrb[18].mxu0 }
 0x910   : > { %5854 = vst [vmem:[%s11630_s21 + $0x1d0] sm:$0xff] %v5774_v47  ;;  %v5777_v63 = vadd.f32 %v7634_v25, %v11626_v59  ;;  %v5768_v60 = vpop.f32.mrb[19].mxu0 }
 0x911   : > { %5852 = vst [vmem:[%s11630_s21 + $0x1c0] sm:$0xff] %v5766_v5  ;;  %v5769_v54 = vadd.f32 %v11626_v59, %v5768_v60 }
 0x912   : > { %5855 = vst [vmem:[%s11630_s21 + $0x1d8] sm:$0xff] %v5777_v63 }
 0x913   : > { %5853 = vst [vmem:[%s11630_s21 + $0x1c8] sm:$0xff] %v5769_v54 }
 0x915   : > { %v7637_v11 = vpop.f32.mrb[20].mxu0 }
 0x916   : > { %v5790_v61 = vadd.f32 %v7637_v11, %v11626_v59  ;;  %v5781_v1 = vpop.f32.mrb[21].mxu0 }
 0x917   : > { %v5782_v44 = vadd.f32 %v11626_v59, %v5781_v1  ;;  %v7638_v7 = vpop.f32.mrb[22].mxu0 }
 0x918   : > { %5858 = vst [vmem:[%s11630_s21 + $0x1f0] sm:$0xff] %v5790_v61  ;;  %v5793_v32 = vadd.f32 %v7638_v7, %v11626_v59  ;;  %v5784_v40 = vpop.f32.mrb[23].mxu0 }
 0x919   : > { %5856 = vst [vmem:[%s11630_s21 + $0x1e0] sm:$0xff] %v5782_v44  ;;  %v5785_v22 = vadd.f32 %v11626_v59, %v5784_v40 }
 0x91a   : > { %5859 = vst [vmem:[%s11630_s21 + $0x1f8] sm:$0xff] %v5793_v32 }
 0x91b   : > { %5857 = vst [vmem:[%s11630_s21 + $0x1e8] sm:$0xff] %v5785_v22 }
 0x91c   : > { %8552 = shalt.err (!%p8549_p8)
}
 0x91d   : > { %s8553_s24 = scalar_lea.hbm %s11759_s16, 8192  ;;  %s8557_s21 = scalar_lea.hbm %s12635_s1, 16384 }
 0x91e   : > { %p8554_p6 = scmp.ne.s32.totalorder %s11759_s16, %s8553_s24  ;;  %p8558_p3 = scmp.lt.u32.totalorder %s11759_s16, %s12635_s1 }
 0x91f   : > { %p8559_p0 = scmp.lt.u32.totalorder %s8557_s21, %s8553_s24  ;;  %p8561_p2 = scmp.lt.u32.totalorder %s8553_s24, %s11759_s16 }
 0x920   : > { %p8555_p9 = pnand %p8554_p6, %p12636_p7 }
 0x921   : > { %p8560_p5 = por %p8559_p0, %p8558_p3 }
 0x922   : > { %p8556_p4 = pneg %p8555_p9 }
 0x923   : > { %p8562_p10 = por %p8561_p2, %p8560_p5 }
 0x925   : > { %p8563_p1 = pnand %p8562_p10, %p8556_p4 }
 0x927   : > { %8566 = shalt.err (!%p8563_p1)
}
 0x928   : > { %s8633_s29 = smov 128   ;;  %s8634_s19 = smov 8  }
 0x929   : > { %7677 = dma.vmem_to_hbm [thread:$0]  (%p12636_p7), %s11761_s23, 8192, %s11759_s16, %s5861_s15, %s8633_s29, %s8633_s29, %s8634_s19  }
 0x92a PF: > { %s5889_s20 = sand.u32 1, %s8605_s30   ;;  %p12637_p11 = scmp.ne.s32.totalorder %s12069_s13, 0 }
 0x92b   : > { %p12638_p12 = scmp.ge.s32.totalorder %s8617_s12, 2  ;;  %s5890_s28 = scalar_lea.sflag [#allocation4], %s5889_s20 }
 0x92d   : > { %p7700_p13 = pnand %p12638_p12, %p12637_p11 }
 0x92f   : > { %8600 = dma.done.wait (!%p7700_p13), %s5890_s28, 8192  }
 0x930   : > { %8602 = vsyncadd (!%p7700_p13), %s5890_s28, 4294959104  ;;  %p25_p8 = scmp.ge.s32.totalorder %s8848_s27, 4   ;;  %s12639_s30 = smov %s8609_s10 }
 0x931   : > { %s12640_s10 = smov %s8613_s11  ;;  %s12641_s11 = smov %s8860_s25 }
 0x932   : > { %s12642_s12 = smov %s8848_s27  ;;  %27 = sbr.rel (!%p25_p8) target bundleno = 12 (0xc), region = 121 }
 0x939   :  { %5895 = vsyncpa [#allocation3], 1 }
 0x93a   :  { %5897 = vsyncpa [#allocation3 + $0x1], 1 }
 0x93b   :  { %5898 = vsyncpa [#allocation6], 1 }
 0x93c   :  { %5899 = vsyncpa [#allocation9], 1 }
 0x93d   :  { %5900 = vsyncpa [#allocation12], 1 }
 0x93e   :  { %5901 = vsyncpa [#allocation4], 1 }
 0x93f   :  { %5903 = vsyncpa [#allocation4 + $0x1], 1 }

</bundles_post_ra>
